<compile_context>
chip_gen: v6e
topology: v6e:2x2x1
jax: 0.10.0
libtpu: 0.0.40
codegen_flags: <defaults>
</compile_context>

<pallas_src>
from functools import partial

import jax
import jax.numpy as jnp
import numpy as np
from jax.experimental import pallas as pl
from jax.experimental.pallas import tpu as pltpu


# ----------------------------------------------------------------------------- kernel
def _gct_bottleneck_kernel(conv2_im2col, x_ref, w1_ref, b1_ref, w2f_ref, b2_ref,
                           w3_ref, b3_ref, c_ref, out_ref, y1p_ref):
    # x_ref : (B, H, W, Cin) bf16 (unpadded)
    # w1    : (Cin, P) bf16 (BN1 scale folded)       b1: (1, P) f32
    # w2f   : (9P, P) bf16 (im2col rows, BN2 folded) b2: (1, P) f32
    # w3    : (P, C3) bf16 (BN3 scale folded)        b3: (1, C3) f32
    # c_ref : (1, 1) f32 in SMEM (GCT learnable scalar)
    # y1p_ref: (B, H+2, W+2, P) bf16 VMEM scratch (padded conv1 output frame)
    B, H, W, Cin = x_ref.shape
    P = w1_ref.shape[1]
    C3 = w3_ref.shape[1]
    HW = H * W
    f32, bf16 = jnp.float32, jnp.bfloat16

    x = x_ref[...]                                       # (B, H, W, Cin) bf16
    xm = x.reshape(B * HW, Cin)

    # ---- conv1 (1x1, BN1 scale folded) + bias + relu -----------------------------------
    y1 = jnp.dot(xm, w1_ref[...], preferred_element_type=f32)            # (BHW, P) f32
    y1 = jnp.maximum(y1 + b1_ref[...], 0.0)

    # ---- store y1 into the padded scratch; the 1-pixel ring acts as conv2's zero pad ---
    # Re-zeroed every step (cheap) so it is correct under megacore grid sharding.
    y1p_ref[...] = jnp.zeros_like(y1p_ref)
    y1p_ref[:, 1:H + 1, 1:W + 1, :] = y1.reshape(B, H, W, P).astype(bf16)
    y1p = y1p_ref[...]                                    # (B, H+2, W+2, P) bf16

    # ---- conv2 (3x3, stride=1, pad=1) ---------------------------------------------------
    if conv2_im2col:
        # single (BHW, 9P) x (9P, P) matmul -- best on v6e/v7x (256-deep MXU)
        cols = [y1p[:, ky:ky + H, kx:kx + W, :] for ky in range(3) for kx in range(3)]
        patches = jnp.concatenate(cols, axis=-1).reshape(B * HW, 9 * P)
        y2 = jnp.dot(patches, w2f_ref[...], preferred_element_type=f32)
    else:
        # 9 accumulating K=P matmuls -- preferred on v5e (128-deep MXU, single vst slot)
        y2 = None
        for idx in range(9):
            ky, kx = divmod(idx, 3)
            lhs = y1p[:, ky:ky + H, kx:kx + W, :].reshape(B * HW, P)
            part = jnp.dot(lhs, w2f_ref[idx * P:(idx + 1) * P, :],
                           preferred_element_type=f32)
            y2 = part if y2 is None else y2 + part
    y2 = jnp.maximum(y2 + b2_ref[...], 0.0)

    # ---- conv3 (1x1, BN3 scale folded) + bias -------------------------------------------
    y3 = jnp.dot(y2.astype(bf16), w3_ref[...], preferred_element_type=f32) + b3_ref[...]

    # ---- Parametric GCT (Gaussian Context Transformer, learnable c), per image ---------
    eps = 1e-5
    y3b = y3.reshape(B, HW, C3)
    z = jnp.mean(y3b, axis=1, keepdims=True)             # (B, 1, C3) global average pool
    mu = jnp.mean(z, axis=2, keepdims=True)
    var = jnp.maximum(jnp.mean(z * z, axis=2, keepdims=True) - mu * mu, 0.0)
    zn = (z - mu) * jax.lax.rsqrt(var + eps)
    gate = jnp.exp((-0.5 * c_ref[0, 0]) * (zn * zn))     # (B, 1, C3)
    y3b = y3b * gate

    # ---- residual add (identity) + relu -------------------------------------------------
    residual = xm.reshape(B, HW, Cin).astype(f32)
    out = jnp.maximum(y3b + residual, 0.0)
    out_ref[...] = out.reshape(B, H, W, C3)


# ----------------------------------------------------------------------------- helpers
def _fold_params(w1, s1, w2, s2, w3, s3):
    """Fold eval-mode BN scales into the weight output channels; cast to bf16 MXU operands."""
    bf = jnp.bfloat16
    P = w1.shape[1]
    w1f = (w1 * s1).astype(bf)                                        # (Cin, P)
    w2f = (w2 * s2.reshape(1, 1, 1, P)).reshape(9 * P, P).astype(bf)  # (ky,kx,cin) -> im2col rows
    w3f = (w3 * s3).astype(bf)                                        # (P, C3)
    return w1f, w2f, w3f


def _pick_b_tile(N):
    """Largest of (8,4,2) dividing N that still leaves >=2 grid steps (v7x 2-TC sharding)."""
    for bt in (8, 4, 2, 1):
        if N % bt == 0 and N // bt >= 2:
            return bt
    return N


def _default_conv2_im2col():
    try:
        kind = jax.devices()[0].device_kind.lower()
    except Exception:
        return True
    # v5e's 128-deep MXU gains nothing from the big im2col K; prefer 9 accumulating matmuls.
    return not ("v5e" in kind or "v5 lite" in kind or "v5lite" in kind)


# ----------------------------------------------------------------------------- wrapper
@partial(jax.jit, static_argnames=("b_tile", "conv2_im2col"))
def _gct_bottleneck_call(x, w1, s1, b1, w2, s2, b2, w3, s3, b3, c, *, b_tile, conv2_im2col):
    N, H, W, Cin = x.shape
    P = w1.shape[1]
    C3 = w3.shape[1]
    Hp, Wp = H + 2, W + 2
    assert Cin == C3, "identity residual requires inplanes == planes * expansion (downsample=None)"
    assert N % b_tile == 0

    x = x.astype(jnp.bfloat16)   # no-op when the caller already stores activations in bf16
    w1f, w2f, w3f = _fold_params(w1, s1, w2, s2, w3, s3)

    # Explicit scoped-VMEM budget from actual block sizes (2x margin on temporaries), capped
    # well below v7x's 64 MiB physical VMEM to leave compiler headroom.
    bhw = b_tile * H * W
    vmem_est = (
        2 * bhw * Cin * 2                                  # pipelined bf16 input blocks
        + 2 * bhw * C3 * 4                                 # pipelined f32 output blocks
        + (Cin * P + 9 * P * P + P * C3) * 2               # bf16 folded weights (single buffer)
        + (2 * P + C3) * 4                                 # biases
        + b_tile * Hp * Wp * P * 2                         # y1p scratch (bf16)
        + 2 * bhw * (P * 4 + 9 * P * 2 + P * 4 + 2 * C3 * 4 + Cin * 4)   # y1/patches/y2/y3/out/resid
    )
    vmem_limit = int(min(48 * 2 ** 20, max(16 * 2 ** 20, vmem_est)))

    vmem = pl.BlockSpec(memory_space=pltpu.MemorySpace.VMEM)   # whole-array resident weights
    smem = pl.BlockSpec(memory_space=pltpu.MemorySpace.SMEM)   # scalar GCT parameter

    return pl.pallas_call(
        partial(_gct_bottleneck_kernel, conv2_im2col),
        out_shape=jax.ShapeDtypeStruct((N, H, W, C3), jnp.float32),
        grid_spec=pltpu.PrefetchScalarGridSpec(
            num_scalar_prefetch=0,
            grid=(N // b_tile,),                           # B_TILE images per grid step
            in_specs=[
                pl.BlockSpec((b_tile, H, W, Cin), lambda n: (n, 0, 0, 0)),
                vmem, vmem,          # w1f, b1
                vmem, vmem,          # w2f, b2
                vmem, vmem,          # w3f, b3
                smem,                # c
            ],
            out_specs=pl.BlockSpec((b_tile, H, W, C3), lambda n: (n, 0, 0, 0)),
            scratch_shapes=[pltpu.VMEM((b_tile, Hp, Wp, P), jnp.bfloat16)],
        ),
        compiler_params=pltpu.CompilerParams(
            dimension_semantics=("parallel",),
            vmem_limit_bytes=vmem_limit,
        ),
    )(x, w1f, b1, w2f, b2, w3f, b3, c)


def gct_bottleneck(x, w1, s1, b1, w2, s2, b2, w3, s3, b3, c,
                   b_tile=None, conv2_im2col=None):
    if b_tile is None:
        b_tile = _pick_b_tile(x.shape[0])
    if conv2_im2col is None:
        conv2_im2col = _default_conv2_im2col()
    return _gct_bottleneck_call(x, w1, s1, b1, w2, s2, b2, w3, s3, b3, c,
                                b_tile=b_tile, conv2_im2col=conv2_im2col)


# ----------------------------------------------------------------------------- reference
def _reference(x, w1, s1, b1, w2, s2, b2, w3, s3, b3, c):
    """Pure-JAX mirror of the kernel math (same folded bf16 operands, f32 accumulation)."""
    N, H, W, Cin = x.shape
    P = w1.shape[1]
    C3 = w3.shape[1]
    bf = jnp.bfloat16
    w1f, w2f, w3f = _fold_params(w1, s1, w2, s2, w3, s3)
    xb = x.astype(bf)
    outs = []
    for n in range(N):
        xm = xb[n].reshape(H * W, Cin)
        y1 = jnp.maximum(jnp.dot(xm, w1f, preferred_element_type=jnp.float32) + b1, 0.0)
        y1p = jnp.pad(y1.reshape(H, W, P).astype(bf), ((1, 1), (1, 1), (0, 0)))
        cols = [y1p[ky:ky + H, kx:kx + W, :] for ky in range(3) for kx in range(3)]
        patches = jnp.concatenate(cols, axis=-1).reshape(H * W, 9 * P)
        y2 = jnp.maximum(jnp.dot(patches, w2f, preferred_element_type=jnp.float32) + b2, 0.0)
        y3 = jnp.dot(y2.astype(bf), w3f, preferred_element_type=jnp.float32) + b3
        z = jnp.mean(y3, axis=0, keepdims=True)
        mu = jnp.mean(z, axis=1, keepdims=True)
        var = jnp.maximum(jnp.mean(z * z, axis=1, keepdims=True) - mu * mu, 0.0)
        zn = (z - mu) * jax.lax.rsqrt(var + 1e-5)
        y3 = y3 * jnp.exp(-0.5 * c[0, 0] * (zn * zn))
        outs.append(jnp.maximum(y3 + xm.astype(jnp.float32), 0.0).reshape(H, W, C3))
    return jnp.stack(outs, axis=0)


# ----------------------------------------------------------------------------- main
if __name__ == "__main__":
    # ResNet-50 layer3-style block: inplanes = planes * expansion, so downsample=None and the
    # identity residual applies.  N=8 so the batched grid has >= 2 steps.
    N, H, W = 8, 8, 8
    planes = 128
    inplanes = planes * 4      # bottleneck expansion 4
    C3 = planes * 4

    key = jax.random.PRNGKey(0)
    keys = jax.random.split(key, 16)

    # Activations live in bf16 in HBM (the kernel's matmul dtype) -> half the input DMA.
    x = jax.random.normal(keys[0], (N, H, W, inplanes), jnp.float32).astype(jnp.bfloat16)

    # conv weights in (Cin, Cout) / (kh, kw, Cin, Cout) layout, He-like scaling.
    w1 = jax.random.normal(keys[1], (inplanes, planes), jnp.float32) * (1.0 / inplanes) ** 0.5
    w2 = jax.random.normal(keys[2], (3, 3, planes, planes), jnp.float32) * (1.0 / (9 * planes)) ** 0.5
    w3 = jax.random.normal(keys[3], (planes, C3), jnp.float32) * (1.0 / planes) ** 0.5

    # BatchNorm (eval mode) parameters, folded to per-channel scale/bias.
    def bn_fold(kg, kb, km, kv, C):
        gamma = 1.0 + 0.1 * jax.random.normal(kg, (C,), jnp.float32)
        beta = 0.1 * jax.random.normal(kb, (C,), jnp.float32)
        rmean = 0.1 * jax.random.normal(km, (C,), jnp.float32)
        rvar = jnp.abs(jax.random.normal(kv, (C,), jnp.float32)) + 0.5
        scale = gamma / jnp.sqrt(rvar + 1e-5)
        bias = beta - rmean * scale
        return scale.reshape(1, C), bias.reshape(1, C)

    s1, b1 = bn_fold(keys[4], keys[5], keys[6], keys[7], planes)
    s2, b2 = bn_fold(keys[8], keys[9], keys[10], keys[11], planes)
    s3, b3 = bn_fold(keys[12], keys[13], keys[14], keys[15], C3)

    c = jnp.full((1, 1), 2.0, jnp.float32)   # Parametric GCT learnable scalar, init 2.0

    out = gct_bottleneck(x, w1, s1, b1, w2, s2, b2, w3, s3, b3, c)
    out = jax.block_until_ready(out)

    ref = _reference(x, w1, s1, b1, w2, s2, b2, w3, s3, b3, c)
    np.testing.assert_allclose(np.asarray(out), np.asarray(ref), rtol=2e-3, atol=2e-3)

    print("KERNEL_OK")
</pallas_src>

<mosaic_0001>
module attributes {stable_mosaic.version = 11 : i64} {
  func.func @_gct_bottleneck_kernel(%arg0: i32, %arg1: memref<4x8x8x512xbf16, #tpu.memory_space<vmem>>, %arg2: memref<512x128xbf16, #tpu.memory_space<vmem>>, %arg3: memref<1x128xf32, #tpu.memory_space<vmem>>, %arg4: memref<1152x128xbf16, #tpu.memory_space<vmem>>, %arg5: memref<1x128xf32, #tpu.memory_space<vmem>>, %arg6: memref<128x512xbf16, #tpu.memory_space<vmem>>, %arg7: memref<1x512xf32, #tpu.memory_space<vmem>>, %arg8: memref<1x1xf32, #tpu.memory_space<smem>>, %arg9: memref<4x8x8x512xf32, #tpu.memory_space<vmem>>, %arg10: memref<4x10x10x128xbf16, #tpu.memory_space<vmem>>) attributes {dimension_semantics = [#tpu.dimension_semantics<parallel>], iteration_bounds = array<i64: 2>, scalar_prefetch = 0 : i64, scratch_operands = 1 : i64, tpu.core_type = #tpu.core_type<tc>, window_params = [{transform_indices = @transform_0, window_bounds = array<i64: 4, 8, 8, 512>}, {pipeline_mode = #tpu.pipeline_mode<synchronous>, transform_indices = @transform_1, window_bounds = array<i64: 512, 128>}, {pipeline_mode = #tpu.pipeline_mode<synchronous>, transform_indices = @transform_2, window_bounds = array<i64: 1, 128>}, {pipeline_mode = #tpu.pipeline_mode<synchronous>, transform_indices = @transform_3, window_bounds = array<i64: 1152, 128>}, {pipeline_mode = #tpu.pipeline_mode<synchronous>, transform_indices = @transform_4, window_bounds = array<i64: 1, 128>}, {pipeline_mode = #tpu.pipeline_mode<synchronous>, transform_indices = @transform_5, window_bounds = array<i64: 128, 512>}, {pipeline_mode = #tpu.pipeline_mode<synchronous>, transform_indices = @transform_6, window_bounds = array<i64: 1, 512>}, {transform_indices = @transform_7, window_bounds = array<i64: 1, 1>}, {transform_indices = @transform_8, window_bounds = array<i64: 4, 8, 8, 512>}]} {
    %c0 = arith.constant 0 : index
    %c0_0 = arith.constant 0 : index
    %c0_1 = arith.constant 0 : index
    %c0_2 = arith.constant 0 : index
    %0 = vector.load %arg1[%c0, %c0_0, %c0_1, %c0_2] : memref<4x8x8x512xbf16, #tpu.memory_space<vmem>>, vector<4x8x8x512xbf16>
    %1 = vector.shape_cast %0 : vector<4x8x8x512xbf16> to vector<256x512xbf16>
    %c0_3 = arith.constant 0 : index
    %c0_4 = arith.constant 0 : index
    %2 = vector.load %arg2[%c0_3, %c0_4] : memref<512x128xbf16, #tpu.memory_space<vmem>>, vector<512x128xbf16>
    %cst = arith.constant dense<0.000000e+00> : vector<256x128xf32>
    %3 = tpu.matmul %1, %2, %cst {dimension_numbers = #tpu.dot_dimension_numbers<[1], [0], [0], [1], [0, 0, 1, 1], [], []>} : vector<256x512xbf16>, vector<512x128xbf16>, vector<256x128xf32> -> vector<256x128xf32>
    %c0_5 = arith.constant 0 : index
    %c0_6 = arith.constant 0 : index
    %4 = vector.load %arg3[%c0_5, %c0_6] : memref<1x128xf32, #tpu.memory_space<vmem>>, vector<1x128xf32>
    %5 = vector.broadcast %4 : vector<1x128xf32> to vector<256x128xf32>
    %6 = arith.addf %3, %5 : vector<256x128xf32>
    %cst_7 = arith.constant 0.000000e+00 : f32
    %7 = vector.broadcast %cst_7 : f32 to vector<256x128xf32>
    %8 = arith.maximumf %6, %7 : vector<256x128xf32>
    %cst_8 = arith.constant 0.000000e+00 : bf16
    %9 = vector.broadcast %cst_8 : bf16 to vector<4x10x10x128xbf16>
    %c0_9 = arith.constant 0 : index
    %c0_10 = arith.constant 0 : index
    %c0_11 = arith.constant 0 : index
    %c0_12 = arith.constant 0 : index
    %10 = vector.load %arg10[%c0_9, %c0_10, %c0_11, %c0_12] : memref<4x10x10x128xbf16, #tpu.memory_space<vmem>>, vector<4x10x10x128xbf16>
    tpu.vector_store %arg10[%c0_9, %c0_10, %c0_11, %c0_12], %9 {strides = array<i32>} : memref<4x10x10x128xbf16, #tpu.memory_space<vmem>>, vector<4x10x10x128xbf16>,
    %11 = vector.shape_cast %8 : vector<256x128xf32> to vector<4x8x8x128xf32>
    %12 = arith.truncf %11 : vector<4x8x8x128xf32> to vector<4x8x8x128xbf16>
    %c0_13 = arith.constant 0 : index
    %c1 = arith.constant 1 : index
    %c1_14 = arith.constant 1 : index
    %c0_15 = arith.constant 0 : index
    %13 = vector.load %arg10[%c0_13, %c1, %c1_14, %c0_15] : memref<4x10x10x128xbf16, #tpu.memory_space<vmem>>, vector<4x8x8x128xbf16>
    tpu.vector_store %arg10[%c0_13, %c1, %c1_14, %c0_15], %12 {strides = array<i32>} : memref<4x10x10x128xbf16, #tpu.memory_space<vmem>>, vector<4x8x8x128xbf16>,
    %c0_16 = arith.constant 0 : index
    %c0_17 = arith.constant 0 : index
    %c0_18 = arith.constant 0 : index
    %c0_19 = arith.constant 0 : index
    %14 = vector.load %arg10[%c0_16, %c0_17, %c0_18, %c0_19] : memref<4x10x10x128xbf16, #tpu.memory_space<vmem>>, vector<4x10x10x128xbf16>
    %15 = vector.extract_strided_slice %14 {offsets = [0, 0, 0, 0], sizes = [4, 8, 8, 128], strides = [1, 1, 1, 1]} : vector<4x10x10x128xbf16> to vector<4x8x8x128xbf16>
    %16 = vector.extract_strided_slice %14 {offsets = [0, 0, 1, 0], sizes = [4, 8, 8, 128], strides = [1, 1, 1, 1]} : vector<4x10x10x128xbf16> to vector<4x8x8x128xbf16>
    %17 = vector.extract_strided_slice %14 {offsets = [0, 0, 2, 0], sizes = [4, 8, 8, 128], strides = [1, 1, 1, 1]} : vector<4x10x10x128xbf16> to vector<4x8x8x128xbf16>
    %18 = vector.extract_strided_slice %14 {offsets = [0, 1, 0, 0], sizes = [4, 8, 8, 128], strides = [1, 1, 1, 1]} : vector<4x10x10x128xbf16> to vector<4x8x8x128xbf16>
    %19 = vector.extract_strided_slice %14 {offsets = [0, 1, 1, 0], sizes = [4, 8, 8, 128], strides = [1, 1, 1, 1]} : vector<4x10x10x128xbf16> to vector<4x8x8x128xbf16>
    %20 = vector.extract_strided_slice %14 {offsets = [0, 1, 2, 0], sizes = [4, 8, 8, 128], strides = [1, 1, 1, 1]} : vector<4x10x10x128xbf16> to vector<4x8x8x128xbf16>
    %21 = vector.extract_strided_slice %14 {offsets = [0, 2, 0, 0], sizes = [4, 8, 8, 128], strides = [1, 1, 1, 1]} : vector<4x10x10x128xbf16> to vector<4x8x8x128xbf16>
    %22 = vector.extract_strided_slice %14 {offsets = [0, 2, 1, 0], sizes = [4, 8, 8, 128], strides = [1, 1, 1, 1]} : vector<4x10x10x128xbf16> to vector<4x8x8x128xbf16>
    %23 = vector.extract_strided_slice %14 {offsets = [0, 2, 2, 0], sizes = [4, 8, 8, 128], strides = [1, 1, 1, 1]} : vector<4x10x10x128xbf16> to vector<4x8x8x128xbf16>
    %24 = tpu.concatenate %15, %16, %17, %18, %19, %20, %21, %22, %23 in 3 : vector<4x8x8x128xbf16>, vector<4x8x8x128xbf16>, vector<4x8x8x128xbf16>, vector<4x8x8x128xbf16>, vector<4x8x8x128xbf16>, vector<4x8x8x128xbf16>, vector<4x8x8x128xbf16>, vector<4x8x8x128xbf16>, vector<4x8x8x128xbf16> -> vector<4x8x8x1152xbf16>
    %25 = vector.shape_cast %24 : vector<4x8x8x1152xbf16> to vector<256x1152xbf16>
    %c0_20 = arith.constant 0 : index
    %c0_21 = arith.constant 0 : index
    %26 = vector.load %arg4[%c0_20, %c0_21] : memref<1152x128xbf16, #tpu.memory_space<vmem>>, vector<1152x128xbf16>
    %cst_22 = arith.constant dense<0.000000e+00> : vector<256x128xf32>
    %27 = tpu.matmul %25, %26, %cst_22 {dimension_numbers = #tpu.dot_dimension_numbers<[1], [0], [0], [1], [0, 0, 1, 1], [], []>} : vector<256x1152xbf16>, vector<1152x128xbf16>, vector<256x128xf32> -> vector<256x128xf32>
    %c0_23 = arith.constant 0 : index
    %c0_24 = arith.constant 0 : index
    %28 = vector.load %arg5[%c0_23, %c0_24] : memref<1x128xf32, #tpu.memory_space<vmem>>, vector<1x128xf32>
    %29 = vector.broadcast %28 : vector<1x128xf32> to vector<256x128xf32>
    %30 = arith.addf %27, %29 : vector<256x128xf32>
    %cst_25 = arith.constant 0.000000e+00 : f32
    %31 = vector.broadcast %cst_25 : f32 to vector<256x128xf32>
    %32 = arith.maximumf %30, %31 : vector<256x128xf32>
    %33 = arith.truncf %32 : vector<256x128xf32> to vector<256x128xbf16>
    %c0_26 = arith.constant 0 : index
    %c0_27 = arith.constant 0 : index
    %34 = vector.load %arg6[%c0_26, %c0_27] : memref<128x512xbf16, #tpu.memory_space<vmem>>, vector<128x512xbf16>
    %cst_28 = arith.constant dense<0.000000e+00> : vector<256x512xf32>
    %35 = tpu.matmul %33, %34, %cst_28 {dimension_numbers = #tpu.dot_dimension_numbers<[1], [0], [0], [1], [0, 0, 1, 1], [], []>} : vector<256x128xbf16>, vector<128x512xbf16>, vector<256x512xf32> -> vector<256x512xf32>
    %c0_29 = arith.constant 0 : index
    %c0_30 = arith.constant 0 : index
    %36 = vector.load %arg7[%c0_29, %c0_30] : memref<1x512xf32, #tpu.memory_space<vmem>>, vector<1x512xf32>
    %37 = vector.broadcast %36 : vector<1x512xf32> to vector<256x512xf32>
    %38 = arith.addf %35, %37 : vector<256x512xf32>
    %39 = vector.shape_cast %38 : vector<256x512xf32> to vector<4x64x512xf32>
    %cst_31 = arith.constant dense<0.000000e+00> : vector<4x512xf32>
    %40 = vector.multi_reduction <add>, %39, %cst_31 [1] : vector<4x64x512xf32> to vector<4x512xf32>
    %41 = vector.shape_cast %40 : vector<4x512xf32> to vector<4x1x512xf32>
    %cst_32 = arith.constant 6.400000e+01 : f32
    %42 = vector.broadcast %cst_32 : f32 to vector<4x1x512xf32>
    %43 = arith.divf %41, %42 : vector<4x1x512xf32>
    %cst_33 = arith.constant dense<0.000000e+00> : vector<4x1xf32>
    %44 = vector.multi_reduction <add>, %43, %cst_33 [2] : vector<4x1x512xf32> to vector<4x1xf32>
    %45 = vector.shape_cast %44 : vector<4x1xf32> to vector<4x1x1xf32>
    %cst_34 = arith.constant 5.120000e+02 : f32
    %46 = vector.broadcast %cst_34 : f32 to vector<4x1x1xf32>
    %47 = arith.divf %45, %46 : vector<4x1x1xf32>
    %48 = arith.mulf %43, %43 : vector<4x1x512xf32>
    %cst_35 = arith.constant dense<0.000000e+00> : vector<4x1xf32>
    %49 = vector.multi_reduction <add>, %48, %cst_35 [2] : vector<4x1x512xf32> to vector<4x1xf32>
    %50 = vector.shape_cast %49 : vector<4x1xf32> to vector<4x1x1xf32>
    %cst_36 = arith.constant 5.120000e+02 : f32
    %51 = vector.broadcast %cst_36 : f32 to vector<4x1x1xf32>
    %52 = arith.divf %50, %51 : vector<4x1x1xf32>
    %53 = arith.mulf %47, %47 : vector<4x1x1xf32>
    %54 = arith.subf %52, %53 : vector<4x1x1xf32>
    %cst_37 = arith.constant 0.000000e+00 : f32
    %55 = vector.broadcast %cst_37 : f32 to vector<4x1x1xf32>
    %56 = arith.maximumf %54, %55 : vector<4x1x1xf32>
    %57 = vector.broadcast %47 : vector<4x1x1xf32> to vector<4x1x512xf32>
    %58 = arith.subf %43, %57 : vector<4x1x512xf32>
    %cst_38 = arith.constant 9.99999974E-6 : f32
    %59 = vector.broadcast %cst_38 : f32 to vector<4x1x1xf32>
    %60 = arith.addf %56, %59 : vector<4x1x1xf32>
    %61 = math.rsqrt %60 : vector<4x1x1xf32>
    %62 = vector.broadcast %61 : vector<4x1x1xf32> to vector<4x1x512xf32>
    %63 = arith.mulf %58, %62 : vector<4x1x512xf32>
    %c0_39 = arith.constant 0 : index
    %c0_40 = arith.constant 0 : index
    %64 = memref.load %arg8[%c0_39, %c0_40] : memref<1x1xf32, #tpu.memory_space<smem>>
    %cst_41 = arith.constant -5.000000e-01 : f32
    %65 = arith.mulf %cst_41, %64 : f32
    %66 = arith.mulf %63, %63 : vector<4x1x512xf32>
    %67 = vector.broadcast %65 : f32 to vector<4x1x512xf32>
    %68 = arith.mulf %67, %66 : vector<4x1x512xf32>
    %69 = math.exp %68 : vector<4x1x512xf32>
    %70 = vector.broadcast %69 : vector<4x1x512xf32> to vector<4x64x512xf32>
    %71 = arith.mulf %39, %70 : vector<4x64x512xf32>
    %72 = vector.shape_cast %1 : vector<256x512xbf16> to vector<4x64x512xbf16>
    %73 = arith.extf %72 : vector<4x64x512xbf16> to vector<4x64x512xf32>
    %74 = arith.addf %71, %73 : vector<4x64x512xf32>
    %cst_42 = arith.constant 0.000000e+00 : f32
    %75 = vector.broadcast %cst_42 : f32 to vector<4x64x512xf32>
    %76 = arith.maximumf %74, %75 : vector<4x64x512xf32>
    %77 = vector.shape_cast %76 : vector<4x64x512xf32> to vector<4x8x8x512xf32>
    %c0_43 = arith.constant 0 : index
    %c0_44 = arith.constant 0 : index
    %c0_45 = arith.constant 0 : index
    %c0_46 = arith.constant 0 : index
    %78 = vector.load %arg9[%c0_43, %c0_44, %c0_45, %c0_46] : memref<4x8x8x512xf32, #tpu.memory_space<vmem>>, vector<4x8x8x512xf32>
    tpu.vector_store %arg9[%c0_43, %c0_44, %c0_45, %c0_46], %77 {strides = array<i32>} : memref<4x8x8x512xf32, #tpu.memory_space<vmem>>, vector<4x8x8x512xf32>,
    return
  }
  func.func @transform_0(%arg0: i32) -> (i32, i32, i32, i32) {
    %c0_i32 = arith.constant 0 : i32
    %c0_i32_0 = arith.constant 0 : i32
    %c0_i32_1 = arith.constant 0 : i32
    %c0_i32_2 = arith.constant 0 : i32
    return %arg0, %c0_i32, %c0_i32_0, %c0_i32_1 : i32, i32, i32, i32
  }
  func.func @transform_1(%arg0: i32) -> (i32, i32) {
    %c0_i32 = arith.constant 0 : i32
    %c0_i32_0 = arith.constant 0 : i32
    %c0_i32_1 = arith.constant 0 : i32
    return %c0_i32, %c0_i32_0 : i32, i32
  }
  func.func @transform_2(%arg0: i32) -> (i32, i32) {
    %c0_i32 = arith.constant 0 : i32
    %c0_i32_0 = arith.constant 0 : i32
    %c0_i32_1 = arith.constant 0 : i32
    return %c0_i32, %c0_i32_0 : i32, i32
  }
  func.func @transform_3(%arg0: i32) -> (i32, i32) {
    %c0_i32 = arith.constant 0 : i32
    %c0_i32_0 = arith.constant 0 : i32
    %c0_i32_1 = arith.constant 0 : i32
    return %c0_i32, %c0_i32_0 : i32, i32
  }
  func.func @transform_4(%arg0: i32) -> (i32, i32) {
    %c0_i32 = arith.constant 0 : i32
    %c0_i32_0 = arith.constant 0 : i32
    %c0_i32_1 = arith.constant 0 : i32
    return %c0_i32, %c0_i32_0 : i32, i32
  }
  func.func @transform_5(%arg0: i32) -> (i32, i32) {
    %c0_i32 = arith.constant 0 : i32
    %c0_i32_0 = arith.constant 0 : i32
    %c0_i32_1 = arith.constant 0 : i32
    return %c0_i32, %c0_i32_0 : i32, i32
  }
  func.func @transform_6(%arg0: i32) -> (i32, i32) {
    %c0_i32 = arith.constant 0 : i32
    %c0_i32_0 = arith.constant 0 : i32
    %c0_i32_1 = arith.constant 0 : i32
    return %c0_i32, %c0_i32_0 : i32, i32
  }
  func.func @transform_7(%arg0: i32) -> (i32, i32) {
    %c0_i32 = arith.constant 0 : i32
    %c0_i32_0 = arith.constant 0 : i32
    %c0_i32_1 = arith.constant 0 : i32
    return %c0_i32, %c0_i32_0 : i32, i32
  }
  func.func @transform_8(%arg0: i32) -> (i32, i32, i32, i32) {
    %c0_i32 = arith.constant 0 : i32
    %c0_i32_0 = arith.constant 0 : i32
    %c0_i32_1 = arith.constant 0 : i32
    %c0_i32_2 = arith.constant 0 : i32
    return %arg0, %c0_i32, %c0_i32_0, %c0_i32_1 : i32, i32, i32, i32
  }
}

</mosaic_0001>

<bundles_post_ra>
// kernel: _gct_bottleneck_call.1
= control target key start
LH: loop header
LB: loop body
LE: loop exit
PB: predicated region body
PF: predicated region fallthrough
CT: control target
= control target key end

     0   :  { %s11923_s0 = inlined_call_operand.vmem [shape: bf16[8,8,8,512], index: 0, kind: input, shape index: {}]   ;;  %s11924_s1 = inlined_call_operand.vmem [shape: bf16[512,128], index: 1, kind: input, shape index: {}]   ;;  %s11925_s2 = inlined_call_operand.vmem [shape: f32[1,128], index: 2, kind: input, shape index: {}]   ;;  %s11926_s3 = inlined_call_operand.vmem [shape: bf16[1152,128], index: 3, kind: input, shape index: {}]   ;;  %s11927_s4 = inlined_call_operand.vmem [shape: f32[1,128], index: 4, kind: input, shape index: {}]   ;;  %s11928_s5 = inlined_call_operand.vmem [shape: bf16[128,512], index: 5, kind: input, shape index: {}]   ;;  %s11929_s6 = inlined_call_operand.vmem [shape: f32[1,512], index: 6, kind: input, shape index: {}]   ;;  %s11930_s7 = inlined_call_operand.<no memory space> [shape: f32[1,1], index: 7, kind: input, shape index: {}]   ;;  %s11931_s8 = inlined_call_operand.hbm [shape: f32[8,8,8,512], index: 8, kind: output, shape index: {}]  }
   0x1   :  { %13 = sst [smem:[#allocation3]] %s11930_s7 }
   0x2   :  { %14 = vsyncpa [#allocation5], 0 }
   0x3   :  { %16 = vsyncpa [#allocation5 + $0x1], 0  ;;  %s7848_s29 = smov 0   ;;  %s7850_s30 = smov 0  }
   0x4   :  { %s7852_s9 = smov 0   ;;  %s7854_s10 = smov 0  }
   0x5 LB: > { %s7869_s7 = sadd.s32 4294967295, %s7794_s10   ;;  %s6098_s11 = sadd.s32 4294967294, %s7794_s10   ;;  %s7794_s10 = sphi %s7854_s10, %s12776_s10   ;;  %s7790_s9 = sphi %s7852_s9, %s12775_s9   ;;  %s7786_s30 = sphi %s7850_s30, %s12774_s30   ;;  %s7782_s29 = sphi %s7848_s29, %s12773_s29  }
   0x6   : > { %s7873_s12 = sadd.s32 1, %s7794_s10   ;;  %s202_s13 = sadd.s32 1, %s7790_s9 }
   0x7   : > { %s199_s14 = ssub.s32 %s7794_s10, %s7873_s12  ;;  %p212_p0 = scmp.ne.s32.totalorder %s7790_s9, %s7786_s30 }
   0x8   : > { %p200_p1 = scmp.eq.s32.totalorder %s199_s14, 0  ;;  %p213_p2 = scmp.eq.s32.totalorder %s7869_s7, 1 }
   0x9   : > { %p218_p3 = scmp.ne.s32.totalorder %s7786_s30, %s7782_s29  ;;  %p219_p4 = scmp.eq.s32.totalorder %s6098_s11, 1 }
   0xa   : > { %s7884_s15 = scalar_select %p200_p1, %s7790_s9, %s202_s13  }
   0xb   : > { %p7886_p5 = por %p213_p2, %p212_p0  ;;  %p7890_p6 = por %p219_p4, %p218_p3 }
   0xc   : > { %p6101_p7 = scmp.ge.s32.totalorder %s7794_s10, 1  ;;  %p268_p8 = scmp.lt.s32.totalorder %s7794_s10, 3 }
   0xe   : > { %p269_p9 = pnand %p6101_p7, %p268_p8 }
  0x10   : > { %272 = sbr.rel (%p269_p9) target bundleno = 1464 (0x5b8), region = 52 }
  0x15   : > { %v7331_v0 = vld [vmem:[%s11924_s1 + $0x78] sm:$0xff]   ;;  %s6103_s20 = sshll.u32 %s7869_s7, 2  ;;  %v7333_v2 = vld [vmem:[%s11924_s1 + $0x70] sm:$0xff]   ;;  %v7335_v4 = vld [vmem:[%s11924_s1 + $0x68] sm:$0xff]   ;;  %vm1842_vm0 = vcmask 1043456   ;;  %vm1848_vm2 = vcmask 1040384  }
  0x16   : > { %v7332_v1 = vld [vmem:[%s11924_s1 + $0x38] sm:$0xff]   ;;  %7273 = vmatprep.subr.bf16.mxu1 %v7331_v0  ;;  %6529 = vmatprep.subr.bf16.mxu0 %v7331_v0  ;;  %p304_p10 = scmp.lt.s32.totalorder %s6103_s20, 7  ;;  %v7334_v3 = vld [vmem:[%s11924_s1 + $0x30] sm:$0xff]   ;;  %v7336_v5 = vld [vmem:[%s11924_s1 + $0x28] sm:$0xff]   ;;  %vm1843_vm1 = vsmask.f32 7938 }
  0x17   : > { %7281 = vmatpush3.bf16.msra.mxu1 %v7332_v1  ;;  %6530 = vmatpush3.bf16.msra.mxu0 %v7332_v1  ;;  %v7337_v6 = vld [vmem:[%s11924_s1 + $0x60] sm:$0xff]   ;;  %v7339_v8 = vld [vmem:[%s11924_s1 + $0x58] sm:$0xff]   ;;  %v7341_v10 = vld [vmem:[%s11924_s1 + $0x50] sm:$0xff]   ;;  %vm1849_vm3 = vsmask.f32 256  ;;  %s5314_s14 = sld [smem:[#allocation3]] }
  0x18   : > { %7274 = vmatprep.subr.bf16.mxu1 %v7333_v2  ;;  %6531 = vmatprep.subr.bf16.mxu0 %v7333_v2  ;;  %s12778_s20 = smov (!%p304_p10, %s6103_s20), 7  ;;  %v7338_v7 = vld [vmem:[%s11924_s1 + $0x20] sm:$0xff]   ;;  %v7340_v9 = vld [vmem:[%s11924_s1 + $0x18] sm:$0xff]   ;;  %v7342_v14 = vld [vmem:[%s11924_s1 + $0x10] sm:$0xff]   ;;  %s7797_s11 = smov [#allocation4]  }
  0x19   : > { %s6494_s19 = sshll.u32 %s12778_s20, 7  ;;  %v7343_v15 = vld [vmem:[%s11924_s1 + $0x48] sm:$0xff]   ;;  %v7345_v17 = vld [vmem:[%s11924_s1 + $0x40] sm:$0xff]   ;;  %v7349_v19 = vld [vmem:[%s11924_s1 + $0xf8] sm:$0xff]   ;;  %s7738_s20 = sshll.u32 %s7797_s11, 4  ;;  %s7739_s20 = int_to_ptr.vmem [resolvable:$false] %s7738_s20 }
  0x1a   : > { %s7927_s27 = scalar_lea.vmem %s11923_s0, %s6494_s19  ;;  %v7344_v16 = vld [vmem:[%s11924_s1 + $0x8] sm:$0xff]   ;;  %v7346_v18 = vld [vmem:[%s11924_s1] sm:$0xff]   ;;  %v7350_v23 = vld [vmem:[%s11924_s1 + $0xb8] sm:$0xff]   ;;  %s300_s19 = sand.u32 1, %s7786_s30  }
  0x1b   : > { %7282 = vmatpush3.bf16.msra.mxu1 %v7334_v3  ;;  %6532 = vmatpush3.bf16.msra.mxu0 %v7334_v3  ;;  %v360_v11 = vld [vmem:[%s7927_s27 + $0x180] sm:$0xff]  ;;  %v362_v12 = vld [vmem:[%s7927_s27 + $0x190] sm:$0xff]  ;;  %v7355_v31 = vld [vmem:[%s11924_s1 + $0xe8] sm:$0xff]   ;;  %s6102_s21 = sshll.u32 %s300_s19, 10  ;;  %s11883_s26 = scalar_lea.sflag [#allocation5], %s300_s19 }
  0x1c   : > { %7275 = vmatprep.subr.bf16.mxu1 %v7335_v4  ;;  %6533 = vmatprep.subr.bf16.mxu0 %v7335_v4  ;;  %v6156_v13 = vcombine.high %v360_v11, %v362_v12  ;;  %v364_v20 = vld [vmem:[%s7927_s27 + $0x1a0] sm:$0xff]  ;;  %v366_v21 = vld [vmem:[%s7927_s27 + $0x1b0] sm:$0xff]  ;;  %v6155_v22 = vcombine.low %v360_v11, %v362_v12  ;;  %v7356_v40 = vld [vmem:[%s11924_s1 + $0xa8] sm:$0xff]   ;;  %s11014_s22 = scalar_lea.vmem [#allocation4], %s6102_s21  ;;  %s7740_s13 = scalar_lea.vmem %s7739_s20, 32768 }
  0x1d   : > { %v312_v24 = vld [vmem:[%s7927_s27] sm:$0xff]  ;;  %v6160_v25 = vcombine.high %v364_v20, %v366_v21  ;;  %v314_v26 = vld [vmem:[%s7927_s27 + $0x10] sm:$0xff]  ;;  %v6159_v37 = vcombine.low %v364_v20, %v366_v21  ;;  %v7361_v46 = vld [vmem:[%s11924_s1 + $0xd8] sm:$0xff]   ;;  %s5315_s18 = smul.f32 -0.5, %s5314_s14  ;;  %s6036_s23 = sshll.u32 %s11014_s22, 4  ;;  %s11863_s23 = int_to_ptr.vmem [resolvable:$true] %s6036_s23 }
  0x1e   : > { %1087 = vmatprep.mubr.bf16.mxu1 %v6156_v13  ;;  %v7351_v27 = vld [vmem:[%s11924_s1 + $0xf0] sm:$0xff]   ;;  %v6108_v28 = vcombine.high %v312_v24, %v314_v26  ;;  %v6107_v29 = vcombine.low %v312_v24, %v314_v26  ;;  %v368_v32 = vld [vmem:[%s7927_s27 + $0x1c0] sm:$0xff]  ;;  %v7362_v52 = vld [vmem:[%s11924_s1 + $0x98] sm:$0xff]   ;;  %s7734_s28 = scalar_lea.vmem %s11863_s23, 16384  ;;  %p7741_p0 = scmp.lt.s32.totalorder %s11863_s23, %s7739_s20 }
  0x1f   : > { %7283 = vmatpush3.bf16.msra.mxu1 %v7336_v5  ;;  %6534 = vmatpush3.bf16.msra.mxu0 %v7336_v5  ;;  %v7352_v30 = vld [vmem:[%s11924_s1 + $0xb0] sm:$0xff]   ;;  %v316_v34 = vld [vmem:[%s7927_s27 + $0x20] sm:$0xff]  ;;  %v7368_v58 = vld [vmem:[%s11924_s1 + $0xc8] sm:$0xff]   ;;  %p7735_p11 = scmp.ne.s32.totalorder %s11863_s23, %s7734_s28  ;;  %p7742_p1 = scmp.lt.s32.totalorder %s7740_s13, %s7734_s28 }
  0x20   : > { %7276 = vmatprep.subr.bf16.mxu1 %v7337_v6  ;;  %6535 = vmatprep.subr.bf16.mxu0 %v7337_v6  ;;  %v370_v33 = vld [vmem:[%s7927_s27 + $0x1d0] sm:$0xff]  ;;  %v320_v38 = vld [vmem:[%s7927_s27 + $0x40] sm:$0xff]  ;;  %v313_v59 = vld [vmem:[%s7927_s27 + $0x8] sm:$0xff] }
  0x21   : > { %991 = vmatprep.mubr.bf16.mxu0 %v6108_v28  ;;  %v318_v35 = vld [vmem:[%s7927_s27 + $0x30] sm:$0xff]  ;;  %v6164_v41 = vcombine.high %v368_v32, %v370_v33  ;;  %v7357_v42 = vld [vmem:[%s11924_s1 + $0xe0] sm:$0xff]   ;;  %v6163_v49 = vcombine.low %v368_v32, %v370_v33  ;;  %v315_v60 = vld [vmem:[%s7927_s27 + $0x18] sm:$0xff]  ;;  %p7736_p12 = pnand %p7735_p11, %p7886_p5  ;;  %p7743_p2 = por %p7742_p1, %p7741_p0 }
  0x22   : > { %v6112_v36 = vcombine.high %v316_v34, %v318_v35  ;;  %v322_v39 = vld [vmem:[%s7927_s27 + $0x50] sm:$0xff]  ;;  %v6111_v43 = vcombine.low %v316_v34, %v318_v35  ;;  %v7358_v45 = vld [vmem:[%s11924_s1 + $0xa0] sm:$0xff]   ;;  %v7370_v62 = vld [vmem:[%s11924_s1 + $0x88] sm:$0xff]   ;;  %v6110_v2 = vcombine.high %v313_v59, %v315_v60 }
  0x23   : > { %7284 = vmatpush3.bf16.msra.mxu1 %v7338_v7  ;;  %6536 = vmatpush3.bf16.msra.mxu0 %v7338_v7  ;;  %v6116_v44 = vcombine.high %v320_v38, %v322_v39  ;;  %v372_v47 = vld [vmem:[%s7927_s27 + $0x1e0] sm:$0xff]  ;;  %v374_v48 = vld [vmem:[%s7927_s27 + $0x1f0] sm:$0xff]  ;;  %v6115_v55 = vcombine.low %v320_v38, %v322_v39  ;;  %v7427_v6 = vld [vmem:[%s11926_s3 + $0x78] sm:$0xff]   ;;  %p7737_p13 = pneg %p7736_p12 }
  0x24   : > { %7277 = vmatprep.subr.bf16.mxu1 %v7339_v8  ;;  %6537 = vmatprep.subr.bf16.mxu0 %v7339_v8  ;;  %v324_v50 = vld [vmem:[%s7927_s27 + $0x60] sm:$0xff]  ;;  %v326_v51 = vld [vmem:[%s7927_s27 + $0x70] sm:$0xff]  ;;  %v6168_v53 = vcombine.high %v372_v47, %v374_v48  ;;  %v6167_v0 = vcombine.low %v372_v47, %v374_v48  ;;  %v7428_v7 = vld [vmem:[%s11926_s3 + $0x38] sm:$0xff]  }
  0x25   : > { %v7363_v54 = vld [vmem:[%s11924_s1 + $0xd0] sm:$0xff]   ;;  %v6120_v56 = vcombine.high %v324_v50, %v326_v51  ;;  %v328_v61 = vld [vmem:[%s7927_s27 + $0x80] sm:$0xff]  ;;  %v6119_v3 = vcombine.low %v324_v50, %v326_v51  ;;  %v317_v8 = vld [vmem:[%s7927_s27 + $0x28] sm:$0xff]  ;;  %p7744_p3 = pnand %p7743_p2, %p7737_p13 }
  0x26   : > { %v7364_v57 = vld [vmem:[%s11924_s1 + $0x90] sm:$0xff]   ;;  %v7371_v1 = vld [vmem:[%s11924_s1 + $0xc0] sm:$0xff]   ;;  %v321_v20 = vld [vmem:[%s7927_s27 + $0x48] sm:$0xff] }
  0x27   : > { %7285 = vmatpush3.bf16.msra.mxu1 %v7340_v9  ;;  %6538 = vmatpush3.bf16.msra.mxu0 %v7340_v9  ;;  %v330_v63 = vld [vmem:[%s7927_s27 + $0x90] sm:$0xff]  ;;  %v7372_v5 = vld [vmem:[%s11924_s1 + $0x80] sm:$0xff]   ;;  %v319_v9 = vld [vmem:[%s7927_s27 + $0x38] sm:$0xff] }
  0x28   : > { %7278 = vmatprep.subr.bf16.mxu1 %v7341_v10  ;;  %6539 = vmatprep.subr.bf16.mxu0 %v7341_v10  ;;  %v6124_v4 = vcombine.high %v328_v61, %v330_v63  ;;  %v7429_v10 = vld [vmem:[%s11926_s3 + $0x70] sm:$0xff]   ;;  %v332_v11 = vld [vmem:[%s7927_s27 + $0xa0] sm:$0xff]  ;;  %v323_v21 = vld [vmem:[%s7927_s27 + $0x58] sm:$0xff]  ;;  %v6113_v24 = vcombine.low %v317_v8, %v319_v9 }
  0x29   : > { %v334_v12 = vld [vmem:[%s7927_s27 + $0xb0] sm:$0xff]  ;;  %v325_v28 = vld [vmem:[%s7927_s27 + $0x68] sm:$0xff]  ;;  %v6117_v32 = vcombine.low %v321_v20, %v323_v21  ;;  %v344_v38 = vld [vmem:[%s7927_s27 + $0x100] sm:$0xff] }
  0x2a   : > { %v7430_v13 = vld [vmem:[%s11926_s3 + $0x30] sm:$0xff]   ;;  %v6127_v26 = vcombine.low %v332_v11, %v334_v12  ;;  %vm8352_vm4 = vmand %vm1842_vm0, %vm1843_vm1 }
  0x2b   : > { %7286 = vmatpush3.bf16.msra.mxu1 %v7342_v14  ;;  %6540 = vmatpush3.bf16.msra.mxu0 %v7342_v14  ;;  %v7431_v14 = vld [vmem:[%s11926_s3 + $0x68] sm:$0xff]   ;;  %v346_v39 = vld [vmem:[%s7927_s27 + $0x110] sm:$0xff]  ;;  %vm8363_vm5 = vmand %vm1848_vm2, %vm1849_vm3 }
  0x2c   : > { %7279 = vmatprep.subr.bf16.mxu1 %v7343_v15  ;;  %6541 = vmatprep.subr.bf16.mxu0 %v7343_v15  ;;  %v6109_v15 = vcombine.low %v313_v59, %v315_v60  ;;  %v350_v47 = vld [vmem:[%s7927_s27 + $0x130] sm:$0xff]  ;;  %v6139_v50 = vcombine.low %v344_v38, %v346_v39  ;;  %v341_v60 = vld [vmem:[%s7927_s27 + $0xe8] sm:$0xff] }
  0x2f   : > { %7287 = vmatpush3.bf16.msra.mxu1 %v7344_v16  ;;  %6542 = vmatpush3.bf16.msra.mxu0 %v7344_v16  ;;  %v6114_v16 = vcombine.high %v317_v8, %v319_v9 }
  0x30   : > { %7280 = vmatprep.subr.bf16.mxu1 %v7345_v17  ;;  %6543 = vmatprep.subr.bf16.mxu0 %v7345_v17  ;;  %v6123_v17 = vcombine.low %v328_v61, %v330_v63  ;;  %v343_v61 = vld [vmem:[%s7927_s27 + $0xf8] sm:$0xff]  ;;  %v356_v63 = vld [vmem:[%s7927_s27 + $0x160] sm:$0xff] }
  0x31   : > { %v6137_v8 = vcombine.low %v341_v60, %v343_v61 }
  0x33   : > { %7288 = vmatpush3.bf16.msra.mxu1 %v7346_v18  ;;  %6544 = vmatpush3.bf16.msra.mxu0 %v7346_v18  ;;  %v7432_v18 = vld [vmem:[%s11926_s3 + $0x28] sm:$0xff]  }
  0x34   : > { %6641 = vmatprep.subr.bf16.mxu1 %v7349_v19  ;;  %6753 = vmatprep.subr.bf16.mxu0 %v7427_v6  ;;  %v6128_v19 = vcombine.high %v332_v11, %v334_v12  ;;  %v345_v6 = vld [vmem:[%s7927_s27 + $0x108] sm:$0xff]  ;;  %v7436_v12 = vld [vmem:[%s11926_s3 + $0x18] sm:$0xff]  }
  0x36   : > { %1088 = vmatmul.mubr.bf16.vlgmr.msra.gmra.mxu1 %v6155_v22  ;;  %992 = vmatmul.mubr.bf16.vlgmr.msra.gmra.mxu0 %v6107_v29  ;;  %v336_v22 = vld [vmem:[%s7927_s27 + $0xc0] sm:$0xff]  ;;  %v327_v29 = vld [vmem:[%s7927_s27 + $0x78] sm:$0xff] }
  0x37   : > { %6642 = vmatpush3.bf16.msra.mxu1 %v7350_v23  ;;  %1095 = vmatprep.mubr.bf16.mxu1 %v6160_v25  ;;  %v338_v23 = vld [vmem:[%s7927_s27 + $0xd0] sm:$0xff]  ;;  %v6118_v25 = vcombine.high %v321_v20, %v323_v21  ;;  %v6122_v33 = vcombine.high %v325_v28, %v327_v29  ;;  %v8090_v20 = vld [vmem:[%s7927_s27 + $0x148] sm:$0xff]  ;;  %v8093_v21 = vld [vmem:[%s7927_s27 + $0x158] sm:$0xff] }
  0x38   : > { %6643 = vmatprep.subr.bf16.mxu1 %v7351_v27  ;;  %999 = vmatprep.mubr.bf16.mxu0 %v6112_v36  ;;  %v6132_v27 = vcombine.high %v336_v22, %v338_v23  ;;  %v6131_v34 = vcombine.low %v336_v22, %v338_v23  ;;  %v329_v36 = vld [vmem:[%s7927_s27 + $0x88] sm:$0xff]  ;;  %v7441_v22 = vld [vmem:[%s11926_s3 + $0xf0] sm:$0xff]  }
  0x39   : > { %6754 = vmatpush3.bf16.msra.mxu0 %v7428_v7  ;;  %v347_v7 = vld [vmem:[%s7927_s27 + $0x118] sm:$0xff] }
  0x3a   : > { %6755 = vmatprep.subr.bf16.mxu0 %v7429_v10  ;;  %v6142_v9 = vcombine.high %v345_v6, %v347_v7  ;;  %v7435_v10 = vld [vmem:[%s11926_s3 + $0x58] sm:$0xff]  }
  0x3b   : > { %6644 = vmatpush3.bf16.msra.mxu1 %v7352_v30  ;;  %v340_v30 = vld [vmem:[%s7927_s27 + $0xe0] sm:$0xff] }
  0x3c   : > { %6645 = vmatprep.subr.bf16.mxu1 %v7355_v31  ;;  %v342_v31 = vld [vmem:[%s7927_s27 + $0xf0] sm:$0xff] }
  0x3d   : > { %6756 = vmatpush3.bf16.msra.mxu0 %v7430_v13  ;;  %v6136_v35 = vcombine.high %v340_v30, %v342_v31  ;;  %v349_v13 = vld [vmem:[%s7927_s27 + $0x128] sm:$0xff] }
  0x3e   : > { %1096 = vmatmul.mubr.bf16.gmra.mxu1 %v6159_v37  ;;  %1000 = vmatmul.mubr.bf16.gmra.mxu0 %v6111_v43  ;;  %v331_v37 = vld [vmem:[%s7927_s27 + $0x98] sm:$0xff]  ;;  %v6140_v43 = vcombine.high %v344_v38, %v346_v39  ;;  %v7439_v39 = vld [vmem:[%s11926_s3 + $0x10] sm:$0xff]  }
  0x3f   : > { %6646 = vmatpush3.bf16.msra.mxu1 %v7356_v40  ;;  %1103 = vmatprep.mubr.bf16.mxu1 %v6164_v41  ;;  %v6121_v40 = vcombine.low %v325_v28, %v327_v29  ;;  %v6126_v41 = vcombine.high %v329_v36, %v331_v37  ;;  %v6125_v48 = vcombine.low %v329_v36, %v331_v37  ;;  %v7444_v28 = vld [vmem:[%s11926_s3 + $0xa8] sm:$0xff]   ;;  %v7450_v36 = vld [vmem:[%s11926_s3 + $0x98] sm:$0xff]  }
  0x40   : > { %6647 = vmatprep.subr.bf16.mxu1 %v7357_v42  ;;  %1007 = vmatprep.mubr.bf16.mxu0 %v6116_v44  ;;  %v6135_v42 = vcombine.low %v340_v30, %v342_v31  ;;  %v333_v44 = vld [vmem:[%s7927_s27 + $0xa8] sm:$0xff]  ;;  %v359_v30 = vld [vmem:[%s7927_s27 + $0x178] sm:$0xff]  ;;  %v6149_v31 = vcombine.low %v8090_v20, %v8093_v21 }
  0x41   : > { %6757 = vmatprep.subr.bf16.mxu0 %v7431_v14  ;;  %v351_v14 = vld [vmem:[%s7927_s27 + $0x138] sm:$0xff]  ;;  %v357_v29 = vld [vmem:[%s7927_s27 + $0x168] sm:$0xff] }
  0x42   : > { %6758 = vmatpush3.bf16.msra.mxu0 %v7432_v18  ;;  %v7440_v18 = vld [vmem:[%s11926_s3 + $0xb8] sm:$0xff]   ;;  %v6145_v23 = vcombine.low %v349_v13, %v351_v14  ;;  %v361_v37 = vld [vmem:[%s7927_s27 + $0x188] sm:$0xff] }
  0x43   : > { %6648 = vmatpush3.bf16.msra.mxu1 %v7358_v45  ;;  %v335_v45 = vld [vmem:[%s7927_s27 + $0xb8] sm:$0xff] }
  0x44   : > { %6649 = vmatprep.subr.bf16.mxu1 %v7361_v46  ;;  %v348_v46 = vld [vmem:[%s7927_s27 + $0x120] sm:$0xff]  ;;  %v363_v38 = vld [vmem:[%s7927_s27 + $0x198] sm:$0xff] }
  0x45   : > { %v6144_v51 = vcombine.high %v348_v46, %v350_v47 }
  0x46   : > { %1104 = vmatmul.mubr.bf16.gmra.mxu1 %v6163_v49  ;;  %1008 = vmatmul.mubr.bf16.gmra.mxu0 %v6115_v55  ;;  %v6130_v49 = vcombine.high %v333_v44, %v335_v45  ;;  %v354_v55 = vld [vmem:[%s7927_s27 + $0x150] sm:$0xff] }
  0x47   : > { %6650 = vmatpush3.bf16.msra.mxu1 %v7362_v52  ;;  %1111 = vmatprep.mubr.bf16.mxu1 %v6168_v53  ;;  %v337_v52 = vld [vmem:[%s7927_s27 + $0xc8] sm:$0xff]  ;;  %v339_v53 = vld [vmem:[%s7927_s27 + $0xd8] sm:$0xff] }
  0x48   : > { %6651 = vmatprep.subr.bf16.mxu1 %v7363_v54  ;;  %1015 = vmatprep.mubr.bf16.mxu0 %v6120_v56  ;;  %v352_v54 = vld [vmem:[%s7927_s27 + $0x140] sm:$0xff]  ;;  %v6129_v56 = vcombine.low %v333_v44, %v335_v45  ;;  %v7454_v44 = vld [vmem:[%s11926_s3 + $0xc8] sm:$0xff]  }
  0x49   : > { %v6148_v59 = vcombine.high %v352_v54, %v354_v55  ;;  %v7456_v45 = vld [vmem:[%s11926_s3 + $0x88] sm:$0xff]  }
  0x4b   : > { %6652 = vmatpush3.bf16.msra.mxu1 %v7364_v57  ;;  %v6134_v57 = vcombine.high %v337_v52, %v339_v53 }
  0x4c   : > { %6653 = vmatprep.subr.bf16.mxu1 %v7368_v58  ;;  %v6143_v58 = vcombine.low %v348_v46, %v350_v47  ;;  %v365_v46 = vld [vmem:[%s7927_s27 + $0x1a8] sm:$0xff]  ;;  %v367_v47 = vld [vmem:[%s7927_s27 + $0x1b8] sm:$0xff] }
  0x4e   : > { %1112 = vmatmul.mubr.bf16.gmra.mxu1 %v6167_v0  ;;  %1016 = vmatmul.mubr.bf16.gmra.mxu0 %v6119_v3  ;;  %v358_v0 = vld [vmem:[%s7927_s27 + $0x170] sm:$0xff]  ;;  %v7434_v3 = vld [vmem:[%s11926_s3 + $0x20] sm:$0xff]  }
  0x4f   : > { %6654 = vmatpush3.bf16.msra.mxu1 %v7370_v62  ;;  %1152 = vmatprep.mubr.bf16.mxu1 %v6110_v2  ;;  %v7433_v62 = vld [vmem:[%s11926_s3 + $0x60] sm:$0xff]   ;;  %v6138_v2 = vcombine.high %v341_v60, %v343_v61  ;;  %v6151_v11 = vcombine.low %v356_v63, %v358_v0  ;;  %v373_v60 = vld [vmem:[%s7927_s27 + $0x1e8] sm:$0xff]  ;;  %v375_v61 = vld [vmem:[%s7927_s27 + $0x1f8] sm:$0xff] }
  0x50   : > { %6655 = vmatprep.subr.bf16.mxu1 %v7371_v1  ;;  %1023 = vmatprep.mubr.bf16.mxu0 %v6124_v4  ;;  %v6133_v1 = vcombine.low %v337_v52, %v339_v53  ;;  %v6147_v4 = vcombine.low %v352_v54, %v354_v55  ;;  %v7447_v52 = vld [vmem:[%s11926_s3 + $0x8] sm:$0xff]   ;;  %v7458_v53 = vld [vmem:[%s11926_s3 + $0x80] sm:$0xff]  }
  0x51   : > { %6759 = vmatprep.subr.bf16.mxu0 %v7433_v62  ;;  %v7453_v54 = vld [vmem:[%s11926_s3 + $0x40] sm:$0xff]  }
  0x52   : > { %6760 = vmatpush3.bf16.msra.mxu0 %v7434_v3  ;;  %v7455_v55 = vld [vmem:[%s11926_s3] sm:$0xff]  }
  0x53   : > { %6656 = vmatpush3.bf16.msra.mxu1 %v7372_v5  ;;  %v6152_v5 = vcombine.high %v356_v63, %v358_v0  ;;  %6761 = vmatprep.subr.bf16.mxu0 %v7435_v10  ;;  %v6170_v63 = vcombine.high %v373_v60, %v375_v61  ;;  %v7464_v0 = vld [vmem:[%s11926_s3 + $0x178] sm:$0xff]  }
  0x56   : > { %1153 = vmatmul.mubr.bf16.vlgmr.msra.gmra.mxu1 %v6109_v15  ;;  %1024 = vmatmul.mubr.bf16.gmra.mxu0 %v6123_v17  ;;  %v6141_v15 = vcombine.low %v345_v6, %v347_v7  ;;  %v7438_v17 = vld [vmem:[%s11926_s3 + $0xf8] sm:$0xff]  }
  0x57   : > { %1160 = vmatprep.mubr.bf16.mxu1 %v6114_v16  ;;  %1031 = vmatprep.mubr.bf16.mxu0 %v6128_v19  ;;  %v6146_v16 = vcombine.high %v349_v13, %v351_v14  ;;  %v7437_v19 = vld [vmem:[%s11926_s3 + $0x50] sm:$0xff]  }
  0x58   : > { %6762 = vmatpush3.bf16.msra.mxu0 %v7436_v12  ;;  %6865 = vmatprep.subr.bf16.mxu1 %v7438_v17 }
  0x59   : > { %6866 = vmatpush3.bf16.msra.mxu1 %v7440_v18  ;;  %6763 = vmatprep.subr.bf16.mxu0 %v7437_v19 }
  0x5a   : > { %6867 = vmatprep.subr.bf16.mxu1 %v7441_v22 }
  0x5c   : > { %6764 = vmatpush3.bf16.msra.mxu0 %v7439_v39 }
  0x5e   : > { %1161 = vmatmul.mubr.bf16.gmra.mxu1 %v6113_v24  ;;  %1032 = vmatmul.mubr.bf16.gmra.mxu0 %v6127_v26  ;;  %v7442_v24 = vld [vmem:[%s11926_s3 + $0xb0] sm:$0xff]   ;;  %v8106_v26 = vld [vmem:[%s11926_s3 + $0xe8] sm:$0xff]  }
  0x5f   : > { %1168 = vmatprep.mubr.bf16.mxu1 %v6118_v25  ;;  %1039 = vmatprep.mubr.bf16.mxu0 %v6132_v27  ;;  %v6150_v25 = vcombine.high %v8090_v20, %v8093_v21  ;;  %v11932_v27 = vmov 0  }
  0x60   : > { %6868 = vmatpush3.bf16.msra.mxu1 %v7442_v24  ;;  %1315 = vst [vmem:[#allocation2 + $0x8] sm:$0xf] %v11932_v27  ;;  %1316 = vst [vmem:[#allocation2 + $0xc] sm:$0x1] %v11932_v27 }
  0x61   : > { %1313 = vst [vmem:[#allocation2] sm:$0xf] %v11932_v27  ;;  %1314 = vst [vmem:[#allocation2 + $0x4] sm:$0x1] %v11932_v27  ;;  %6869 = vmatprep.subr.bf16.mxu1 %v8106_v26 }
  0x62   : > { %1317 = vst [vmem:[#allocation2 + $0x10] sm:$0xf] %v11932_v27  ;;  %1318 = vst [vmem:[#allocation2 + $0x14] sm:$0x1] %v11932_v27 }
  0x63   : > { %1319 = vst [vmem:[#allocation2 + $0x18] sm:$0xf] %v11932_v27  ;;  %1320 = vst [vmem:[#allocation2 + $0x1c] sm:$0x1] %v11932_v27 }
  0x64   : > { %1321 = vst [vmem:[#allocation2 + $0x20] sm:$0xf] %v11932_v27  ;;  %1322 = vst [vmem:[#allocation2 + $0x24] sm:$0x1] %v11932_v27  ;;  %6870 = vmatpush3.bf16.msra.mxu1 %v7444_v28 }
  0x65   : > { %1323 = vst [vmem:[#allocation2 + $0x28] sm:$0xf] %v11932_v27  ;;  %1324 = vst [vmem:[#allocation2 + $0x2c] sm:$0x1] %v11932_v27 }
  0x66   : > { %1169 = vmatmul.mubr.bf16.gmra.mxu1 %v6117_v32  ;;  %1040 = vmatmul.mubr.bf16.gmra.mxu0 %v6131_v34  ;;  %1325 = vst [vmem:[#allocation2 + $0x30] sm:$0xf] %v11932_v27  ;;  %1326 = vst [vmem:[#allocation2 + $0x34] sm:$0x1] %v11932_v27  ;;  %v7446_v32 = vld [vmem:[%s11926_s3 + $0xe0] sm:$0xff]  }
  0x67   : > { %1176 = vmatprep.mubr.bf16.mxu1 %v6122_v33  ;;  %1047 = vmatprep.mubr.bf16.mxu0 %v6136_v35  ;;  %1327 = vst [vmem:[#allocation2 + $0x38] sm:$0xf] %v11932_v27  ;;  %1328 = vst [vmem:[#allocation2 + $0x3c] sm:$0x1] %v11932_v27  ;;  %v6154_v33 = vcombine.high %v357_v29, %v359_v30  ;;  %v7448_v34 = vld [vmem:[%s11926_s3 + $0xa0] sm:$0xff]   ;;  %v7449_v35 = vld [vmem:[%s11926_s3 + $0xd8] sm:$0xff]  }
  0x68   : > { %1329 = vst [vmem:[#allocation2 + $0x40] sm:$0xf] %v11932_v27  ;;  %1330 = vst [vmem:[#allocation2 + $0x44] sm:$0x1] %v11932_v27  ;;  %6871 = vmatprep.subr.bf16.mxu1 %v7446_v32 }
  0x69   : > { %1331 = vst [vmem:[#allocation2 + $0x48] sm:$0xf] %v11932_v27  ;;  %1332 = vst [vmem:[#allocation2 + $0x4c] sm:$0x1] %v11932_v27  ;;  %6872 = vmatpush3.bf16.msra.mxu1 %v7448_v34 }
  0x6a   : > { %1333 = vst [vmem:[#allocation2 + $0x50] sm:$0xf] %v11932_v27  ;;  %1334 = vst [vmem:[#allocation2 + $0x54] sm:$0x1] %v11932_v27  ;;  %6873 = vmatprep.subr.bf16.mxu1 %v7449_v35 }
  0x6b   : > { %1335 = vst [vmem:[#allocation2 + $0x58] sm:$0xf] %v11932_v27  ;;  %1336 = vst [vmem:[#allocation2 + $0x5c] sm:$0x1] %v11932_v27 }
  0x6c   : > { %1337 = vst [vmem:[#allocation2 + $0x60] sm:$0xf] %v11932_v27  ;;  %1338 = vst [vmem:[#allocation2 + $0x64] sm:$0x1] %v11932_v27 }
  0x6d   : > { %1339 = vst [vmem:[#allocation2 + $0x68] sm:$0xf] %v11932_v27  ;;  %1340 = vst [vmem:[#allocation2 + $0x6c] sm:$0x1] %v11932_v27  ;;  %6874 = vmatpush3.bf16.msra.mxu1 %v7450_v36 }
  0x6e   : > { %1177 = vmatmul.mubr.bf16.gmra.mxu1 %v6121_v40  ;;  %1048 = vmatmul.mubr.bf16.gmra.mxu0 %v6135_v42  ;;  %1341 = vst [vmem:[#allocation2 + $0x70] sm:$0xf] %v11932_v27  ;;  %1342 = vst [vmem:[#allocation2 + $0x74] sm:$0x1] %v11932_v27  ;;  %v6153_v40 = vcombine.low %v357_v29, %v359_v30  ;;  %v6158_v42 = vcombine.high %v361_v37, %v363_v38  ;;  %v8273_v29 = vld [vmem:[#allocation2] sm:$0xf] }
  0x6f   : > { %1184 = vmatprep.mubr.bf16.mxu1 %v6126_v41  ;;  %1055 = vmatprep.mubr.bf16.mxu0 %v6140_v43  ;;  %1343 = vst [vmem:[#allocation2 + $0x78] sm:$0xf] %v11932_v27  ;;  %1344 = vst [vmem:[#allocation2 + $0x7c] sm:$0x1] %v11932_v27  ;;  %v7451_v41 = vld [vmem:[%s11926_s3 + $0xd0] sm:$0xff]  }
  0x70   : > { %1345 = vst [vmem:[#allocation2 + $0x80] sm:$0xf] %v11932_v27  ;;  %1346 = vst [vmem:[#allocation2 + $0x84] sm:$0x1] %v11932_v27  ;;  %v7452_v43 = vld [vmem:[%s11926_s3 + $0x90] sm:$0xff]   ;;  %6875 = vmatprep.subr.bf16.mxu1 %v7451_v41 }
  0x71   : > { %1347 = vst [vmem:[#allocation2 + $0x88] sm:$0xf] %v11932_v27  ;;  %1348 = vst [vmem:[#allocation2 + $0x8c] sm:$0x1] %v11932_v27  ;;  %6876 = vmatpush3.bf16.msra.mxu1 %v7452_v43  ;;  %v2041_v30 = vld [vmem:[#allocation2 + $0x4] sm:$0x1] }
  0x72   : > { %1349 = vst [vmem:[#allocation2 + $0x90] sm:$0xf] %v11932_v27  ;;  %1350 = vst [vmem:[#allocation2 + $0x94] sm:$0x1] %v11932_v27  ;;  %6877 = vmatprep.subr.bf16.mxu1 %v7454_v44  ;;  %v2061_v32 = vld [vmem:[#allocation2 + $0x54] sm:$0x1] }
  0x73   : > { %1351 = vst [vmem:[#allocation2 + $0x98] sm:$0xf] %v11932_v27  ;;  %1352 = vst [vmem:[#allocation2 + $0x9c] sm:$0x1] %v11932_v27 }
  0x74   : > { %1353 = vst [vmem:[#allocation2 + $0xa0] sm:$0xf] %v11932_v27  ;;  %1354 = vst [vmem:[#allocation2 + $0xa4] sm:$0x1] %v11932_v27 }
  0x75   : > { %1355 = vst [vmem:[#allocation2 + $0xa8] sm:$0xf] %v11932_v27  ;;  %1356 = vst [vmem:[#allocation2 + $0xac] sm:$0x1] %v11932_v27  ;;  %6878 = vmatpush3.bf16.msra.mxu1 %v7456_v45 }
  0x76   : > { %1185 = vmatmul.mubr.bf16.gmra.mxu1 %v6125_v48  ;;  %1056 = vmatmul.mubr.bf16.gmra.mxu0 %v6139_v50  ;;  %1357 = vst [vmem:[#allocation2 + $0xb0] sm:$0xf] %v11932_v27  ;;  %1358 = vst [vmem:[#allocation2 + $0xb4] sm:$0x1] %v11932_v27  ;;  %v7445_v48 = vld [vmem:[%s11926_s3 + $0x48] sm:$0xff]   ;;  %v7457_v50 = vld [vmem:[%s11926_s3 + $0xc0] sm:$0xff]  }
  0x77   : > { %1192 = vmatprep.mubr.bf16.mxu1 %v6130_v49  ;;  %1063 = vmatprep.mubr.bf16.mxu0 %v6144_v51  ;;  %1359 = vst [vmem:[#allocation2 + $0xb8] sm:$0xf] %v11932_v27  ;;  %1360 = vst [vmem:[#allocation2 + $0xbc] sm:$0x1] %v11932_v27  ;;  %v6157_v49 = vcombine.low %v361_v37, %v363_v38  ;;  %v6162_v51 = vcombine.high %v365_v46, %v367_v47 }
  0x78   : > { %1361 = vst [vmem:[#allocation2 + $0xc0] sm:$0xf] %v11932_v27  ;;  %1362 = vst [vmem:[#allocation2 + $0xc4] sm:$0x1] %v11932_v27  ;;  %6765 = vmatprep.subr.bf16.mxu0 %v7445_v48  ;;  %6879 = vmatprep.subr.bf16.mxu1 %v7457_v50  ;;  %v8278_v37 = vcombine.low %v8273_v29, %v2041_v30 }
  0x79   : > { %1363 = vst [vmem:[#allocation2 + $0xc8] sm:$0xf] %v11932_v27  ;;  %1364 = vst [vmem:[#allocation2 + $0xcc] sm:$0x1] %v11932_v27  ;;  %6766 = vmatpush3.bf16.msra.mxu0 %v7447_v52  ;;  %6880 = vmatpush3.bf16.msra.mxu1 %v7458_v53  ;;  %v8300_v52 = vld [vmem:[%s11925_s2] ss:$0 sm:$0xff] }
  0x7a   : > { %1365 = vst [vmem:[#allocation2 + $0xd0] sm:$0xf] %v11932_v27  ;;  %1366 = vst [vmem:[#allocation2 + $0xd4] sm:$0x1] %v11932_v27  ;;  %6767 = vmatprep.subr.bf16.mxu0 %v7453_v54  ;;  %v2283_v44 = vshll.u32 %v8278_v37, 16 }
  0x7b   : > { %1367 = vst [vmem:[#allocation2 + $0xd8] sm:$0xf] %v11932_v27  ;;  %1368 = vst [vmem:[#allocation2 + $0xdc] sm:$0x1] %v11932_v27  ;;  %v2081_v48 = vld [vmem:[#allocation2 + $0xa4] sm:$0x1] }
  0x7c   : > { %1369 = vst [vmem:[#allocation2 + $0xe0] sm:$0xf] %v11932_v27  ;;  %1370 = vst [vmem:[#allocation2 + $0xe4] sm:$0x1] %v11932_v27 }
  0x7d   : > { %1371 = vst [vmem:[#allocation2 + $0xe8] sm:$0xf] %v11932_v27  ;;  %1372 = vst [vmem:[#allocation2 + $0xec] sm:$0x1] %v11932_v27  ;;  %6768 = vmatpush3.bf16.msra.mxu0 %v7455_v55  ;;  %v2285_v55 = vrot.slane %v2283_v44, 1 }
  0x7e   : > { %1193 = vmatmul.mubr.bf16.gmra.mxu1 %v6129_v56  ;;  %1064 = vmatmul.mubr.bf16.gmra.mxu0 %v6143_v58  ;;  %1373 = vst [vmem:[#allocation2 + $0xf0] sm:$0xf] %v11932_v27  ;;  %1374 = vst [vmem:[#allocation2 + $0xf4] sm:$0x1] %v11932_v27  ;;  %v369_v56 = vld [vmem:[%s7927_s27 + $0x1c8] sm:$0xff]  ;;  %v6161_v58 = vcombine.low %v365_v46, %v367_v47 }
  0x7f   : > { %1200 = vmatprep.mubr.bf16.mxu1 %v6134_v57  ;;  %1071 = vmatprep.mubr.bf16.mxu0 %v6148_v59  ;;  %1375 = vst [vmem:[#allocation2 + $0xf8] sm:$0xf] %v11932_v27  ;;  %1376 = vst [vmem:[#allocation2 + $0xfc] sm:$0x1] %v11932_v27  ;;  %v371_v57 = vld [vmem:[%s7927_s27 + $0x1d8] sm:$0xff] }
  0x80   : > { %1377 = vst [vmem:[#allocation2 + $0x100] sm:$0xf] %v11932_v27  ;;  %1378 = vst [vmem:[#allocation2 + $0x104] sm:$0x1] %v11932_v27  ;;  %v6166_v59 = vcombine.high %v369_v56, %v371_v57  ;;  %v6165_v62 = vcombine.low %v369_v56, %v371_v57  ;;  %6977 = vmatprep.subr.bf16.mxu0 %v7464_v0  ;;  %v2080_v47 = vld [vmem:[#allocation2 + $0xa0] sm:$0xf] }
  0x81   : > { %1379 = vst [vmem:[#allocation2 + $0x108] sm:$0xf] %v11932_v27  ;;  %1380 = vst [vmem:[#allocation2 + $0x10c] sm:$0x1] %v11932_v27 }
  0x82   : > { %1381 = vst [vmem:[#allocation2 + $0x110] sm:$0xf] %v11932_v27  ;;  %1382 = vst [vmem:[#allocation2 + $0x114] sm:$0x1] %v11932_v27 }
  0x83   : > { %1383 = vst [vmem:[#allocation2 + $0x118] sm:$0xf] %v11932_v27  ;;  %1384 = vst [vmem:[#allocation2 + $0x11c] sm:$0x1] %v11932_v27 }
  0x84   : > { %1385 = vst [vmem:[#allocation2 + $0x120] sm:$0xf] %v11932_v27  ;;  %1386 = vst [vmem:[#allocation2 + $0x124] sm:$0x1] %v11932_v27 }
  0x85   : > { %1387 = vst [vmem:[#allocation2 + $0x128] sm:$0xf] %v11932_v27  ;;  %1388 = vst [vmem:[#allocation2 + $0x12c] sm:$0x1] %v11932_v27 }
  0x86   : > { %1201 = vmatmul.mubr.bf16.gmra.mxu1 %v6133_v1  ;;  %1072 = vmatmul.mubr.bf16.gmra.mxu0 %v6147_v4  ;;  %1389 = vst [vmem:[#allocation2 + $0x130] sm:$0xf] %v11932_v27  ;;  %1390 = vst [vmem:[#allocation2 + $0x134] sm:$0x1] %v11932_v27  ;;  %v6169_v1 = vcombine.low %v373_v60, %v375_v61 }
  0x87   : > { %1208 = vmatprep.mubr.bf16.mxu1 %v6138_v2  ;;  %1079 = vmatprep.mubr.bf16.mxu0 %v6152_v5  ;;  %1391 = vst [vmem:[#allocation2 + $0x138] sm:$0xf] %v11932_v27  ;;  %1392 = vst [vmem:[#allocation2 + $0x13c] sm:$0x1] %v11932_v27 }
  0x8e   : > { %1209 = vmatmul.mubr.bf16.gmra.mxu1 %v6137_v8  ;;  %1080 = vmatmul.mubr.bf16.gmra.mxu0 %v6151_v11 }
  0x8f   : > { %1216 = vmatprep.mubr.bf16.mxu1 %v6142_v9 }
  0x96   : > { %1217 = vmatmul.mubr.bf16.gmra.mxu1 %v6141_v15 }
  0x97   : > { %1224 = vmatprep.mubr.bf16.mxu1 %v6146_v16 }
  0x9e   : > { %1225 = vmatmul.mubr.bf16.gmra.mxu1 %v6145_v23 }
  0x9f   : > { %1232 = vmatprep.mubr.bf16.mxu1 %v6150_v25 }
  0xa6   : > { %1233 = vmatmul.mubr.bf16.gmra.mxu1 %v6149_v31  ;;  %v2060_v31 = vld [vmem:[#allocation2 + $0x50] sm:$0xf] }
  0xa7   : > { %1240 = vmatprep.mubr.bf16.mxu1 %v6154_v33  ;;  %v8280_v38 = vcombine.low %v2060_v31, %v2061_v32 }
  0xa9   : > { %v2339_v45 = vshll.u32 %v8280_v38, 16  ;;  %v2337_v56 = vshrl.u32 %v8280_v38, 16 }
  0xab   : > { %v2341_v57 = vrot.slane %v2339_v45, 1 }
  0xae   : > { %1241 = vmatmul.mubr.bf16.gmra.mxu1 %v6153_v40 }
  0xaf   : > { %1248 = vmatprep.mubr.bf16.mxu1 %v6158_v42 }
  0xb6   : > { %1249 = vmatmul.mubr.bf16.gmra.mxu1 %v6157_v49 }
  0xb7   : > { %1256 = vmatprep.mubr.bf16.mxu1 %v6162_v51  ;;  %v2281_v51 = vshrl.u32 %v8278_v37, 16 }
  0xbe   : > { %1257 = vmatmul.mubr.bf16.gmra.mxu1 %v6161_v58  ;;  %v8305_v58 = vcombine.low %v2080_v47, %v2081_v48 }
  0xbf   : > { %1264 = vmatprep.mubr.bf16.mxu1 %v6166_v59 }
  0xc6   : > { %1265 = vmatmul.mubr.bf16.gmra.mxu1 %v6165_v62 }
  0xc7   : > { %1272 = vmatprep.mubr.bf16.mxu1 %v6170_v63 }
  0xce   : > { %1273 = vmatmul.mubr.bf16.gmra.mxu1 %v6169_v1 }
  0xf6   : > { %v6617_v2 = vpop.f32.mrf.mxu1  ;;  %v6545_v4 = vpop.f32.mrf.mxu0 }
  0xf8   : > { %v6618_v3 = vpop.f32.mrf.mxu1  ;;  %v6546_v7 = vpop.f32.mrf.mxu0 }
  0xf9   : > { %v8255_v5 = vadd.f32 %v6618_v3, %v6617_v2  ;;  %v6547_v46 = vadd.f32 %v6546_v7, %v6545_v4  ;;  %v2504_v3 = vrot.slane %v8278_v37, 1 }
  0xfa   : > { %v6620_v6 = vpop.f32.mrf.mxu1  ;;  %v6548_v9 = vpop.f32.mrf.mxu0 }
  0xfb   : > { %v994_v59 = vadd.f32 %v6547_v46, %v8300_v52 }
  0xfc   : > { %v6621_v8 = vpop.f32.mrf.mxu1  ;;  %v6549_v11 = vpop.f32.mrf.mxu0 }
  0xfd   : > { %v6550_v60 = vadd.f32 %v6549_v11, %v6548_v9  ;;  %v6622_v62 = vadd.f32 %v6621_v8, %v6620_v6  ;;  %v8316_v11 = vor.u32 %v2341_v57, %v2337_v56  ;;  %v2395_v6 = vshll.u32 %v8305_v58, 16 }
  0xfe   : > { %v6623_v10 = vpop.f32.mrf.mxu1  ;;  %v6551_v13 = vpop.f32.mrf.mxu0 }
 0x100   : > { %v6624_v12 = vpop.f32.mrf.mxu1  ;;  %v6552_v16 = vpop.f32.mrf.mxu0 }
 0x101   : > { %v8257_v14 = vadd.f32 %v6624_v12, %v6623_v10  ;;  %v6553_v2 = vadd.f32 %v6552_v16, %v6551_v13  ;;  %v8313_v10 = vor.u32 %v2285_v55, %v2281_v51  ;;  %v997_v12 = vadd.f32 %v6550_v60, %v8300_v52 }
 0x102   : > { %v6626_v15 = vpop.f32.mrf.mxu1  ;;  %v8259_v18 = vpop.f32.mrf.mxu0  ;;  %v8322_v13 = vadd.f32 %v8255_v5, %v8300_v52  ;;  %v8325_v16 = vadd.f32 %v6622_v62, %v8300_v52 }
 0x104   : > { %v6627_v17 = vpop.f32.mrf.mxu1  ;;  %v8261_v20 = vpop.f32.mrf.mxu0 }
 0x105   : > { %v6628_v8 = vadd.f32 %v6627_v17, %v6626_v15  ;;  %v6556_v30 = vadd.f32 %v8261_v20, %v8259_v18  ;;  %v8332_v15 = vadd.f32 %v8257_v14, %v8300_v52  ;;  %v2393_v18 = vshrl.u32 %v8305_v58, 16 }
 0x106   : > { %v6629_v19 = vpop.f32.mrf.mxu1  ;;  %v8263_v22 = vpop.f32.mrf.mxu0  ;;  %v2397_v20 = vrot.slane %v2395_v6, 1 }
 0x107   : > { %v1005_v51 = vadd.f32 %v6556_v30, %v8300_v52 }
 0x108   : > { %v6630_v21 = vpop.f32.mrf.mxu1  ;;  %v6558_v25 = vpop.f32.mrf.mxu0 }
 0x109   : > { %v8265_v23 = vadd.f32 %v6630_v21, %v6629_v19  ;;  %v6559_v32 = vadd.f32 %v6558_v25, %v8263_v22  ;;  %v8340_v22 = vadd.f32 %v6628_v8, %v8300_v52 }
 0x10a   : > { %v8267_v24 = vpop.f32.mrf.mxu1  ;;  %v8271_v28 = vpop.f32.mrf.mxu0 }
 0x10c   : > { %v8269_v26 = vpop.f32.mrf.mxu1  ;;  %v6561_v34 = vpop.f32.mrf.mxu0 }
 0x10d   : > { %v6634_v5 = vadd.f32 %v8269_v26, %v8267_v24  ;;  %v6562_v46 = vadd.f32 %v6561_v34, %v8271_v28  ;;  %v1010_v24 = vadd.f32 %v6559_v32, %v8300_v52 }
 0x10e   : > { %v6635_v33 = vpop.f32.mrf.mxu1  ;;  %v8275_v36 = vpop.f32.mrf.mxu0 }
 0x110   : > { %v6636_v35 = vpop.f32.mrf.mxu1  ;;  %v8286_v41 = vpop.f32.mrf.mxu0 }
 0x111   : > { %v8282_v39 = vadd.f32 %v6636_v35, %v6635_v33  ;;  %v1002_v35 = vadd.f32 %v6553_v2, %v8300_v52  ;;  %v6565_v28 = vadd.f32 %v8286_v41, %v8275_v36  ;;  %v1851_v41 = vld [vmem:[#allocation2 + $0xc] sm:$0x1]  ;;  %v8370_v2 = vor.u32 %v2397_v20, %v2393_v18 }
 0x112   : > { %v8284_v40 = vpop.f32.mrf.mxu1  ;;  %v8290_v43 = vpop.f32.mrf.mxu0 }
 0x114   : > { %v8288_v42 = vpop.f32.mrf.mxu1  ;;  %v8294_v50 = vpop.f32.mrf.mxu0 }
 0x115   : > { %v6640_v60 = vadd.f32 %v8288_v42, %v8284_v40  ;;  %v6568_v30 = vadd.f32 %v8294_v50, %v8290_v43 }
 0x116   : > { %v6657_v49 = vpop.f32.mrf.mxu1  ;;  %v8302_v54 = vpop.f32.mrf.mxu0 }
 0x118   : > { %v6658_v53 = vpop.f32.mrf.mxu1  ;;  %v8308_v0 = vpop.f32.mrf.mxu0 }
 0x119   : > { %v6659_v61 = vadd.f32 %v6658_v53, %v6657_v49  ;;  %v8344_v49 = vadd.f32 %v8265_v23, %v8300_v52  ;;  %v6571_v43 = vadd.f32 %v8308_v0, %v8302_v54 }
 0x11a   : > { %v6660_v63 = vpop.f32.mrf.mxu1  ;;  %v8311_v7 = vpop.f32.mrf.mxu0 }
 0x11b   : > { %v1155_v1 = vadd.f32 %v6659_v61, %v994_v59  ;;  %v8357_v59 = vadd.f32 %v6634_v5, %v8300_v52  ;;  %v1845_v61 = vld [vmem:[#allocation2 + $0x8] sm:$0xf]  ;;  %v1854_v5 = vld [vmem:[#allocation2 + $0x10] sm:$0xf] }
 0x11c   : > { %v6661_v4 = vpop.f32.mrf.mxu1  ;;  %v6573_v33 = vpop.f32.mrf.mxu0 }
 0x11d   : > { %v1281_v19 = vmax.f32 %v1155_v1, 0.0  ;;  %v6662_v21 = vadd.f32 %v6661_v4, %v6660_v63  ;;  %v8368_v63 = vadd.f32 %v6562_v46, %v8300_v52  ;;  %v8374_v4 = vadd.f32 %v8282_v39, %v8300_v52 }
 0x11e   : > { %v6663_v31 = vpop.f32.mrf.mxu1  ;;  %v6575_v47 = vpop.f32.mrf.mxu0 }
 0x11f   : > { %v6495_v17 = vpack.c.bf16 %v1281_v19, %v1281_v19  ;;  %v1158_v44 = vadd.f32 %v6662_v21, %v997_v12  ;;  %v8377_v21 = vadd.f32 %v6565_v28, %v8300_v52 }
 0x120   : > { %v6664_v45 = vpop.f32.mrf.mxu1  ;;  %v6576_v34 = vpop.f32.mrf.mxu0 }
 0x121   : > { %v1522_v25 = vshrl.u32 %v6495_v17, 16  ;;  %v1282_v14 = vmax.f32 %v1158_v44, 0.0  ;;  %v6665_v48 = vadd.f32 %v6664_v45, %v6663_v31  ;;  %v1525_v55 = vshll.u32 %v6495_v17, 16  ;;  %v1857_v45 = vld [vmem:[#allocation2 + $0x14] sm:$0x1] }
 0x122   : > { %v6666_v26 = vpop.f32.mrf.mxu1  ;;  %v6578_v1 = vpop.f32.mrf.mxu0  ;;  %v8386_v44 = vadd.f32 %v6640_v60, %v8300_v52 }
 0x123   : > { %v1524_v53 = vrot.slane %v1522_v25, 7  ;;  %v6496_v57 = vpack.c.bf16 %v1282_v14, %v1282_v14  ;;  %v1163_v23 = vadd.f32 %v6665_v48, %v1002_v35 }
 0x124   : > { %v6667_v62 = vpop.f32.mrf.mxu1  ;;  %v6579_v31 = vpop.f32.mrf.mxu0 }
 0x125   : > { %v1527_v40 = vor.u32 %v1525_v55, %v1524_v53  ;;  %v1528_v42 = vrot.slane %v1524_v53, 4  ;;  %v1530_v6 = vshrl.u32 %v6496_v57, 16  ;;  %v1283_v8 = vmax.f32 %v1163_v23, 0.0 }
 0x126   : > { %v6668_v12 = vadd.f32 %v6667_v62, %v6666_v26  ;;  %v6669_v19 = vpop.f32.mrf.mxu1  ;;  %v1533_v35 = vshll.u32 %v6496_v57, 16  ;;  %v6581_v50 = vpop.f32.mrf.mxu0  ;;  %v6574_v26 = vadd.f32 %v6573_v33, %v8311_v7  ;;  %v8392_v57 = vadd.f32 %v6568_v30, %v8300_v52 }
 0x127   : > { %v1846_v32 = vsel %vm8352_vm4, %v1527_v40, %v1845_v61  ;;  %v1852_v39 = vsel %vm8363_vm5, %v1528_v42, %v1851_v41  ;;  %v1532_v17 = vrot.slane %v1530_v6, 7  ;;  %v6497_v46 = vpack.c.bf16 %v1283_v8, %v1283_v8 }
 0x128   : > { %1847 = vst [vmem:[#allocation2 + $0x8] sm:$0xf] %v1846_v32  ;;  %1853 = vst [vmem:[#allocation2 + $0xc] sm:$0x1] %v1852_v39  ;;  %v1166_v18 = vadd.f32 %v6668_v12, %v1005_v51  ;;  %v6670_v20 = vpop.f32.mrf.mxu1  ;;  %v6577_v23 = vadd.f32 %v6576_v34, %v6575_v47  ;;  %v6582_v60 = vpop.f32.mrf.mxu0  ;;  %v6580_v61 = vadd.f32 %v6579_v31, %v6578_v1  ;;  %v1860_v47 = vld [vmem:[#allocation2 + $0x18] sm:$0xf] }
 0x129   : > { %v1535_v25 = vor.u32 %v1533_v35, %v1532_v17  ;;  %v1536_v14 = vrot.slane %v1532_v17, 4  ;;  %v6671_v48 = vadd.f32 %v6670_v20, %v6669_v19  ;;  %v1538_v28 = vshrl.u32 %v6497_v46, 16  ;;  %v1863_v34 = vld [vmem:[#allocation2 + $0x1c] sm:$0x1] }
 0x12a   : > { %v1284_v53 = vmax.f32 %v1166_v18, 0.0  ;;  %v6672_v55 = vpop.f32.mrf.mxu1  ;;  %v1541_v7 = vshll.u32 %v6497_v46, 16  ;;  %v8399_v40 = vadd.f32 %v6571_v43, %v8300_v52  ;;  %v6584_v42 = vpop.f32.mrf.mxu0  ;;  %v8402_v12 = vadd.f32 %v6574_v26, %v8300_v52  ;;  %v1869_v26 = vld [vmem:[#allocation2 + $0x24] sm:$0x1] }
 0x12b   : > { %v1855_v51 = vsel %vm8352_vm4, %v1535_v25, %v1854_v5  ;;  %v1858_v54 = vsel %vm8363_vm5, %v1536_v14, %v1857_v45  ;;  %v1171_v0 = vadd.f32 %v6671_v48, %v1010_v24  ;;  %v1540_v41 = vrot.slane %v1538_v28, 7 }
 0x12c   : > { %1856 = vst [vmem:[#allocation2 + $0x10] sm:$0xf] %v1855_v51  ;;  %1859 = vst [vmem:[#allocation2 + $0x14] sm:$0x1] %v1858_v54  ;;  %v6498_v33 = vpack.c.bf16 %v1284_v53, %v1284_v53  ;;  %v6673_v62 = vpop.f32.mrf.mxu1  ;;  %v6583_v19 = vadd.f32 %v6582_v60, %v6581_v50  ;;  %v8405_v32 = vadd.f32 %v6577_v23, %v8300_v52  ;;  %v6585_v39 = vpop.f32.mrf.mxu0 }
 0x12d   : > { %v1285_v6 = vmax.f32 %v1171_v0, 0.0  ;;  %v6674_v8 = vadd.f32 %v6673_v62, %v6672_v55  ;;  %v1543_v24 = vor.u32 %v1541_v7, %v1540_v41  ;;  %v1544_v1 = vrot.slane %v1540_v41, 4 }
 0x12e   : > { %v1546_v30 = vshrl.u32 %v6498_v33, 16  ;;  %v6675_v31 = vpop.f32.mrf.mxu1  ;;  %v1549_v17 = vshll.u32 %v6498_v33, 16  ;;  %v8411_v18 = vadd.f32 %v6580_v61, %v8300_v52  ;;  %v8420_v48 = vpop.f32.mrf.mxu0  ;;  %v8423_v23 = vadd.f32 %v6583_v19, %v8300_v52  ;;  %v1872_v19 = vld [vmem:[#allocation2 + $0x28] sm:$0xf] }
 0x12f   : > { %v6499_v35 = vpack.c.bf16 %v1285_v6, %v1285_v6  ;;  %v1174_v5 = vadd.f32 %v6674_v8, %v8368_v63  ;;  %v8408_v45 = vld [vmem:[#allocation2 + $0x8] sm:$0xf]  ;;  %v2043_v46 = vld [vmem:[#allocation2 + $0xc] sm:$0x1]  ;;  %v1861_v20 = vsel %vm8352_vm4, %v1543_v24, %v1860_v47  ;;  %v1864_v43 = vsel %vm8363_vm5, %v1544_v1, %v1863_v34  ;;  %v1866_v63 = vld [vmem:[#allocation2 + $0x20] sm:$0xf] }
 0x130   : > { %v1548_v50 = vrot.slane %v1546_v30, 7  ;;  %v6676_v25 = vpop.f32.mrf.mxu1  ;;  %v8418_v14 = vcombine.low %v8408_v45, %v2043_v46  ;;  %1862 = vst [vmem:[#allocation2 + $0x18] sm:$0xf] %v1861_v20  ;;  %1865 = vst [vmem:[#allocation2 + $0x1c] sm:$0x1] %v1864_v43  ;;  %v8426_v61 = vadd.f32 %v6585_v39, %v6584_v42  ;;  %v8428_v41 = vpop.f32.mrf.mxu0  ;;  %v6276_v42 = vcombine.low %v8273_v29, %v8408_v45  ;;  %v7527_v20 = vld [vmem:[%s11926_s3 + $0x1b8] sm:$0xff]  }
 0x131   : > { %v1554_v28 = vshrl.u32 %v6499_v35, 16  ;;  %v1286_v53 = vmax.f32 %v1174_v5, 0.0  ;;  %v6677_v55 = vadd.f32 %v6676_v25, %v6675_v31  ;;  %v1557_v33 = vshll.u32 %v6499_v35, 16  ;;  %v1875_v24 = vld [vmem:[#allocation2 + $0x2c] sm:$0x1] }
 0x132   : > { %v1551_v60 = vor.u32 %v1549_v17, %v1548_v50  ;;  %v1552_v51 = vrot.slane %v1548_v50, 4  ;;  %v6678_v54 = vpop.f32.mrf.mxu1  ;;  %v11935_v0 = vrot.slane %v8418_v14, 1  ;;  %v8441_v31 = vpop.f32.mrf.mxu0  ;;  %v2288_v46 = vshrl.u32 %v8418_v14, 16  ;;  %v1890_v29 = vld [vmem:[#allocation2 + $0x40] sm:$0xf] }
 0x133   : > { %v1556_v7 = vrot.slane %v1554_v28, 7  ;;  %v6500_v62 = vpack.c.bf16 %v1286_v53, %v1286_v53  ;;  %v1179_v47 = vadd.f32 %v6677_v55, %v8377_v21  ;;  %v8431_v34 = vld [vmem:[#allocation2 + $0x10] sm:$0xf]  ;;  %v7526_v21 = vld [vmem:[%s11926_s3 + $0x1f8] sm:$0xff]   ;;  %v2045_v5 = vld [vmem:[#allocation2 + $0x14] sm:$0x1] }
 0x134   : > { %v1867_v6 = vsel %vm8352_vm4, %v1551_v60, %v1866_v63  ;;  %v1870_v8 = vsel %vm8363_vm5, %v1552_v51, %v1869_v26  ;;  %v6679_v1 = vpop.f32.mrf.mxu1  ;;  %v6279_v30 = vcombine.low %v8408_v45, %v8431_v34  ;;  %v6278_v63 = vcombine.low %v2504_v3, %v11935_v0  ;;  %7089 = vmatprep.subr.bf16.mxu1 %v7526_v21  ;;  %v1878_v51 = vld [vmem:[#allocation2 + $0x30] sm:$0xf] }
 0x135   : > { %1868 = vst [vmem:[#allocation2 + $0x20] sm:$0xf] %v1867_v6  ;;  %1871 = vst [vmem:[#allocation2 + $0x24] sm:$0x1] %v1870_v8  ;;  %v1559_v39 = vor.u32 %v1557_v33, %v1556_v7  ;;  %v1560_v17 = vrot.slane %v1556_v7, 4  ;;  %v1562_v35 = vshrl.u32 %v6500_v62, 16  ;;  %v6680_v50 = vadd.f32 %v6679_v1, %v6678_v54 }
 0x136   : > { %v1287_v43 = vmax.f32 %v1179_v47, 0.0  ;;  %v6681_v25 = vpop.f32.mrf.mxu1  ;;  %3712 = vmatprep.mubr.bf16.mxu1 %v6279_v30  ;;  %v2290_v26 = vshll.u32 %v8418_v14, 16  ;;  %v1565_v60 = vshll.u32 %v6500_v62, 16  ;;  %v1881_v54 = vld [vmem:[#allocation2 + $0x34] sm:$0x1]  ;;  %v8461_v37 = vcombine.low %v8431_v34, %v2045_v5 }
 0x137   : > { %v1873_v28 = vsel %vm8352_vm4, %v1559_v39, %v1872_v19  ;;  %v1876_v53 = vsel %vm8363_vm5, %v1560_v17, %v1875_v24  ;;  %v1564_v55 = vrot.slane %v1562_v35, 7  ;;  %v1182_v33 = vadd.f32 %v6680_v50, %v8392_v57  ;;  %3713 = vmatmul.mubr.bf16.vlgmr.msra.gmra.mxu1 %v6278_v63  ;;  %v8463_v6 = vld [vmem:[#allocation2 + $0x18] sm:$0xf]  ;;  %v2047_v8 = vld [vmem:[#allocation2 + $0x1c] sm:$0x1]  ;;  %v8465_v19 = vpop.f32.mrf.mxu0  ;;  %v7530_v57 = vld [vmem:[%s11926_s3 + $0x1f0] sm:$0xff]  }
 0x138   : > { %1874 = vst [vmem:[#allocation2 + $0x28] sm:$0xf] %v1873_v28  ;;  %1877 = vst [vmem:[#allocation2 + $0x2c] sm:$0x1] %v1876_v53  ;;  %v6501_v7 = vpack.c.bf16 %v1287_v43, %v1287_v43  ;;  %v6682_v3 = vpop.f32.mrf.mxu1  ;;  %v2292_v47 = vrot.slane %v2290_v26, 1  ;;  %v8468_v30 = vcombine.low %v8463_v6, %v2047_v8  ;;  %7090 = vmatpush3.bf16.msra.mxu1 %v7527_v20  ;;  %v7532_v43 = vld [vmem:[%s11926_s3 + $0x1b0] sm:$0xff]  }
 0x139   : > { %v1567_v24 = vor.u32 %v1565_v60, %v1564_v55  ;;  %v1568_v62 = vrot.slane %v1564_v55, 4  ;;  %v6683_v1 = vadd.f32 %v6682_v3, %v6681_v25  ;;  %v1288_v17 = vmax.f32 %v1182_v33, 0.0  ;;  %v7536_v50 = vld [vmem:[%s11926_s3 + $0x1e8] sm:$0xff]   ;;  %v1884_v63 = vld [vmem:[#allocation2 + $0x38] sm:$0xf]  ;;  %7091 = vmatprep.subr.bf16.mxu1 %v7530_v57 }
 0x13a   : > { %12163 = vst [vmem:[#allocation7_spill] sm:$0xff] %v8468_v30  ;;  %v1570_v21 = vshrl.u32 %v6501_v7, 16  ;;  %v1573_v39 = vshll.u32 %v6501_v7, 16  ;;  %v6684_v35 = vpop.f32.mrf.mxu1  ;;  %v8473_v5 = vor.u32 %v2292_v47, %v2288_v46  ;;  %v11934_v46 = vrot.slane %v8468_v30, 1  ;;  %v1887_v33 = vld [vmem:[#allocation2 + $0x3c] sm:$0x1] }
 0x13b   : > { %v1879_v20 = vsel %vm8352_vm4, %v1567_v24, %v1878_v51  ;;  %v1882_v25 = vsel %vm8363_vm5, %v1568_v62, %v1881_v54  ;;  %v1187_v26 = vadd.f32 %v6683_v1, %v8399_v40  ;;  %v6502_v53 = vpack.c.bf16 %v1288_v17, %v1288_v17  ;;  %v7465_v51 = vld [vmem:[%s11926_s3 + $0x138] sm:$0xff]   ;;  %v8495_v40 = vpop.f32.mrf.mxu0 }
 0x13c   : > { %12164 = vst [vmem:[#allocation8_spill] sm:$0xff] %v8473_v5  ;;  %1880 = vst [vmem:[#allocation2 + $0x30] sm:$0xf] %v1879_v20  ;;  %v1572_v28 = vrot.slane %v1570_v21, 7  ;;  %v6277_v55 = vcombine.low %v8313_v10, %v8473_v5  ;;  %v6685_v60 = vpop.f32.mrf.mxu1  ;;  %v8492_v7 = vld [vmem:[#allocation2 + $0x20] sm:$0xf]  ;;  %7092 = vmatpush3.bf16.msra.mxu1 %v7532_v43 }
 0x13d   : > { %1883 = vst [vmem:[#allocation2 + $0x34] sm:$0x1] %v1882_v25  ;;  %v2297_v54 = vshll.u32 %v8461_v37, 16  ;;  %v1289_v3 = vmax.f32 %v1187_v26, 0.0  ;;  %v6686_v47 = vadd.f32 %v6685_v60, %v6684_v35  ;;  %v6285_v8 = vcombine.low %v8463_v6, %v8492_v7  ;;  %v7474_v10 = vld [vmem:[%s11926_s3 + $0x170] sm:$0xff]   ;;  %7093 = vmatprep.subr.bf16.mxu1 %v7536_v50  ;;  %v7537_v35 = vld [vmem:[%s11926_s3 + $0x1a8] sm:$0xff]  }
 0x13e   : > { %v11936_v24 = vrot.slane %v8461_v37, 1  ;;  %v1575_v62 = vor.u32 %v1573_v39, %v1572_v28  ;;  %v1576_v1 = vrot.slane %v1572_v28, 4  ;;  %v1578_v57 = vshrl.u32 %v6502_v53, 16  ;;  %3551 = vmatprep.mubr.bf16.mxu0 %v6277_v55  ;;  %v6687_v21 = vpop.f32.mrf.mxu1  ;;  %v7539_v60 = vld [vmem:[%s11926_s3 + $0x1e0] sm:$0xff]  }
 0x13f   : > { %v2295_v17 = vshrl.u32 %v8461_v37, 16  ;;  %v6503_v20 = vpack.c.bf16 %v1289_v3, %v1289_v3  ;;  %3552 = vmatmul.mubr.bf16.vlgmr.msra.gmra.mxu0 %v6276_v42  ;;  %v1190_v25 = vadd.f32 %v6686_v47, %v8402_v12  ;;  %3720 = vmatprep.mubr.bf16.mxu1 %v6285_v8  ;;  %v2299_v43 = vrot.slane %v2297_v54, 1  ;;  %v7475_v12 = vld [vmem:[%s11926_s3 + $0x130] sm:$0xff]   ;;  %v8524_v42 = vpop.f32.mrf.mxu0  ;;  %v7485_v3 = vld [vmem:[%s11926_s3 + $0x168] sm:$0xff]  }
 0x140   : > { %v8515_v39 = vcombine.low %v11936_v24, %v11934_v46  ;;  %v1885_v50 = vsel %vm8352_vm4, %v1575_v62, %v1884_v63  ;;  %v1888_v26 = vsel %vm8363_vm5, %v1576_v1, %v1887_v33  ;;  %v1580_v28 = vrot.slane %v1578_v57, 7  ;;  %6978 = vmatpush3.bf16.msra.mxu0 %v7465_v51  ;;  %v6688_v45 = vpop.f32.mrf.mxu1  ;;  %v1893_v63 = vld [vmem:[#allocation2 + $0x44] sm:$0x1]  ;;  %v1896_v62 = vld [vmem:[#allocation2 + $0x58] sm:$0xf]  ;;  %7094 = vmatpush3.bf16.msra.mxu1 %v7537_v35 }
 0x141   : > { %v1581_v55 = vshll.u32 %v6502_v53, 16  ;;  %1886 = vst [vmem:[#allocation2 + $0x38] sm:$0xf] %v1885_v50  ;;  %1889 = vst [vmem:[#allocation2 + $0x3c] sm:$0x1] %v1888_v26  ;;  %v1586_v54 = vshrl.u32 %v6503_v20, 16  ;;  %v6689_v53 = vadd.f32 %v6688_v45, %v6687_v21  ;;  %6979 = vmatprep.subr.bf16.mxu0 %v7474_v10  ;;  %v8534_v50 = vor.u32 %v2299_v43, %v2295_v17 }
 0x142   : > { %12165 = vst [vmem:[#allocation9_spill] sm:$0xff] %v8515_v39  ;;  %v1290_v33 = vmax.f32 %v1190_v25, 0.0  ;;  %3721 = vmatmul.mubr.bf16.gmra.mxu1 %v8515_v39  ;;  %v2302_v51 = vshrl.u32 %v8468_v30, 16  ;;  %v1584_v8 = vrot.slane %v1580_v28, 4  ;;  %v2049_v1 = vld [vmem:[#allocation2 + $0x24] sm:$0x1]  ;;  %v6690_v57 = vpop.f32.mrf.mxu1  ;;  %7095 = vmatprep.subr.bf16.mxu1 %v7539_v60 }
 0x143   : > { %v1583_v47 = vor.u32 %v1581_v55, %v1580_v28  ;;  %12166 = vst [vmem:[#allocation10_spill] sm:$0xff] %v8534_v50  ;;  %v2304_v26 = vshll.u32 %v8468_v30, 16  ;;  %v7540_v21 = vld [vmem:[%s11926_s3 + $0x1a0] sm:$0xff]   ;;  %v1588_v25 = vrot.slane %v1586_v54, 7  ;;  %v1589_v10 = vshll.u32 %v6503_v20, 16  ;;  %v7544_v28 = vld [vmem:[%s11926_s3 + $0x1d8] sm:$0xff]  }
 0x144   : > { %v1899_v45 = vld [vmem:[#allocation2 + $0x5c] sm:$0x1]  ;;  %v6504_v27 = vpack.c.bf16 %v1290_v33, %v1290_v33  ;;  %v1195_v46 = vadd.f32 %v6689_v53, %v8405_v32  ;;  %v1894_v35 = vsel %vm8363_vm5, %v1584_v8, %v1893_v63  ;;  %v6691_v20 = vpop.f32.mrf.mxu1  ;;  %v8550_v54 = vld [vmem:[#allocation2 + $0x28] sm:$0xf]  ;;  %v2051_v33 = vld [vmem:[#allocation2 + $0x2c] sm:$0x1]  ;;  %6980 = vmatpush3.bf16.msra.mxu0 %v7475_v12  ;;  %v8552_v32 = vpop.f32.mrf.mxu0  ;;  %7096 = vmatpush3.bf16.msra.mxu1 %v7540_v21 }
 0x145   : > { %v1891_v17 = vsel %vm8352_vm4, %v1583_v47, %v1890_v29  ;;  %v2306_v43 = vrot.slane %v2304_v26, 1  ;;  %v7486_v60 = vld [vmem:[%s11926_s3 + $0x128] sm:$0xff]   ;;  %1895 = vst [vmem:[#allocation2 + $0x44] sm:$0x1] %v1894_v35  ;;  %v1591_v29 = vor.u32 %v1589_v10, %v1588_v25  ;;  %v1592_v53 = vrot.slane %v1588_v25, 4  ;;  %6981 = vmatprep.subr.bf16.mxu0 %v7485_v3  ;;  %v7495_v8 = vld [vmem:[%s11926_s3 + $0x160] sm:$0xff]   ;;  %7097 = vmatprep.subr.bf16.mxu1 %v7544_v28 }
 0x146   : > { %1892 = vst [vmem:[#allocation2 + $0x40] sm:$0xf] %v1891_v17  ;;  %v1594_v63 = vshrl.u32 %v6504_v27, 16  ;;  %v8558_v47 = vcombine.low %v8492_v7, %v2049_v1  ;;  %v1597_v12 = vshll.u32 %v6504_v27, 16  ;;  %v1291_v26 = vmax.f32 %v1195_v46, 0.0  ;;  %v6693_v24 = vpop.f32.mrf.mxu1  ;;  %v7545_v25 = vld [vmem:[%s11926_s3 + $0x198] sm:$0xff]   ;;  %v8586_v35 = vpop.f32.mrf.mxu0 }
 0x147   : > { %v8563_v55 = vor.u32 %v2306_v43, %v2302_v51  ;;  %v6692_v0 = vadd.f32 %v6691_v20, %v6690_v57  ;;  %v8565_v9 = vld [vmem:[#allocation2 + $0x30] sm:$0xf]  ;;  %v1897_v3 = vsel %vm8352_vm4, %v1591_v29, %v1896_v62  ;;  %v1900_v1 = vsel %vm8363_vm5, %v1592_v53, %v1899_v45  ;;  %v1902_v46 = vld [vmem:[#allocation2 + $0x60] sm:$0xf]  ;;  %v1905_v51 = vld [vmem:[#allocation2 + $0x64] sm:$0x1] }
 0x148   : > { %v1596_v10 = vrot.slane %v1594_v63, 7  ;;  %v8575_v27 = vcombine.low %v8550_v54, %v2051_v33  ;;  %1898 = vst [vmem:[#allocation2 + $0x58] sm:$0xf] %v1897_v3  ;;  %1901 = vst [vmem:[#allocation2 + $0x5c] sm:$0x1] %v1900_v1  ;;  %v6505_v57 = vpack.c.bf16 %v1291_v26, %v1291_v26  ;;  %v8583_v62 = vcombine.low %v8431_v34, %v8463_v6  ;;  %v6694_v17 = vpop.f32.mrf.mxu1  ;;  %v7496_v28 = vld [vmem:[%s11926_s3 + $0x120] sm:$0xff]  }
 0x149   : > { %12167 = vst [vmem:[#allocation11_spill] sm:$0xff] %v8563_v55  ;;  %v8579_v21 = vcombine.low %v8534_v50, %v8563_v55  ;;  %v1198_v45 = vadd.f32 %v6692_v0, %v8411_v18  ;;  %6982 = vmatpush3.bf16.msra.mxu0 %v7486_v60  ;;  %v8593_v33 = vadd.f32 %v8426_v61, %v8300_v52  ;;  %v7506_v18 = vld [vmem:[%s11926_s3 + $0x158] sm:$0xff]   ;;  %v7548_v0 = vld [vmem:[%s11926_s3 + $0x1d0] sm:$0xff]   ;;  %v11938_v29 = vrot.slane %v8558_v47, 1 }
 0x14a   : > { %12168 = vst [vmem:[#allocation12_spill] sm:$0xff] %v8575_v27  ;;  %v1599_v43 = vor.u32 %v1597_v12, %v1596_v10  ;;  %v1600_v20 = vrot.slane %v1596_v10, 4  ;;  %v6291_v34 = vcombine.low %v8550_v54, %v8565_v9  ;;  %6983 = vmatprep.subr.bf16.mxu0 %v7495_v8  ;;  %v1602_v6 = vshrl.u32 %v6505_v57, 16  ;;  %v6696_v53 = vpop.f32.mrf.mxu1  ;;  %7098 = vmatpush3.bf16.msra.mxu1 %v7545_v25  ;;  %v1908_v12 = vld [vmem:[#allocation2 + $0x68] sm:$0xf]  ;;  %v7550_v1 = vld [vmem:[%s11926_s3 + $0x190] sm:$0xff]  }
 0x14b   : > { %3559 = vmatprep.mubr.bf16.mxu0 %v8579_v21  ;;  %v1292_v60 = vmax.f32 %v1198_v45, 0.0  ;;  %v11937_v61 = vrot.slane %v8575_v27, 1  ;;  %v6695_v26 = vadd.f32 %v6694_v17, %v6693_v24  ;;  %v1605_v10 = vshll.u32 %v6505_v57, 16  ;;  %v1911_v45 = vld [vmem:[#allocation2 + $0x6c] sm:$0x1]  ;;  %v8621_v24 = vpop.f32.mrf.mxu0  ;;  %v7507_v17 = vld [vmem:[%s11926_s3 + $0x118] sm:$0xff]   ;;  %7099 = vmatprep.subr.bf16.mxu1 %v7548_v0 }
 0x14c   : > { %v1903_v63 = vsel %vm8352_vm4, %v1599_v43, %v1902_v46  ;;  %v1906_v8 = vsel %vm8363_vm5, %v1600_v20, %v1905_v51  ;;  %3560 = vmatmul.mubr.bf16.gmra.mxu0 %v8583_v62  ;;  %3728 = vmatprep.mubr.bf16.mxu1 %v6291_v34  ;;  %v1604_v25 = vrot.slane %v1602_v6, 7  ;;  %v6697_v43 = vpop.f32.mrf.mxu1  ;;  %v7554_v57 = vld [vmem:[%s11926_s3 + $0x1c8] sm:$0xff]   ;;  %v2053_v20 = vld [vmem:[#allocation2 + $0x34] sm:$0x1]  ;;  %v2309_v6 = vshrl.u32 %v8558_v47, 16 }
 0x14d   : > { %1904 = vst [vmem:[#allocation2 + $0x60] sm:$0xf] %v1903_v63  ;;  %1907 = vst [vmem:[#allocation2 + $0x64] sm:$0x1] %v1906_v8  ;;  %v6506_v46 = vpack.c.bf16 %v1292_v60, %v1292_v60  ;;  %v8619_v51 = vcombine.low %v11938_v29, %v11937_v61  ;;  %6984 = vmatpush3.bf16.msra.mxu0 %v7496_v28  ;;  %v1203_v34 = vadd.f32 %v6695_v26, %v8423_v23  ;;  %v7516_v28 = vld [vmem:[%s11926_s3 + $0x150] sm:$0xff]   ;;  %v8651_v30 = vpop.f32.mrf.mxu0 }
 0x14e   : > { %v2311_v60 = vshll.u32 %v8558_v47, 16  ;;  %v2318_v63 = vshll.u32 %v8575_v27, 16  ;;  %6985 = vmatprep.subr.bf16.mxu0 %v7506_v18  ;;  %v1607_v8 = vor.u32 %v1605_v10, %v1604_v25  ;;  %v1608_v0 = vrot.slane %v1604_v25, 4  ;;  %v8639_v23 = vpop.f32.mrf.mxu1  ;;  %v8641_v26 = vld [vmem:[#allocation2 + $0x38] sm:$0xf]  ;;  %7100 = vmatpush3.bf16.msra.mxu1 %v7550_v1  ;;  %v7555_v25 = vld [vmem:[%s11926_s3 + $0x188] sm:$0xff]  }
 0x14f   : > { %12169 = vst [vmem:[#allocation13_spill] sm:$0xff] %v8619_v51  ;;  %v1610_v61 = vshrl.u32 %v6506_v46, 16  ;;  %3729 = vmatmul.mubr.bf16.gmra.mxu1 %v8619_v51  ;;  %v6589_v29 = vadd.f32 %v8428_v41, %v8420_v48  ;;  %v2055_v3 = vld [vmem:[#allocation2 + $0x3c] sm:$0x1]  ;;  %v1293_v39 = vmax.f32 %v1203_v34, 0.0  ;;  %v2316_v18 = vshrl.u32 %v8575_v27, 16  ;;  %7101 = vmatprep.subr.bf16.mxu1 %v7554_v57 }
 0x150   : > { %v2313_v55 = vrot.slane %v2311_v60, 1  ;;  %v2320_v50 = vrot.slane %v2318_v63, 1  ;;  %v1909_v10 = vsel %vm8352_vm4, %v1607_v8, %v1908_v12  ;;  %v1912_v48 = vsel %vm8363_vm5, %v1608_v0, %v1911_v45  ;;  %v6700_v5 = vpop.f32.mrf.mxu1  ;;  %v7517_v1 = vld [vmem:[%s11926_s3 + $0x110] sm:$0xff]   ;;  %v7529_v45 = vld [vmem:[%s11926_s3 + $0x148] sm:$0xff]   ;;  %v2056_v57 = vld [vmem:[#allocation2 + $0x40] sm:$0xf] }
 0x151   : > { %v1612_v41 = vrot.slane %v1610_v61, 7  ;;  %v1613_v51 = vshll.u32 %v6506_v46, 16  ;;  %6986 = vmatpush3.bf16.msra.mxu0 %v7507_v17  ;;  %1910 = vst [vmem:[#allocation2 + $0x68] sm:$0xf] %v1909_v10  ;;  %1913 = vst [vmem:[#allocation2 + $0x6c] sm:$0x1] %v1912_v48  ;;  %v6507_v63 = vpack.c.bf16 %v1293_v39, %v1293_v39  ;;  %v6698_v61 = vadd.f32 %v6697_v43, %v6696_v53 }
 0x152   : > { %v1914_v34 = vld [vmem:[#allocation2 + $0x70] sm:$0xf]  ;;  %v1917_v60 = vld [vmem:[#allocation2 + $0x74] sm:$0x1]  ;;  %v8656_v12 = vor.u32 %v2313_v55, %v2309_v6  ;;  %v8658_v8 = vor.u32 %v2320_v50, %v2316_v18  ;;  %6987 = vmatprep.subr.bf16.mxu0 %v7516_v28  ;;  %v8664_v0 = vcombine.low %v8565_v9, %v2053_v20  ;;  %v8667_v10 = vcombine.low %v8641_v26, %v2055_v3  ;;  %v8669_v39 = vpop.f32.mrf.mxu1  ;;  %v7557_v50 = vld [vmem:[%s11926_s3 + $0x1c0] sm:$0xff]  }
 0x153   : > { %v1615_v46 = vor.u32 %v1613_v51, %v1612_v41  ;;  %v1616_v17 = vrot.slane %v1612_v41, 4  ;;  %v1618_v55 = vshrl.u32 %v6507_v63, 16  ;;  %v1050_v53 = vadd.f32 %v6589_v29, %v8300_v52  ;;  %7102 = vmatpush3.bf16.msra.mxu1 %v7555_v25  ;;  %v7558_v3 = vld [vmem:[%s11926_s3 + $0x180] sm:$0xff]   ;;  %v2100_v25 = vld [vmem:[#allocation2 + $0xf0] sm:$0xf]  ;;  %v7531_v48 = vld [vmem:[%s11926_s3 + $0x108] sm:$0xff]  }
 0x154   : > { %12170 = vst [vmem:[#allocation14_spill] sm:$0xff] %v8658_v8  ;;  %12171 = vst [vmem:[#allocation15_spill] sm:$0xff] %v8664_v0  ;;  %v8677_v51 = vcombine.low %v8656_v12, %v8658_v8  ;;  %v1206_v43 = vadd.f32 %v6698_v61, %v8593_v33  ;;  %v8689_v29 = vcombine.low %v8492_v7, %v8550_v54  ;;  %v6703_v18 = vpop.f32.mrf.mxu1  ;;  %v8693_v33 = vpop.f32.mrf.mxu0  ;;  %v11946_v61 = vrot.slane %v8664_v0, 1 }
 0x155   : > { %12172 = vst [vmem:[#allocation16_spill] sm:$0xff] %v8667_v10  ;;  %v1915_v20 = vsel %vm8352_vm4, %v1615_v46, %v1914_v34  ;;  %v1918_v6 = vsel %vm8363_vm5, %v1616_v17, %v1917_v60  ;;  %v6592_v28 = vadd.f32 %v8465_v19, %v8441_v31  ;;  %6988 = vmatpush3.bf16.msra.mxu0 %v7517_v1  ;;  %v1620_v41 = vrot.slane %v1618_v55, 7  ;;  %v2101_v60 = vld [vmem:[#allocation2 + $0xf4] sm:$0x1]  ;;  %v7547_v31 = vld [vmem:[%s11926_s3 + $0x140] sm:$0xff]  }
 0x156   : > { %1916 = vst [vmem:[#allocation2 + $0x70] sm:$0xf] %v1915_v20  ;;  %1919 = vst [vmem:[#allocation2 + $0x74] sm:$0x1] %v1918_v6  ;;  %v1621_v34 = vshll.u32 %v6507_v63, 16  ;;  %3567 = vmatprep.mubr.bf16.mxu0 %v8677_v51  ;;  %v1294_v7 = vmax.f32 %v1206_v43, 0.0  ;;  %v6297_v54 = vcombine.low %v8641_v26, %v2056_v57  ;;  %6989 = vmatprep.subr.bf16.mxu0 %v7529_v45  ;;  %v8709_v57 = vpop.f32.mrf.mxu1 }
 0x157   : > { %v1920_v19 = vld [vmem:[#allocation2 + $0x78] sm:$0xf]  ;;  %v1923_v1 = vld [vmem:[#allocation2 + $0x7c] sm:$0x1]  ;;  %3568 = vmatmul.mubr.bf16.gmra.mxu0 %v8689_v29  ;;  %v11945_v46 = vrot.slane %v8667_v10, 1  ;;  %v6701_v63 = vadd.f32 %v6700_v5, %v8639_v23  ;;  %v6595_v17 = vadd.f32 %v8524_v42, %v8495_v40  ;;  %7103 = vmatprep.subr.bf16.mxu1 %v7557_v50  ;;  %v1624_v55 = vrot.slane %v1620_v41, 4 }
 0x158   : > { %v1623_v45 = vor.u32 %v1621_v34, %v1620_v41  ;;  %v6508_v43 = vpack.c.bf16 %v1294_v7, %v1294_v7  ;;  %3736 = vmatprep.mubr.bf16.mxu1 %v6297_v54  ;;  %v2325_v20 = vshll.u32 %v8664_v0, 16  ;;  %7104 = vmatpush3.bf16.msra.mxu1 %v7558_v3  ;;  %v1053_v6 = vadd.f32 %v6592_v28, %v8300_v52  ;;  %v8719_v40 = vld [vmem:[#allocation2 + $0x58] sm:$0xf]  ;;  %v2063_v42 = vld [vmem:[#allocation2 + $0x5c] sm:$0x1]  ;;  %v6706_v50 = vpop.f32.mrf.mxu1  ;;  %v8721_v34 = vpop.f32.mrf.mxu0  ;;  %v7549_v3 = vld [vmem:[%s11926_s3 + $0x100] sm:$0xff]  }
 0x159   : > { %v8717_v5 = vcombine.low %v11946_v61, %v11945_v46  ;;  %v1211_v23 = vadd.f32 %v6701_v63, %v1050_v53  ;;  %v8723_v41 = vcombine.low %v2100_v25, %v2101_v60  ;;  %6990 = vmatpush3.bf16.msra.mxu0 %v7531_v48  ;;  %v1924_v7 = vsel %vm8363_vm5, %v1624_v55, %v1923_v1  ;;  %v7559_v25 = vld [vmem:[%s11926_s3 + $0x238] sm:$0xff]   ;;  %v8742_v46 = vld [vmem:[#allocation2 + $0x60] sm:$0xf] }
 0x15a   : > { %v1921_v28 = vsel %vm8352_vm4, %v1623_v45, %v1920_v19  ;;  %v1626_v53 = vshrl.u32 %v6508_v43, 16  ;;  %v2323_v54 = vshrl.u32 %v8664_v0, 16  ;;  %6991 = vmatprep.subr.bf16.mxu0 %v7547_v31  ;;  %1925 = vst [vmem:[#allocation2 + $0x7c] sm:$0x1] %v1924_v7  ;;  %v1058_v60 = vadd.f32 %v6595_v17, %v8300_v52  ;;  %v8739_v45 = vpop.f32.mrf.mxu1  ;;  %v1929_v7 = vld [vmem:[#allocation2 + $0x84] sm:$0x1] }
 0x15b   : > { %12173 = vst [vmem:[#allocation17_spill] sm:$0xff] %v8717_v5  ;;  %1922 = vst [vmem:[#allocation2 + $0x78] sm:$0xf] %v1921_v28  ;;  %3737 = vmatmul.mubr.bf16.gmra.mxu1 %v8717_v5  ;;  %v1295_v48 = vmax.f32 %v1211_v23, 0.0  ;;  %v2327_v63 = vrot.slane %v2325_v20, 1  ;;  %v2332_v19 = vshll.u32 %v8667_v10, 16  ;;  %v6704_v31 = vadd.f32 %v6703_v18, %v8669_v39 }
 0x15c   : > { %v1628_v1 = vrot.slane %v1626_v53, 7  ;;  %v1629_v55 = vshll.u32 %v6508_v43, 16  ;;  %v8745_v61 = vcombine.low %v8719_v40, %v2063_v42  ;;  %v1926_v28 = vld [vmem:[#allocation2 + $0x80] sm:$0xf]  ;;  %v2330_v23 = vshrl.u32 %v8667_v10, 16  ;;  %v6709_v20 = vpop.f32.mrf.mxu1  ;;  %v8752_v53 = vpop.f32.mrf.mxu0 }
 0x15d   : > { %v6509_v5 = vpack.c.bf16 %v1295_v48, %v1295_v48  ;;  %v2334_v52 = vrot.slane %v2332_v19, 1  ;;  %v8750_v17 = vcombine.low %v8565_v9, %v8641_v26  ;;  %6992 = vmatpush3.bf16.msra.mxu0 %v7549_v3  ;;  %v1214_v43 = vadd.f32 %v6704_v31, %v1053_v6  ;;  %v2065_v19 = vld [vmem:[#allocation2 + $0x64] sm:$0x1] }
 0x15e   : > { %12174 = vst [vmem:[#allocation18_spill] sm:$0xff] %v8745_v61  ;;  %v1631_v39 = vor.u32 %v1629_v55, %v1628_v1  ;;  %v1632_v18 = vrot.slane %v1628_v1, 4  ;;  %v6598_v42 = vadd.f32 %v8586_v35, %v8552_v32  ;;  %7225 = vmatprep.subr.bf16.mxu0 %v7559_v25  ;;  %v8756_v48 = vor.u32 %v2327_v63, %v2323_v54  ;;  %v8762_v26 = vpop.f32.mrf.mxu1  ;;  %v8774_v31 = vpop.f32.mrf.mxu0 }
 0x15f   : > { %12175 = vst [vmem:[#allocation19_spill] sm:$0xff] %v8750_v17  ;;  %v1634_v8 = vshrl.u32 %v6509_v5, 16  ;;  %v8758_v10 = vor.u32 %v2334_v52, %v2330_v23  ;;  %v6306_v9 = vcombine.low %v8719_v40, %v8742_v46  ;;  %v1296_v1 = vmax.f32 %v1214_v43, 0.0  ;;  %v1935_v23 = vld [vmem:[#allocation2 + $0x8c] sm:$0x1] }
 0x160   : > { %12176 = vst [vmem:[#allocation20_spill] sm:$0xff] %v8756_v48  ;;  %v1927_v3 = vsel %vm8352_vm4, %v1631_v39, %v1926_v28  ;;  %v1930_v6 = vsel %vm8363_vm5, %v1632_v18, %v1929_v7  ;;  %v11950_v32 = vrot.slane %v8745_v61, 1  ;;  %v1637_v54 = vshll.u32 %v6509_v5, 16  ;;  %v6712_v55 = vpop.f32.mrf.mxu1  ;;  %v1932_v28 = vld [vmem:[#allocation2 + $0x88] sm:$0xf] }
 0x161   : > { %12177 = vst [vmem:[#allocation21_spill] sm:$0xff] %v8758_v10  ;;  %1928 = vst [vmem:[#allocation2 + $0x80] sm:$0xf] %v1927_v3  ;;  %v1636_v35 = vrot.slane %v1634_v8, 7  ;;  %v8771_v25 = vcombine.low %v8756_v48, %v8758_v10  ;;  %3744 = vmatprep.mubr.bf16.mxu1 %v6306_v9  ;;  %v6707_v63 = vadd.f32 %v6706_v50, %v8709_v57  ;;  %v12179_v8 = vrot.slane %v8280_v38, 1 }
 0x162   : > { %1931 = vst [vmem:[#allocation2 + $0x84] sm:$0x1] %v1930_v6  ;;  %v6510_v7 = vpack.c.bf16 %v1296_v1, %v1296_v1  ;;  %v8777_v52 = vcombine.low %v8742_v46, %v2065_v19  ;;  %v2346_v39 = vshll.u32 %v8745_v61, 16  ;;  %v6601_v50 = vadd.f32 %v8651_v30, %v8621_v24  ;;  %v8787_v9 = vld [vmem:[#allocation2 + $0x68] sm:$0xf]  ;;  %v8789_v19 = vpop.f32.mrf.mxu1 }
 0x163   : > { %v6305_v5 = vcombine.low %v12179_v8, %v11950_v32  ;;  %v1639_v18 = vor.u32 %v1637_v54, %v1636_v35  ;;  %v1640_v43 = vrot.slane %v1636_v35, 4  ;;  %3575 = vmatprep.mubr.bf16.mxu0 %v8771_v25  ;;  %v1219_v57 = vadd.f32 %v6707_v63, %v1058_v60  ;;  %v2067_v3 = vld [vmem:[#allocation2 + $0x6c] sm:$0x1]  ;;  %v8795_v38 = vld [vmem:[%s11925_s2] ss:$0 sm:$0xff]  ;;  %v8806_v32 = vpop.f32.mrf.mxu0 }
 0x164   : > { %12178 = vst [vmem:[#allocation22_spill] sm:$0xff] %v8777_v52  ;;  %3576 = vmatmul.mubr.bf16.gmra.mxu0 %v8750_v17  ;;  %v1642_v6 = vshrl.u32 %v6510_v7, 16  ;;  %v1061_v1 = vadd.f32 %v8795_v38, %v6598_v42  ;;  %v2344_v60 = vshrl.u32 %v8745_v61, 16  ;;  %v2348_v35 = vrot.slane %v2346_v39, 1  ;;  %v8799_v30 = vld [vmem:[#allocation2 + $0x70] sm:$0xf]  ;;  %v8808_v10 = vpop.f32.mrf.mxu1 }
 0x165   : > { %3745 = vmatmul.mubr.bf16.gmra.mxu1 %v6305_v5  ;;  %v1933_v24 = vsel %vm8352_vm4, %v1639_v18, %v1932_v28  ;;  %v1936_v54 = vsel %vm8363_vm5, %v1640_v43, %v1935_v23  ;;  %v1297_v63 = vmax.f32 %v1219_v57, 0.0  ;;  %v6710_v8 = vadd.f32 %v6709_v20, %v8739_v45  ;;  %v1938_v28 = vld [vmem:[#allocation2 + $0x90] sm:$0xf]  ;;  %v1941_v18 = vld [vmem:[#allocation2 + $0x94] sm:$0x1] }
 0x166   : > { %1934 = vst [vmem:[#allocation2 + $0x88] sm:$0xf] %v1933_v24  ;;  %1937 = vst [vmem:[#allocation2 + $0x8c] sm:$0x1] %v1936_v54  ;;  %v1644_v42 = vrot.slane %v1642_v6, 7  ;;  %v1645_v5 = vshll.u32 %v6510_v7, 16  ;;  %v8810_v39 = vor.u32 %v2348_v35, %v2344_v60  ;;  %v8813_v61 = vcombine.low %v8787_v9, %v2067_v3  ;;  %v8818_v20 = vpop.f32.mrf.mxu1 }
 0x167   : > { %v6511_v48 = vpack.c.bf16 %v1297_v63, %v1297_v63  ;;  %v1066_v23 = vadd.f32 %v8795_v38, %v6601_v50  ;;  %v1222_v43 = vadd.f32 %v6710_v8, %v1061_v1  ;;  %v6312_v45 = vcombine.low %v8787_v9, %v8799_v30  ;;  %v2069_v6 = vld [vmem:[#allocation2 + $0x74] sm:$0x1]  ;;  %v7664_v35 = vld [vmem:[#allocation2 + $0x50] sm:$0xf]  ;;  %v6609_v63 = vpop.f32.mrf.mxu0  ;;  %v1944_v1 = vld [vmem:[#allocation2 + $0xa8] sm:$0xf] }
 0x168   : > { %12180 = vst [vmem:[#allocation23_spill] sm:$0xff] %v8810_v39  ;;  %12181 = vst [vmem:[#allocation24_spill] sm:$0xff] %v8813_v61  ;;  %v1647_v57 = vor.u32 %v1645_v5, %v1644_v42  ;;  %v1648_v24 = vrot.slane %v1644_v42, 4  ;;  %v6304_v7 = vcombine.low %v8316_v11, %v8810_v39  ;;  %v6604_v3 = vadd.f32 %v8721_v34, %v8693_v33  ;;  %v8826_v8 = vpop.f32.mrf.mxu1 }
 0x169   : > { %v1650_v60 = vshrl.u32 %v6511_v48, 16  ;;  %v6303_v54 = vcombine.low %v7664_v35, %v8719_v40  ;;  %v1298_v50 = vmax.f32 %v1222_v43, 0.0  ;;  %3752 = vmatprep.mubr.bf16.mxu1 %v6312_v45  ;;  %v11954_v33 = vrot.slane %v8813_v61, 1 }
 0x16a   : > { %v1939_v42 = vsel %vm8352_vm4, %v1647_v57, %v1938_v28  ;;  %v1942_v11 = vsel %vm8363_vm5, %v1648_v24, %v1941_v18  ;;  %3583 = vmatprep.mubr.bf16.mxu0 %v6304_v7  ;;  %v6713_v34 = vadd.f32 %v6712_v55, %v8762_v26  ;;  %v1653_v5 = vshll.u32 %v6511_v48, 16  ;;  %v8837_v35 = vpop.f32.mrf.mxu1  ;;  %v1947_v28 = vld [vmem:[#allocation2 + $0xac] sm:$0x1] }
 0x16b   : > { %1940 = vst [vmem:[#allocation2 + $0x90] sm:$0xf] %v1939_v42  ;;  %1943 = vst [vmem:[#allocation2 + $0x94] sm:$0x1] %v1942_v11  ;;  %v1652_v40 = vrot.slane %v1650_v60, 7  ;;  %v6512_v43 = vpack.c.bf16 %v1298_v50, %v1298_v50  ;;  %v8835_v45 = vcombine.low %v8799_v30, %v2069_v6  ;;  %v1069_v18 = vadd.f32 %v8795_v38, %v6604_v3 }
 0x16c   : > { %3584 = vmatmul.mubr.bf16.gmra.mxu0 %v6303_v54  ;;  %v12183_v57 = vrot.slane %v8777_v52, 1  ;;  %v1227_v55 = vadd.f32 %v6713_v34, %v1066_v23  ;;  %v2353_v48 = vshll.u32 %v8777_v52, 16  ;;  %v6607_v60 = vadd.f32 %v8774_v31, %v8752_v53  ;;  %v8849_v50 = vld [vmem:[#allocation2 + $0x78] sm:$0xf]  ;;  %v6611_v54 = vpop.f32.mrf.mxu0  ;;  %v8851_v42 = vpop.f32.mrf.mxu1  ;;  %v2071_v34 = vld [vmem:[#allocation2 + $0x7c] sm:$0x1] }
 0x16d   : > { %12182 = vst [vmem:[#allocation25_spill] sm:$0xff] %v8835_v45  ;;  %v1655_v24 = vor.u32 %v1653_v5, %v1652_v40  ;;  %v1656_v7 = vrot.slane %v1652_v40, 4  ;;  %v1658_v6 = vshrl.u32 %v6512_v43, 16  ;;  %v2351_v11 = vshrl.u32 %v8777_v52, 16 }
 0x16e   : > { %v8844_v26 = vcombine.low %v12183_v57, %v11954_v33  ;;  %v1299_v3 = vmax.f32 %v1227_v55, 0.0  ;;  %v2355_v57 = vrot.slane %v2353_v48, 1  ;;  %v2360_v23 = vshll.u32 %v8813_v61, 16  ;;  %v8860_v33 = vpop.f32.mrf.mxu1  ;;  %v1953_v55 = vld [vmem:[#allocation2 + $0xb4] sm:$0x1] }
 0x16f   : > { %v1945_v40 = vsel %vm8352_vm4, %v1655_v24, %v1944_v1  ;;  %v1948_v53 = vsel %vm8363_vm5, %v1656_v7, %v1947_v28  ;;  %v1660_v31 = vrot.slane %v1658_v6, 7  ;;  %v1661_v5 = vshll.u32 %v6512_v43, 16  ;;  %v8866_v28 = vld [vmem:[#allocation2 + $0x80] sm:$0xf]  ;;  %v6612_v7 = vpop.f32.mrf.mxu0 }
 0x170   : > { %12184 = vst [vmem:[#allocation26_spill] sm:$0xff] %v8844_v26  ;;  %3753 = vmatmul.mubr.bf16.gmra.mxu1 %v8844_v26  ;;  %1946 = vst [vmem:[#allocation2 + $0xa8] sm:$0xf] %v1945_v40  ;;  %v1950_v26 = vld [vmem:[#allocation2 + $0xb0] sm:$0xf]  ;;  %v6513_v39 = vpack.c.bf16 %v1299_v3, %v1299_v3  ;;  %v2358_v48 = vshrl.u32 %v8813_v61, 16  ;;  %v6716_v17 = vadd.f32 %v8808_v10, %v8789_v19  ;;  %v8871_v6 = vpop.f32.mrf.mxu1 }
 0x171   : > { %1949 = vst [vmem:[#allocation2 + $0xac] sm:$0x1] %v1948_v53  ;;  %v2362_v52 = vrot.slane %v2360_v23, 1  ;;  %v1663_v27 = vor.u32 %v1661_v5, %v1660_v31  ;;  %v1664_v1 = vrot.slane %v1660_v31, 4  ;;  %v1074_v24 = vadd.f32 %v8795_v38, %v6607_v60  ;;  %v1956_v61 = vld [vmem:[#allocation2 + $0xb8] sm:$0xf] }
 0x172   : > { %v8869_v43 = vcombine.low %v8849_v50, %v2071_v34  ;;  %v1666_v40 = vshrl.u32 %v6513_v39, 16  ;;  %v8873_v3 = vor.u32 %v2355_v57, %v2351_v11  ;;  %v1230_v23 = vadd.f32 %v6716_v17, %v1069_v18  ;;  %v8882_v34 = vpop.f32.mrf.mxu1  ;;  %v1959_v18 = vld [vmem:[#allocation2 + $0xbc] sm:$0x1]  ;;  %v6614_v57 = vpop.f32.mrf.mxu0 }
 0x173   : > { %v8875_v53 = vor.u32 %v2362_v52, %v2358_v48  ;;  %v1951_v10 = vsel %vm8352_vm4, %v1663_v27, %v1950_v26  ;;  %v1954_v19 = vsel %vm8363_vm5, %v1664_v1, %v1953_v55  ;;  %v1669_v60 = vshll.u32 %v6513_v39, 16 }
 0x174   : > { %12185 = vst [vmem:[#allocation27_spill] sm:$0xff] %v8873_v3  ;;  %v6610_v31 = vadd.f32 %v6609_v63, %v8806_v32  ;;  %1952 = vst [vmem:[#allocation2 + $0xb0] sm:$0xf] %v1951_v10  ;;  %v1668_v5 = vrot.slane %v1666_v40, 7  ;;  %v1300_v17 = vmax.f32 %v1230_v23, 0.0  ;;  %v6318_v27 = vcombine.low %v8849_v50, %v8866_v28  ;;  %v8898_v55 = vpop.f32.mrf.mxu1 }
 0x175   : > { %12186 = vst [vmem:[#allocation28_spill] sm:$0xff] %v8875_v53  ;;  %1955 = vst [vmem:[#allocation2 + $0xb4] sm:$0x1] %v1954_v19  ;;  %v8886_v52 = vcombine.low %v8873_v3, %v8875_v53  ;;  %v8892_v39 = vcombine.low %v8742_v46, %v8787_v9  ;;  %v2073_v32 = vld [vmem:[#allocation2 + $0x84] sm:$0x1]  ;;  %v11962_v63 = vrot.slane %v8835_v45, 1  ;;  %v6719_v11 = vadd.f32 %v8826_v8, %v8818_v20 }
 0x176   : > { %v11961_v26 = vrot.slane %v8869_v43, 1  ;;  %v1671_v48 = vor.u32 %v1669_v60, %v1668_v5  ;;  %v1672_v1 = vrot.slane %v1668_v5, 4  ;;  %v6514_v40 = vpack.c.bf16 %v1300_v17, %v1300_v17  ;;  %3760 = vmatprep.mubr.bf16.mxu1 %v6318_v27  ;;  %v8910_v10 = vpop.f32.mrf.mxu1  ;;  %v2075_v5 = vld [vmem:[#allocation2 + $0x8c] sm:$0x1]  ;;  %v8930_v53 = vld [vmem:[#allocation2 + $0x90] sm:$0xf] }
 0x177   : > { %12187 = vst [vmem:[#allocation29_spill] sm:$0xff] %v8886_v52  ;;  %12188 = vst [vmem:[#allocation30_spill] sm:$0xff] %v8892_v39  ;;  %3591 = vmatprep.mubr.bf16.mxu0 %v8886_v52  ;;  %v6613_v23 = vadd.f32 %v6612_v7, %v6611_v54  ;;  %v1077_v46 = vadd.f32 %v8795_v38, %v6610_v31  ;;  %v1235_v20 = vadd.f32 %v6719_v11, %v1074_v24  ;;  %v8919_v31 = vld [vmem:[#allocation2 + $0x88] sm:$0xf]  ;;  %v6615_v11 = vpop.f32.mrf.mxu0 }
 0x178   : > { %3592 = vmatmul.mubr.bf16.gmra.mxu0 %v8892_v39  ;;  %v8907_v9 = vcombine.low %v11962_v63, %v11961_v26  ;;  %v2367_v8 = vshll.u32 %v8835_v45, 16  ;;  %v1957_v19 = vsel %vm8352_vm4, %v1671_v48, %v1956_v61  ;;  %v1960_v54 = vsel %vm8363_vm5, %v1672_v1, %v1959_v18  ;;  %v8924_v48 = vpop.f32.mrf.mxu1 }
 0x179   : > { %v1674_v7 = vshrl.u32 %v6514_v40, 16  ;;  %v8917_v60 = vcombine.low %v8866_v28, %v2073_v32  ;;  %1958 = vst [vmem:[#allocation2 + $0xb8] sm:$0xf] %v1957_v19  ;;  %1961 = vst [vmem:[#allocation2 + $0xbc] sm:$0x1] %v1960_v54  ;;  %v1301_v24 = vmax.f32 %v1235_v20, 0.0  ;;  %v1082_v26 = vadd.f32 %v8795_v38, %v6613_v23 }
 0x17a   : > { %12189 = vst [vmem:[#allocation31_spill] sm:$0xff] %v8907_v9  ;;  %3761 = vmatmul.mubr.bf16.gmra.mxu1 %v8907_v9  ;;  %v2365_v17 = vshrl.u32 %v8835_v45, 16  ;;  %v2369_v27 = vrot.slane %v2367_v8, 1  ;;  %v2374_v61 = vshll.u32 %v8869_v43, 16  ;;  %v1677_v1 = vshll.u32 %v6514_v40, 16  ;;  %v8935_v45 = vpop.f32.mrf.mxu1 }
 0x17b   : > { %v1676_v18 = vrot.slane %v1674_v7, 7  ;;  %v1962_v32 = vld [vmem:[#allocation2 + $0xc0] sm:$0xf]  ;;  %v6722_v19 = vadd.f32 %v8851_v42, %v8837_v35  ;;  %v1965_v54 = vld [vmem:[#allocation2 + $0xc4] sm:$0x1]  ;;  %v6515_v63 = vpack.c.bf16 %v1301_v24, %v1301_v24  ;;  %v2372_v20 = vshrl.u32 %v8869_v43, 16 }
 0x17c   : > { %v2376_v9 = vrot.slane %v2374_v61, 1  ;;  %v8933_v8 = vcombine.low %v8919_v31, %v2075_v5  ;;  %v6616_v39 = vadd.f32 %v6615_v11, %v6614_v57  ;;  %v8937_v0 = vor.u32 %v2369_v27, %v2365_v17  ;;  %v8941_v42 = vpop.f32.mrf.mxu1  ;;  %v1968_v27 = vld [vmem:[#allocation2 + $0xc8] sm:$0xf]  ;;  %v1971_v11 = vld [vmem:[#allocation2 + $0xcc] sm:$0x1] }
 0x17d   : > { %v1679_v7 = vor.u32 %v1677_v1, %v1676_v18  ;;  %v1680_v40 = vrot.slane %v1676_v18, 4  ;;  %v1238_v3 = vadd.f32 %v6722_v19, %v1077_v46  ;;  %v1682_v23 = vshrl.u32 %v6515_v63, 16 }
 0x17e   : > { %12190 = vst [vmem:[#allocation32_spill] sm:$0xff] %v8933_v8  ;;  %v1685_v52 = vshll.u32 %v6515_v63, 16  ;;  %v8939_v35 = vor.u32 %v2376_v9, %v2372_v20  ;;  %v6324_v18 = vcombine.low %v8919_v31, %v8930_v53  ;;  %v11971_v46 = vrot.slane %v8917_v60, 1  ;;  %v8955_v17 = vpop.f32.mrf.mxu1 }
 0x17f   : > { %v1963_v24 = vsel %vm8352_vm4, %v1679_v7, %v1962_v32  ;;  %v1966_v5 = vsel %vm8363_vm5, %v1680_v40, %v1965_v54  ;;  %v1302_v61 = vmax.f32 %v1238_v3, 0.0  ;;  %v1684_v57 = vrot.slane %v1682_v23, 7 }
 0x180   : > { %12191 = vst [vmem:[#allocation33_spill] sm:$0xff] %v8939_v35  ;;  %1964 = vst [vmem:[#allocation2 + $0xc0] sm:$0xf] %v1963_v24  ;;  %v8951_v63 = vcombine.low %v8937_v0, %v8939_v35  ;;  %v11970_v9 = vrot.slane %v8933_v8, 1  ;;  %v8959_v3 = vcombine.low %v8799_v30, %v8849_v50  ;;  %3768 = vmatprep.mubr.bf16.mxu1 %v6324_v18  ;;  %v2381_v19 = vshll.u32 %v8917_v60, 16  ;;  %v8974_v23 = vpop.f32.mrf.mxu1 }
 0x181   : > { %1967 = vst [vmem:[#allocation2 + $0xc4] sm:$0x1] %v1966_v5  ;;  %v6516_v1 = vpack.c.bf16 %v1302_v61, %v1302_v61  ;;  %v6725_v32 = vadd.f32 %v8871_v6, %v8860_v33  ;;  %v1687_v54 = vor.u32 %v1685_v52, %v1684_v57  ;;  %v1688_v20 = vrot.slane %v1684_v57, 4  ;;  %v8972_v30 = vld [vmem:[#allocation2 + $0xa8] sm:$0xf] }
 0x182   : > { %3599 = vmatprep.mubr.bf16.mxu0 %v8951_v63  ;;  %v1085_v7 = vadd.f32 %v8795_v38, %v6616_v39  ;;  %v8970_v40 = vcombine.low %v11971_v46, %v11970_v9  ;;  %v2083_v50 = vld [vmem:[#allocation2 + $0xac] sm:$0x1]  ;;  %v2379_v52 = vshrl.u32 %v8917_v60, 16  ;;  %v2386_v24 = vshrl.u32 %v8933_v8, 16  ;;  %v8979_v38 = vld [vmem:[#allocation2 + $0xb0] sm:$0xf]  ;;  %v8987_v57 = vpop.f32.mrf.mxu1 }
 0x183   : > { %3600 = vmatmul.mubr.bf16.gmra.mxu0 %v8959_v3  ;;  %v1690_v33 = vshrl.u32 %v6516_v1, 16  ;;  %v1243_v6 = vadd.f32 %v6725_v32, %v1082_v26  ;;  %v1969_v39 = vsel %vm8352_vm4, %v1687_v54, %v1968_v27  ;;  %v1972_v5 = vsel %vm8363_vm5, %v1688_v20, %v1971_v11  ;;  %v1974_v9 = vld [vmem:[#allocation2 + $0xd0] sm:$0xf]  ;;  %v1977_v27 = vld [vmem:[#allocation2 + $0xd4] sm:$0x1] }
 0x184   : > { %12192 = vst [vmem:[#allocation34_spill] sm:$0xff] %v8970_v40  ;;  %3769 = vmatmul.mubr.bf16.gmra.mxu1 %v8970_v40  ;;  %v2383_v61 = vrot.slane %v2381_v19, 1  ;;  %v2388_v18 = vshll.u32 %v8933_v8, 16  ;;  %1970 = vst [vmem:[#allocation2 + $0xc8] sm:$0xf] %v1969_v39  ;;  %v1693_v32 = vshll.u32 %v6516_v1, 16  ;;  %v6728_v35 = vadd.f32 %v8898_v55, %v8882_v34  ;;  %v9000_v40 = vpop.f32.mrf.mxu1 }
 0x185   : > { %1973 = vst [vmem:[#allocation2 + $0xcc] sm:$0x1] %v1972_v5  ;;  %v1692_v26 = vrot.slane %v1690_v33, 7  ;;  %v1303_v46 = vmax.f32 %v1243_v6, 0.0  ;;  %v8993_v11 = vcombine.low %v8866_v28, %v8919_v31  ;;  %v2085_v19 = vld [vmem:[#allocation2 + $0xb4] sm:$0x1]  ;;  %v8996_v20 = vcombine.low %v8972_v30, %v2083_v50 }
 0x186   : > { %v2390_v54 = vrot.slane %v2388_v18, 1  ;;  %v6333_v39 = vcombine.low %v8972_v30, %v8979_v38  ;;  %v1246_v6 = vadd.f32 %v6728_v35, %v1085_v7  ;;  %v9002_v34 = vor.u32 %v2383_v61, %v2379_v52  ;;  %v9016_v7 = vld [vmem:[#allocation2 + $0xb8] sm:$0xf]  ;;  %v2087_v52 = vld [vmem:[#allocation2 + $0xbc] sm:$0x1] }
 0x187   : > { %12193 = vst [vmem:[#allocation35_spill] sm:$0xff] %v8993_v11  ;;  %v1695_v33 = vor.u32 %v1693_v32, %v1692_v26  ;;  %v1696_v1 = vrot.slane %v1692_v26, 4  ;;  %v6517_v5 = vpack.c.bf16 %v1303_v46, %v1303_v46  ;;  %v11974_v28 = vrot.slane %v8996_v20, 1 }
 0x188   : > { %12194 = vst [vmem:[#allocation36_spill] sm:$0xff] %v9002_v34  ;;  %v9004_v55 = vor.u32 %v2390_v54, %v2386_v24  ;;  %3776 = vmatprep.mubr.bf16.mxu1 %v6333_v39  ;;  %v6731_v31 = vadd.f32 %v8924_v48, %v8910_v10  ;;  %v9014_v35 = vcombine.low %v8979_v38, %v2085_v19  ;;  %v1304_v10 = vmax.f32 %v1246_v6, 0.0  ;;  %v9030_v19 = vld [vmem:[#allocation2 + $0xc0] sm:$0xf]  ;;  %v9032_v39 = vpop.f32.mrf.mxu1 }
 0x189   : > { %v1975_v50 = vsel %vm8352_vm4, %v1695_v33, %v1974_v9  ;;  %v1978_v18 = vsel %vm8363_vm5, %v1696_v1, %v1977_v27  ;;  %v1698_v46 = vshrl.u32 %v6517_v5, 16  ;;  %v12196_v48 = vrot.slane %v8305_v58, 1  ;;  %v1980_v33 = vld [vmem:[#allocation2 + $0xd8] sm:$0xf]  ;;  %v1983_v1 = vld [vmem:[#allocation2 + $0xdc] sm:$0x1] }
 0x18a   : > { %12195 = vst [vmem:[#allocation37_spill] sm:$0xff] %v9004_v55  ;;  %1976 = vst [vmem:[#allocation2 + $0xd0] sm:$0xf] %v1975_v50  ;;  %v9020_v24 = vcombine.low %v9002_v34, %v9004_v55  ;;  %v1251_v61 = vadd.f32 %v6731_v31, %v8322_v13  ;;  %v1701_v32 = vshll.u32 %v6517_v5, 16  ;;  %v2402_v27 = vshll.u32 %v8996_v20, 16 }
 0x18b   : > { %1979 = vst [vmem:[#allocation2 + $0xd4] sm:$0x1] %v1978_v18  ;;  %v6332_v9 = vcombine.low %v12196_v48, %v11974_v28  ;;  %v1700_v26 = vrot.slane %v1698_v46, 7  ;;  %v6734_v54 = vadd.f32 %v8941_v42, %v8935_v45  ;;  %v6518_v6 = vpack.c.bf16 %v1304_v10, %v1304_v10  ;;  %v7665_v48 = vld [vmem:[#allocation2 + $0xa0] sm:$0xf] }
 0x18c   : > { %3607 = vmatprep.mubr.bf16.mxu0 %v9020_v24  ;;  %v1305_v58 = vmax.f32 %v1251_v61, 0.0  ;;  %v2400_v13 = vshrl.u32 %v8996_v20, 16  ;;  %v9037_v5 = vcombine.low %v9016_v7, %v2087_v52  ;;  %v2404_v45 = vrot.slane %v2402_v27, 1  ;;  %v1989_v55 = vld [vmem:[#allocation2 + $0xe4] sm:$0x1] }
 0x18d   : > { %3777 = vmatmul.mubr.bf16.gmra.mxu1 %v6332_v9  ;;  %v1703_v31 = vor.u32 %v1701_v32, %v1700_v26  ;;  %v1704_v50 = vrot.slane %v1700_v26, 4  ;;  %3608 = vmatmul.mubr.bf16.gmra.mxu0 %v8993_v11  ;;  %v1254_v42 = vadd.f32 %v6734_v54, %v8325_v16  ;;  %v1706_v18 = vshrl.u32 %v6518_v6, 16  ;;  %v9050_v32 = vpop.f32.mrf.mxu1 }
 0x18e   : > { %v6519_v46 = vpack.c.bf16 %v1305_v58, %v1305_v58  ;;  %v6330_v28 = vcombine.low %v7665_v48, %v8972_v30  ;;  %v6339_v10 = vcombine.low %v9016_v7, %v9030_v19  ;;  %v9048_v61 = vor.u32 %v2404_v45, %v2400_v13  ;;  %v2089_v30 = vld [vmem:[#allocation2 + $0xc4] sm:$0x1]  ;;  %v1986_v48 = vld [vmem:[#allocation2 + $0xe0] sm:$0xf] }
 0x18f   : > { %v1981_v9 = vsel %vm8352_vm4, %v1703_v31, %v1980_v33  ;;  %v1984_v52 = vsel %vm8363_vm5, %v1704_v50, %v1983_v1  ;;  %v1306_v26 = vmax.f32 %v1254_v42, 0.0  ;;  %v1708_v16 = vrot.slane %v1706_v18, 7  ;;  %v1992_v18 = vld [vmem:[#allocation2 + $0xf8] sm:$0xf] }
 0x190   : > { %1982 = vst [vmem:[#allocation2 + $0xd8] sm:$0xf] %v1981_v9  ;;  %1985 = vst [vmem:[#allocation2 + $0xdc] sm:$0x1] %v1984_v52  ;;  %v1709_v27 = vshll.u32 %v6518_v6, 16  ;;  %v1714_v54 = vshrl.u32 %v6519_v46, 16  ;;  %3784 = vmatprep.mubr.bf16.mxu1 %v6339_v10  ;;  %v6331_v33 = vcombine.low %v8370_v2, %v9048_v61  ;;  %v6737_v31 = vadd.f32 %v8974_v23, %v8955_v17  ;;  %v9068_v17 = vpop.f32.mrf.mxu1 }
 0x191   : > { %v11979_v58 = vrot.slane %v9014_v35, 1  ;;  %v6520_v1 = vpack.c.bf16 %v1306_v26, %v1306_v26  ;;  %v11976_v13 = vrot.slane %v9037_v5, 1  ;;  %v1712_v45 = vrot.slane %v1708_v16, 4  ;;  %v1995_v9 = vld [vmem:[#allocation2 + $0xfc] sm:$0x1] }
 0x192   : > { %v1711_v50 = vor.u32 %v1709_v27, %v1708_v16  ;;  %v1716_v42 = vrot.slane %v1714_v54, 7  ;;  %v1717_v6 = vshll.u32 %v6519_v46, 16  ;;  %3615 = vmatprep.mubr.bf16.mxu0 %v6331_v33  ;;  %v9059_v52 = vcombine.low %v9030_v19, %v2089_v30  ;;  %v9074_v54 = vld [vmem:[#allocation2 + $0xc8] sm:$0xf] }
 0x193   : > { %v1722_v10 = vshrl.u32 %v6520_v1, 16  ;;  %v9065_v2 = vcombine.low %v11979_v58, %v11976_v13  ;;  %v1259_v26 = vadd.f32 %v6737_v31, %v8332_v15  ;;  %v1990_v46 = vsel %vm8363_vm5, %v1712_v45, %v1989_v55  ;;  %v2091_v13 = vld [vmem:[#allocation2 + $0xcc] sm:$0x1]  ;;  %v2001_v45 = vld [vmem:[#allocation2 + $0x104] sm:$0x1] }
 0x194   : > { %v1987_v23 = vsel %vm8352_vm4, %v1711_v50, %v1986_v48  ;;  %v1719_v16 = vor.u32 %v1717_v6, %v1716_v42  ;;  %v1720_v27 = vrot.slane %v1716_v42, 4  ;;  %1991 = vst [vmem:[#allocation2 + $0xe4] sm:$0x1] %v1990_v46  ;;  %v1725_v33 = vshll.u32 %v6520_v1, 16  ;;  %v1998_v50 = vld [vmem:[#allocation2 + $0x100] sm:$0xf]  ;;  %v6745_v46 = vpop.f32.mrf.mxu1 }
 0x195   : > { %12197 = vst [vmem:[#allocation38_spill] sm:$0xff] %v9065_v2  ;;  %1988 = vst [vmem:[#allocation2 + $0xe0] sm:$0xf] %v1987_v23  ;;  %3616 = vmatmul.mubr.bf16.gmra.mxu0 %v6330_v28  ;;  %v1724_v30 = vrot.slane %v1722_v10, 7  ;;  %3785 = vmatmul.mubr.bf16.gmra.mxu1 %v9065_v2  ;;  %v1307_v15 = vmax.f32 %v1259_v26, 0.0  ;;  %v2409_v31 = vshll.u32 %v9014_v35, 16 }
 0x196   : > { %v1993_v48 = vsel %vm8352_vm4, %v1719_v16, %v1992_v18  ;;  %v1996_v55 = vsel %vm8363_vm5, %v1720_v27, %v1995_v9  ;;  %v2407_v42 = vshrl.u32 %v9014_v35, 16  ;;  %v2416_v28 = vshll.u32 %v9037_v5, 16  ;;  %v9084_v23 = vld [vmem:[#allocation2 + $0xd0] sm:$0xf] }
 0x197   : > { %1994 = vst [vmem:[#allocation2 + $0xf8] sm:$0xf] %v1993_v48  ;;  %1997 = vst [vmem:[#allocation2 + $0xfc] sm:$0x1] %v1996_v55  ;;  %v1727_v1 = vor.u32 %v1725_v33, %v1724_v30  ;;  %v1728_v6 = vrot.slane %v1724_v30, 4  ;;  %v6521_v10 = vpack.c.bf16 %v1307_v15, %v1307_v15  ;;  %v2411_v26 = vrot.slane %v2409_v31, 1 }
 0x198   : > { %v2414_v18 = vshrl.u32 %v9037_v5, 16  ;;  %v2418_v16 = vrot.slane %v2416_v28, 1  ;;  %v6740_v9 = vadd.f32 %v9000_v40, %v8987_v57  ;;  %v9090_v27 = vcombine.low %v9074_v54, %v2091_v13  ;;  %v2093_v13 = vld [vmem:[#allocation2 + $0xd4] sm:$0x1] }
 0x199   : > { %v1999_v48 = vsel %vm8352_vm4, %v1727_v1, %v1998_v50  ;;  %v2002_v30 = vsel %vm8363_vm5, %v1728_v6, %v2001_v45  ;;  %v1730_v33 = vshrl.u32 %v6521_v10, 16  ;;  %v1733_v15 = vshll.u32 %v6521_v10, 16  ;;  %v6747_v6 = vpop.f32.mrf.mxu1  ;;  %v2004_v10 = vld [vmem:[#allocation2 + $0x108] sm:$0xf] }
 0x19a   : > { %2000 = vst [vmem:[#allocation2 + $0x100] sm:$0xf] %v1999_v48  ;;  %2003 = vst [vmem:[#allocation2 + $0x104] sm:$0x1] %v2002_v30  ;;  %v9096_v31 = vor.u32 %v2411_v26, %v2407_v42  ;;  %v9098_v55 = vor.u32 %v2418_v16, %v2414_v18  ;;  %v1262_v28 = vadd.f32 %v6740_v9, %v8340_v22  ;;  %v11978_v50 = vrot.slane %v9059_v52, 1 }
 0x19b   : > { %v6345_v40 = vcombine.low %v9074_v54, %v9084_v23  ;;  %v1732_v57 = vrot.slane %v1730_v33, 7  ;;  %v11977_v1 = vrot.slane %v9090_v27, 1  ;;  %v6743_v45 = vadd.f32 %v9050_v32, %v9032_v39  ;;  %v2007_v42 = vld [vmem:[#allocation2 + $0x10c] sm:$0x1] }
 0x19c   : > { %v9109_v26 = vcombine.low %v9096_v31, %v9098_v55  ;;  %v9113_v22 = vcombine.low %v8979_v38, %v9016_v7  ;;  %v1308_v18 = vmax.f32 %v1262_v28, 0.0  ;;  %v2423_v16 = vshll.u32 %v9059_v52, 16  ;;  %v9128_v28 = vld [vmem:[#allocation2 + $0xd8] sm:$0xf] }
 0x19d   : > { %3792 = vmatprep.mubr.bf16.mxu1 %v6345_v40  ;;  %v1735_v9 = vor.u32 %v1733_v15, %v1732_v57  ;;  %v1736_v48 = vrot.slane %v1732_v57, 4  ;;  %v9120_v39 = vcombine.low %v11978_v50, %v11977_v1  ;;  %v1267_v32 = vadd.f32 %v6743_v45, %v8344_v49  ;;  %v2095_v15 = vld [vmem:[#allocation2 + $0xdc] sm:$0x1]  ;;  %v9137_v45 = vld [vmem:[#allocation2 + $0xe0] sm:$0xf] }
 0x19e   : > { %12198 = vst [vmem:[#allocation39_spill] sm:$0xff] %v9109_v26  ;;  %12199 = vst [vmem:[#allocation40_spill] sm:$0xff] %v9113_v22  ;;  %3623 = vmatprep.mubr.bf16.mxu0 %v9109_v26  ;;  %v6522_v30 = vpack.c.bf16 %v1308_v18, %v1308_v18  ;;  %v9125_v38 = vcombine.low %v9084_v23, %v2093_v13  ;;  %v2425_v7 = vrot.slane %v2423_v16, 1  ;;  %v2430_v33 = vshll.u32 %v9090_v27, 16  ;;  %v6748_v18 = vpop.f32.mrf.mxu1 }
 0x19f   : > { %12200 = vst [vmem:[#allocation41_spill] sm:$0xff] %v9120_v39  ;;  %v2005_v40 = vsel %vm8352_vm4, %v1735_v9, %v2004_v10  ;;  %v2008_v57 = vsel %vm8363_vm5, %v1736_v48, %v2007_v42  ;;  %3624 = vmatmul.mubr.bf16.gmra.mxu0 %v9113_v22  ;;  %3793 = vmatmul.mubr.bf16.gmra.mxu1 %v9120_v39  ;;  %v1309_v49 = vmax.f32 %v1267_v32, 0.0  ;;  %v2421_v13 = vshrl.u32 %v9059_v52, 16  ;;  %v2010_v39 = vld [vmem:[#allocation2 + $0x110] sm:$0xf] }
 0x1a0   : > { %12201 = vst [vmem:[#allocation42_spill] sm:$0xff] %v9137_v45  ;;  %2006 = vst [vmem:[#allocation2 + $0x108] sm:$0xf] %v2005_v40  ;;  %v1738_v16 = vshrl.u32 %v6522_v30, 16  ;;  %v2428_v1 = vshrl.u32 %v9090_v27, 16  ;;  %v2432_v50 = vrot.slane %v2430_v33, 1  ;;  %v9142_v10 = vcombine.low %v9030_v19, %v9074_v54 }
 0x1a1   : > { %2009 = vst [vmem:[#allocation2 + $0x10c] sm:$0x1] %v2008_v57  ;;  %v1741_v42 = vshll.u32 %v6522_v30, 16  ;;  %v6523_v9 = vpack.c.bf16 %v1309_v49, %v1309_v49  ;;  %v6746_v48 = vadd.f32 %v6745_v46, %v9068_v17  ;;  %v9146_v32 = vcombine.low %v9128_v28, %v2095_v15  ;;  %v2013_v57 = vld [vmem:[#allocation2 + $0x114] sm:$0x1]  ;;  %v6750_v46 = vpop.f32.mrf.mxu1 }
 0x1a2   : > { %12202 = vst [vmem:[#allocation43_spill] sm:$0xff] %v9142_v10  ;;  %v1740_v58 = vrot.slane %v1738_v16, 7  ;;  %v9148_v2 = vor.u32 %v2425_v7, %v2421_v13  ;;  %v9150_v40 = vor.u32 %v2432_v50, %v2428_v1  ;;  %v6351_v33 = vcombine.low %v9128_v28, %v9137_v45 }
 0x1a3   : > { %v1746_v22 = vshrl.u32 %v6523_v9, 16  ;;  %v1270_v19 = vadd.f32 %v6746_v48, %v8357_v59  ;;  %v11984_v54 = vrot.slane %v9125_v38, 1  ;;  %v11983_v17 = vrot.slane %v9146_v32, 1  ;;  %v2019_v48 = vld [vmem:[#allocation2 + $0x11c] sm:$0x1] }
 0x1a4   : > { %v1743_v30 = vor.u32 %v1741_v42, %v1740_v58  ;;  %v1744_v15 = vrot.slane %v1740_v58, 4  ;;  %v9159_v7 = vcombine.low %v9148_v2, %v9150_v40  ;;  %3800 = vmatprep.mubr.bf16.mxu1 %v6351_v33  ;;  %v6749_v50 = vadd.f32 %v6748_v18, %v6747_v6  ;;  %v2016_v42 = vld [vmem:[#allocation2 + $0x118] sm:$0xf] }
 0x1a5   : > { %v1748_v1 = vrot.slane %v1746_v22, 7  ;;  %v1749_v49 = vshll.u32 %v6523_v9, 16  ;;  %v1310_v13 = vmax.f32 %v1270_v19, 0.0  ;;  %v9165_v59 = vcombine.low %v11984_v54, %v11983_v17  ;;  %v9177_v19 = vld [vmem:[#allocation2 + $0xf8] sm:$0xf] }
 0x1a6   : > { %12203 = vst [vmem:[#allocation44_spill] sm:$0xff] %v9159_v7  ;;  %v2011_v16 = vsel %vm8352_vm4, %v1743_v30, %v2010_v39  ;;  %v2014_v58 = vsel %vm8363_vm5, %v1744_v15, %v2013_v57  ;;  %3631 = vmatprep.mubr.bf16.mxu0 %v9159_v7  ;;  %v1275_v6 = vadd.f32 %v6749_v50, %v8374_v4  ;;  %v2437_v22 = vshll.u32 %v9125_v38, 16  ;;  %v6751_v57 = vpop.f32.mrf.mxu1  ;;  %v2103_v30 = vld [vmem:[#allocation2 + $0xfc] sm:$0x1]  ;;  %v2022_v7 = vld [vmem:[#allocation2 + $0x120] sm:$0xf] }
 0x1a7   : > { %12204 = vst [vmem:[#allocation45_spill] sm:$0xff] %v9165_v59  ;;  %2012 = vst [vmem:[#allocation2 + $0x110] sm:$0xf] %v2011_v16  ;;  %v1751_v18 = vor.u32 %v1749_v49, %v1748_v1  ;;  %v1752_v9 = vrot.slane %v1748_v1, 4  ;;  %3632 = vmatmul.mubr.bf16.gmra.mxu0 %v9142_v10  ;;  %v6524_v33 = vpack.c.bf16 %v1310_v13, %v1310_v13  ;;  %3801 = vmatmul.mubr.bf16.gmra.mxu1 %v9165_v59  ;;  %v9181_v16 = vld [vmem:[#allocation2 + $0x100] sm:$0xf] }
 0x1a8   : > { %2015 = vst [vmem:[#allocation2 + $0x114] sm:$0x1] %v2014_v58  ;;  %v2435_v39 = vshrl.u32 %v9125_v38, 16  ;;  %v1311_v15 = vmax.f32 %v1275_v6, 0.0  ;;  %v2439_v17 = vrot.slane %v2437_v22, 1  ;;  %v2442_v4 = vshrl.u32 %v9146_v32, 16 }
 0x1a9   : > { %v2444_v50 = vshll.u32 %v9146_v32, 16  ;;  %v2017_v1 = vsel %vm8352_vm4, %v1751_v18, %v2016_v42  ;;  %v2020_v49 = vsel %vm8363_vm5, %v1752_v9, %v2019_v48  ;;  %v1754_v13 = vshrl.u32 %v6524_v33, 16  ;;  %v2025_v18 = vld [vmem:[#allocation2 + $0x124] sm:$0x1] }
 0x1aa   : > { %v9189_v58 = vcombine.low %v9084_v23, %v9128_v28  ;;  %2018 = vst [vmem:[#allocation2 + $0x118] sm:$0xf] %v2017_v1  ;;  %2021 = vst [vmem:[#allocation2 + $0x11c] sm:$0x1] %v2020_v49  ;;  %v1757_v6 = vshll.u32 %v6524_v33, 16  ;;  %v6525_v22 = vpack.c.bf16 %v1311_v15, %v1311_v15  ;;  %v6752_v59 = vadd.f32 %v6751_v57, %v6750_v46 }
 0x1ab   : > { %v2446_v54 = vrot.slane %v2444_v50, 1  ;;  %v1756_v10 = vrot.slane %v1754_v13, 7  ;;  %v9191_v26 = vor.u32 %v2439_v17, %v2435_v39  ;;  %v9194_v42 = vcombine.low %v9177_v19, %v2103_v30  ;;  %v2105_v15 = vld [vmem:[#allocation2 + $0x104] sm:$0x1]  ;;  %v9203_v57 = vld [vmem:[#allocation2 + $0x108] sm:$0xf] }
 0x1ac   : > { %12205 = vst [vmem:[#allocation46_spill] sm:$0xff] %v9189_v58  ;;  %v6360_v48 = vcombine.low %v9177_v19, %v9181_v16  ;;  %v1762_v9 = vshrl.u32 %v6525_v22, 16  ;;  %v1765_v23 = vshll.u32 %v6525_v22, 16  ;;  %v1278_v33 = vadd.f32 %v6752_v59, %v8386_v44  ;;  %v2028_v59 = vld [vmem:[#allocation2 + $0x128] sm:$0xf] }
 0x1ad   : > { %12206 = vst [vmem:[#allocation47_spill] sm:$0xff] %v9191_v26  ;;  %v9198_v28 = vor.u32 %v2446_v54, %v2442_v4  ;;  %v1759_v50 = vor.u32 %v1757_v6, %v1756_v10  ;;  %v1760_v46 = vrot.slane %v1756_v10, 4  ;;  %v2528_v17 = vrot.slane %v8723_v41, 1  ;;  %v2107_v4 = vld [vmem:[#allocation2 + $0x10c] sm:$0x1] }
 0x1ae   : > { %3808 = vmatprep.mubr.bf16.mxu1 %v6360_v48  ;;  %v11990_v39 = vrot.slane %v9194_v42, 1  ;;  %v1764_v30 = vrot.slane %v1762_v9, 7  ;;  %v1312_v49 = vmax.f32 %v1278_v33, 0.0  ;;  %v2449_v54 = vshrl.u32 %v8723_v41, 16  ;;  %v2031_v13 = vld [vmem:[#allocation2 + $0x12c] sm:$0x1] }
 0x1af   : > { %v9207_v1 = vcombine.low %v9191_v26, %v9198_v28  ;;  %v2023_v44 = vsel %vm8352_vm4, %v1759_v50, %v2022_v7  ;;  %v2026_v10 = vsel %vm8363_vm5, %v1760_v46, %v2025_v18  ;;  %v2451_v22 = vshll.u32 %v8723_v41, 16  ;;  %v9221_v7 = vld [vmem:[#allocation2 + $0x110] sm:$0xf]  ;;  %v2109_v46 = vld [vmem:[#allocation2 + $0x114] sm:$0x1] }
 0x1b0   : > { %v6359_v6 = vcombine.low %v2528_v17, %v11990_v39  ;;  %2024 = vst [vmem:[#allocation2 + $0x120] sm:$0xf] %v2023_v44  ;;  %2027 = vst [vmem:[#allocation2 + $0x124] sm:$0x1] %v2026_v10  ;;  %v1767_v48 = vor.u32 %v1765_v23, %v1764_v30  ;;  %v1768_v9 = vrot.slane %v1764_v30, 4  ;;  %v6526_v33 = vpack.c.bf16 %v1312_v49, %v1312_v49 }
 0x1b1   : > { %12207 = vst [vmem:[#allocation48_spill] sm:$0xff] %v9207_v1  ;;  %3639 = vmatprep.mubr.bf16.mxu0 %v9207_v1  ;;  %v9219_v8 = vcombine.low %v9181_v16, %v2105_v15  ;;  %v2453_v18 = vrot.slane %v2451_v22, 1  ;;  %v2458_v50 = vshll.u32 %v9194_v42, 16  ;;  %v9226_v41 = vcombine.low %v9203_v57, %v2107_v4  ;;  %v2034_v44 = vld [vmem:[#allocation2 + $0x130] sm:$0xf] }
 0x1b2   : > { %3640 = vmatmul.mubr.bf16.gmra.mxu0 %v9189_v58  ;;  %3809 = vmatmul.mubr.bf16.gmra.mxu1 %v6359_v6  ;;  %v2029_v23 = vsel %vm8352_vm4, %v1767_v48, %v2028_v59  ;;  %v2032_v17 = vsel %vm8363_vm5, %v1768_v9, %v2031_v13  ;;  %v1770_v15 = vshrl.u32 %v6526_v33, 16  ;;  %v2456_v30 = vshrl.u32 %v9194_v42, 16  ;;  %v9235_v4 = vld [vmem:[#allocation2 + $0x118] sm:$0xf]  ;;  %v2111_v9 = vld [vmem:[#allocation2 + $0x11c] sm:$0x1] }
 0x1b3   : > { %2030 = vst [vmem:[#allocation2 + $0x128] sm:$0xf] %v2029_v23  ;;  %2033 = vst [vmem:[#allocation2 + $0x12c] sm:$0x1] %v2032_v17  ;;  %v1773_v49 = vshll.u32 %v6526_v33, 16  ;;  %v2454_v10 = vor.u32 %v2453_v18, %v2449_v54  ;;  %v2460_v6 = vrot.slane %v2458_v50, 1  ;;  %v6366_v22 = vcombine.low %v9203_v57, %v9221_v7 }
 0x1b4   : > { %v1772_v39 = vrot.slane %v1770_v15, 7  ;;  %v9238_v59 = vcombine.low %v9221_v7, %v2109_v46  ;;  %v11996_v13 = vrot.slane %v9219_v8, 1  ;;  %v11995_v48 = vrot.slane %v9226_v41, 1  ;;  %v2037_v23 = vld [vmem:[#allocation2 + $0x134] sm:$0x1] }
 0x1b5   : > { %v9242_v17 = vor.u32 %v2460_v6, %v2456_v30  ;;  %3816 = vmatprep.mubr.bf16.mxu1 %v6366_v22  ;;  %v2463_v54 = vshrl.u32 %v9219_v8, 16  ;;  %v2465_v33 = vshll.u32 %v9219_v8, 16  ;;  %v2472_v18 = vshll.u32 %v9226_v41, 16 }
 0x1b6   : > { %v1775_v50 = vor.u32 %v1773_v49, %v1772_v39  ;;  %v1776_v15 = vrot.slane %v1772_v39, 4  ;;  %v9251_v46 = vcombine.low %v11996_v13, %v11995_v48  ;;  %v2470_v58 = vshrl.u32 %v9226_v41, 16  ;;  %v7666_v48 = vld [vmem:[#allocation2 + $0xf0] sm:$0xf] }
 0x1b7   : > { %v6358_v30 = vcombine.low %v2454_v10, %v9242_v17  ;;  %v2467_v6 = vrot.slane %v2465_v33, 1  ;;  %v2474_v22 = vrot.slane %v2472_v18, 1  ;;  %v9255_v1 = vld [vmem:[#allocation2 + $0x120] sm:$0xf]  ;;  %v2113_v34 = vld [vmem:[#allocation2 + $0x124] sm:$0x1]  ;;  %v9258_v11 = vcombine.low %v9235_v4, %v2111_v9 }
 0x1b8   : > { %12208 = vst [vmem:[#allocation49_spill] sm:$0xff] %v9251_v46  ;;  %v2035_v39 = vsel %vm8352_vm4, %v1775_v50, %v2034_v44  ;;  %v2038_v49 = vsel %vm8363_vm5, %v1776_v15, %v2037_v23  ;;  %v6357_v13 = vcombine.low %v7666_v48, %v9177_v19  ;;  %v6372_v10 = vcombine.low %v9235_v4, %v9255_v1 }
 0x1b9   : > { %2036 = vst [vmem:[#allocation2 + $0x130] sm:$0xf] %v2035_v39  ;;  %2039 = vst [vmem:[#allocation2 + $0x134] sm:$0x1] %v2038_v49  ;;  %3647 = vmatprep.mubr.bf16.mxu0 %v6358_v30  ;;  %v9268_v33 = vor.u32 %v2467_v6, %v2463_v54  ;;  %v9270_v9 = vor.u32 %v2474_v22, %v2470_v58  ;;  %v9273_v56 = vcombine.low %v9255_v1, %v2113_v34 }
 0x1ba   : > { %3817 = vmatmul.mubr.bf16.gmra.mxu1 %v9251_v46  ;;  %v11997_v36 = vrot.slane %v9258_v11, 1  ;;  %3648 = vmatmul.mubr.bf16.gmra.mxu0 %v6357_v13  ;;  %v2479_v19 = vshll.u32 %v9238_v59, 16  ;;  %v2486_v44 = vshll.u32 %v9258_v11, 16  ;;  %v2114_v48 = vld [vmem:[#allocation2 + $0x128] sm:$0xf]  ;;  %v11998_v54 = vrot.slane %v9238_v59, 1 }
 0x1bb   : > { %3824 = vmatprep.mubr.bf16.mxu1 %v6372_v10  ;;  %v9280_v23 = vcombine.low %v9268_v33, %v9270_v9  ;;  %v2477_v58 = vshrl.u32 %v9238_v59, 16  ;;  %v2115_v18 = vld [vmem:[#allocation2 + $0x12c] sm:$0x1]  ;;  %v2484_v50 = vshrl.u32 %v9258_v11, 16  ;;  %v2493_v6 = vshll.u32 %v9273_v56, 16 }
 0x1bc   : > { %v2481_v34 = vrot.slane %v2479_v19, 1  ;;  %v2488_v15 = vrot.slane %v2486_v44, 1  ;;  %v9285_v13 = vcombine.low %v2114_v48, %v2115_v18  ;;  %v9292_v30 = vcombine.low %v11998_v54, %v11997_v36  ;;  %v2097_v54 = vld [vmem:[#allocation2 + $0xe4] sm:$0x1] }
 0x1bd   : > { %12209 = vst [vmem:[#allocation50_spill] sm:$0xff] %v9280_v23  ;;  %3655 = vmatprep.mubr.bf16.mxu0 %v9280_v23  ;;  %v9302_v10 = vcombine.low %v9181_v16, %v9203_v57  ;;  %v2534_v16 = vrot.slane %v9273_v56, 1  ;;  %v2491_v57 = vshrl.u32 %v9273_v56, 16  ;;  %v9335_v56 = vcombine.low %v9221_v7, %v9235_v4  ;;  %v9358_v4 = vld [vmem:[#allocation2 + $0x40] sm:$0xf] }
 0x1be   : > { %12210 = vst [vmem:[#allocation51_spill] sm:$0xff] %v9292_v30  ;;  %v9295_v22 = vor.u32 %v2481_v34, %v2477_v58  ;;  %v9297_v39 = vor.u32 %v2488_v15, %v2484_v50  ;;  %v2500_v49 = vshll.u32 %v9285_v13, 16  ;;  %v12002_v18 = vrot.slane %v9285_v13, 1 }
 0x1bf   : > { %12211 = vst [vmem:[#allocation52_spill] sm:$0xff] %v9302_v10  ;;  %v2495_v34 = vrot.slane %v2493_v6, 1  ;;  %v2498_v50 = vshrl.u32 %v9285_v13, 16  ;;  %12216 = vst [vmem:[#allocation57_spill] sm:$0xff] %v9335_v56  ;;  %v12227_v26 = vrot.slane %v9194_v42, 1  ;;  %v12230_v42 = vrot.slane %v9258_v11, 1 }
 0x1c0   : > { %v9306_v19 = vcombine.low %v9295_v22, %v9297_v39  ;;  %v9308_v44 = vld [vmem:[#allocation2 + $0x130] sm:$0xf]  ;;  %v2502_v15 = vrot.slane %v2500_v49, 1  ;;  %v9327_v49 = vcombine.low %v9137_v45, %v2097_v54 }
 0x1c1   : > { %12213 = vst [vmem:[#allocation54_spill] sm:$0xff] %v9308_v44  ;;  %v6378_v58 = vcombine.low %v2114_v48, %v9308_v44  ;;  %v9324_v6 = vor.u32 %v2495_v34, %v2491_v57  ;;  %v2117_v34 = vld [vmem:[#allocation2 + $0x134] sm:$0x1]  ;;  %v12219_v57 = vrot.slane %v9059_v52, 1 }
 0x1c2   : > { %12212 = vst [vmem:[#allocation53_spill] sm:$0xff] %v9306_v19  ;;  %3825 = vmatmul.mubr.bf16.gmra.mxu1 %v9292_v30  ;;  %3656 = vmatmul.mubr.bf16.gmra.mxu0 %v9302_v10  ;;  %v9318_v36 = vor.u32 %v2502_v15, %v2498_v50  ;;  %v9322_v30 = vcombine.low %v2534_v16, %v12002_v18  ;;  %v12217_v50 = vrot.slane %v9014_v35, 1  ;;  %v12218_v15 = vrot.slane %v8996_v20, 1  ;;  %v9354_v35 = vld [vmem:[#allocation2 + $0x48] sm:$0xf] }
 0x1c3   : > { %3663 = vmatprep.mubr.bf16.mxu0 %v9306_v19  ;;  %3832 = vmatprep.mubr.bf16.mxu1 %v6378_v58  ;;  %v2057_v58 = vld [vmem:[#allocation2 + $0x44] sm:$0x1]  ;;  %v2077_v19 = vld [vmem:[#allocation2 + $0x94] sm:$0x1]  ;;  %v12220_v10 = vrot.slane %v9037_v5, 1  ;;  %v2573_v7 = vshll.u32 %v9327_v49, 16  ;;  %v6270_v54 = vcombine.low %v9308_v44, %v2117_v34 }
 0x1c4   : > { %12214 = vst [vmem:[#allocation55_spill] sm:$0xff] %v9322_v30  ;;  %v9331_v46 = vcombine.low %v9324_v6, %v9318_v36  ;;  %v9341_v18 = vcombine.low %v12218_v15, %v12217_v50  ;;  %v2059_v20 = vld [vmem:[#allocation2 + $0x4c] sm:$0x1]  ;;  %v9361_v50 = vcombine.low %v9358_v4, %v2057_v58  ;;  %v9364_v52 = vcombine.low %v8930_v53, %v2077_v19  ;;  %v9367_v5 = vld [vmem:[#allocation2 + $0x98] sm:$0xf] }
 0x1c5   : > { %v9350_v23 = vcombine.low %v12220_v10, %v12219_v57  ;;  %v2079_v10 = vld [vmem:[#allocation2 + $0x9c] sm:$0x1]  ;;  %v12222_v15 = vrot.slane %v9090_v27, 1  ;;  %v9378_v58 = vcombine.low %v9255_v1, %v2114_v48  ;;  %v9380_v53 = vld [vmem:[#allocation2 + $0xe8] sm:$0xf]  ;;  %v12224_v27 = vrot.slane %v8418_v14, 1 }
 0x1c6   : > { %12215 = vst [vmem:[#allocation56_spill] sm:$0xff] %v9331_v46  ;;  %v2099_v19 = vld [vmem:[#allocation2 + $0xec] sm:$0x1]  ;;  %v2571_v34 = vshrl.u32 %v9327_v49, 16  ;;  %v2575_v44 = vrot.slane %v2573_v7, 1  ;;  %v2578_v11 = vshrl.u32 %v6270_v54, 16 }
 0x1c7   : > { %v9391_v1 = vld [vmem:[#allocation2 + $0x138] sm:$0xf]  ;;  %v2119_v48 = vld [vmem:[#allocation2 + $0x13c] sm:$0x1] }
 0x1ca   : > { %3833 = vmatmul.mubr.bf16.gmra.mxu1 %v9322_v30  ;;  %3664 = vmatmul.mubr.bf16.gmra.mxu0 %v9335_v56  ;;  %v12225_v56 = vrot.slane %v9146_v32, 1  ;;  %v12226_v30 = vrot.slane %v9219_v8, 1  ;;  %v9413_v32 = vcombine.low %v9367_v5, %v2079_v10  ;;  %v12012_v10 = vrot.slane %v9364_v52, 1 }
 0x1cb   : > { %4034 = vmatprep.mubr.bf16.mxu1 %v8579_v21  ;;  %3671 = vmatprep.mubr.bf16.mxu0 %v9331_v46  ;;  %v12221_v21 = vrot.slane %v9125_v38, 1  ;;  %v2586_v46 = vrot.slane %v9327_v49, 1  ;;  %v12223_v38 = vrot.slane %v8461_v37, 1  ;;  %v12229_v49 = vrot.slane %v9226_v41, 1 }
 0x1cc   : > { %v9401_v37 = vcombine.low %v12227_v26, %v12226_v30  ;;  %v9420_v26 = vcombine.low %v9380_v53, %v2099_v19  ;;  %v2580_v41 = vshll.u32 %v6270_v54, 16  ;;  %v9427_v30 = vcombine.low %v9391_v1, %v2119_v48 }
 0x1cd   : > { %v9373_v57 = vcombine.low %v12222_v15, %v12221_v21  ;;  %v6281_v21 = vcombine.low %v12224_v27, %v12223_v38  ;;  %v6271_v15 = vcombine.low %v9354_v35, %v2059_v20  ;;  %v9395_v45 = vcombine.low %v12225_v56, %v2586_v46 }
 0x1ce   : > { %v12228_v20 = vrot.slane %v9238_v59, 1  ;;  %v12011_v38 = vrot.slane %v9361_v50, 1  ;;  %v9415_v56 = vor.u32 %v2575_v44, %v2571_v34  ;;  %v9424_v59 = vcombine.low %v12230_v42, %v2534_v16  ;;  %v7561_v44 = vld [vmem:[%s11926_s3 + $0x230] sm:$0xff]  }
 0x1cf   : > { %v2587_v19 = vrot.slane %v6270_v54, 1  ;;  %v2582_v16 = vrot.slane %v2580_v41, 1  ;;  %v2559_v34 = vshll.u32 %v9361_v50, 16  ;;  %v2611_v42 = vshll.u32 %v6271_v15, 16 }
 0x1d0   : > { %v9409_v7 = vcombine.low %v12229_v49, %v12228_v20  ;;  %v2636_v20 = vrot.slane %v6271_v15, 1  ;;  %v2637_v49 = vrot.slane %v9413_v32, 1  ;;  %v2638_v27 = vrot.slane %v9420_v26, 1 }
 0x1d1   : > { %v9443_v8 = vor.u32 %v2582_v16, %v2578_v11  ;;  %v2639_v14 = vrot.slane %v9427_v30, 1  ;;  %v2561_v11 = vrot.slane %v2559_v34, 1  ;;  %v2609_v16 = vshrl.u32 %v6271_v15, 16  ;;  %v12240_v34 = vld [vmem:[#allocation15_spill] sm:$0xff] }
 0x1d2   : > { %4035 = vmatmul.mubr.bf16.vlgmr.msra.gmra.mxu1 %v8583_v62  ;;  %3672 = vmatmul.mubr.bf16.gmra.mxu0 %v9378_v58  ;;  %v12231_v62 = vrot.slane %v9285_v13, 1  ;;  %v9453_v54 = vcombine.low %v12012_v10, %v2637_v49  ;;  %v12236_v10 = vld [vmem:[#allocation8_spill] sm:$0xff]  ;;  %v12237_v13 = vld [vmem:[#allocation10_spill] sm:$0xff]  ;;  %v2557_v15 = vshrl.u32 %v9361_v50, 16 }
 0x1d3   : > { %4042 = vmatprep.mubr.bf16.mxu1 %v8677_v51  ;;  %3873 = vmatprep.mubr.bf16.mxu0 %v6281_v21  ;;  %v9449_v51 = vcombine.low %v12011_v38, %v2636_v20  ;;  %v9457_v21 = vcombine.low %v2586_v46, %v2638_v27  ;;  %v9459_v41 = vcombine.low %v2587_v19, %v2639_v14  ;;  %v12233_v20 = vrot.slane %v8558_v47, 1  ;;  %v12234_v38 = vld [vmem:[#allocation7_spill] sm:$0xff]  ;;  %v7668_v14 = vld [vmem:[%s11926_s3 + $0x238] sm:$0xff]  }
 0x1d4   : > { %v9440_v48 = vcombine.low %v12231_v62, %v2587_v19  ;;  %v2613_v62 = vrot.slane %v2611_v42, 1  ;;  %v12238_v46 = vcombine.low %v12236_v10, %v12237_v13  ;;  %v2562_v47 = vor.u32 %v2561_v11, %v2557_v15  ;;  %v7565_v19 = vld [vmem:[%s11926_s3 + $0x220] sm:$0xff]  }
 0x1d5   : > { %12232 = vst [vmem:[#allocation58_spill] sm:$0xff] %v9449_v51  ;;  %v12235_v51 = vrot.slane %v12234_v38, 1  ;;  %v12239_v38 = vld [vmem:[#allocation11_spill] sm:$0xff]  ;;  %v12241_v42 = vrot.slane %v12240_v34, 1  ;;  %v12247_v15 = vrot.slane %v9361_v50, 1  ;;  %v12254_v34 = vld [vmem:[#allocation18_spill] sm:$0xff] }
 0x1d6   : > { %v2614_v27 = vor.u32 %v2613_v62, %v2609_v16  ;;  %v6286_v10 = vcombine.low %v12239_v38, %v8656_v12  ;;  %v12244_v16 = vld [vmem:[#allocation19_spill] sm:$0xff]  ;;  %v7567_v12 = vld [vmem:[%s11926_s3 + $0x218] sm:$0xff]   ;;  %v12245_v62 = vld [vmem:[#allocation20_spill] sm:$0xff] }
 0x1d7   : > { %v6287_v49 = vcombine.low %v12235_v51, %v12233_v20  ;;  %v12242_v51 = vld [vmem:[#allocation12_spill] sm:$0xff]  ;;  %v12246_v20 = vld [vmem:[#allocation14_spill] sm:$0xff]  ;;  %v12250_v38 = vld [vmem:[#allocation29_spill] sm:$0xff] }
 0x1d8   : > { %v12243_v13 = vrot.slane %v12242_v51, 1  ;;  %v7573_v50 = vld [vmem:[%s11926_s3 + $0x200] sm:$0xff]  }
 0x1da   : > { %4043 = vmatmul.mubr.bf16.gmra.mxu1 %v8689_v29  ;;  %3874 = vmatmul.mubr.bf16.vlgmr.msra.gmra.mxu0 %v12238_v46  ;;  %v7563_v29 = vld [vmem:[%s11926_s3 + $0x228] sm:$0xff]   ;;  %v6293_v11 = vcombine.low %v12243_v13, %v12241_v42  ;;  %v7569_v46 = vld [vmem:[%s11926_s3 + $0x210] sm:$0xff]   ;;  %v12255_v42 = vrot.slane %v12254_v34, 1  ;;  %v12256_v13 = vld [vmem:[#allocation30_spill] sm:$0xff] }
 0x1db   : > { %4050 = vmatprep.mubr.bf16.mxu1 %v8771_v25  ;;  %3881 = vmatprep.mubr.bf16.mxu0 %v6287_v49  ;;  %v6301_v25 = vcombine.low %v2562_v47, %v2614_v27  ;;  %v6292_v49 = vcombine.low %v12246_v20, %v12245_v62  ;;  %v2616_v20 = vshrl.u32 %v9413_v32, 16 }
 0x1dc   : > { %7226 = vmatpush3.bf16.msra.mxu0 %v7668_v14  ;;  %v12248_v14 = vld [vmem:[#allocation16_spill] sm:$0xff] }
 0x1dd   : > { %7227 = vmatprep.subr.bf16.mxu0 %v7561_v44  ;;  %v12249_v27 = vrot.slane %v12248_v14, 1  ;;  %v12261_v14 = vld [vmem:[#allocation24_spill] sm:$0xff] }
 0x1e0   : > { %7228 = vmatpush3.bf16.msra.mxu0 %v7561_v44  ;;  %v6300_v44 = vcombine.low %v9358_v4, %v9354_v35  ;;  %v7571_v35 = vld [vmem:[%s11926_s3 + $0x208] sm:$0xff]   ;;  %v12251_v4 = vld [vmem:[#allocation21_spill] sm:$0xff] }
 0x1e1   : > { %7229 = vmatprep.subr.bf16.mxu0 %v7563_v29 }
 0x1e2   : > { %4051 = vmatmul.mubr.bf16.gmra.mxu1 %v12244_v16  ;;  %3882 = vmatmul.mubr.bf16.gmra.mxu0 %v6286_v10  ;;  %v6298_v10 = vcombine.low %v12251_v4, %v2562_v47  ;;  %v2618_v47 = vshll.u32 %v9413_v32, 16  ;;  %v12257_v16 = vld [vmem:[#allocation27_spill] sm:$0xff] }
 0x1e3   : > { %4058 = vmatprep.mubr.bf16.mxu1 %v6301_v25  ;;  %3889 = vmatprep.mubr.bf16.mxu0 %v6293_v11  ;;  %v12252_v25 = vld [vmem:[#allocation22_spill] sm:$0xff]  ;;  %v2566_v11 = vshll.u32 %v9364_v52, 16 }
 0x1e4   : > { %7230 = vmatpush3.bf16.msra.mxu0 %v7563_v29  ;;  %v6299_v29 = vcombine.low %v12249_v27, %v12247_v15  ;;  %v12262_v27 = vrot.slane %v12261_v14, 1 }
 0x1e5   : > { %7231 = vmatprep.subr.bf16.mxu0 %v7565_v19  ;;  %v2568_v62 = vrot.slane %v2566_v11, 1 }
 0x1e8   : > { %7232 = vmatpush3.bf16.msra.mxu0 %v7565_v19  ;;  %v12253_v19 = vrot.slane %v12252_v25, 1  ;;  %v12263_v25 = vld [vmem:[#allocation28_spill] sm:$0xff] }
 0x1e9   : > { %7233 = vmatprep.subr.bf16.mxu0 %v7567_v12 }
 0x1ea   : > { %4059 = vmatmul.mubr.bf16.gmra.mxu1 %v6300_v44  ;;  %3890 = vmatmul.mubr.bf16.gmra.mxu0 %v6292_v49  ;;  %v6308_v51 = vcombine.low %v12255_v42, %v12253_v19  ;;  %v2620_v49 = vrot.slane %v2618_v47, 1  ;;  %v6313_v19 = vcombine.low %v12263_v25, %v8937_v0 }
 0x1eb   : > { %4066 = vmatprep.mubr.bf16.mxu1 %v12250_v38  ;;  %3897 = vmatprep.mubr.bf16.mxu0 %v6299_v29  ;;  %v2564_v29 = vshrl.u32 %v9364_v52, 16 }
 0x1ec   : > { %7234 = vmatpush3.bf16.msra.mxu0 %v7567_v12  ;;  %v12258_v12 = vld [vmem:[#allocation23_spill] sm:$0xff]  ;;  %v2621_v4 = vor.u32 %v2620_v49, %v2616_v20  ;;  %v7669_v49 = vld [vmem:[#allocation2 + $0x90] sm:$0xf] }
 0x1ed   : > { %7235 = vmatprep.subr.bf16.mxu0 %v7569_v46  ;;  %v6307_v44 = vcombine.low %v12258_v12, %v12257_v16  ;;  %v9540_v16 = vld [vmem:[%s11927_s4] ss:$0 sm:$0xff] }
 0x1f0   : > { %7236 = vmatpush3.bf16.msra.mxu0 %v7569_v46  ;;  %v12259_v46 = vld [vmem:[#allocation25_spill] sm:$0xff] }
 0x1f1   : > { %7237 = vmatprep.subr.bf16.mxu0 %v7571_v35  ;;  %v12260_v15 = vrot.slane %v12259_v46, 1  ;;  %v6327_v46 = vcombine.low %v7669_v49, %v9367_v5 }
 0x1f2   : > { %4067 = vmatmul.mubr.bf16.gmra.mxu1 %v12256_v13  ;;  %3898 = vmatmul.mubr.bf16.gmra.mxu0 %v6298_v10 }
 0x1f3   : > { %4074 = vmatprep.mubr.bf16.mxu1 %v8951_v63  ;;  %3905 = vmatprep.mubr.bf16.mxu0 %v6308_v51  ;;  %v6314_v63 = vcombine.low %v12262_v27, %v12260_v15  ;;  %v12264_v51 = vrot.slane %v8917_v60, 1  ;;  %v12267_v27 = vld [vmem:[#allocation36_spill] sm:$0xff] }
 0x1f4   : > { %7238 = vmatpush3.bf16.msra.mxu0 %v7571_v35  ;;  %v2569_v35 = vor.u32 %v2568_v62, %v2564_v29 }
 0x1f5   : > { %7239 = vmatprep.subr.bf16.mxu0 %v7573_v50 }
 0x1f6   : > { %v6328_v34 = vcombine.low %v2569_v35, %v2621_v4 }
 0x1f7   : > { %v6881_v38 = vpop.f32.mrf.mxu1 }
 0x1f8   : > { %7240 = vmatpush3.bf16.msra.mxu0 %v7573_v50 }
 0x1f9   : > { %v6882_v10 = vpop.f32.mrf.mxu1 }
 0x1fa   : > { %4075 = vmatmul.mubr.bf16.gmra.mxu1 %v8959_v3  ;;  %3906 = vmatmul.mubr.bf16.gmra.mxu0 %v6307_v44  ;;  %v6883_v50 = vadd.f32 %v6882_v10, %v6881_v38  ;;  %v12265_v3 = vrot.slane %v8869_v43, 1  ;;  %v12269_v10 = vrot.slane %v9364_v52, 1 }
 0x1fb   : > { %4082 = vmatprep.mubr.bf16.mxu1 %v9020_v24  ;;  %3913 = vmatprep.mubr.bf16.mxu0 %v6314_v63  ;;  %v6884_v32 = vpop.f32.mrf.mxu1  ;;  %v12266_v24 = vld [vmem:[#allocation35_spill] sm:$0xff]  ;;  %v12268_v63 = vld [vmem:[#allocation33_spill] sm:$0xff] }
 0x1fc   : > { %v6320_v13 = vcombine.low %v12265_v3, %v12264_v51  ;;  %v6319_v29 = vcombine.low %v12268_v63, %v12267_v27 }
 0x1fd   : > { %v6885_v42 = vpop.f32.mrf.mxu1 }
 0x1fe   : > { %v6886_v47 = vadd.f32 %v6885_v42, %v6884_v32  ;;  %v12270_v32 = vld [vmem:[#allocation32_spill] sm:$0xff]  ;;  %v12272_v42 = vld [vmem:[#allocation39_spill] sm:$0xff] }
 0x1ff   : > { %v6769_v11 = vpop.f32.mrf.mxu0  ;;  %v12271_v25 = vrot.slane %v12270_v32, 1 }
 0x201   : > { %v6770_v0 = vpop.f32.mrf.mxu0 }
 0x202   : > { %4083 = vmatmul.mubr.bf16.gmra.mxu1 %v12266_v24  ;;  %3914 = vmatmul.mubr.bf16.gmra.mxu0 %v6313_v19  ;;  %v6887_v12 = vpop.f32.mrf.mxu1  ;;  %v6771_v44 = vadd.f32 %v6770_v0, %v6769_v11  ;;  %v6326_v19 = vcombine.low %v12271_v25, %v12269_v10 }
 0x203   : > { %4090 = vmatprep.mubr.bf16.mxu1 %v6328_v34  ;;  %3921 = vmatprep.mubr.bf16.mxu0 %v6320_v13  ;;  %v6772_v62 = vpop.f32.mrf.mxu0 }
 0x204   : > { %v6888_v60 = vpop.f32.mrf.mxu1  ;;  %v3554_v43 = vadd.f32 %v6771_v44, %v9540_v16 }
 0x205   : > { %v6889_v20 = vadd.f32 %v6888_v60, %v6887_v12  ;;  %v6773_v15 = vpop.f32.mrf.mxu0  ;;  %v12274_v12 = vld [vmem:[#allocation40_spill] sm:$0xff] }
 0x206   : > { %v6890_v14 = vpop.f32.mrf.mxu1  ;;  %v6774_v38 = vadd.f32 %v6773_v15, %v6772_v62  ;;  %v9546_v4 = vadd.f32 %v6883_v50, %v3554_v43  ;;  %v12273_v50 = vld [vmem:[#allocation37_spill] sm:$0xff]  ;;  %v12275_v62 = vld [vmem:[#allocation44_spill] sm:$0xff] }
 0x207   : > { %v6325_v11 = vcombine.low %v12273_v50, %v2569_v35 }
 0x208   : > { %v6891_v34 = vpop.f32.mrf.mxu1  ;;  %v3557_v5 = vadd.f32 %v6774_v38, %v9540_v16  ;;  %v2623_v38 = vshrl.u32 %v9420_v26, 16 }
 0x209   : > { %v6892_v51 = vadd.f32 %v6891_v34, %v6890_v14  ;;  %v12278_v34 = vld [vmem:[#allocation48_spill] sm:$0xff] }
 0x20a   : > { %4091 = vmatmul.mubr.bf16.gmra.mxu1 %v6327_v46  ;;  %3922 = vmatmul.mubr.bf16.gmra.mxu0 %v6319_v29  ;;  %v9554_v3 = vadd.f32 %v6886_v47, %v3557_v5  ;;  %v2625_v46 = vshll.u32 %v9420_v26, 16 }
 0x20b   : > { %4098 = vmatprep.mubr.bf16.mxu1 %v12272_v42  ;;  %3929 = vmatprep.mubr.bf16.mxu0 %v6326_v19  ;;  %v12276_v19 = vld [vmem:[#allocation43_spill] sm:$0xff] }
 0x20c   : > { %v6775_v13 = vpop.f32.mrf.mxu0  ;;  %v2627_v10 = vrot.slane %v2625_v46, 1  ;;  %v12281_v46 = vld [vmem:[#allocation42_spill] sm:$0xff] }
 0x20e   : > { %v6776_v24 = vpop.f32.mrf.mxu0  ;;  %v2628_v5 = vor.u32 %v2627_v10, %v2623_v38  ;;  %v12282_v10 = vld [vmem:[#allocation47_spill] sm:$0xff] }
 0x20f   : > { %v6777_v0 = vadd.f32 %v6776_v24, %v6775_v13  ;;  %v6893_v52 = vpop.f32.mrf.mxu1 }
 0x210   : > { %v6778_v44 = vpop.f32.mrf.mxu0 }
 0x211   : > { %v3562_v60 = vadd.f32 %v6777_v0, %v9540_v16  ;;  %v6894_v43 = vpop.f32.mrf.mxu1 }
 0x212   : > { %4099 = vmatmul.mubr.bf16.gmra.mxu1 %v12274_v12  ;;  %3930 = vmatmul.mubr.bf16.gmra.mxu0 %v6325_v11  ;;  %v6779_v49 = vpop.f32.mrf.mxu0  ;;  %v6895_v47 = vadd.f32 %v6894_v43, %v6893_v52  ;;  %v12279_v12 = vld [vmem:[#allocation46_spill] sm:$0xff] }
 0x213   : > { %4106 = vmatprep.mubr.bf16.mxu1 %v12275_v62  ;;  %3937 = vmatprep.mubr.bf16.mxu0 %v9341_v18  ;;  %v6780_v15 = vadd.f32 %v6779_v49, %v6778_v44  ;;  %v6896_v14 = vpop.f32.mrf.mxu1  ;;  %v9562_v35 = vadd.f32 %v6889_v20, %v3562_v60  ;;  %v12277_v18 = vcombine.low %v9048_v61, %v9096_v31 }
 0x214   : > { %v6355_v61 = vcombine.low %v9415_v56, %v2628_v5 }
 0x215   : > { %v3565_v27 = vadd.f32 %v6780_v15, %v9540_v16  ;;  %v6897_v63 = vpop.f32.mrf.mxu1  ;;  %v6354_v15 = vcombine.low %v12281_v46, %v9380_v53  ;;  %v12284_v53 = vld [vmem:[#allocation50_spill] sm:$0xff] }
 0x216   : > { %v6898_v29 = vadd.f32 %v6897_v63, %v6896_v14  ;;  %v7575_v63 = vld [vmem:[%s11928_s5 + $0xe0] ss:$16 sps:$4 sm:$0xff]  }
 0x217   : > { %v6781_v32 = vpop.f32.mrf.mxu0  ;;  %v9566_v25 = vadd.f32 %v6892_v51, %v3565_v27 }
 0x219   : > { %v6782_v20 = vpop.f32.mrf.mxu0 }
 0x21a   : > { %4107 = vmatmul.mubr.bf16.gmra.mxu1 %v12276_v19  ;;  %3938 = vmatmul.mubr.bf16.gmra.mxu0 %v12277_v18  ;;  %v6783_v42 = vadd.f32 %v6782_v20, %v6781_v32  ;;  %v12283_v32 = vcombine.low %v9150_v40, %v12282_v10 }
 0x21b   : > { %4114 = vmatprep.mubr.bf16.mxu1 %v12278_v34  ;;  %3945 = vmatprep.mubr.bf16.mxu0 %v9350_v23  ;;  %v6784_v13 = vpop.f32.mrf.mxu0  ;;  %v6899_v24 = vpop.f32.mrf.mxu1  ;;  %v12280_v23 = vcombine.low %v9098_v55, %v9148_v2  ;;  %v7577_v2 = vld [vmem:[%s11928_s5 + $0xe4] ss:$16 sps:$4 sm:$0xff]  }
 0x21c   : > { %v3570_v26 = vadd.f32 %v6783_v42, %v9540_v16  ;;  %4586 = vmatprep.subr.bf16.mxu1 %v7577_v2  ;;  %v12288_v2 = vld [vmem:[#allocation57_spill] sm:$0xff] }
 0x21d   : > { %v6785_v50 = vpop.f32.mrf.mxu0  ;;  %v6900_v51 = vpop.f32.mrf.mxu1  ;;  %4587 = vmatpush1.bf16.msra.mxu1 %v7575_v63 }
 0x21e   : > { %v6786_v11 = vadd.f32 %v6785_v50, %v6784_v13  ;;  %v6901_v0 = vadd.f32 %v6900_v51, %v6899_v24  ;;  %v9575_v52 = vadd.f32 %v6895_v47, %v3570_v26  ;;  %v12285_v51 = vld [vmem:[#allocation52_spill] sm:$0xff] }
 0x21f   : > { %v6902_v31 = vpop.f32.mrf.mxu1 }
 0x220   : > { %v3573_v44 = vadd.f32 %v6786_v11, %v9540_v16 }
 0x221   : > { %v6903_v62 = vpop.f32.mrf.mxu1 }
 0x222   : > { %4115 = vmatmul.mubr.bf16.gmra.mxu1 %v12279_v12  ;;  %3946 = vmatmul.mubr.bf16.gmra.mxu0 %v12280_v23  ;;  %v6904_v60 = vadd.f32 %v6903_v62, %v6902_v31  ;;  %v9584_v43 = vadd.f32 %v6898_v29, %v3573_v44  ;;  %v12287_v31 = vld [vmem:[#allocation53_spill] sm:$0xff] }
 0x223   : > { %4122 = vmatprep.mubr.bf16.mxu1 %v6355_v61  ;;  %3953 = vmatprep.mubr.bf16.mxu0 %v9373_v57 }
 0x224   : > { %v6787_v49 = vpop.f32.mrf.mxu0 }
 0x225   : > { %v6905_v47 = vpop.f32.mrf.mxu1 }
 0x226   : > { %v6788_v14 = vpop.f32.mrf.mxu0 }
 0x227   : > { %v6906_v27 = vpop.f32.mrf.mxu1  ;;  %v6789_v55 = vadd.f32 %v6788_v14, %v6787_v49  ;;  %v2630_v14 = vshrl.u32 %v9427_v30, 16 }
 0x228   : > { %v6907_v57 = vadd.f32 %v6906_v27, %v6905_v47  ;;  %v6790_v29 = vpop.f32.mrf.mxu0 }
 0x229   : > { %v6908_v38 = vpop.f32.mrf.mxu1  ;;  %v3578_v19 = vadd.f32 %v6789_v55, %v9540_v16  ;;  %v12289_v55 = vcombine.low %v9242_v17, %v9268_v33 }
 0x22a   : > { %4123 = vmatmul.mubr.bf16.gmra.mxu1 %v6354_v15  ;;  %3954 = vmatmul.mubr.bf16.gmra.mxu0 %v12283_v32  ;;  %v6791_v18 = vpop.f32.mrf.mxu0 }
 0x22b   : > { %4130 = vmatprep.mubr.bf16.mxu1 %v12284_v53  ;;  %3961 = vmatprep.mubr.bf16.mxu0 %v9395_v45  ;;  %v6909_v34 = vpop.f32.mrf.mxu1  ;;  %v6792_v20 = vadd.f32 %v6791_v18, %v6790_v29  ;;  %v9600_v42 = vadd.f32 %v6901_v0, %v3578_v19  ;;  %v12286_v45 = vcombine.low %v9198_v28, %v9415_v56  ;;  %v7578_v28 = vld [vmem:[%s11928_s5 + $0xc0] ss:$16 sps:$4 sm:$0xff]   ;;  %v7580_v56 = vld [vmem:[%s11928_s5 + $0xc4] ss:$16 sps:$4 sm:$0xff]  }
 0x22c   : > { %v6793_v5 = vpop.f32.mrf.mxu0  ;;  %v6910_v47 = vadd.f32 %v6909_v34, %v6908_v38  ;;  %4588 = vmatprep.subr.bf16.mxu1 %v7580_v56 }
 0x22d   : > { %v3581_v13 = vadd.f32 %v6792_v20, %v9540_v16  ;;  %4589 = vmatpush1.bf16.msra.mxu1 %v7578_v28 }
 0x22e   : > { %v6794_v24 = vpop.f32.mrf.mxu0 }
 0x22f   : > { %v6795_v50 = vadd.f32 %v6794_v24, %v6793_v5  ;;  %v9603_v40 = vadd.f32 %v6904_v60, %v3581_v13  ;;  %v2632_v60 = vshll.u32 %v9427_v30, 16 }
 0x230   : > { %v6911_v26 = vpop.f32.mrf.mxu1  ;;  %v6796_v11 = vpop.f32.mrf.mxu0 }
 0x231   : > { %v3586_v0 = vadd.f32 %v6795_v50, %v9540_v16  ;;  %v2634_v27 = vrot.slane %v2632_v60, 1  ;;  %v12293_v60 = vcombine.low %v9297_v39, %v9324_v6 }
 0x232   : > { %4131 = vmatmul.mubr.bf16.gmra.mxu1 %v12285_v51  ;;  %v6912_v61 = vpop.f32.mrf.mxu1  ;;  %3962 = vmatmul.mubr.bf16.gmra.mxu0 %v12286_v45  ;;  %v6797_v44 = vpop.f32.mrf.mxu0 }
 0x233   : > { %4138 = vmatprep.mubr.bf16.mxu1 %v12287_v31  ;;  %v6913_v12 = vadd.f32 %v6912_v61, %v6911_v26  ;;  %3969 = vmatprep.mubr.bf16.mxu0 %v9401_v37  ;;  %v6798_v62 = vadd.f32 %v6797_v44, %v6796_v11  ;;  %v9613_v49 = vadd.f32 %v6907_v57, %v3586_v0  ;;  %v12290_v57 = vld [vmem:[#allocation56_spill] sm:$0xff] }
 0x234   : > { %v6914_v23 = vpop.f32.mrf.mxu1  ;;  %v2635_v30 = vor.u32 %v2634_v27, %v2630_v14  ;;  %v12291_v26 = vcombine.low %v9270_v9, %v9295_v22  ;;  %v7581_v9 = vld [vmem:[%s11928_s5 + $0xa0] ss:$16 sps:$4 sm:$0xff]   ;;  %v7583_v22 = vld [vmem:[%s11928_s5 + $0xa4] ss:$16 sps:$4 sm:$0xff]  }
 0x235   : > { %v3589_v46 = vadd.f32 %v6798_v62, %v9540_v16  ;;  %4590 = vmatprep.subr.bf16.mxu1 %v7583_v22 }
 0x236   : > { %v6915_v15 = vpop.f32.mrf.mxu1  ;;  %v6382_v17 = vcombine.low %v9443_v8, %v2635_v30  ;;  %4591 = vmatpush1.bf16.msra.mxu1 %v7581_v9 }
 0x237   : > { %v9623_v63 = vadd.f32 %v6910_v47, %v3589_v46  ;;  %v6916_v24 = vadd.f32 %v6915_v15, %v6914_v23  ;;  %v12294_v15 = vmov 0  }
 0x238   : > { %v6799_v37 = vpop.f32.mrf.mxu0 }
 0x23a   : > { %4139 = vmatmul.mubr.bf16.gmra.mxu1 %v12288_v2  ;;  %3970 = vmatmul.mubr.bf16.gmra.mxu0 %v12289_v55  ;;  %v6800_v29 = vpop.f32.mrf.mxu0  ;;  %v6917_v38 = vpop.f32.mrf.mxu1 }
 0x23b   : > { %4146 = vmatprep.mubr.bf16.mxu1 %v12290_v57  ;;  %3977 = vmatprep.mubr.bf16.mxu0 %v9409_v7  ;;  %v6801_v10 = vadd.f32 %v6800_v29, %v6799_v37 }
 0x23c   : > { %v6802_v32 = vpop.f32.mrf.mxu0  ;;  %v6918_v53 = vpop.f32.mrf.mxu1 }
 0x23d   : > { %v3594_v19 = vadd.f32 %v6801_v10, %v9540_v16  ;;  %v6919_v18 = vadd.f32 %v6918_v53, %v6917_v38  ;;  %v12295_v38 = vcombine.low %v9318_v36, %v9443_v8  ;;  %v7584_v36 = vld [vmem:[%s11928_s5 + $0x80] ss:$16 sps:$4 sm:$0xff]   ;;  %v7586_v8 = vld [vmem:[%s11928_s5 + $0x84] ss:$16 sps:$4 sm:$0xff]  }
 0x23e   : > { %v6803_v34 = vpop.f32.mrf.mxu0  ;;  %v6920_v20 = vpop.f32.mrf.mxu1  ;;  %4592 = vmatprep.subr.bf16.mxu1 %v7586_v8 }
 0x23f   : > { %v6804_v5 = vadd.f32 %v6803_v34, %v6802_v32  ;;  %v9632_v13 = vadd.f32 %v6913_v12, %v3594_v19  ;;  %v12292_v12 = vld [vmem:[#allocation54_spill] sm:$0xff]  ;;  %v12296_v32 = vld [vmem:[#allocation9_spill] sm:$0xff]  ;;  %4593 = vmatpush1.bf16.msra.mxu1 %v7584_v36 }
 0x240   : > { %v6921_v33 = vpop.f32.mrf.mxu1  ;;  %v12302_v36 = vld [vmem:[#allocation34_spill] sm:$0xff] }
 0x241   : > { %v3597_v7 = vadd.f32 %v6804_v5, %v9540_v16  ;;  %v6922_v28 = vadd.f32 %v6921_v33, %v6920_v20 }
 0x242   : > { %4147 = vmatmul.mubr.bf16.gmra.mxu1 %v9378_v58  ;;  %3978 = vmatmul.mubr.bf16.gmra.mxu0 %v12291_v26  ;;  %v6381_v58 = vcombine.low %v12292_v12, %v9391_v1 }
 0x243   : > { %4154 = vmatprep.mubr.bf16.mxu1 %v6382_v17  ;;  %3985 = vmatprep.mubr.bf16.mxu0 %v9424_v59  ;;  %v6805_v50 = vpop.f32.mrf.mxu0  ;;  %v9641_v51 = vadd.f32 %v6916_v24, %v3597_v7 }
 0x244   : > { %v6923_v11 = vpop.f32.mrf.mxu1 }
 0x245   : > { %v6806_v61 = vpop.f32.mrf.mxu0 }
 0x246   : > { %v6807_v45 = vadd.f32 %v6806_v61, %v6805_v50  ;;  %v6924_v31 = vpop.f32.mrf.mxu1  ;;  %v12297_v61 = vld [vmem:[#allocation13_spill] sm:$0xff] }
 0x247   : > { %v6808_v0 = vpop.f32.mrf.mxu0  ;;  %v6925_v44 = vadd.f32 %v6924_v31, %v6923_v11  ;;  %v12298_v31 = vld [vmem:[#allocation17_spill] sm:$0xff] }
 0x248   : > { %v3602_v59 = vadd.f32 %v6807_v45, %v9540_v16  ;;  %v6926_v23 = vpop.f32.mrf.mxu1 }
 0x249   : > { %v6809_v62 = vpop.f32.mrf.mxu0 }
 0x24a   : > { %4155 = vmatmul.mubr.bf16.gmra.mxu1 %v6381_v58  ;;  %3986 = vmatmul.mubr.bf16.gmra.mxu0 %v12293_v60  ;;  %v6810_v1 = vadd.f32 %v6809_v62, %v6808_v0  ;;  %v6927_v47 = vpop.f32.mrf.mxu1  ;;  %v9655_v46 = vadd.f32 %v6919_v18, %v3602_v59 }
 0x24b   : > { %3993 = vmatprep.mubr.bf16.mxu0 %v9440_v48  ;;  %4618 = vmatprep.mubr.bf16.mxu1 %v12294_v15  ;;  %v6928_v20 = vadd.f32 %v6927_v47, %v6926_v23  ;;  %v12299_v47 = vld [vmem:[#allocation58_spill] sm:$0xff] }
 0x24c   : > { %v3605_v56 = vadd.f32 %v6810_v1, %v9540_v16 }
 0x24d   : > { %v6929_v37 = vpop.f32.mrf.mxu1  ;;  %v6811_v14 = vpop.f32.mrf.mxu0 }
 0x24e   : > { %v9660_v2 = vadd.f32 %v6922_v28, %v3605_v56 }
 0x24f   : > { %v6930_v27 = vpop.f32.mrf.mxu1  ;;  %v6812_v55 = vpop.f32.mrf.mxu0 }
 0x250   : > { %v6931_v39 = vadd.f32 %v6930_v27, %v6929_v37  ;;  %v6813_v6 = vadd.f32 %v6812_v55, %v6811_v14  ;;  %v12300_v37 = vld [vmem:[#allocation26_spill] sm:$0xff] }
 0x251   : > { %v6932_v57 = vpop.f32.mrf.mxu1  ;;  %v6814_v29 = vpop.f32.mrf.mxu0 }
 0x252   : > { %3994 = vmatmul.mubr.bf16.gmra.mxu0 %v12295_v38  ;;  %v3610_v48 = vadd.f32 %v6813_v6, %v9540_v16 }
 0x253   : > { %v6933_v10 = vpop.f32.mrf.mxu1  ;;  %7241 = vmatprep.mubr.bf16.mxu0 %v12296_v32  ;;  %v6815_v30 = vpop.f32.mrf.mxu0  ;;  %v7589_v32 = vld [vmem:[%s11928_s5 + $0x64] ss:$16 sps:$4 sm:$0xff]  }
 0x254   : > { %v6816_v53 = vadd.f32 %v6815_v30, %v6814_v29  ;;  %v9667_v19 = vadd.f32 %v6925_v44, %v3610_v48  ;;  %v6934_v9 = vadd.f32 %v6933_v10, %v6932_v57  ;;  %v7587_v10 = vld [vmem:[%s11928_s5 + $0x60] ss:$16 sps:$4 sm:$0xff]   ;;  %4594 = vmatprep.subr.bf16.mxu1 %v7589_v32 }
 0x255   : > { %v6817_v18 = vpop.f32.mrf.mxu0  ;;  %v6935_v34 = vpop.f32.mrf.mxu1  ;;  %4595 = vmatpush1.bf16.msra.mxu1 %v7587_v10 }
 0x256   : > { %v3613_v5 = vadd.f32 %v6816_v53, %v9540_v16 }
 0x257   : > { %v6818_v17 = vpop.f32.mrf.mxu0  ;;  %v6936_v33 = vpop.f32.mrf.mxu1 }
 0x258   : > { %v6819_v24 = vadd.f32 %v6818_v17, %v6817_v18  ;;  %v6937_v7 = vadd.f32 %v6936_v33, %v6935_v34  ;;  %v9676_v26 = vadd.f32 %v6928_v20, %v3613_v5  ;;  %v12301_v20 = vld [vmem:[#allocation31_spill] sm:$0xff] }
 0x259   : > { %v6820_v50 = vpop.f32.mrf.mxu0  ;;  %v6938_v11 = vpop.f32.mrf.mxu1 }
 0x25a   : > { %7242 = vmatmul.mubr.bf16.vlgmr.msra.gmra.mxu0 %v12297_v61  ;;  %v3618_v45 = vadd.f32 %v6819_v24, %v9540_v16 }
 0x25b   : > { %7245 = vmatprep.mubr.bf16.mxu0 %v12298_v31  ;;  %v6821_v0 = vpop.f32.mrf.mxu0  ;;  %v6939_v12 = vpop.f32.mrf.mxu1 }
 0x25c   : > { %v6822_v58 = vadd.f32 %v6821_v0, %v6820_v50  ;;  %v9681_v44 = vadd.f32 %v6931_v39, %v3618_v45  ;;  %v6940_v30 = vadd.f32 %v6939_v12, %v6938_v11  ;;  %v7592_v50 = vld [vmem:[%s11928_s5 + $0xec] ss:$16 sps:$4 sm:$0xff]  }
 0x25d   : > { %4779 = vmatprep.subr.bf16.mxu0 %v7592_v50 }
 0x25e   : > { %v3621_v22 = vadd.f32 %v6822_v58, %v9540_v16 }
 0x25f   : > { %v6823_v59 = vpop.f32.mrf.mxu0  ;;  %v6941_v23 = vpop.f32.mrf.mxu1 }
 0x260   : > { %v9684_v62 = vadd.f32 %v6934_v9, %v3621_v22 }
 0x261   : > { %v6824_v60 = vpop.f32.mrf.mxu0  ;;  %v6942_v1 = vpop.f32.mrf.mxu1 }
 0x262   : > { %7246 = vmatmul.mubr.bf16.gmra.mxu0 %v12299_v47  ;;  %v6825_v28 = vadd.f32 %v6824_v60, %v6823_v59  ;;  %v6943_v56 = vadd.f32 %v6942_v1, %v6941_v23  ;;  %v12303_v23 = vld [vmem:[#allocation38_spill] sm:$0xff] }
 0x263   : > { %7249 = vmatprep.mubr.bf16.mxu0 %v12300_v37  ;;  %v6826_v14 = vpop.f32.mrf.mxu0  ;;  %v6944_v27 = vpop.f32.mrf.mxu1  ;;  %v7593_v47 = vld [vmem:[%s11928_s5 + $0xc8] ss:$16 sps:$4 sm:$0xff]  }
 0x264   : > { %v3626_v55 = vadd.f32 %v6825_v28, %v9540_v16  ;;  %v7595_v28 = vld [vmem:[%s11928_s5 + $0xcc] ss:$16 sps:$4 sm:$0xff]  }
 0x265   : > { %v6827_v39 = vpop.f32.mrf.mxu0  ;;  %v6945_v6 = vpop.f32.mrf.mxu1 }
 0x266   : > { %v6828_v57 = vadd.f32 %v6827_v39, %v6826_v14  ;;  %v9689_v29 = vadd.f32 %v6937_v7, %v3626_v55  ;;  %v7590_v7 = vld [vmem:[%s11928_s5 + $0xe8] ss:$16 sps:$4 sm:$0xff]   ;;  %v6946_v12 = vadd.f32 %v6945_v6, %v6944_v27  ;;  %v7596_v6 = vld [vmem:[%s11928_s5 + $0x40] ss:$16 sps:$4 sm:$0xff]  }
 0x267   : > { %v6829_v38 = vpop.f32.mrf.mxu0  ;;  %v6947_v48 = vpop.f32.mrf.mxu1  ;;  %4780 = vmatpush1.bf16.msra.mxu0 %v7590_v7 }
 0x268   : > { %v3629_v53 = vadd.f32 %v6828_v57, %v9540_v16  ;;  %4781 = vmatprep.subr.bf16.mxu0 %v7595_v28  ;;  %v7598_v57 = vld [vmem:[%s11928_s5 + $0x44] ss:$16 sps:$4 sm:$0xff]   ;;  %v7602_v28 = vld [vmem:[%s11928_s5 + $0x88] ss:$16 sps:$4 sm:$0xff]  }
 0x269   : > { %v6830_v18 = vpop.f32.mrf.mxu0  ;;  %v6948_v34 = vpop.f32.mrf.mxu1  ;;  %4596 = vmatprep.subr.bf16.mxu1 %v7598_v57  ;;  %v7605_v57 = vld [vmem:[%s11928_s5 + $0x20] ss:$16 sps:$4 sm:$0xff]  }
 0x26a   : > { %7250 = vmatmul.mubr.bf16.gmra.mxu0 %v12301_v20  ;;  %v6831_v5 = vadd.f32 %v6830_v18, %v6829_v38  ;;  %v6949_v17 = vadd.f32 %v6948_v34, %v6947_v48  ;;  %v9699_v33 = vadd.f32 %v6940_v30, %v3629_v53  ;;  %v12304_v18 = vld [vmem:[#allocation41_spill] sm:$0xff]  ;;  %4597 = vmatpush1.bf16.msra.mxu1 %v7596_v6 }
 0x26b   : > { %7253 = vmatprep.mubr.bf16.mxu0 %v12302_v36  ;;  %v6832_v8 = vpop.f32.mrf.mxu0  ;;  %v6950_v24 = vpop.f32.mrf.mxu1  ;;  %4782 = vmatpush1.bf16.msra.mxu0 %v7593_v47  ;;  %v12305_v34 = vld [vmem:[#allocation45_spill] sm:$0xff] }
 0x26c   : > { %v3634_v11 = vadd.f32 %v6831_v5, %v9540_v16  ;;  %v7599_v5 = vld [vmem:[%s11928_s5 + $0xa8] ss:$16 sps:$4 sm:$0xff]  }
 0x26d   : > { %v6833_v61 = vpop.f32.mrf.mxu0  ;;  %v6951_v45 = vpop.f32.mrf.mxu1 }
 0x26e   : > { %v6834_v31 = vadd.f32 %v6833_v61, %v6832_v8  ;;  %v9709_v0 = vadd.f32 %v6943_v56, %v3634_v11  ;;  %v6952_v32 = vadd.f32 %v6951_v45, %v6950_v24 }
 0x270   : > { %v3637_v58 = vadd.f32 %v6834_v31, %v9540_v16 }
 0x272   : > { %v6835_v9 = vpop.f32.mrf.mxu0  ;;  %v6953_v22 = vpop.f32.mrf.mxu1  ;;  %7254 = vmatmul.mubr.bf16.gmra.mxu0 %v9453_v54  ;;  %v9713_v59 = vadd.f32 %v6946_v12, %v3637_v58 }
 0x273   : > { %7257 = vmatprep.mubr.bf16.mxu0 %v12303_v23 }
 0x274   : > { %v6836_v60 = vpop.f32.mrf.mxu0  ;;  %v6954_v1 = vpop.f32.mrf.mxu1 }
 0x275   : > { %v6837_v56 = vadd.f32 %v6836_v60, %v6835_v9  ;;  %v6955_v37 = vadd.f32 %v6954_v1, %v6953_v22  ;;  %v12306_v1 = vld [vmem:[#allocation49_spill] sm:$0xff] }
 0x276   : > { %v6838_v14 = vpop.f32.mrf.mxu0  ;;  %v6956_v27 = vpop.f32.mrf.mxu1 }
 0x277   : > { %v3642_v54 = vadd.f32 %v6837_v56, %v9540_v16  ;;  %v7604_v56 = vld [vmem:[%s11928_s5 + $0x8c] ss:$16 sps:$4 sm:$0xff]  }
 0x278   : > { %v6839_v55 = vpop.f32.mrf.mxu0  ;;  %v6957_v39 = vpop.f32.mrf.mxu1 }
 0x279   : > { %v6840_v38 = vadd.f32 %v6839_v55, %v6838_v14  ;;  %v9729_v48 = vadd.f32 %v6949_v17, %v3642_v54  ;;  %v7601_v17 = vld [vmem:[%s11928_s5 + $0xac] ss:$16 sps:$4 sm:$0xff]   ;;  %v6958_v23 = vadd.f32 %v6957_v39, %v6956_v27 }
 0x27a   : > { %v6959_v10 = vpop.f32.mrf.mxu1  ;;  %v6841_v53 = vpop.f32.mrf.mxu0  ;;  %7258 = vmatmul.mubr.bf16.gmra.mxu0 %v12304_v18  ;;  %4783 = vmatprep.subr.bf16.mxu0 %v7601_v17  ;;  %v12308_v17 = vld [vmem:[#allocation55_spill] sm:$0xff] }
 0x27b   : > { %v3645_v30 = vadd.f32 %v6840_v38, %v9540_v16  ;;  %7261 = vmatprep.mubr.bf16.mxu0 %v12305_v34  ;;  %4784 = vmatpush1.bf16.msra.mxu0 %v7599_v5  ;;  %v7607_v38 = vld [vmem:[%s11928_s5 + $0x24] ss:$16 sps:$4 sm:$0xff]  }
 0x27c   : > { %v6960_v20 = vpop.f32.mrf.mxu1  ;;  %v6842_v36 = vpop.f32.mrf.mxu0  ;;  %4785 = vmatprep.subr.bf16.mxu0 %v7604_v56  ;;  %4598 = vmatprep.subr.bf16.mxu1 %v7607_v38  ;;  %v12307_v34 = vld [vmem:[#allocation51_spill] sm:$0xff] }
 0x27d   : > { %v6961_v8 = vadd.f32 %v6960_v20, %v6959_v10  ;;  %v9740_v24 = vadd.f32 %v6952_v32, %v3645_v30  ;;  %v6843_v7 = vadd.f32 %v6842_v36, %v6841_v53  ;;  %4599 = vmatpush1.bf16.msra.mxu1 %v7605_v57 }
 0x27e   : > { %v6962_v50 = vpop.f32.mrf.mxu1  ;;  %v6844_v11 = vpop.f32.mrf.mxu0 }
 0x27f   : > { %v3650_v61 = vadd.f32 %v6843_v7, %v9540_v16  ;;  %4786 = vmatpush1.bf16.msra.mxu0 %v7602_v28  ;;  %v7608_v7 = vld [vmem:[%s11928_s5 + $0x68] ss:$16 sps:$4 sm:$0xff]  }
 0x280   : > { %v6963_v45 = vpop.f32.mrf.mxu1  ;;  %v6845_v31 = vpop.f32.mrf.mxu0 }
 0x281   : > { %v6846_v12 = vadd.f32 %v6845_v31, %v6844_v11  ;;  %v9743_v9 = vadd.f32 %v6955_v37, %v3650_v61  ;;  %v6964_v20 = vadd.f32 %v6963_v45, %v6962_v50 }
 0x282   : > { %v6965_v58 = vpop.f32.mrf.mxu1  ;;  %v6847_v22 = vpop.f32.mrf.mxu0  ;;  %7262 = vmatmul.mubr.bf16.gmra.mxu0 %v9457_v21 }
 0x283   : > { %v3653_v60 = vadd.f32 %v6846_v12, %v9540_v16  ;;  %7265 = vmatprep.mubr.bf16.mxu0 %v12306_v1 }
 0x284   : > { %v6966_v47 = vpop.f32.mrf.mxu1  ;;  %v6848_v14 = vpop.f32.mrf.mxu0 }
 0x285   : > { %v6967_v37 = vadd.f32 %v6966_v47, %v6965_v58  ;;  %v6849_v54 = vadd.f32 %v6848_v14, %v6847_v22  ;;  %v9754_v6 = vadd.f32 %v6958_v23, %v3653_v60 }
 0x286   : > { %v6968_v55 = vpop.f32.mrf.mxu1  ;;  %v6850_v21 = vpop.f32.mrf.mxu0 }
 0x287   : > { %v3658_v27 = vadd.f32 %v6849_v54, %v9540_v16 }
 0x288   : > { %v6969_v39 = vpop.f32.mrf.mxu1  ;;  %v6851_v10 = vpop.f32.mrf.mxu0 }
 0x289   : > { %v6852_v32 = vadd.f32 %v6851_v10, %v6850_v21  ;;  %v9763_v53 = vadd.f32 %v6961_v8, %v3658_v27  ;;  %v7610_v8 = vld [vmem:[%s11928_s5 + $0x6c] ss:$16 sps:$4 sm:$0xff]   ;;  %v6970_v56 = vadd.f32 %v6969_v39, %v6968_v55  ;;  %v7611_v21 = vld [vmem:[%s11928_s5 + $0x48] ss:$16 sps:$4 sm:$0xff]  }
 0x28a   : > { %v6971_v30 = vpop.f32.mrf.mxu1  ;;  %v6853_v18 = vpop.f32.mrf.mxu0  ;;  %7266 = vmatmul.mubr.bf16.gmra.mxu0 %v12307_v34  ;;  %4787 = vmatprep.subr.bf16.mxu0 %v7610_v8  ;;  %v7613_v27 = vld [vmem:[%s11928_s5 + $0x4c] ss:$16 sps:$4 sm:$0xff]  }
 0x28b   : > { %v3661_v5 = vadd.f32 %v6852_v32, %v9540_v16  ;;  %7269 = vmatprep.mubr.bf16.mxu0 %v12308_v17  ;;  %4788 = vmatpush1.bf16.msra.mxu0 %v7608_v7  ;;  %v7614_v32 = vld [vmem:[%s11928_s5] ss:$16 sps:$4 sm:$0xff]  }
 0x28c   : > { %v6972_v36 = vpop.f32.mrf.mxu1  ;;  %v6854_v11 = vpop.f32.mrf.mxu0  ;;  %4789 = vmatprep.subr.bf16.mxu0 %v7613_v27 }
 0x28d   : > { %v6973_v61 = vadd.f32 %v6972_v36, %v6971_v30  ;;  %v6855_v31 = vadd.f32 %v6854_v11, %v6853_v18  ;;  %v9774_v58 = vadd.f32 %v6964_v20, %v3661_v5  ;;  %v7616_v30 = vld [vmem:[%s11928_s5 + $0x4] ss:$16 sps:$4 sm:$0xff]  }
 0x28e   : > { %v6974_v12 = vpop.f32.mrf.mxu1  ;;  %v6856_v50 = vpop.f32.mrf.mxu0  ;;  %4600 = vmatprep.subr.bf16.mxu1 %v7616_v30 }
 0x28f   : > { %v3666_v45 = vadd.f32 %v6855_v31, %v9540_v16  ;;  %4790 = vmatpush1.bf16.msra.mxu0 %v7611_v21  ;;  %4601 = vmatpush1.bf16.msra.mxu1 %v7614_v32 }
 0x290   : > { %v6975_v22 = vpop.f32.mrf.mxu1  ;;  %v6857_v23 = vpop.f32.mrf.mxu0 }
 0x291   : > { %v6858_v60 = vadd.f32 %v6857_v23, %v6856_v50  ;;  %v9779_v47 = vadd.f32 %v6967_v37, %v3666_v45  ;;  %v6976_v36 = vadd.f32 %v6975_v22, %v6974_v12  ;;  %v7617_v23 = vld [vmem:[%s11928_s5 + $0x28] ss:$16 sps:$4 sm:$0xff]  }
 0x292   : > { %v9777_v1 = vpop.f32.mrf.mxu1  ;;  %v6859_v28 = vpop.f32.mrf.mxu0  ;;  %7270 = vmatmul.mubr.bf16.gmra.mxu0 %v9459_v41 }
 0x293   : > { %v3669_v14 = vadd.f32 %v6858_v60, %v9540_v16  ;;  %4811 = vmatprep.mubr.bf16.mxu0 %v12294_v15 }
 0x294   : > { %v9783_v54 = vpop.f32.mrf.mxu1  ;;  %v6860_v37 = vpop.f32.mrf.mxu0 }
 0x295   : > { %v6861_v57 = vadd.f32 %v6860_v37, %v6859_v28  ;;  %v9794_v41 = vadd.f32 %v6970_v56, %v3669_v14 }
 0x296   : > { %v9792_v38 = vpop.f32.mrf.mxu1  ;;  %v6862_v55 = vpop.f32.mrf.mxu0 }
 0x297   : > { %v3674_v39 = vadd.f32 %v6861_v57, %v9540_v16 }
 0x298   : > { %v9797_v10 = vpop.f32.mrf.mxu1  ;;  %v6863_v18 = vpop.f32.mrf.mxu0 }
 0x299   : > { %v6864_v34 = vadd.f32 %v6863_v18, %v6862_v55  ;;  %v9807_v5 = vadd.f32 %v6973_v61, %v3674_v39  ;;  %v7619_v61 = vld [vmem:[%s11928_s5 + $0x2c] ss:$16 sps:$4 sm:$0xff]  }
 0x29a   : > { %v9805_v20 = vpop.f32.mrf.mxu1  ;;  %v6993_v17 = vpop.f32.mrf.mxu0  ;;  %4791 = vmatprep.subr.bf16.mxu0 %v7619_v61  ;;  %v7622_v39 = vld [vmem:[%s11928_s5 + $0xc] ss:$16 sps:$4 sm:$0xff]  }
 0x29b   : > { %v3677_v7 = vadd.f32 %v6864_v34, %v9540_v16  ;;  %4792 = vmatpush1.bf16.msra.mxu0 %v7617_v23 }
 0x29c   : > { %v9810_v8 = vpop.f32.mrf.mxu1  ;;  %v6994_v11 = vpop.f32.mrf.mxu0  ;;  %4793 = vmatprep.subr.bf16.mxu0 %v7622_v39 }
 0x29d   : > { %v6995_v31 = vadd.f32 %v6994_v11, %v6993_v17  ;;  %v9814_v45 = vadd.f32 %v6976_v36, %v3677_v7 }
 0x29e   : > { %v9812_v50 = vpop.f32.mrf.mxu1  ;;  %v6996_v60 = vpop.f32.mrf.mxu0 }
 0x29f   : > { %v9823_v12 = vadd.f32 %v6995_v31, %v9546_v4  ;;  %v7620_v4 = vld [vmem:[%s11928_s5 + $0x8] ss:$16 sps:$4 sm:$0xff]  }
 0x2a0   : > { %v9825_v16 = vpop.f32.mrf.mxu1  ;;  %v6997_v22 = vpop.f32.mrf.mxu0  ;;  %4794 = vmatpush1.bf16.msra.mxu0 %v7620_v4 }
 0x2a1   : > { %v6998_v28 = vadd.f32 %v6997_v22, %v6996_v60 }
 0x2a2   : > { %v9827_v56 = vpop.f32.mrf.mxu1  ;;  %v6999_v14 = vpop.f32.mrf.mxu0 }
 0x2a3   : > { %v9830_v21 = vadd.f32 %v6998_v28, %v9554_v3 }
 0x2a4   : > { %v9832_v27 = vpop.f32.mrf.mxu1  ;;  %v7000_v37 = vpop.f32.mrf.mxu0 }
 0x2a5   : > { %v7001_v57 = vadd.f32 %v7000_v37, %v6999_v14 }
 0x2a6   : > { %v9834_v55 = vpop.f32.mrf.mxu1  ;;  %v7002_v32 = vpop.f32.mrf.mxu0 }
 0x2a7   : > { %v9843_v30 = vadd.f32 %v7001_v57, %v9562_v35 }
 0x2a8   : > { %v9845_v3 = vpop.f32.mrf.mxu1  ;;  %v7003_v18 = vpop.f32.mrf.mxu0 }
 0x2a9   : > { %v7004_v34 = vadd.f32 %v7003_v18, %v7002_v32 }
 0x2aa   : > { %v9847_v17 = vpop.f32.mrf.mxu1  ;;  %v7005_v36 = vpop.f32.mrf.mxu0 }
 0x2ab   : > { %v9850_v7 = vadd.f32 %v7004_v34, %v9566_v25 }
 0x2ac   : > { %v9852_v11 = vpop.f32.mrf.mxu1  ;;  %v7006_v31 = vpop.f32.mrf.mxu0 }
 0x2ad   : > { %v7007_v23 = vadd.f32 %v7006_v31, %v7005_v36 }
 0x2ae   : > { %v9854_v61 = vpop.f32.mrf.mxu1  ;;  %v7008_v35 = vpop.f32.mrf.mxu0 }
 0x2af   : > { %v9857_v60 = vadd.f32 %v7007_v23, %v9575_v52 }
 0x2b0   : > { %v9859_v22 = vpop.f32.mrf.mxu1  ;;  %v7009_v28 = vpop.f32.mrf.mxu0 }
 0x2b1   : > { %v7010_v14 = vadd.f32 %v7009_v28, %v7008_v35 }
 0x2b2   : > { %v9861_v37 = vpop.f32.mrf.mxu1  ;;  %v7011_v57 = vpop.f32.mrf.mxu0 }
 0x2b3   : > { %12309 = vst [vmem:[#allocation7_spill] sm:$0xff] %v9861_v37  ;;  %v9864_v25 = vadd.f32 %v7010_v14, %v9584_v43 }
 0x2b4   : > { %v9866_v4 = vpop.f32.mrf.mxu1  ;;  %v7012_v39 = vpop.f32.mrf.mxu0 }
 0x2b5   : > { %12310 = vst [vmem:[#allocation8_spill] sm:$0xff] %v9866_v4  ;;  %v7013_v32 = vadd.f32 %v7012_v39, %v7011_v57 }
 0x2b6   : > { %v9868_v18 = vpop.f32.mrf.mxu1  ;;  %v7014_v34 = vpop.f32.mrf.mxu0 }
 0x2b7   : > { %12311 = vst [vmem:[#allocation10_spill] sm:$0xff] %v9868_v18  ;;  %v9871_v52 = vadd.f32 %v7013_v32, %v9600_v42 }
 0x2b8   : > { %v9873_v36 = vpop.f32.mrf.mxu1  ;;  %v7015_v31 = vpop.f32.mrf.mxu0 }
 0x2b9   : > { %12312 = vst [vmem:[#allocation11_spill] sm:$0xff] %v9873_v36  ;;  %v7016_v23 = vadd.f32 %v7015_v31, %v7014_v34 }
 0x2ba   : > { %v9875_v35 = vpop.f32.mrf.mxu1  ;;  %v7017_v28 = vpop.f32.mrf.mxu0 }
 0x2bb   : > { %v9878_v43 = vadd.f32 %v7016_v23, %v9603_v40 }
 0x2bc   : > { %v9880_v14 = vpop.f32.mrf.mxu1  ;;  %v7018_v4 = vpop.f32.mrf.mxu0 }
 0x2bd   : > { %12313 = vst [vmem:[#allocation15_spill] sm:$0xff] %v9880_v14  ;;  %v7019_v57 = vadd.f32 %v7018_v4, %v7017_v28 }
 0x2be   : > { %v9882_v39 = vpop.f32.mrf.mxu1  ;;  %v7020_v18 = vpop.f32.mrf.mxu0 }
 0x2bf   : > { %12314 = vst [vmem:[#allocation12_spill] sm:$0xff] %v9882_v39  ;;  %v9885_v42 = vadd.f32 %v7019_v57, %v9613_v49 }
 0x2c0   : > { %v9887_v32 = vpop.f32.mrf.mxu1  ;;  %v7021_v36 = vpop.f32.mrf.mxu0 }
 0x2c1   : > { %12315 = vst [vmem:[#allocation19_spill] sm:$0xff] %v9885_v42  ;;  %v7022_v34 = vadd.f32 %v7021_v36, %v7020_v18 }
 0x2c2   : > { %v9889_v31 = vpop.f32.mrf.mxu1  ;;  %v7023_v37 = vpop.f32.mrf.mxu0 }
 0x2c3   : > { %12316 = vst [vmem:[#allocation20_spill] sm:$0xff] %v9889_v31  ;;  %v9892_v40 = vadd.f32 %v7022_v34, %v9623_v63 }
 0x2c4   : > { %v9894_v23 = vpop.f32.mrf.mxu1  ;;  %v7024_v14 = vpop.f32.mrf.mxu0 }
 0x2c5   : > { %12317 = vst [vmem:[#allocation14_spill] sm:$0xff] %v9892_v40  ;;  %12318 = vst [vmem:[#allocation16_spill] sm:$0xff] %v9894_v23  ;;  %v7025_v4 = vadd.f32 %v7024_v14, %v7023_v37 }
 0x2c6   : > { %v9896_v28 = vpop.f32.mrf.mxu1  ;;  %v7026_v39 = vpop.f32.mrf.mxu0 }
 0x2c7   : > { %12319 = vst [vmem:[#allocation29_spill] sm:$0xff] %v9896_v28  ;;  %v9899_v49 = vadd.f32 %v7025_v4, %v9632_v13 }
 0x2c8   : > { %v9901_v57 = vpop.f32.mrf.mxu1  ;;  %v7027_v42 = vpop.f32.mrf.mxu0 }
 0x2c9   : > { %12320 = vst [vmem:[#allocation21_spill] sm:$0xff] %v9901_v57  ;;  %v7028_v18 = vadd.f32 %v7027_v42, %v7026_v39 }
 0x2ca   : > { %v9903_v36 = vpop.f32.mrf.mxu1  ;;  %v7029_v31 = vpop.f32.mrf.mxu0 }
 0x2cb   : > { %12321 = vst [vmem:[#allocation22_spill] sm:$0xff] %v9903_v36  ;;  %v9906_v63 = vadd.f32 %v7028_v18, %v9641_v51 }
 0x2cc   : > { %v9908_v34 = vpop.f32.mrf.mxu1  ;;  %v7030_v23 = vpop.f32.mrf.mxu0 }
 0x2cd   : > { %12322 = vst [vmem:[#allocation18_spill] sm:$0xff] %v9908_v34  ;;  %v7031_v37 = vadd.f32 %v7030_v23, %v7029_v31 }
 0x2ce   : > { %v9910_v14 = vpop.f32.mrf.mxu1  ;;  %v7032_v28 = vpop.f32.mrf.mxu0 }
 0x2cf   : > { %v9913_v13 = vadd.f32 %v7031_v37, %v9655_v46 }
 0x2d0   : > { %v9915_v4 = vpop.f32.mrf.mxu1  ;;  %v7033_v57 = vpop.f32.mrf.mxu0 }
 0x2d1   : > { %12323 = vst [vmem:[#allocation30_spill] sm:$0xff] %v9913_v13  ;;  %12324 = vst [vmem:[#allocation27_spill] sm:$0xff] %v9915_v4  ;;  %v7034_v39 = vadd.f32 %v7033_v57, %v7032_v28 }
 0x2d2   : > { %v7035_v42 = vpop.f32.mrf.mxu0  ;;  %v9920_v51 = vpop.f32.mrf.mxu1 }
 0x2d3   : > { %v9918_v36 = vadd.f32 %v7034_v39, %v9660_v2  ;;  %12325 = vst [vmem:[#allocation23_spill] sm:$0xff] %v9920_v51 }
 0x2d4   : > { %v7036_v18 = vpop.f32.mrf.mxu0  ;;  %v9925_v23 = vpop.f32.mrf.mxu1 }
 0x2d5   : > { %v7037_v34 = vadd.f32 %v7036_v18, %v7035_v42  ;;  %12326 = vst [vmem:[#allocation25_spill] sm:$0xff] %v9925_v23 }
 0x2d6   : > { %v7038_v40 = vpop.f32.mrf.mxu0  ;;  %v9930_v28 = vpop.f32.mrf.mxu1 }
 0x2d7   : > { %v9923_v31 = vadd.f32 %v7037_v34, %v9667_v19  ;;  %12327 = vst [vmem:[#allocation24_spill] sm:$0xff] %v9930_v28 }
 0x2d8   : > { %v7039_v46 = vpop.f32.mrf.mxu0  ;;  %v9935_v42 = vpop.f32.mrf.mxu1 }
 0x2d9   : > { %v7040_v37 = vadd.f32 %v7039_v46, %v7038_v40  ;;  %12329 = vst [vmem:[#allocation35_spill] sm:$0xff] %v9935_v42 }
 0x2da   : > { %v7041_v13 = vpop.f32.mrf.mxu0  ;;  %v9937_v23 = vpop.f32.mrf.mxu1 }
 0x2db   : > { %v9928_v4 = vadd.f32 %v7040_v37, %v9676_v26 }
 0x2dc   : > { %v7042_v2 = vpop.f32.mrf.mxu0  ;;  %v9942_v28 = vpop.f32.mrf.mxu1 }
 0x2dd   : > { %v7043_v57 = vadd.f32 %v7042_v2, %v7041_v13 }
 0x2de   : > { %v7044_v39 = vpop.f32.mrf.mxu0 }
 0x2df   : > { %v9933_v51 = vadd.f32 %v7043_v57, %v9681_v44 }
 0x2e0   : > { %v7045_v19 = vpop.f32.mrf.mxu0 }
 0x2e1   : > { %12328 = vst [vmem:[#allocation28_spill] sm:$0xff] %v9933_v51  ;;  %v7046_v34 = vadd.f32 %v7045_v19, %v7044_v39  ;;  %v9947_v51 = vpop.f32.mrf.mxu1 }
 0x2e2   : > { %v7047_v18 = vpop.f32.mrf.mxu0 }
 0x2e3   : > { %v9940_v40 = vadd.f32 %v7046_v34, %v9684_v62  ;;  %v9952_v34 = vpop.f32.mrf.mxu1 }
 0x2e4   : > { %v7048_v26 = vpop.f32.mrf.mxu0 }
 0x2e5   : > { %12330 = vst [vmem:[#allocation36_spill] sm:$0xff] %v9940_v40  ;;  %v7049_v46 = vadd.f32 %v7048_v26, %v7047_v18 }
 0x2e6   : > { %v7050_v37 = vpop.f32.mrf.mxu0 }
 0x2e7   : > { %v9945_v13 = vadd.f32 %v7049_v46, %v9689_v29  ;;  %v9957_v46 = vpop.f32.mrf.mxu1 }
 0x2e8   : > { %v7051_v44 = vpop.f32.mrf.mxu0 }
 0x2e9   : > { %12331 = vst [vmem:[#allocation33_spill] sm:$0xff] %v9945_v13  ;;  %v7052_v2 = vadd.f32 %v7051_v44, %v7050_v37 }
 0x2ea   : > { %v7053_v57 = vpop.f32.mrf.mxu0 }
 0x2eb   : > { %v9950_v39 = vadd.f32 %v7052_v2, %v9699_v33  ;;  %v9962_v2 = vpop.f32.mrf.mxu1 }
 0x2ec   : > { %v7054_v19 = vpop.f32.mrf.mxu0 }
 0x2ed   : > { %12332 = vst [vmem:[#allocation32_spill] sm:$0xff] %v9950_v39  ;;  %v7055_v42 = vadd.f32 %v7054_v19, %v7053_v57 }
 0x2ee   : > { %v7056_v62 = vpop.f32.mrf.mxu0 }
 0x2ef   : > { %v9955_v18 = vadd.f32 %v7055_v42, %v9709_v0  ;;  %v9967_v42 = vpop.f32.mrf.mxu1 }
 0x2f0   : > { %v7057_v26 = vpop.f32.mrf.mxu0  ;;  %12335 = vst [vmem:[#allocation40_spill] sm:$0xff] %v9967_v42 }
 0x2f1   : > { %12333 = vst [vmem:[#allocation39_spill] sm:$0xff] %v9955_v18  ;;  %v7058_v40 = vadd.f32 %v7057_v26, %v7056_v62 }
 0x2f2   : > { %v7059_v29 = vpop.f32.mrf.mxu0 }
 0x2f3   : > { %v9960_v37 = vadd.f32 %v7058_v40, %v9713_v59  ;;  %v9972_v40 = vpop.f32.mrf.mxu1 }
 0x2f4   : > { %v7060_v44 = vpop.f32.mrf.mxu0 }
 0x2f5   : > { %12334 = vst [vmem:[#allocation37_spill] sm:$0xff] %v9960_v37  ;;  %v7061_v13 = vadd.f32 %v7060_v44, %v7059_v29 }
 0x2f6   : > { %v7062_v33 = vpop.f32.mrf.mxu0 }
 0x2f7   : > { %v9965_v57 = vadd.f32 %v7061_v13, %v9729_v48  ;;  %v9977_v13 = vpop.f32.mrf.mxu1 }
 0x2f8   : > { %v7063_v19 = vpop.f32.mrf.mxu0 }
 0x2f9   : > { %v7064_v39 = vadd.f32 %v7063_v19, %v7062_v33 }
 0x2fa   : > { %v7065_v0 = vpop.f32.mrf.mxu0 }
 0x2fb   : > { %v9970_v62 = vadd.f32 %v7064_v39, %v9740_v24  ;;  %v9982_v39 = vpop.f32.mrf.mxu1 }
 0x2fc   : > { %v7066_v26 = vpop.f32.mrf.mxu0 }
 0x2fd   : > { %12336 = vst [vmem:[#allocation44_spill] sm:$0xff] %v9970_v62  ;;  %v7067_v18 = vadd.f32 %v7066_v26, %v7065_v0 }
 0x2fe   : > { %v7068_v59 = vpop.f32.mrf.mxu0 }
 0x2ff   : > { %v9975_v29 = vadd.f32 %v7067_v18, %v9743_v9  ;;  %v9987_v18 = vpop.f32.mrf.mxu1 }
 0x300   : > { %v7069_v44 = vpop.f32.mrf.mxu0 }
 0x301   : > { %12337 = vst [vmem:[#allocation43_spill] sm:$0xff] %v9975_v29  ;;  %v7070_v37 = vadd.f32 %v7069_v44, %v7068_v59 }
 0x302   : > { %v7071_v48 = vpop.f32.mrf.mxu0 }
 0x303   : > { %v9980_v33 = vadd.f32 %v7070_v37, %v9754_v6  ;;  %v9992_v37 = vpop.f32.mrf.mxu1 }
 0x304   : > { %v7072_v19 = vpop.f32.mrf.mxu0 }
 0x305   : > { %12338 = vst [vmem:[#allocation48_spill] sm:$0xff] %v9980_v33  ;;  %v7073_v42 = vadd.f32 %v7072_v19, %v7071_v48 }
 0x306   : > { %v7074_v24 = vpop.f32.mrf.mxu0 }
 0x307   : > { %v9985_v0 = vadd.f32 %v7073_v42, %v9763_v53  ;;  %v9997_v42 = vpop.f32.mrf.mxu1 }
 0x308   : > { %v7075_v26 = vpop.f32.mrf.mxu0 }
 0x309   : > { %12339 = vst [vmem:[#allocation46_spill] sm:$0xff] %v9985_v0  ;;  %v7076_v62 = vadd.f32 %v7075_v26, %v7074_v24 }
 0x30a   : > { %v7077_v9 = vpop.f32.mrf.mxu0 }
 0x30b   : > { %v9990_v59 = vadd.f32 %v7076_v62, %v9774_v58  ;;  %v10002_v62 = vpop.f32.mrf.mxu1 }
 0x30c   : > { %v7078_v44 = vpop.f32.mrf.mxu0 }
 0x30d   : > { %v7079_v29 = vadd.f32 %v7078_v44, %v7077_v9 }
 0x30e   : > { %v7080_v6 = vpop.f32.mrf.mxu0 }
 0x30f   : > { %v9995_v48 = vadd.f32 %v7079_v29, %v9779_v47  ;;  %v7113_v47 = vadd.f32 %v9810_v8, %v9805_v20 }
 0x310   : > { %v7081_v19 = vpop.f32.mrf.mxu0 }
 0x311   : > { %v7082_v33 = vadd.f32 %v7081_v19, %v7080_v6  ;;  %v7107_v19 = vadd.f32 %v9783_v54, %v9777_v1 }
 0x312   : > { %v7083_v53 = vpop.f32.mrf.mxu0 }
 0x313   : > { %v10000_v24 = vadd.f32 %v7082_v33, %v9794_v41  ;;  %v7116_v41 = vadd.f32 %v9825_v16, %v9812_v50  ;;  %v10013_v33 = vpop.f32.mrf.mxu1  ;;  %v4037_v8 = vadd.f32 %v7107_v19, %v9823_v12 }
 0x314   : > { %v7084_v26 = vpop.f32.mrf.mxu0 }
 0x315   : > { %12340 = vst [vmem:[#allocation42_spill] sm:$0xff] %v10000_v24  ;;  %v7085_v0 = vadd.f32 %v7084_v26, %v7083_v53  ;;  %v7110_v26 = vadd.f32 %v9797_v10, %v9792_v38  ;;  %v10023_v54 = vpop.f32.mrf.mxu1  ;;  %v7119_v38 = vadd.f32 %v9832_v27, %v9827_v56  ;;  %v7128_v10 = vadd.f32 %v9859_v22, %v9854_v61 }
 0x316   : > { %v7086_v58 = vpop.f32.mrf.mxu0 }
 0x317   : > { %v10005_v9 = vadd.f32 %v7085_v0, %v9807_v5  ;;  %v4045_v5 = vadd.f32 %v7113_v47, %v9843_v30  ;;  %v7125_v30 = vadd.f32 %v9852_v11, %v9847_v17  ;;  %v7122_v17 = vadd.f32 %v9845_v3, %v9834_v55  ;;  %v12341_v55 = vld [vmem:[#allocation15_spill] sm:$0xff] }
 0x318   : > { %v7087_v44 = vpop.f32.mrf.mxu0  ;;  %v4064_v56 = vadd.f32 %v7128_v10, %v9878_v43  ;;  %v7137_v3 = vadd.f32 %v12341_v55, %v9875_v35  ;;  %v12345_v10 = vld [vmem:[#allocation10_spill] sm:$0xff]  ;;  %v12346_v35 = vld [vmem:[#allocation11_spill] sm:$0xff] }
 0x319   : > { %v7088_v29 = vadd.f32 %v7087_v44, %v7086_v58  ;;  %v4048_v58 = vadd.f32 %v7116_v41, %v9850_v7  ;;  %v4040_v44 = vadd.f32 %v7110_v26, %v9830_v21  ;;  %v10032_v7 = vpop.f32.mrf.mxu1  ;;  %v4061_v21 = vadd.f32 %v7125_v30, %v9871_v52 }
 0x31a   : > { %v7243_v6 = vpop.f32.mrf.mxu0  ;;  %v4053_v26 = vadd.f32 %v7119_v38, %v9857_v60  ;;  %v4077_v38 = vadd.f32 %v7137_v3, %v9899_v49 }
 0x31b   : > { %v10016_v53 = vadd.f32 %v7088_v29, %v9814_v45  ;;  %v4206_v20 = vadd.f32 %v7243_v6, %v4045_v5  ;;  %v10039_v61 = vpop.f32.mrf.mxu1 }
 0x31c   : > { %v4197_v0 = vpop.f32.mrf.mxu0 }
 0x31d   : > { %v4198_v50 = vadd.f32 %v4197_v0, %v4037_v8  ;;  %v4326_v47 = vmax.f32 %v4206_v20, 0.0  ;;  %v10050_v30 = vpop.f32.mrf.mxu1 }
 0x31e   : > { %v7244_v1 = vpop.f32.mrf.mxu0 }
 0x31f   : > { %v4209_v16 = vadd.f32 %v7244_v1, %v4048_v58  ;;  %v4324_v6 = vmax.f32 %v4198_v50, 0.0  ;;  %v12342_v58 = vld [vmem:[#allocation7_spill] sm:$0xff]  ;;  %v12343_v1 = vld [vmem:[#allocation8_spill] sm:$0xff] }
 0x320   : > { %v4200_v45 = vpop.f32.mrf.mxu0  ;;  %v7131_v50 = vadd.f32 %v12343_v1, %v12342_v58  ;;  %v12353_v58 = vld [vmem:[#allocation27_spill] sm:$0xff] }
 0x321   : > { %v4327_v29 = vmax.f32 %v4209_v16, 0.0  ;;  %v4201_v24 = vadd.f32 %v4200_v45, %v4040_v44  ;;  %v12344_v16 = vld [vmem:[#allocation12_spill] sm:$0xff]  ;;  %v7152_v1 = vadd.f32 %v12353_v58, %v9910_v14 }
 0x322   : > { %v7247_v12 = vpop.f32.mrf.mxu0  ;;  %v7140_v44 = vadd.f32 %v9887_v32, %v12344_v16  ;;  %v12360_v58 = vld [vmem:[#allocation24_spill] sm:$0xff] }
 0x323   : > { %v4357_v19 = vpack.c.bf16 %v4327_v29, %v4326_v47  ;;  %v4325_v41 = vmax.f32 %v4201_v24, 0.0  ;;  %v4222_v0 = vadd.f32 %v7247_v12, %v4061_v21  ;;  %v4056_v24 = vadd.f32 %v7122_v17, %v9864_v25  ;;  %v12347_v17 = vld [vmem:[#allocation19_spill] sm:$0xff] }
 0x324   : > { %v4213_v11 = vpop.f32.mrf.mxu0  ;;  %v7134_v12 = vadd.f32 %v12346_v35, %v12345_v10  ;;  %v4096_v14 = vadd.f32 %v7152_v1, %v9928_v4 }
 0x325   : > { %v4356_v5 = vpack.c.bf16 %v4325_v41, %v4324_v6  ;;  %v4214_v22 = vadd.f32 %v4213_v11, %v4053_v26  ;;  %v4330_v60 = vmax.f32 %v4222_v0, 0.0  ;;  %v4069_v11 = vadd.f32 %v7131_v50, %v12347_v17  ;;  %v10059_v0 = vpop.f32.mrf.mxu1 }
 0x326   : > { %v7248_v27 = vpop.f32.mrf.mxu0 }
 0x327   : > { %v4225_v20 = vadd.f32 %v7248_v27, %v4064_v56  ;;  %4619 = vmatmul.mubr.bf16.vlgmr.msra.gmra.mxu1 %v4356_v5  ;;  %4812 = vmatmul.mubr.bf16.vlgmr.msra.gmra.mxu0 %v4356_v5  ;;  %v4328_v25 = vmax.f32 %v4214_v22, 0.0  ;;  %v4080_v5 = vadd.f32 %v7140_v44, %v9906_v63  ;;  %v12348_v27 = vld [vmem:[#allocation14_spill] sm:$0xff]  ;;  %v10070_v50 = vpop.f32.mrf.mxu1 }
 0x328   : > { %v4216_v52 = vpop.f32.mrf.mxu0  ;;  %4628 = vmatprep.mubr.bf16.mxu1 %v12294_v15  ;;  %4821 = vmatprep.mubr.bf16.mxu0 %v12294_v15  ;;  %v4072_v22 = vadd.f32 %v7134_v12, %v12348_v27  ;;  %v7161_v27 = vadd.f32 %v9942_v28, %v9937_v23  ;;  %v12361_v23 = vld [vmem:[#allocation35_spill] sm:$0xff] }
 0x329   : > { %v4331_v8 = vmax.f32 %v4225_v20, 0.0  ;;  %v4217_v43 = vadd.f32 %v4216_v52, %v4056_v24  ;;  %v12349_v20 = vld [vmem:[#allocation22_spill] sm:$0xff]  ;;  %v7158_v28 = vadd.f32 %v12361_v23, %v12360_v58 }
 0x32a   : > { %v7251_v45 = vpop.f32.mrf.mxu0  ;;  %v12350_v24 = vld [vmem:[#allocation18_spill] sm:$0xff] }
 0x32b   : > { %v10052_v47 = vpack.c.bf16 %v4331_v8, %v4330_v60  ;;  %v4329_v29 = vmax.f32 %v4217_v43, 0.0  ;;  %v4238_v21 = vadd.f32 %v7251_v45, %v4077_v38  ;;  %v7149_v52 = vadd.f32 %v12350_v24, %v12349_v20  ;;  %v12351_v60 = vld [vmem:[#allocation20_spill] sm:$0xff]  ;;  %v12355_v38 = vld [vmem:[#allocation21_spill] sm:$0xff]  ;;  %v12357_v20 = vld [vmem:[#allocation23_spill] sm:$0xff] }
 0x32c   : > { %v4229_v6 = vpop.f32.mrf.mxu0  ;;  %v12352_v8 = vld [vmem:[#allocation16_spill] sm:$0xff]  ;;  %v12358_v24 = vld [vmem:[#allocation25_spill] sm:$0xff] }
 0x32d   : > { %v4358_v41 = vpack.c.bf16 %v4329_v29, %v4328_v25  ;;  %v4230_v26 = vadd.f32 %v4229_v6, %v4069_v11  ;;  %v4334_v55 = vmax.f32 %v4238_v21, 0.0  ;;  %v7143_v43 = vadd.f32 %v12352_v8, %v12351_v60  ;;  %v12354_v29 = vld [vmem:[#allocation29_spill] sm:$0xff]  ;;  %v12356_v21 = vld [vmem:[#allocation30_spill] sm:$0xff] }
 0x32e   : > { %v7252_v32 = vpop.f32.mrf.mxu0  ;;  %v4093_v25 = vadd.f32 %v7149_v52, %v9923_v31  ;;  %v7146_v10 = vadd.f32 %v12355_v38, %v12354_v29  ;;  %v7155_v52 = vadd.f32 %v12358_v24, %v12357_v20  ;;  %v12359_v8 = vld [vmem:[#allocation33_spill] sm:$0xff]  ;;  %v12363_v29 = vld [vmem:[#allocation32_spill] sm:$0xff] }
 0x32f   : > { %v4241_v56 = vadd.f32 %v7252_v32, %v4080_v5  ;;  %4629 = vmatmul.mubr.bf16.gmra.mxu1 %v4357_v19  ;;  %4822 = vmatmul.mubr.bf16.gmra.mxu0 %v4357_v19  ;;  %v4332_v16 = vmax.f32 %v4230_v26, 0.0  ;;  %v4085_v17 = vadd.f32 %v7143_v43, %v12356_v21  ;;  %v10081_v5 = vpop.f32.mrf.mxu1  ;;  %v4109_v43 = vadd.f32 %v7161_v27, %v12359_v8  ;;  %v12365_v24 = vld [vmem:[#allocation40_spill] sm:$0xff] }
 0x330   : > { %v4232_v49 = vpop.f32.mrf.mxu0  ;;  %4638 = vmatprep.mubr.bf16.mxu1 %v12294_v15  ;;  %4831 = vmatprep.mubr.bf16.mxu0 %v12294_v15  ;;  %v4088_v31 = vadd.f32 %v7146_v10, %v9918_v36 }
 0x331   : > { %v4335_v3 = vmax.f32 %v4241_v56, 0.0  ;;  %v4233_v63 = vadd.f32 %v4232_v49, %v4072_v22 }
 0x332   : > { %v7255_v19 = vpop.f32.mrf.mxu0 }
 0x333   : > { %v10072_v44 = vpack.c.bf16 %v4335_v3, %v4334_v55  ;;  %v4333_v45 = vmax.f32 %v4233_v63, 0.0  ;;  %v4254_v6 = vadd.f32 %v7255_v19, %v4093_v25  ;;  %v7164_v55 = vadd.f32 %v9952_v34, %v9947_v51  ;;  %v10092_v3 = vpop.f32.mrf.mxu1 }
 0x334   : > { %v4245_v35 = vpop.f32.mrf.mxu0 }
 0x335   : > { %v10077_v12 = vpack.c.bf16 %v4333_v45, %v4332_v16  ;;  %v4246_v32 = vadd.f32 %v4245_v35, %v4085_v17  ;;  %v4338_v22 = vmax.f32 %v4254_v6, 0.0  ;;  %v12362_v45 = vld [vmem:[#allocation28_spill] sm:$0xff]  ;;  %v4112_v51 = vadd.f32 %v7164_v55, %v12363_v29  ;;  %v10103_v38 = vpop.f32.mrf.mxu1 }
 0x336   : > { %v7256_v11 = vpop.f32.mrf.mxu0  ;;  %v4101_v25 = vadd.f32 %v7155_v52, %v12362_v45  ;;  %v12364_v6 = vld [vmem:[#allocation36_spill] sm:$0xff]  ;;  %v7188_v45 = vadd.f32 %v10059_v0, %v10050_v30 }
 0x337   : > { %v4257_v26 = vadd.f32 %v7256_v11, %v4096_v14  ;;  %4639 = vmatmul.mubr.bf16.gmra.mxu1 %v4358_v41  ;;  %4832 = vmatmul.mubr.bf16.gmra.mxu0 %v4358_v41  ;;  %v4336_v36 = vmax.f32 %v4246_v32, 0.0  ;;  %v4104_v21 = vadd.f32 %v7158_v28, %v12364_v6  ;;  %v7173_v14 = vadd.f32 %v9982_v39, %v9977_v13  ;;  %v7195_v27 = vpop.f32.mrf.mxu1 }
 0x338   : > { %v4248_v56 = vpop.f32.mrf.mxu0  ;;  %4648 = vmatprep.mubr.bf16.mxu1 %v12294_v15  ;;  %4841 = vmatprep.mubr.bf16.mxu0 %v12294_v15  ;;  %v7170_v13 = vadd.f32 %v9972_v40, %v12365_v24  ;;  %v7185_v40 = vadd.f32 %v10039_v61, %v10032_v7  ;;  %v7182_v7 = vadd.f32 %v10023_v54, %v10013_v33 }
 0x339   : > { %v4339_v49 = vmax.f32 %v4257_v26, 0.0  ;;  %v4249_v4 = vadd.f32 %v4248_v56, %v4088_v31  ;;  %v7167_v31 = vadd.f32 %v9962_v2, %v9957_v46  ;;  %v7176_v56 = vadd.f32 %v9992_v37, %v9987_v18  ;;  %v12367_v2 = vld [vmem:[#allocation44_spill] sm:$0xff]  ;;  %v7196_v37 = vpop.f32.mrf.mxu1 }
 0x33a   : > { %v7259_v41 = vpop.f32.mrf.mxu0  ;;  %v4125_v20 = vadd.f32 %v7173_v14, %v9965_v57  ;;  %v12368_v57 = vld [vmem:[#allocation37_spill] sm:$0xff]  ;;  %v7197_v33 = vadd.f32 %v7196_v37, %v7195_v27 }
 0x33b   : > { %v10094_v63 = vpack.c.bf16 %v4339_v49, %v4338_v22  ;;  %v4337_v60 = vmax.f32 %v4249_v4, 0.0  ;;  %v4270_v16 = vadd.f32 %v7259_v41, %v4109_v43  ;;  %v12366_v41 = vld [vmem:[#allocation39_spill] sm:$0xff]  ;;  %v4120_v43 = vadd.f32 %v7170_v13, %v12368_v57 }
 0x33c   : > { %v4261_v1 = vpop.f32.mrf.mxu0  ;;  %v4117_v46 = vadd.f32 %v7167_v31, %v12366_v41 }
 0x33d   : > { %v10099_v19 = vpack.c.bf16 %v4337_v60, %v4336_v36  ;;  %v4262_v10 = vadd.f32 %v4261_v1, %v4101_v25  ;;  %v4342_v11 = vmax.f32 %v4270_v16, 0.0  ;;  %v4128_v36 = vadd.f32 %v7176_v56, %v12367_v2  ;;  %v7198_v25 = vpop.f32.mrf.mxu1 }
 0x33e   : > { %v7260_v34 = vpop.f32.mrf.mxu0  ;;  %v7179_v16 = vadd.f32 %v10002_v62, %v9997_v42  ;;  %v4144_v42 = vadd.f32 %v7188_v45, %v9990_v59  ;;  %v7191_v59 = vadd.f32 %v10081_v5, %v10070_v50  ;;  %v12372_v5 = vld [vmem:[#allocation42_spill] sm:$0xff] }
 0x33f   : > { %v4273_v35 = vadd.f32 %v7260_v34, %v4112_v51  ;;  %4649 = vmatmul.mubr.bf16.gmra.mxu1 %v10052_v47  ;;  %4842 = vmatmul.mubr.bf16.gmra.mxu0 %v10052_v47  ;;  %v4340_v22 = vmax.f32 %v4262_v10, 0.0  ;;  %v12369_v10 = vld [vmem:[#allocation46_spill] sm:$0xff]  ;;  %v7199_v30 = vpop.f32.mrf.mxu1 }
 0x340   : > { %v4264_v17 = vpop.f32.mrf.mxu0  ;;  %4658 = vmatprep.mubr.bf16.mxu1 %v12294_v15  ;;  %4851 = vmatprep.mubr.bf16.mxu0 %v12294_v15  ;;  %v4149_v27 = vadd.f32 %v7191_v59, %v9995_v48 }
 0x341   : > { %v4343_v32 = vmax.f32 %v4273_v35, 0.0  ;;  %v4265_v26 = vadd.f32 %v4264_v17, %v4104_v21  ;;  %v4141_v35 = vadd.f32 %v7185_v40, %v12369_v10  ;;  %v12370_v17 = vld [vmem:[#allocation43_spill] sm:$0xff] }
 0x342   : > { %v7263_v47 = vpop.f32.mrf.mxu0  ;;  %v4133_v14 = vadd.f32 %v7179_v16, %v12370_v17 }
 0x343   : > { %v10116_v49 = vpack.c.bf16 %v4343_v32, %v4342_v11  ;;  %v4341_v4 = vmax.f32 %v4265_v26, 0.0  ;;  %v4286_v55 = vadd.f32 %v7263_v47, %v4125_v20  ;;  %v12371_v32 = vld [vmem:[#allocation48_spill] sm:$0xff] }
 0x344   : > { %v4277_v39 = vpop.f32.mrf.mxu0  ;;  %v4136_v26 = vadd.f32 %v7182_v7, %v12371_v32 }
 0x345   : > { %v10121_v52 = vpack.c.bf16 %v4341_v4, %v4340_v22  ;;  %v4278_v60 = vadd.f32 %v4277_v39, %v4117_v46  ;;  %v4346_v23 = vmax.f32 %v4286_v55, 0.0  ;;  %v7200_v22 = vadd.f32 %v7199_v30, %v7198_v25 }
 0x346   : > { %v7264_v18 = vpop.f32.mrf.mxu0  ;;  %v7194_v39 = vadd.f32 %v10103_v38, %v10092_v3 }
 0x347   : > { %v4289_v8 = vadd.f32 %v7264_v18, %v4128_v36  ;;  %4659 = vmatmul.mubr.bf16.gmra.mxu1 %v10077_v12  ;;  %4852 = vmatmul.mubr.bf16.gmra.mxu0 %v10077_v12  ;;  %v4344_v29 = vmax.f32 %v4278_v60, 0.0  ;;  %v4160_v2 = vadd.f32 %v7200_v22, %v10016_v53 }
 0x348   : > { %v4280_v58 = vpop.f32.mrf.mxu0  ;;  %4668 = vmatprep.mubr.bf16.mxu1 %v12294_v15  ;;  %4861 = vmatprep.mubr.bf16.mxu0 %v12294_v15  ;;  %v4152_v37 = vadd.f32 %v7194_v39, %v12372_v5 }
 0x349   : > { %v4347_v28 = vmax.f32 %v4289_v8, 0.0  ;;  %v4281_v1 = vadd.f32 %v4280_v58, %v4120_v43 }
 0x34a   : > { %v7267_v12 = vpop.f32.mrf.mxu0 }
 0x34b   : > { %v10136_v51 = vpack.c.bf16 %v4347_v28, %v4346_v23  ;;  %v4345_v34 = vmax.f32 %v4281_v1, 0.0  ;;  %v4302_v21 = vadd.f32 %v7267_v12, %v4141_v35 }
 0x34c   : > { %v4293_v61 = vpop.f32.mrf.mxu0 }
 0x34d   : > { %v4366_v6 = vpack.c.bf16 %v4345_v34, %v4344_v29  ;;  %v4294_v0 = vadd.f32 %v4293_v61, %v4133_v14  ;;  %v4350_v54 = vmax.f32 %v4302_v21, 0.0 }
 0x34e   : > { %v7268_v62 = vpop.f32.mrf.mxu0 }
 0x34f   : > { %v4305_v11 = vadd.f32 %v7268_v62, %v4144_v42  ;;  %4669 = vmatmul.mubr.bf16.gmra.mxu1 %v10072_v44  ;;  %4862 = vmatmul.mubr.bf16.gmra.mxu0 %v10072_v44  ;;  %v4348_v20 = vmax.f32 %v4294_v0, 0.0  ;;  %v4157_v44 = vadd.f32 %v7197_v33, %v10005_v9 }
 0x350   : > { %v4296_v31 = vpop.f32.mrf.mxu0  ;;  %4678 = vmatprep.mubr.bf16.mxu1 %v12294_v15  ;;  %4871 = vmatprep.mubr.bf16.mxu0 %v12294_v15 }
 0x351   : > { %v4351_v56 = vmax.f32 %v4305_v11, 0.0  ;;  %v4297_v47 = vadd.f32 %v4296_v31, %v4136_v26 }
 0x352   : > { %v7271_v4 = vpop.f32.mrf.mxu0 }
 0x353   : > { %v4369_v24 = vpack.c.bf16 %v4351_v56, %v4350_v54  ;;  %v4349_v13 = vmax.f32 %v4297_v47, 0.0  ;;  %v4318_v46 = vadd.f32 %v7271_v4, %v4157_v44 }
 0x354   : > { %v4309_v55 = vpop.f32.mrf.mxu0 }
 0x355   : > { %v4368_v41 = vpack.c.bf16 %v4349_v13, %v4348_v20  ;;  %v4310_v18 = vadd.f32 %v4309_v55, %v4149_v27  ;;  %v4354_v3 = vmax.f32 %v4318_v46, 0.0 }
 0x356   : > { %v7272_v36 = vpop.f32.mrf.mxu0 }
 0x357   : > { %v4321_v50 = vadd.f32 %v7272_v36, %v4160_v2  ;;  %4679 = vmatmul.mubr.bf16.gmra.mxu1 %v10099_v19  ;;  %4872 = vmatmul.mubr.bf16.gmra.mxu0 %v10099_v19  ;;  %v4352_v48 = vmax.f32 %v4310_v18, 0.0 }
 0x358   : > { %v4312_v9 = vpop.f32.mrf.mxu0  ;;  %4688 = vmatprep.mubr.bf16.mxu1 %v12294_v15  ;;  %4881 = vmatprep.mubr.bf16.mxu0 %v12294_v15 }
 0x359   : > { %v4355_v38 = vmax.f32 %v4321_v50, 0.0  ;;  %v4313_v60 = vadd.f32 %v4312_v9, %v4152_v37 }
 0x35b   : > { %v4371_v8 = vpack.c.bf16 %v4355_v38, %v4354_v3  ;;  %v4353_v53 = vmax.f32 %v4313_v60, 0.0 }
 0x35d   : > { %v4370_v57 = vpack.c.bf16 %v4353_v53, %v4352_v48 }
 0x35f   : > { %4689 = vmatmul.mubr.bf16.gmra.mxu1 %v10094_v63  ;;  %4882 = vmatmul.mubr.bf16.gmra.mxu0 %v10094_v63 }
 0x360   : > { %4698 = vmatprep.mubr.bf16.mxu1 %v12294_v15  ;;  %4891 = vmatprep.mubr.bf16.mxu0 %v12294_v15 }
 0x367   : > { %4699 = vmatmul.mubr.bf16.gmra.mxu1 %v10121_v52  ;;  %4892 = vmatmul.mubr.bf16.gmra.mxu0 %v10121_v52 }
 0x368   : > { %4708 = vmatprep.mubr.bf16.mxu1 %v12294_v15  ;;  %4901 = vmatprep.mubr.bf16.mxu0 %v12294_v15 }
 0x36f   : > { %4709 = vmatmul.mubr.bf16.gmra.mxu1 %v10116_v49  ;;  %4902 = vmatmul.mubr.bf16.gmra.mxu0 %v10116_v49  ;;  %v4406_v49 = vlaneseq }
 0x370   : > { %4718 = vmatprep.mubr.bf16.mxu1 %v12294_v15  ;;  %4911 = vmatprep.mubr.bf16.mxu0 %v12294_v15 }
 0x371   : > { %v4407_v23 = vshrl.u32 %v4406_v49, 7 }
 0x373   : > { %v4408_v12 = vsub.s32 0, %v4407_v23  ;;  %v4416_v25 = vsub.s32 2, %v4407_v23  ;;  %v4412_v29 = vsub.s32 1, %v4407_v23 }
 0x377   : > { %4719 = vmatmul.mubr.bf16.gmra.mxu1 %v4366_v6  ;;  %4912 = vmatmul.mubr.bf16.gmra.mxu0 %v4366_v6 }
 0x378   : > { %4728 = vmatprep.mubr.bf16.mxu1 %v12294_v15  ;;  %4921 = vmatprep.mubr.bf16.mxu0 %v12294_v15 }
 0x37f   : > { %4729 = vmatmul.mubr.bf16.gmra.mxu1 %v10136_v51  ;;  %4922 = vmatmul.mubr.bf16.gmra.mxu0 %v10136_v51  ;;  %v4420_v51 = vsub.s32 3, %v4407_v23 }
 0x380   : > { %4738 = vmatprep.mubr.bf16.mxu1 %v12294_v15  ;;  %4931 = vmatprep.mubr.bf16.mxu0 %v12294_v15 }
 0x387   : > { %4739 = vmatmul.mubr.bf16.gmra.mxu1 %v4368_v41  ;;  %4932 = vmatmul.mubr.bf16.gmra.mxu0 %v4368_v41 }
 0x388   : > { %4748 = vmatprep.mubr.bf16.mxu1 %v12294_v15  ;;  %4941 = vmatprep.mubr.bf16.mxu0 %v12294_v15 }
 0x38f   : > { %4749 = vmatmul.mubr.bf16.gmra.mxu1 %v4369_v24  ;;  %4942 = vmatmul.mubr.bf16.gmra.mxu0 %v4369_v24 }
 0x390   : > { %4758 = vmatprep.mubr.bf16.mxu1 %v12294_v15  ;;  %4951 = vmatprep.mubr.bf16.mxu0 %v12294_v15 }
 0x397   : > { %4759 = vmatmul.mubr.bf16.gmra.mxu1 %v4370_v57  ;;  %4952 = vmatmul.mubr.bf16.gmra.mxu0 %v4370_v57 }
 0x398   : > { %4768 = vmatprep.mubr.bf16.mxu1 %v12294_v15  ;;  %4961 = vmatprep.mubr.bf16.mxu0 %v12294_v15  ;;  %v4404_v15 = vld [vmem:[%s11929_s6] sm:$0xf] }
 0x399   : > { %v10187_v61 = vrot.slane %v4404_v15, %v4408_v12  ;;  %v10189_v6 = vrot.slane %v4404_v15, %v4416_v25  ;;  %v10191_v21 = vrot.slane %v4404_v15, %v4412_v29  ;;  %v10193_v17 = vrot.slane %v4404_v15, %v4420_v51 }
 0x39f   : > { %4769 = vmatmul.mubr.bf16.gmra.mxu1 %v4371_v8  ;;  %4962 = vmatmul.mubr.bf16.gmra.mxu0 %v4371_v8 }
 0x3e7   : > { %v4620_v63 = vpop.f32.mrf.mxu1  ;;  %v4813_v19 = vpop.f32.mrf.mxu0 }
 0x3e8   : > { %v10208_v31 = vadd.f32 %v4620_v63, %v10187_v61  ;;  %v10211_v33 = vadd.f32 %v4813_v19, %v10189_v6 }
 0x3e9   : > { %v4622_v52 = vpop.f32.mrf.mxu1  ;;  %v4815_v43 = vpop.f32.mrf.mxu0 }
 0x3ea   : > { %v10220_v47 = vadd.f32 %v4622_v52, %v10191_v21  ;;  %v10223_v59 = vadd.f32 %v4815_v43, %v10193_v17 }
 0x3eb   : > { %v4624_v58 = vpop.f32.mrf.mxu1  ;;  %v4817_v40 = vpop.f32.mrf.mxu0 }
 0x3ec   : > { %v10196_v62 = vadd.f32 %v4624_v58, %v10187_v61  ;;  %v10199_v30 = vadd.f32 %v4817_v40, %v10189_v6 }
 0x3ed   : > { %v4626_v28 = vpop.f32.mrf.mxu1  ;;  %v4819_v1 = vpop.f32.mrf.mxu0 }
 0x3ee   : > { %v10202_v0 = vadd.f32 %v4626_v28, %v10191_v21  ;;  %v10205_v11 = vadd.f32 %v4819_v1, %v10193_v17  ;;  %v4972_v13 = vadd.f32 %v10196_v62, %v10208_v31  ;;  %v4998_v44 = vadd.f32 %v10199_v30, %v10211_v33 }
 0x3ef   : > { %v4630_v16 = vpop.f32.mrf.mxu1  ;;  %v4823_v45 = vpop.f32.mrf.mxu0 }
 0x3f0   : > { %v10214_v54 = vadd.f32 %v4630_v16, %v10187_v61  ;;  %v10217_v56 = vadd.f32 %v4823_v45, %v10189_v6  ;;  %v4985_v41 = vadd.f32 %v10202_v0, %v10220_v47  ;;  %v5011_v46 = vadd.f32 %v10205_v11, %v10223_v59 }
 0x3f1   : > { %v4632_v34 = vpop.f32.mrf.mxu1  ;;  %v4825_v10 = vpop.f32.mrf.mxu0 }
 0x3f2   : > { %v10226_v22 = vadd.f32 %v4632_v34, %v10191_v21  ;;  %v10229_v4 = vadd.f32 %v4825_v10, %v10193_v17  ;;  %v4973_v50 = vadd.f32 %v4972_v13, %v10214_v54  ;;  %v4999_v5 = vadd.f32 %v4998_v44, %v10217_v56 }
 0x3f3   : > { %v4634_v35 = vpop.f32.mrf.mxu1  ;;  %v4827_v7 = vpop.f32.mrf.mxu0 }
 0x3f4   : > { %v10236_v39 = vadd.f32 %v4634_v35, %v10187_v61  ;;  %v10239_v55 = vadd.f32 %v4827_v7, %v10189_v6  ;;  %v4986_v3 = vadd.f32 %v4985_v41, %v10226_v22  ;;  %v5012_v38 = vadd.f32 %v5011_v46, %v10229_v4 }
 0x3f5   : > { %v4636_v14 = vpop.f32.mrf.mxu1  ;;  %v4829_v42 = vpop.f32.mrf.mxu0 }
 0x3f6   : > { %v10246_v27 = vadd.f32 %v4636_v14, %v10191_v21  ;;  %v10249_v2 = vadd.f32 %v4829_v42, %v10193_v17  ;;  %v4974_v57 = vadd.f32 %v4973_v50, %v10236_v39  ;;  %v5000_v63 = vadd.f32 %v4999_v5, %v10239_v55 }
 0x3f7   : > { %v4640_v32 = vpop.f32.mrf.mxu1  ;;  %v4833_v26 = vpop.f32.mrf.mxu0 }
 0x3f8   : > { %v10254_v37 = vadd.f32 %v4640_v32, %v10187_v61  ;;  %v10257_v9 = vadd.f32 %v4833_v26, %v10189_v6  ;;  %v4987_v52 = vadd.f32 %v4986_v3, %v10246_v27  ;;  %v5013_v43 = vadd.f32 %v5012_v38, %v10249_v2 }
 0x3f9   : > { %v4642_v20 = vpop.f32.mrf.mxu1  ;;  %v4835_v24 = vpop.f32.mrf.mxu0 }
 0x3fa   : > { %v10262_v60 = vadd.f32 %v4642_v20, %v10191_v21  ;;  %v10265_v48 = vadd.f32 %v4835_v24, %v10193_v17  ;;  %v4975_v1 = vadd.f32 %v4974_v57, %v10254_v37  ;;  %v5001_v16 = vadd.f32 %v5000_v63, %v10257_v9 }
 0x3fb   : > { %v4644_v36 = vpop.f32.mrf.mxu1  ;;  %v4837_v18 = vpop.f32.mrf.mxu0 }
 0x3fc   : > { %v10270_v19 = vadd.f32 %v4644_v36, %v10187_v61  ;;  %v10273_v49 = vadd.f32 %v4837_v18, %v10189_v6  ;;  %v4988_v25 = vadd.f32 %v4987_v52, %v10262_v60  ;;  %v5014_v15 = vadd.f32 %v5013_v43, %v10265_v48 }
 0x3fd   : > { %v4646_v8 = vpop.f32.mrf.mxu1  ;;  %v4839_v53 = vpop.f32.mrf.mxu0 }
 0x3fe   : > { %12373 = vst [vmem:[#allocation47_spill] sm:$0xff] %v10270_v19  ;;  %12374 = vst [vmem:[#allocation50_spill] sm:$0xff] %v10273_v49  ;;  %v10278_v58 = vadd.f32 %v4646_v8, %v10191_v21  ;;  %v10281_v40 = vadd.f32 %v4839_v53, %v10193_v17  ;;  %v4976_v34 = vadd.f32 %v4975_v1, %v10270_v19 }
 0x3ff   : > { %v4650_v23 = vpop.f32.mrf.mxu1  ;;  %v4843_v28 = vpop.f32.mrf.mxu0  ;;  %v5002_v10 = vadd.f32 %v5001_v16, %v10273_v49 }
 0x400   : > { %12375 = vst [vmem:[#allocation52_spill] sm:$0xff] %v10278_v58  ;;  %12376 = vst [vmem:[#allocation53_spill] sm:$0xff] %v10281_v40  ;;  %v10286_v45 = vadd.f32 %v4650_v23, %v10187_v61  ;;  %v10289_v12 = vadd.f32 %v4843_v28, %v10189_v6  ;;  %v4989_v14 = vadd.f32 %v4988_v25, %v10278_v58 }
 0x401   : > { %v4652_v29 = vpop.f32.mrf.mxu1  ;;  %v4845_v51 = vpop.f32.mrf.mxu0  ;;  %v5015_v42 = vadd.f32 %v5014_v15, %v10281_v40 }
 0x402   : > { %12377 = vst [vmem:[#allocation57_spill] sm:$0xff] %v10286_v45  ;;  %12378 = vst [vmem:[#allocation56_spill] sm:$0xff] %v10289_v12  ;;  %v10296_v35 = vadd.f32 %v4652_v29, %v10191_v21  ;;  %v10299_v7 = vadd.f32 %v4845_v51, %v10193_v17  ;;  %v4977_v20 = vadd.f32 %v4976_v34, %v10286_v45 }
 0x403   : > { %v4654_v32 = vpop.f32.mrf.mxu1  ;;  %v4847_v26 = vpop.f32.mrf.mxu0  ;;  %v5003_v24 = vadd.f32 %v5002_v10, %v10289_v12 }
 0x404   : > { %12379 = vst [vmem:[#allocation54_spill] sm:$0xff] %v10296_v35  ;;  %12380 = vst [vmem:[#allocation9_spill] sm:$0xff] %v10299_v7  ;;  %v10306_v13 = vadd.f32 %v4654_v32, %v10187_v61  ;;  %v10309_v44 = vadd.f32 %v4847_v26, %v10189_v6  ;;  %v4990_v41 = vadd.f32 %v4989_v14, %v10296_v35 }
 0x405   : > { %v5016_v46 = vadd.f32 %v5015_v42, %v10299_v7  ;;  %v4656_v36 = vpop.f32.mrf.mxu1  ;;  %v4849_v18 = vpop.f32.mrf.mxu0 }
 0x406   : > { %12381 = vst [vmem:[#allocation13_spill] sm:$0xff] %v10306_v13  ;;  %12382 = vst [vmem:[#allocation17_spill] sm:$0xff] %v10309_v44  ;;  %v4978_v50 = vadd.f32 %v4977_v20, %v10306_v13  ;;  %v5004_v5 = vadd.f32 %v5003_v24, %v10309_v44  ;;  %v10316_v3 = vadd.f32 %v4656_v36, %v10191_v21 }
 0x407   : > { %v10319_v38 = vadd.f32 %v4849_v18, %v10193_v17  ;;  %v4660_v8 = vpop.f32.mrf.mxu1  ;;  %v4853_v53 = vpop.f32.mrf.mxu0 }
 0x408   : > { %12383 = vst [vmem:[#allocation58_spill] sm:$0xff] %v10316_v3  ;;  %v4979_v57 = vrot.slane %v4978_v50, 4  ;;  %v5005_v63 = vrot.slane %v5004_v5, 4  ;;  %v4991_v52 = vadd.f32 %v4990_v41, %v10316_v3 }
 0x409   : > { %12384 = vst [vmem:[#allocation26_spill] sm:$0xff] %v10319_v38  ;;  %v5017_v43 = vadd.f32 %v5016_v46, %v10319_v38  ;;  %v4662_v23 = vpop.f32.mrf.mxu1  ;;  %v4855_v28 = vpop.f32.mrf.mxu0 }
 0x40a   : > { %v4980_v1 = vadd.f32 %v4979_v57, %v4978_v50  ;;  %v5006_v16 = vadd.f32 %v5005_v63, %v5004_v5  ;;  %v4992_v25 = vrot.slane %v4991_v52, 4 }
 0x40b   : > { %v5018_v15 = vrot.slane %v5017_v43, 4  ;;  %v4664_v29 = vpop.f32.mrf.mxu1  ;;  %v4857_v51 = vpop.f32.mrf.mxu0 }
 0x40c   : > { %v4981_v34 = vrot.slane %v4980_v1, 2  ;;  %v5007_v10 = vrot.slane %v5006_v16, 2  ;;  %v4993_v14 = vadd.f32 %v4992_v25, %v4991_v52  ;;  %v10324_v7 = vadd.f32 %v4664_v29, %v10187_v61 }
 0x40d   : > { %v5019_v42 = vadd.f32 %v5018_v15, %v5017_v43  ;;  %v4666_v32 = vpop.f32.mrf.mxu1  ;;  %v4859_v26 = vpop.f32.mrf.mxu0  ;;  %v10327_v52 = vadd.f32 %v4857_v51, %v10189_v6  ;;  %v10342_v51 = vadd.f32 %v4853_v53, %v10189_v6 }
 0x40e   : > { %v4982_v20 = vadd.f32 %v4981_v34, %v4980_v1  ;;  %v5008_v24 = vadd.f32 %v5007_v10, %v5006_v16  ;;  %v4994_v36 = vrot.slane %v4993_v14, 2  ;;  %12385 = vst [vmem:[#allocation31_spill] sm:$0xff] %v10324_v7  ;;  %v10330_v43 = vadd.f32 %v4666_v32, %v10191_v21 }
 0x40f   : > { %v5020_v41 = vrot.slane %v5019_v42, 2  ;;  %v4670_v18 = vpop.f32.mrf.mxu1  ;;  %v4863_v46 = vpop.f32.mrf.mxu0  ;;  %12386 = vst [vmem:[#allocation34_spill] sm:$0xff] %v10327_v52  ;;  %v10333_v10 = vadd.f32 %v4660_v8, %v10187_v61  ;;  %12391 = vst [vmem:[#allocation51_spill] sm:$0xff] %v10342_v51  ;;  %v10353_v8 = vadd.f32 %v4855_v28, %v10193_v17 }
 0x410   : > { %v4983_v38 = vrot.slane %v4982_v20, 1  ;;  %v5009_v44 = vrot.slane %v5008_v24, 1  ;;  %v4995_v50 = vadd.f32 %v4994_v36, %v4993_v14  ;;  %12387 = vst [vmem:[#allocation38_spill] sm:$0xff] %v10330_v43  ;;  %v10339_v29 = vadd.f32 %v4670_v18, %v10187_v61 }
 0x411   : > { %v5021_v5 = vadd.f32 %v5020_v41, %v5019_v42  ;;  %v4672_v57 = vpop.f32.mrf.mxu1  ;;  %v4865_v63 = vpop.f32.mrf.mxu0  ;;  %12388 = vst [vmem:[#allocation41_spill] sm:$0xff] %v10333_v10  ;;  %v10345_v14 = vadd.f32 %v4662_v23, %v10191_v21  ;;  %v10348_v42 = vadd.f32 %v4863_v46, %v10189_v6  ;;  %12394 = vst [vmem:[#allocation7_spill] sm:$0xff] %v10353_v8 }
 0x412   : > { %v4984_v3 = vadd.f32 %v4983_v38, %v4982_v20  ;;  %v4996_v13 = vrot.slane %v4995_v50, 1  ;;  %v5010_v25 = vadd.f32 %v5009_v44, %v5008_v24  ;;  %v10336_v38 = vadd.f32 %v4859_v26, %v10193_v17  ;;  %12390 = vst [vmem:[#allocation49_spill] sm:$0xff] %v10339_v29 }
 0x413   : > { %v4674_v1 = vpop.f32.mrf.mxu1  ;;  %v4867_v16 = vpop.f32.mrf.mxu0  ;;  %v5022_v15 = vrot.slane %v5021_v5, 1  ;;  %12392 = vst [vmem:[#allocation55_spill] sm:$0xff] %v10345_v14  ;;  %12393 = vst [vmem:[#allocation15_spill] sm:$0xff] %v10348_v42  ;;  %v5024_v26 = vadd.f32 %v10324_v7, %v10333_v10  ;;  %v10358_v20 = vadd.f32 %v4672_v57, %v10191_v21  ;;  %v5050_v23 = vadd.f32 %v10327_v52, %v10342_v51 }
 0x414   : > { %v4997_v34 = vadd.f32 %v4996_v13, %v4995_v50  ;;  %12389 = vst [vmem:[#allocation45_spill] sm:$0xff] %v10336_v38  ;;  %v10350_v32 = vmul.f32 0.015625, %v4984_v3  ;;  %v5037_v24 = vadd.f32 %v10330_v43, %v10345_v14  ;;  %v10366_v18 = vmul.f32 0.015625, %v5010_v25 }
 0x415   : > { %v4676_v44 = vpop.f32.mrf.mxu1  ;;  %v4869_v13 = vpop.f32.mrf.mxu0  ;;  %12395 = vst [vmem:[#allocation8_spill] sm:$0xff] %v10358_v20  ;;  %v5023_v41 = vadd.f32 %v5022_v15, %v5021_v5  ;;  %v5063_v28 = vadd.f32 %v10336_v38, %v10353_v8  ;;  %v5025_v46 = vadd.f32 %v5024_v26, %v10339_v29  ;;  %v10372_v50 = vadd.f32 %v4865_v63, %v10193_v17 }
 0x416   : > { %v10360_v53 = vmul.f32 0.015625, %v4997_v34  ;;  %v10375_v57 = vadd.f32 %v4674_v1, %v10187_v61  ;;  %v5051_v34 = vadd.f32 %v5050_v23, %v10348_v42  ;;  %v5222_v25 = vmul.f32 %v10350_v32, %v10350_v32 }
 0x417   : > { %v4680_v36 = vpop.f32.mrf.mxu1  ;;  %v4873_v3 = vpop.f32.mrf.mxu0  ;;  %12396 = vst [vmem:[#allocation12_spill] sm:$0xff] %v10372_v50  ;;  %v5038_v26 = vadd.f32 %v5037_v24, %v10358_v20  ;;  %v10386_v63 = vadd.f32 %v4867_v16, %v10189_v6  ;;  %v10389_v1 = vadd.f32 %v4676_v44, %v10191_v21  ;;  %v10392_v23 = vadd.f32 %v4869_v13, %v10193_v17 }
 0x418   : > { %12397 = vst [vmem:[#allocation10_spill] sm:$0xff] %v10375_v57  ;;  %v5197_v5 = vadd.f32 %v10360_v53, %v10350_v32  ;;  %v5223_v15 = vmul.f32 %v10360_v53, %v10360_v53  ;;  %v10394_v42 = vmul.f32 0.015625, %v5023_v41  ;;  %v5224_v14 = vmul.f32 %v10366_v18, %v10366_v18 }
 0x419   : > { %v4682_v52 = vpop.f32.mrf.mxu1  ;;  %v4875_v51 = vpop.f32.mrf.mxu0  ;;  %12398 = vst [vmem:[#allocation11_spill] sm:$0xff] %v10386_v63  ;;  %12399 = vst [vmem:[#allocation19_spill] sm:$0xff] %v10389_v1  ;;  %v5064_v24 = vadd.f32 %v5063_v28, %v10372_v50  ;;  %v5026_v16 = vadd.f32 %v5025_v46, %v10375_v57  ;;  %v10402_v44 = vadd.f32 %v4680_v36, %v10187_v61 }
 0x41a   : > { %12400 = vst [vmem:[#allocation14_spill] sm:$0xff] %v10392_v23  ;;  %v5198_v43 = vadd.f32 %v5197_v5, %v10366_v18  ;;  %v5238_v29 = vadd.f32 %v5223_v15, %v5222_v25  ;;  %v10405_v13 = vadd.f32 %v4873_v3, %v10189_v6  ;;  %v10408_v20 = vadd.f32 %v4682_v52, %v10191_v21 }
 0x41b   : > { %v4684_v38 = vpop.f32.mrf.mxu1  ;;  %v4877_v8 = vpop.f32.mrf.mxu0  ;;  %12401 = vst [vmem:[#allocation22_spill] sm:$0xff] %v10402_v44  ;;  %v10411_v41 = vadd.f32 %v4875_v51, %v10193_v17  ;;  %v5052_v28 = vadd.f32 %v5051_v34, %v10386_v63  ;;  %v5039_v46 = vadd.f32 %v5038_v26, %v10389_v1  ;;  %v5065_v52 = vadd.f32 %v5064_v24, %v10392_v23 }
 0x41c   : > { %12402 = vst [vmem:[#allocation18_spill] sm:$0xff] %v10405_v13  ;;  %12403 = vst [vmem:[#allocation20_spill] sm:$0xff] %v10408_v20  ;;  %v5199_v25 = vadd.f32 %v5198_v43, %v10394_v42  ;;  %v5239_v15 = vadd.f32 %v5238_v29, %v5224_v14  ;;  %v10417_v36 = vadd.f32 %v4684_v38, %v10187_v61 }
 0x41d   : > { %12404 = vst [vmem:[#allocation16_spill] sm:$0xff] %v10411_v41  ;;  %v4686_v5 = vpop.f32.mrf.mxu1  ;;  %v4879_v7 = vpop.f32.mrf.mxu0  ;;  %v10420_v3 = vadd.f32 %v4877_v8, %v10189_v6  ;;  %v5225_v14 = vmul.f32 %v10394_v42, %v10394_v42  ;;  %v5027_v38 = vadd.f32 %v5026_v16, %v10402_v44  ;;  %v5053_v34 = vadd.f32 %v5052_v28, %v10405_v13 }
 0x41e   : > { %12405 = vst [vmem:[#allocation27_spill] sm:$0xff] %v10417_v36  ;;  %v10424_v51 = vadd.f32 %v4686_v5, %v10191_v21  ;;  %v10427_v50 = vadd.f32 %v4879_v7, %v10193_v17  ;;  %5200 = vadd.xlane.f32.xlu0 %v5199_v25  ;;  %v5040_v24 = vadd.f32 %v5039_v46, %v10408_v20 }
 0x41f   : > { %12406 = vst [vmem:[#allocation29_spill] sm:$0xff] %v10420_v3  ;;  %v4690_v43 = vpop.f32.mrf.mxu1  ;;  %v4883_v29 = vpop.f32.mrf.mxu0  ;;  %v5066_v7 = vadd.f32 %v5065_v52, %v10411_v41  ;;  %v5240_v23 = vadd.f32 %v5239_v15, %v5225_v14  ;;  %v5028_v63 = vadd.f32 %v5027_v38, %v10417_v36  ;;  %v5054_v1 = vadd.f32 %v5053_v34, %v10420_v3 }
 0x420   : > { %12407 = vst [vmem:[#allocation21_spill] sm:$0xff] %v10424_v51  ;;  %12408 = vst [vmem:[#allocation30_spill] sm:$0xff] %v10427_v50  ;;  %v10434_v8 = vadd.f32 %v4690_v43, %v10187_v61  ;;  %v10437_v26 = vadd.f32 %v4883_v29, %v10189_v6  ;;  %v5041_v43 = vadd.f32 %v5040_v24, %v10424_v51 }
 0x421   : > { %v4692_v5 = vpop.f32.mrf.mxu1  ;;  %v4885_v25 = vpop.f32.mrf.mxu0  ;;  %v5067_v29 = vadd.f32 %v5066_v7, %v10427_v50 }
 0x422   : > { %12409 = vst [vmem:[#allocation23_spill] sm:$0xff] %v10434_v8  ;;  %12410 = vst [vmem:[#allocation25_spill] sm:$0xff] %v10437_v26  ;;  %v10444_v16 = vadd.f32 %v4692_v5, %v10191_v21  ;;  %v10447_v28 = vadd.f32 %v4885_v25, %v10193_v17  ;;  %5241 = vadd.xlane.f32.xlu0 %v5240_v23  ;;  %v5029_v41 = vadd.f32 %v5028_v63, %v10434_v8 }
 0x423   : > { %v4694_v46 = vpop.f32.mrf.mxu1  ;;  %v4887_v52 = vpop.f32.mrf.mxu0  ;;  %v5055_v15 = vadd.f32 %v5054_v1, %v10437_v26 }
 0x424   : > { %12411 = vst [vmem:[#allocation33_spill] sm:$0xff] %v10444_v16  ;;  %12412 = vst [vmem:[#allocation24_spill] sm:$0xff] %v10447_v28  ;;  %v10454_v14 = vadd.f32 %v4694_v46, %v10187_v61  ;;  %v10457_v38 = vadd.f32 %v4887_v52, %v10189_v6  ;;  %v5042_v34 = vadd.f32 %v5041_v43, %v10444_v16 }
 0x425   : > { %v5068_v5 = vadd.f32 %v5067_v29, %v10447_v28  ;;  %v4696_v24 = vpop.f32.mrf.mxu1  ;;  %v4889_v25 = vpop.f32.mrf.mxu0 }
 0x426   : > { %12413 = vst [vmem:[#allocation35_spill] sm:$0xff] %v10454_v14  ;;  %12414 = vst [vmem:[#allocation28_spill] sm:$0xff] %v10457_v38  ;;  %v5030_v23 = vadd.f32 %v5029_v41, %v10454_v14  ;;  %v5056_v7 = vadd.f32 %v5055_v15, %v10457_v38  ;;  %v10464_v63 = vadd.f32 %v4696_v24, %v10191_v21 }
 0x427   : > { %v10467_v1 = vadd.f32 %v4889_v25, %v10193_v17  ;;  %v4700_v46 = vpop.f32.mrf.mxu1  ;;  %v4893_v26 = vpop.f32.mrf.mxu0 }
 0x428   : > { %12415 = vst [vmem:[#allocation32_spill] sm:$0xff] %v10464_v63  ;;  %v5031_v52 = vrot.slane %v5030_v23, 4  ;;  %v5057_v8 = vrot.slane %v5056_v7, 4  ;;  %v5043_v43 = vadd.f32 %v5042_v34, %v10464_v63 }
 0x429   : > { %12416 = vst [vmem:[#allocation36_spill] sm:$0xff] %v10467_v1  ;;  %v5069_v29 = vadd.f32 %v5068_v5, %v10467_v1  ;;  %v4702_v28 = vpop.f32.mrf.mxu1  ;;  %v4895_v16 = vpop.f32.mrf.mxu0 }
 0x42a   : > { %v5032_v50 = vadd.f32 %v5031_v52, %v5030_v23  ;;  %v5058_v41 = vadd.f32 %v5057_v8, %v5056_v7  ;;  %v5044_v14 = vrot.slane %v5043_v43, 4  ;;  %v10472_v7 = vadd.f32 %v4700_v46, %v10187_v61 }
 0x42b   : > { %v5070_v15 = vrot.slane %v5069_v29, 4  ;;  %v4704_v38 = vpop.f32.mrf.mxu1  ;;  %v4897_v24 = vpop.f32.mrf.mxu0 }
 0x42c   : > { %v5033_v3 = vrot.slane %v5032_v50, 2  ;;  %v5059_v51 = vrot.slane %v5058_v41, 2  ;;  %v5045_v25 = vadd.f32 %v5044_v14, %v5043_v43  ;;  %12417 = vst [vmem:[#allocation40_spill] sm:$0xff] %v10472_v7  ;;  %v10475_v43 = vadd.f32 %v4893_v26, %v10189_v6 }
 0x42d   : > { %v5071_v36 = vadd.f32 %v5070_v15, %v5069_v29  ;;  %v4706_v13 = vpop.f32.mrf.mxu1  ;;  %v4899_v20 = vpop.f32.mrf.mxu0  ;;  %v10498_v15 = vadd.f32 %v4895_v16, %v10193_v17 }
 0x42e   : > { %v5034_v44 = vadd.f32 %v5033_v3, %v5032_v50  ;;  %v5060_v57 = vadd.f32 %v5059_v51, %v5058_v41  ;;  %v5046_v10 = vrot.slane %v5045_v25, 2  ;;  %12418 = vst [vmem:[#allocation39_spill] sm:$0xff] %v10475_v43  ;;  %v10478_v50 = vadd.f32 %v4704_v38, %v10187_v61 }
 0x42f   : > { %v5072_v34 = vrot.slane %v5071_v36, 2  ;;  %v4710_v63 = vpop.f32.mrf.mxu1  ;;  %v4903_v5 = vpop.f32.mrf.mxu0  ;;  %v10481_v3 = vadd.f32 %v4897_v24, %v10189_v6  ;;  %v10484_v51 = vadd.f32 %v4706_v13, %v10191_v21  ;;  %v10490_v26 = vadd.f32 %v4899_v20, %v10193_v17  ;;  %12426 = vst [vmem:[#allocation60_spill] sm:$0xff] %v10498_v15 }
 0x430   : > { %v5035_v1 = vrot.slane %v5034_v44, 1  ;;  %v5061_v12 = vrot.slane %v5060_v57, 1  ;;  %v5047_v23 = vadd.f32 %v5046_v10, %v5045_v25  ;;  %12419 = vst [vmem:[#allocation44_spill] sm:$0xff] %v10478_v50  ;;  %v10493_v38 = vadd.f32 %v4710_v63, %v10187_v61 }
 0x431   : > { %v5073_v8 = vadd.f32 %v5072_v34, %v5071_v36  ;;  %v4712_v52 = vpop.f32.mrf.mxu1  ;;  %v4905_v35 = vpop.f32.mrf.mxu0  ;;  %12420 = vst [vmem:[#allocation37_spill] sm:$0xff] %v10481_v3  ;;  %12421 = vst [vmem:[#allocation46_spill] sm:$0xff] %v10484_v51  ;;  %v10501_v13 = vadd.f32 %v4903_v5, %v10189_v6  ;;  %v5076_v20 = vadd.f32 %v10478_v50, %v10472_v7 }
 0x432   : > { %v5036_v45 = vadd.f32 %v5035_v1, %v5034_v44  ;;  %v5048_v14 = vrot.slane %v5047_v23, 1  ;;  %v5062_v46 = vadd.f32 %v5061_v12, %v5060_v57  ;;  %v10487_v44 = vadd.f32 %v4702_v28, %v10191_v21  ;;  %12423 = vst [vmem:[#allocation48_spill] sm:$0xff] %v10490_v26  ;;  %12424 = vst [vmem:[#allocation42_spill] sm:$0xff] %v10493_v38 }
 0x433   : > { %v4714_v10 = vpop.f32.mrf.mxu1  ;;  %v4907_v36 = vpop.f32.mrf.mxu0  ;;  %v5074_v29 = vrot.slane %v5073_v8, 1  ;;  %12427 = vst [vmem:[#allocation61_spill] sm:$0xff] %v10501_v13  ;;  %v10508_v28 = vadd.f32 %v4712_v52, %v10191_v21  ;;  %v5102_v16 = vadd.f32 %v10481_v3, %v10475_v43 }
 0x434   : > { %v5049_v41 = vadd.f32 %v5048_v14, %v5047_v23  ;;  %12422 = vst [vmem:[#allocation43_spill] sm:$0xff] %v10487_v44  ;;  %v10495_v1 = vmul.f32 0.015625, %v5036_v45  ;;  %v10511_v45 = vadd.f32 %v4905_v35, %v10193_v17  ;;  %v5089_v63 = vadd.f32 %v10484_v51, %v10487_v44 }
 0x435   : > { %v4716_v12 = vpop.f32.mrf.mxu1  ;;  %v4909_v57 = vpop.f32.mrf.mxu0  ;;  %v5075_v24 = vadd.f32 %v5074_v29, %v5073_v8  ;;  %12429 = vst [vmem:[#allocation63_spill] sm:$0xff] %v10508_v28  ;;  %v10517_v23 = vmul.f32 0.015625, %v5062_v46  ;;  %v5115_v8 = vadd.f32 %v10490_v26, %v10498_v15  ;;  %v5077_v14 = vadd.f32 %v5076_v20, %v10493_v38 }
 0x436   : > { %12425 = vst [vmem:[#allocation59_spill] sm:$0xff] %v10495_v1  ;;  %v10503_v25 = vmul.f32 0.015625, %v5049_v41  ;;  %12430 = vst [vmem:[#allocation64_spill] sm:$0xff] %v10511_v45  ;;  %v10523_v52 = vadd.f32 %v4714_v10, %v10187_v61  ;;  %v5103_v29 = vadd.f32 %v5102_v16, %v10501_v13  ;;  %v5226_v46 = vmul.f32 %v10495_v1, %v10495_v1 }
 0x437   : > { %v4720_v34 = vpop.f32.mrf.mxu1  ;;  %v4913_v5 = vpop.f32.mrf.mxu0  ;;  %12431 = vst [vmem:[#allocation65_spill] sm:$0xff] %v10517_v23  ;;  %v10525_v35 = vmul.f32 0.015625, %v5075_v24  ;;  %v5090_v20 = vadd.f32 %v5089_v63, %v10508_v28  ;;  %v5116_v10 = vadd.f32 %v5115_v8, %v10511_v45  ;;  %v10537_v24 = vadd.f32 %v4907_v36, %v10189_v6 }
 0x438   : > { %12428 = vst [vmem:[#allocation62_spill] sm:$0xff] %v10503_v25  ;;  %12432 = vst [vmem:[#allocation66_spill] sm:$0xff] %v10523_v52  ;;  %v5202_v43 = vadd.f32 %v10503_v25, %v10495_v1  ;;  %v5227_v26 = vmul.f32 %v10503_v25, %v10503_v25  ;;  %v10540_v16 = vadd.f32 %v4716_v12, %v10191_v21  ;;  %v12506_v25 = vld [vmem:[#allocation26_spill] sm:$0xff] }
 0x439   : > { %12433 = vst [vmem:[#allocation67_spill] sm:$0xff] %v10525_v35  ;;  %v4722_v41 = vpop.f32.mrf.mxu1  ;;  %v4915_v3 = vpop.f32.mrf.mxu0  ;;  %12434 = vst [vmem:[#allocation68_spill] sm:$0xff] %v10537_v24  ;;  %v10543_v15 = vadd.f32 %v4909_v57, %v10193_v17  ;;  %v5228_v38 = vmul.f32 %v10517_v23, %v10517_v23  ;;  %v5078_v63 = vadd.f32 %v5077_v14, %v10523_v52 }
 0x43a   : > { %12435 = vst [vmem:[#allocation69_spill] sm:$0xff] %v10540_v16  ;;  %v5203_v44 = vadd.f32 %v5202_v43, %v10517_v23  ;;  %v5243_v50 = vadd.f32 %v5227_v26, %v5226_v46  ;;  %v10550_v8 = vadd.f32 %v4720_v34, %v10187_v61  ;;  %v10553_v36 = vadd.f32 %v4913_v5, %v10189_v6 }
 0x43b   : > { %12436 = vst [vmem:[#allocation70_spill] sm:$0xff] %v10543_v15  ;;  %v4724_v13 = vpop.f32.mrf.mxu1  ;;  %v4917_v51 = vpop.f32.mrf.mxu0  ;;  %v5229_v12 = vmul.f32 %v10525_v35, %v10525_v35  ;;  %v10558_v57 = vadd.f32 %v4722_v41, %v10191_v21  ;;  %v10561_v43 = vadd.f32 %v4915_v3, %v10193_v17  ;;  %v5104_v34 = vadd.f32 %v5103_v29, %v10537_v24 }
 0x43c   : > { %12437 = vst [vmem:[#allocation71_spill] sm:$0xff] %v10550_v8  ;;  %12438 = vst [vmem:[#allocation72_spill] sm:$0xff] %v10553_v36  ;;  %v5204_v26 = vadd.f32 %v5203_v44, %v10525_v35  ;;  %v5244_v14 = vadd.f32 %v5243_v50, %v5228_v38  ;;  %v5091_v46 = vadd.f32 %v5090_v20, %v10540_v16 }
 0x43d   : > { %12439 = vst [vmem:[#allocation73_spill] sm:$0xff] %v10558_v57  ;;  %12440 = vst [vmem:[#allocation74_spill] sm:$0xff] %v10561_v43  ;;  %v4726_v45 = vpop.f32.mrf.mxu1  ;;  %v4919_v28 = vpop.f32.mrf.mxu0  ;;  %v10567_v5 = vadd.f32 %v4724_v13, %v10187_v61  ;;  %v10570_v52 = vadd.f32 %v4917_v51, %v10189_v6  ;;  %v5117_v41 = vadd.f32 %v5116_v10, %v10543_v15 }
 0x43e   : > { %v10574_v3 = vadd.f32 %v4726_v45, %v10191_v21  ;;  %v10577_v7 = vadd.f32 %v4919_v28, %v10193_v17  ;;  %5205 = vadd.xlane.f32.xlu0 %v5204_v26  ;;  %v5245_v38 = vadd.f32 %v5244_v14, %v5229_v12  ;;  %v5079_v29 = vadd.f32 %v5078_v63, %v10550_v8 }
 0x43f   : > { %12441 = vst [vmem:[#allocation75_spill] sm:$0xff] %v10567_v5  ;;  %12442 = vst [vmem:[#allocation76_spill] sm:$0xff] %v10570_v52  ;;  %v4730_v50 = vpop.f32.mrf.mxu1  ;;  %v4923_v44 = vpop.f32.mrf.mxu0  ;;  %v5105_v13 = vadd.f32 %v5104_v34, %v10553_v36  ;;  %v5092_v45 = vadd.f32 %v5091_v46, %v10558_v57  ;;  %v5118_v10 = vadd.f32 %v5117_v41, %v10561_v43 }
 0x440   : > { %12443 = vst [vmem:[#allocation77_spill] sm:$0xff] %v10574_v3  ;;  %12444 = vst [vmem:[#allocation78_spill] sm:$0xff] %v10577_v7  ;;  %v10582_v20 = vadd.f32 %v4730_v50, %v10187_v61  ;;  %v10585_v51 = vadd.f32 %v4923_v44, %v10189_v6  ;;  %5246 = vadd.xlane.f32.xlu1 %v5245_v38  ;;  %v5080_v15 = vadd.f32 %v5079_v29, %v10567_v5 }
 0x441   : > { %v4732_v28 = vpop.f32.mrf.mxu1  ;;  %v4925_v26 = vpop.f32.mrf.mxu0  ;;  %v5106_v12 = vadd.f32 %v5105_v13, %v10570_v52  ;;  %v5093_v34 = vadd.f32 %v5092_v45, %v10574_v3  ;;  %v5119_v50 = vadd.f32 %v5118_v10, %v10577_v7 }
 0x442   : > { %12445 = vst [vmem:[#allocation79_spill] sm:$0xff] %v10582_v20  ;;  %12446 = vst [vmem:[#allocation80_spill] sm:$0xff] %v10585_v51  ;;  %v10592_v63 = vadd.f32 %v4732_v28, %v10191_v21  ;;  %v10595_v14 = vadd.f32 %v4925_v26, %v10193_v17  ;;  %v5081_v41 = vadd.f32 %v5080_v15, %v10582_v20 }
 0x443   : > { %v4734_v46 = vpop.f32.mrf.mxu1  ;;  %v4927_v44 = vpop.f32.mrf.mxu0  ;;  %v5107_v38 = vadd.f32 %v5106_v12, %v10585_v51 }
 0x444   : > { %12447 = vst [vmem:[#allocation81_spill] sm:$0xff] %v10592_v63  ;;  %12448 = vst [vmem:[#allocation82_spill] sm:$0xff] %v10595_v14  ;;  %v10602_v29 = vadd.f32 %v4734_v46, %v10187_v61  ;;  %v10605_v13 = vadd.f32 %v4927_v44, %v10189_v6  ;;  %v5094_v28 = vadd.f32 %v5093_v34, %v10592_v63 }
 0x445   : > { %v5120_v26 = vadd.f32 %v5119_v50, %v10595_v14  ;;  %v4736_v52 = vpop.f32.mrf.mxu1  ;;  %v4929_v45 = vpop.f32.mrf.mxu0 }
 0x446   : > { %12449 = vst [vmem:[#allocation83_spill] sm:$0xff] %v10602_v29  ;;  %12450 = vst [vmem:[#allocation84_spill] sm:$0xff] %v10605_v13  ;;  %v5082_v10 = vadd.f32 %v5081_v41, %v10602_v29  ;;  %v5108_v7 = vadd.f32 %v5107_v38, %v10605_v13  ;;  %v10612_v15 = vadd.f32 %v4736_v52, %v10191_v21 }
 0x447   : > { %v10615_v12 = vadd.f32 %v4929_v45, %v10193_v17  ;;  %v4740_v46 = vpop.f32.mrf.mxu1  ;;  %v4933_v51 = vpop.f32.mrf.mxu0 }
 0x448   : > { %12451 = vst [vmem:[#allocation85_spill] sm:$0xff] %v10612_v15  ;;  %v5083_v44 = vrot.slane %v5082_v10, 4  ;;  %v5109_v20 = vrot.slane %v5108_v7, 4  ;;  %v5095_v34 = vadd.f32 %v5094_v28, %v10612_v15 }
 0x449   : > { %12452 = vst [vmem:[#allocation86_spill] sm:$0xff] %v10615_v12  ;;  %v5121_v50 = vadd.f32 %v5120_v26, %v10615_v12  ;;  %v4742_v14 = vpop.f32.mrf.mxu1  ;;  %v4935_v63 = vpop.f32.mrf.mxu0 }
 0x44a   : > { %v5084_v3 = vadd.f32 %v5083_v44, %v5082_v10  ;;  %v5110_v41 = vadd.f32 %v5109_v20, %v5108_v7  ;;  %v5096_v29 = vrot.slane %v5095_v34, 4  ;;  %v10620_v20 = vadd.f32 %v4740_v46, %v10187_v61 }
 0x44b   : > { %v5122_v38 = vrot.slane %v5121_v50, 4  ;;  %v4744_v13 = vpop.f32.mrf.mxu1  ;;  %v4937_v52 = vpop.f32.mrf.mxu0 }
 0x44c   : > { %v5085_v5 = vrot.slane %v5084_v3, 2  ;;  %v5111_v43 = vrot.slane %v5110_v41, 2  ;;  %v5097_v45 = vadd.f32 %v5096_v29, %v5095_v34  ;;  %12453 = vst [vmem:[#allocation87_spill] sm:$0xff] %v10620_v20  ;;  %v10623_v34 = vadd.f32 %v4933_v51, %v10189_v6 }
 0x44d   : > { %v5123_v36 = vadd.f32 %v5122_v38, %v5121_v50  ;;  %v4746_v57 = vpop.f32.mrf.mxu1  ;;  %v4939_v8 = vpop.f32.mrf.mxu0  ;;  %v10646_v38 = vadd.f32 %v4935_v63, %v10193_v17 }
 0x44e   : > { %v5086_v24 = vadd.f32 %v5085_v5, %v5084_v3  ;;  %v5112_v16 = vadd.f32 %v5111_v43, %v5110_v41  ;;  %v5098_v40 = vrot.slane %v5097_v45, 2  ;;  %12454 = vst [vmem:[#allocation88_spill] sm:$0xff] %v10623_v34  ;;  %v10626_v43 = vadd.f32 %v4744_v13, %v10187_v61 }
 0x44f   : > { %v5124_v28 = vrot.slane %v5123_v36, 2  ;;  %v4750_v15 = vpop.f32.mrf.mxu1  ;;  %v4943_v26 = vpop.f32.mrf.mxu0  ;;  %v10629_v5 = vadd.f32 %v4937_v52, %v10189_v6  ;;  %v10632_v3 = vadd.f32 %v4746_v57, %v10191_v21  ;;  %v10638_v51 = vadd.f32 %v4939_v8, %v10193_v17  ;;  %12462 = vst [vmem:[#allocation96_spill] sm:$0xff] %v10646_v38 }
 0x450   : > { %v5087_v12 = vrot.slane %v5086_v24, 1  ;;  %v5113_v49 = vrot.slane %v5112_v16, 1  ;;  %v5099_v10 = vadd.f32 %v5098_v40, %v5097_v45  ;;  %12455 = vst [vmem:[#allocation89_spill] sm:$0xff] %v10626_v43  ;;  %v10641_v13 = vadd.f32 %v4750_v15, %v10187_v61 }
 0x451   : > { %v5125_v7 = vadd.f32 %v5124_v28, %v5123_v36  ;;  %v4752_v44 = vpop.f32.mrf.mxu1  ;;  %v4945_v58 = vpop.f32.mrf.mxu0  ;;  %12456 = vst [vmem:[#allocation90_spill] sm:$0xff] %v10629_v5  ;;  %12457 = vst [vmem:[#allocation91_spill] sm:$0xff] %v10632_v3  ;;  %v10649_v57 = vadd.f32 %v4943_v26, %v10189_v6  ;;  %v5128_v8 = vadd.f32 %v10626_v43, %v10620_v20 }
 0x452   : > { %v5088_v19 = vadd.f32 %v5087_v12, %v5086_v24  ;;  %v5100_v29 = vrot.slane %v5099_v10, 1  ;;  %v5114_v46 = vadd.f32 %v5113_v49, %v5112_v16  ;;  %v10635_v24 = vadd.f32 %v4742_v14, %v10191_v21  ;;  %12459 = vst [vmem:[#allocation93_spill] sm:$0xff] %v10638_v51  ;;  %12460 = vst [vmem:[#allocation94_spill] sm:$0xff] %v10641_v13 }
 0x453   : > { %v4754_v40 = vpop.f32.mrf.mxu1  ;;  %v4947_v36 = vpop.f32.mrf.mxu0  ;;  %v5126_v50 = vrot.slane %v5125_v7, 1  ;;  %12463 = vst [vmem:[#allocation97_spill] sm:$0xff] %v10649_v57  ;;  %v10656_v14 = vadd.f32 %v4752_v44, %v10191_v21  ;;  %v5154_v63 = vadd.f32 %v10629_v5, %v10623_v34 }
 0x454   : > { %v5101_v41 = vadd.f32 %v5100_v29, %v5099_v10  ;;  %12458 = vst [vmem:[#allocation92_spill] sm:$0xff] %v10635_v24  ;;  %v10643_v12 = vmul.f32 0.015625, %v5088_v19  ;;  %v10659_v19 = vadd.f32 %v4945_v58, %v10193_v17  ;;  %v5141_v15 = vadd.f32 %v10632_v3, %v10635_v24 }
 0x455   : > { %v4756_v49 = vpop.f32.mrf.mxu1  ;;  %v4949_v16 = vpop.f32.mrf.mxu0  ;;  %v5127_v52 = vadd.f32 %v5126_v50, %v5125_v7  ;;  %12465 = vst [vmem:[#allocation99_spill] sm:$0xff] %v10656_v14  ;;  %v10665_v10 = vmul.f32 0.015625, %v5114_v46  ;;  %v5167_v7 = vadd.f32 %v10638_v51, %v10646_v38  ;;  %v5129_v29 = vadd.f32 %v5128_v8, %v10641_v13 }
 0x456   : > { %12461 = vst [vmem:[#allocation95_spill] sm:$0xff] %v10643_v12  ;;  %v10651_v45 = vmul.f32 0.015625, %v5101_v41  ;;  %12466 = vst [vmem:[#allocation100_spill] sm:$0xff] %v10659_v19  ;;  %v10671_v44 = vadd.f32 %v4754_v40, %v10187_v61  ;;  %v5155_v50 = vadd.f32 %v5154_v63, %v10649_v57  ;;  %v5230_v46 = vmul.f32 %v10643_v12, %v10643_v12 }
 0x457   : > { %v4760_v28 = vpop.f32.mrf.mxu1  ;;  %v4953_v26 = vpop.f32.mrf.mxu0  ;;  %12467 = vst [vmem:[#allocation101_spill] sm:$0xff] %v10665_v10  ;;  %v10673_v58 = vmul.f32 0.015625, %v5127_v52  ;;  %v5142_v8 = vadd.f32 %v5141_v15, %v10656_v14  ;;  %v5168_v40 = vadd.f32 %v5167_v7, %v10659_v19  ;;  %v10685_v52 = vadd.f32 %v4947_v36, %v10189_v6 }
 0x458   : > { %12464 = vst [vmem:[#allocation98_spill] sm:$0xff] %v10651_v45  ;;  %12468 = vst [vmem:[#allocation102_spill] sm:$0xff] %v10671_v44  ;;  %v5207_v34 = vadd.f32 %v10651_v45, %v10643_v12  ;;  %v5231_v51 = vmul.f32 %v10651_v45, %v10651_v45  ;;  %v10688_v63 = vadd.f32 %v4756_v49, %v10191_v21 }
 0x459   : > { %12469 = vst [vmem:[#allocation103_spill] sm:$0xff] %v10673_v58  ;;  %v4762_v41 = vpop.f32.mrf.mxu1  ;;  %v4955_v5 = vpop.f32.mrf.mxu0  ;;  %12470 = vst [vmem:[#allocation104_spill] sm:$0xff] %v10685_v52  ;;  %v10691_v38 = vadd.f32 %v4949_v16, %v10193_v17  ;;  %v5232_v13 = vmul.f32 %v10665_v10, %v10665_v10  ;;  %v5130_v15 = vadd.f32 %v5129_v29, %v10671_v44 }
 0x45a   : > { %12471 = vst [vmem:[#allocation105_spill] sm:$0xff] %v10688_v63  ;;  %v5208_v24 = vadd.f32 %v5207_v34, %v10665_v10  ;;  %v5248_v43 = vadd.f32 %v5231_v51, %v5230_v46  ;;  %v10698_v7 = vadd.f32 %v4760_v28, %v10187_v61  ;;  %v10701_v36 = vadd.f32 %v4953_v26, %v10189_v6 }
 0x45b   : > { %12472 = vst [vmem:[#allocation106_spill] sm:$0xff] %v10691_v38  ;;  %v4764_v57 = vpop.f32.mrf.mxu1  ;;  %v4957_v3 = vpop.f32.mrf.mxu0  ;;  %v5233_v49 = vmul.f32 %v10673_v58, %v10673_v58  ;;  %v10706_v16 = vadd.f32 %v4762_v41, %v10191_v21  ;;  %v10709_v34 = vadd.f32 %v4955_v5, %v10193_v17  ;;  %v5156_v28 = vadd.f32 %v5155_v50, %v10685_v52 }
 0x45c   : > { %12473 = vst [vmem:[#allocation107_spill] sm:$0xff] %v10698_v7  ;;  %12474 = vst [vmem:[#allocation108_spill] sm:$0xff] %v10701_v36  ;;  %v5209_v51 = vadd.f32 %v5208_v24, %v10673_v58  ;;  %v5249_v29 = vadd.f32 %v5248_v43, %v5232_v13  ;;  %v5143_v46 = vadd.f32 %v5142_v8, %v10688_v63 }
 0x45d   : > { %12475 = vst [vmem:[#allocation109_spill] sm:$0xff] %v10706_v16  ;;  %12476 = vst [vmem:[#allocation110_spill] sm:$0xff] %v10709_v34  ;;  %v4766_v19 = vpop.f32.mrf.mxu1  ;;  %v4959_v14 = vpop.f32.mrf.mxu0  ;;  %v10715_v26 = vadd.f32 %v4764_v57, %v10187_v61  ;;  %v10718_v44 = vadd.f32 %v4957_v3, %v10189_v6  ;;  %v5169_v41 = vadd.f32 %v5168_v40, %v10691_v38 }
 0x45e   : > { %v10722_v5 = vadd.f32 %v4766_v19, %v10191_v21  ;;  %v10725_v20 = vadd.f32 %v4959_v14, %v10193_v17  ;;  %5210 = vadd.xlane.f32.xlu1 %v5209_v51  ;;  %v5250_v13 = vadd.f32 %v5249_v29, %v5233_v49  ;;  %v5131_v50 = vadd.f32 %v5130_v15, %v10698_v7 }
 0x45f   : > { %12477 = vst [vmem:[#allocation111_spill] sm:$0xff] %v10715_v26  ;;  %12478 = vst [vmem:[#allocation112_spill] sm:$0xff] %v10718_v44  ;;  %v4770_v43 = vpop.f32.mrf.mxu1  ;;  %v4963_v24 = vpop.f32.mrf.mxu0  ;;  %v5157_v57 = vadd.f32 %v5156_v28, %v10701_v36  ;;  %v5144_v19 = vadd.f32 %v5143_v46, %v10706_v16  ;;  %v5170_v40 = vadd.f32 %v5169_v41, %v10709_v34 }
 0x460   : > { %12479 = vst [vmem:[#allocation113_spill] sm:$0xff] %v10722_v5  ;;  %12480 = vst [vmem:[#allocation114_spill] sm:$0xff] %v10725_v20  ;;  %v10730_v8 = vadd.f32 %v4770_v43, %v10187_v61  ;;  %v10733_v3 = vadd.f32 %v4963_v24, %v10189_v6  ;;  %5251 = vadd.xlane.f32.xlu0 %v5250_v13  ;;  %v5132_v38 = vadd.f32 %v5131_v50, %v10715_v26 }
 0x461   : > { %v4772_v14 = vpop.f32.mrf.mxu1  ;;  %v4965_v51 = vpop.f32.mrf.mxu0  ;;  %v5158_v49 = vadd.f32 %v5157_v57, %v10718_v44  ;;  %v5145_v28 = vadd.f32 %v5144_v19, %v10722_v5  ;;  %v5171_v43 = vadd.f32 %v5170_v40, %v10725_v20 }
 0x462   : > { %12481 = vst [vmem:[#allocation115_spill] sm:$0xff] %v10730_v8  ;;  %12482 = vst [vmem:[#allocation116_spill] sm:$0xff] %v10733_v3  ;;  %v10740_v15 = vadd.f32 %v4772_v14, %v10191_v21  ;;  %v10743_v29 = vadd.f32 %v4965_v51, %v10193_v17  ;;  %v5133_v41 = vadd.f32 %v5132_v38, %v10730_v8 }
 0x463   : > { %v4774_v46 = vpop.f32.mrf.mxu1  ;;  %v4967_v24 = vpop.f32.mrf.mxu0  ;;  %v5159_v13 = vadd.f32 %v5158_v49, %v10733_v3 }
 0x464   : > { %12483 = vst [vmem:[#allocation117_spill] sm:$0xff] %v10740_v15  ;;  %12484 = vst [vmem:[#allocation118_spill] sm:$0xff] %v10743_v29  ;;  %v10750_v50 = vadd.f32 %v4774_v46, %v10187_v61  ;;  %v10753_v57 = vadd.f32 %v4967_v24, %v10189_v6  ;;  %v5146_v14 = vadd.f32 %v5145_v28, %v10740_v15 }
 0x465   : > { %v5172_v51 = vadd.f32 %v5171_v43, %v10743_v29  ;;  %v4776_v44 = vpop.f32.mrf.mxu1  ;;  %v4969_v19 = vpop.f32.mrf.mxu0 }
 0x466   : > { %12485 = vst [vmem:[#allocation119_spill] sm:$0xff] %v10750_v50  ;;  %12486 = vst [vmem:[#allocation120_spill] sm:$0xff] %v10753_v57  ;;  %v5134_v40 = vadd.f32 %v5133_v41, %v10750_v50  ;;  %v5160_v20 = vadd.f32 %v5159_v13, %v10753_v57  ;;  %v10760_v38 = vadd.f32 %v4776_v44, %v10191_v21 }
 0x467   : > { %v10763_v49 = vadd.f32 %v4969_v19, %v10193_v17 }
 0x468   : > { %12487 = vst [vmem:[#allocation121_spill] sm:$0xff] %v10760_v38  ;;  %v5135_v61 = vrot.slane %v5134_v40, 4  ;;  %v5161_v46 = vrot.slane %v5160_v20, 4  ;;  %v5147_v6 = vadd.f32 %v5146_v14, %v10760_v38 }
 0x469   : > { %12488 = vst [vmem:[#allocation122_spill] sm:$0xff] %v10763_v49  ;;  %v5173_v28 = vadd.f32 %v5172_v51, %v10763_v49 }
 0x46a   : > { %v5136_v24 = vadd.f32 %v5135_v61, %v5134_v40  ;;  %v5162_v43 = vadd.f32 %v5161_v46, %v5160_v20  ;;  %v5148_v29 = vrot.slane %v5147_v6, 4 }
 0x46b   : > { %v5174_v3 = vrot.slane %v5173_v28, 4 }
 0x46c   : > { %v5137_v15 = vrot.slane %v5136_v24, 2  ;;  %v5163_v41 = vrot.slane %v5162_v43, 2  ;;  %v5149_v50 = vadd.f32 %v5148_v29, %v5147_v6 }
 0x46d   : > { %v5175_v13 = vadd.f32 %v5174_v3, %v5173_v28 }
 0x46e   : > { %v5138_v57 = vadd.f32 %v5137_v15, %v5136_v24  ;;  %v5164_v21 = vadd.f32 %v5163_v41, %v5162_v43  ;;  %v5150_v44 = vrot.slane %v5149_v50, 2 }
 0x46f   : > { %v5176_v8 = vrot.slane %v5175_v13, 2 }
 0x470   : > { %v5139_v17 = vrot.slane %v5138_v57, 1  ;;  %v5165_v19 = vrot.slane %v5164_v21, 1  ;;  %v5151_v5 = vadd.f32 %v5150_v44, %v5149_v50 }
 0x471   : > { %v5177_v26 = vadd.f32 %v5176_v8, %v5175_v13 }
 0x472   : > { %v5140_v34 = vadd.f32 %v5139_v17, %v5138_v57  ;;  %v5152_v14 = vrot.slane %v5151_v5, 1  ;;  %v5166_v38 = vadd.f32 %v5165_v19, %v5164_v21 }
 0x473   : > { %v5178_v51 = vrot.slane %v5177_v26, 1 }
 0x474   : > { %v10767_v40 = vmul.f32 0.015625, %v5140_v34  ;;  %v5153_v20 = vadd.f32 %v5152_v14, %v5151_v5  ;;  %v10771_v29 = vmul.f32 0.015625, %v5166_v38 }
 0x475   : > { %v5179_v46 = vadd.f32 %v5178_v51, %v5177_v26 }
 0x476   : > { %12489 = vst [vmem:[#allocation123_spill] sm:$0xff] %v10767_v40  ;;  %v10769_v61 = vmul.f32 0.015625, %v5153_v20  ;;  %12491 = vst [vmem:[#allocation125_spill] sm:$0xff] %v10771_v29  ;;  %v5234_v15 = vmul.f32 %v10767_v40, %v10767_v40  ;;  %v5236_v5 = vmul.f32 %v10771_v29, %v10771_v29 }
 0x477   : > { %v10779_v50 = vmul.f32 0.015625, %v5179_v46 }
 0x478   : > { %12490 = vst [vmem:[#allocation124_spill] sm:$0xff] %v10769_v61  ;;  %v5212_v3 = vadd.f32 %v10769_v61, %v10767_v40  ;;  %v5235_v8 = vmul.f32 %v10769_v61, %v10769_v61 }
 0x479   : > { %12492 = vst [vmem:[#allocation126_spill] sm:$0xff] %v10779_v50  ;;  %v5237_v6 = vmul.f32 %v10779_v50, %v10779_v50 }
 0x47a   : > { %v5213_v34 = vadd.f32 %v5212_v3, %v10771_v29  ;;  %v5253_v57 = vadd.f32 %v5235_v8, %v5234_v15  ;;  %v12496_v29 = vld [vmem:[#allocation52_spill] sm:$0xff] }
 0x47c   : > { %v5214_v26 = vadd.f32 %v5213_v34, %v10779_v50  ;;  %v5254_v38 = vadd.f32 %v5253_v57, %v5236_v5  ;;  %v10791_v57 = vstv %s5315_s18  ;;  %v12495_v50 = vld [vmem:[#allocation47_spill] sm:$0xff] }
 0x47d   : > { %12493 = vst [vmem:[#allocation127_spill] sm:$0xff] %v10791_v57 }
 0x47e   : > { %5215 = vadd.xlane.f32.xlu1 %v5214_v26  ;;  %v5255_v28 = vadd.f32 %v5254_v38, %v5237_v6 }
 0x482   : > { %5256 = vadd.xlane.f32.xlu1 %v5255_v28 }
 0x4a7   : > { %v5201_v24 = vpop.xlane.xlu0 %5200 }
 0x4a8   : > { %v5218_v43 = vmul.f32 0.001953125, %v5201_v24 }
 0x4aa   : > { %v5262_v13 = vmul.f32 %v5218_v43, %v5218_v43  ;;  %v5274_v14 = vsub.f32 %v10350_v32, %v5218_v43  ;;  %v5275_v51 = vsub.f32 %v10360_v53, %v5218_v43  ;;  %v5276_v20 = vsub.f32 %v10366_v18, %v5218_v43 }
 0x4ab   : > { %v5242_v41 = vpop.xlane.xlu0 %5241  ;;  %v5277_v46 = vsub.f32 %v10394_v42, %v5218_v43 }
 0x4ac   : > { %v5258_v21 = vmul.f32 0.001953125, %v5242_v41 }
 0x4ae   : > { %v5266_v44 = vsub.f32 %v5258_v21, %v5262_v13 }
 0x4b0   : > { %v5270_v17 = vmax.f32 %v5266_v44, 0.0 }
 0x4b2   : > { %v5290_v19 = vadd.f32 1e-05, %v5270_v17 }
 0x4b4   : > { %7623 = vrsqrt.f32 %v5290_v19 }
 0x4c1   : > { %v7624_v3 = vpop.eup %7623 }
 0x4c2   : > { %v5298_v15 = vmul.f32 %v7624_v3, %v5274_v14  ;;  %v5299_v8 = vmul.f32 %v7624_v3, %v5275_v51  ;;  %v5300_v34 = vmul.f32 %v7624_v3, %v5276_v20  ;;  %v5301_v5 = vmul.f32 %v7624_v3, %v5277_v46  ;;  %v10802_v51 = vld [vmem:[%s7927_s27] sm:$0xff]  ;;  %v10807_v3 = vld [vmem:[%s7927_s27 + $0x10] sm:$0xff]  ;;  %v10877_v20 = vld [vmem:[%s7927_s27 + $0x78] sm:$0xff] }
 0x4c4   : > { %v5316_v26 = vmul.f32 %v5298_v15, %v5298_v15  ;;  %v5317_v38 = vmul.f32 %v5299_v8, %v5299_v8  ;;  %v5318_v6 = vmul.f32 %v5300_v34, %v5300_v34  ;;  %v5319_v28 = vmul.f32 %v5301_v5, %v5301_v5  ;;  %v10812_v5 = vld [vmem:[%s7927_s27 + $0x8] sm:$0xff]  ;;  %v10857_v15 = vld [vmem:[%s7927_s27 + $0x58] sm:$0xff] }
 0x4c6   : > { %v5333_v24 = vmul.f32 %v10791_v57, %v5316_v26  ;;  %v5334_v32 = vmul.f32 %v10791_v57, %v5317_v38  ;;  %v5335_v53 = vmul.f32 %v10791_v57, %v5318_v6  ;;  %v5336_v42 = vmul.f32 %v10791_v57, %v5319_v28  ;;  %v10817_v6 = vld [vmem:[%s7927_s27 + $0x18] sm:$0xff]  ;;  %v10852_v28 = vld [vmem:[%s7927_s27 + $0x48] sm:$0xff]  ;;  %v10862_v38 = vld [vmem:[%s7927_s27 + $0x60] sm:$0xff] }
 0x4c7   : > { %v5206_v18 = vpop.xlane.xlu0 %5205  ;;  %v10867_v26 = vld [vmem:[%s7927_s27 + $0x70] sm:$0xff] }
 0x4c8   : > { %v5349_v43 = vmul.f32 1.442695, %v5333_v24  ;;  %v5351_v41 = vmul.f32 1.442695, %v5334_v32  ;;  %v5353_v13 = vmul.f32 1.442695, %v5335_v53 }
 0x4c9   : > { %v5355_v21 = vmul.f32 1.442695, %v5336_v42  ;;  %v10797_v44 = vmul.f32 0.001953125, %v5206_v18  ;;  %v5247_v17 = vpop.xlane.xlu1 %5246  ;;  %v10822_v32 = vld [vmem:[%s7927_s27 + $0x20] sm:$0xff]  ;;  %v10847_v24 = vld [vmem:[%s7927_s27 + $0x50] sm:$0xff]  ;;  %v10872_v42 = vld [vmem:[%s7927_s27 + $0x68] sm:$0xff] }
 0x4ca   : > { %7625 = vpow2.f32 %v5349_v43  ;;  %v5259_v19 = vmul.f32 0.001953125, %v5247_v17  ;;  %v10827_v43 = vld [vmem:[%s7927_s27 + $0x30] sm:$0xff]  ;;  %v10842_v53 = vld [vmem:[%s7927_s27 + $0x40] sm:$0xff] }
 0x4cb   : > { %12494 = vst [vmem:[#allocation128_spill] sm:$0xff] %v10797_v44  ;;  %7627 = vpow2.f32 %v5351_v41  ;;  %v5263_v14 = vmul.f32 %v10797_v44, %v10797_v44 }
 0x4cc   : > { %7629 = vpow2.f32 %v5353_v13 }
 0x4cd   : > { %7631 = vpow2.f32 %v5355_v21  ;;  %v5267_v8 = vsub.f32 %v5259_v19, %v5263_v14  ;;  %v10832_v21 = vld [vmem:[%s7927_s27 + $0x28] sm:$0xff]  ;;  %v10837_v14 = vld [vmem:[%s7927_s27 + $0x38] sm:$0xff] }
 0x4cf   : > { %v5271_v18 = vmax.f32 %v5267_v8, 0.0 }
 0x4d1   : > { %v5291_v8 = vadd.f32 1e-05, %v5271_v18 }
 0x4d3   : > { %7633 = vrsqrt.f32 %v5291_v8 }
 0x4d7   : > { %v7626_v49 = vpop.eup %7625 }
 0x4d8   : > { %v7628_v41 = vpop.eup %7627  ;;  %v5381_v36 = vmul.f32 %v7626_v49, %v10208_v31  ;;  %v5385_v13 = vmul.f32 %v7626_v49, %v10196_v62  ;;  %v5389_v17 = vmul.f32 %v7626_v49, %v10214_v54  ;;  %v5393_v19 = vmul.f32 %v7626_v49, %v10236_v39 }
 0x4d9   : > { %v7630_v16 = vpop.eup %7629  ;;  %v5382_v7 = vmul.f32 %v7628_v41, %v10220_v47  ;;  %v5386_v46 = vmul.f32 %v7628_v41, %v10202_v0  ;;  %v5390_v18 = vmul.f32 %v7628_v41, %v10226_v22  ;;  %v5394_v52 = vmul.f32 %v7628_v41, %v10246_v27 }
 0x4da   : > { %v7632_v34 = vpop.eup %7631  ;;  %v5383_v8 = vmul.f32 %v7630_v16, %v10211_v33  ;;  %v5387_v31 = vmul.f32 %v7630_v16, %v10199_v30  ;;  %v5391_v62 = vmul.f32 %v7630_v16, %v10217_v56  ;;  %v5395_v54 = vmul.f32 %v7630_v16, %v10239_v55 }
 0x4db   : > { %v5384_v39 = vmul.f32 %v7632_v34, %v10223_v59  ;;  %v5388_v63 = vmul.f32 %v7632_v34, %v10205_v11  ;;  %v5392_v47 = vmul.f32 %v7632_v34, %v10229_v4  ;;  %v5396_v0 = vmul.f32 %v7632_v34, %v10249_v2  ;;  %v12497_v59 = vld [vmem:[#allocation50_spill] sm:$0xff]  ;;  %v12498_v11 = vld [vmem:[#allocation53_spill] sm:$0xff] }
 0x4dc   : > { %v5397_v22 = vmul.f32 %v7626_v49, %v10254_v37  ;;  %v5398_v27 = vmul.f32 %v7628_v41, %v10262_v60  ;;  %v5399_v33 = vmul.f32 %v7630_v16, %v10257_v9  ;;  %v5400_v30 = vmul.f32 %v7632_v34, %v10265_v48  ;;  %v12499_v4 = vld [vmem:[#allocation57_spill] sm:$0xff]  ;;  %v12500_v2 = vld [vmem:[#allocation54_spill] sm:$0xff]  ;;  %v12501_v37 = vld [vmem:[#allocation56_spill] sm:$0xff] }
 0x4dd   : > { %v5401_v56 = vmul.f32 %v7626_v49, %v12495_v50  ;;  %v5402_v55 = vmul.f32 %v7628_v41, %v12496_v29  ;;  %v5403_v61 = vmul.f32 %v7630_v16, %v12497_v59  ;;  %v5404_v40 = vmul.f32 %v7632_v34, %v12498_v11  ;;  %v12502_v60 = vld [vmem:[#allocation9_spill] sm:$0xff]  ;;  %v12504_v48 = vld [vmem:[#allocation58_spill] sm:$0xff] }
 0x4de   : > { %v5405_v58 = vmul.f32 %v7626_v49, %v12499_v4  ;;  %v5406_v10 = vmul.f32 %v7628_v41, %v12500_v2  ;;  %v5407_v45 = vmul.f32 %v7630_v16, %v12501_v37  ;;  %v5408_v12 = vmul.f32 %v7632_v34, %v12502_v60  ;;  %v12503_v9 = vld [vmem:[#allocation13_spill] sm:$0xff] }
 0x4df   : > { %v5409_v57 = vmul.f32 %v7626_v49, %v12503_v9  ;;  %v5410_v35 = vmul.f32 %v7628_v41, %v12504_v48  ;;  %v12505_v50 = vld [vmem:[#allocation17_spill] sm:$0xff]  ;;  %v5412_v29 = vmul.f32 %v7632_v34, %v12506_v25  ;;  %v12507_v59 = vunpack.c.l.bf16 %v10802_v51 }
 0x4e0   : > { %v5411_v23 = vmul.f32 %v7630_v16, %v12505_v50  ;;  %v12508_v11 = vunpack.c.h.bf16 %v10802_v51  ;;  %v12509_v2 = vunpack.c.l.bf16 %v10812_v5  ;;  %v12510_v37 = vunpack.c.h.bf16 %v10812_v5 }
 0x4e1   : > { %v5637_v44 = vadd.f32 %v12507_v59, %v5381_v36  ;;  %v12511_v49 = vunpack.c.l.bf16 %v10807_v3  ;;  %v12512_v16 = vunpack.c.h.bf16 %v10807_v3  ;;  %v12513_v34 = vunpack.c.l.bf16 %v10817_v6 }
 0x4e2   : > { %v5638_v4 = vadd.f32 %v12508_v11, %v5382_v7  ;;  %v5639_v1 = vadd.f32 %v12509_v2, %v5383_v8  ;;  %v5640_v60 = vadd.f32 %v12510_v37, %v5384_v39  ;;  %v12514_v51 = vunpack.c.h.bf16 %v10817_v6 }
 0x4e3   : > { %v5641_v41 = vadd.f32 %v12511_v49, %v5385_v13  ;;  %v5642_v25 = vadd.f32 %v12512_v16, %v5386_v46  ;;  %v5643_v36 = vadd.f32 %v12513_v34, %v5387_v31  ;;  %v12515_v9 = vunpack.c.l.bf16 %v10822_v32 }
 0x4e4   : > { %v5644_v7 = vadd.f32 %v12514_v51, %v5388_v63  ;;  %v12516_v5 = vunpack.c.h.bf16 %v10822_v32  ;;  %v12517_v39 = vunpack.c.l.bf16 %v10832_v21  ;;  %v12518_v13 = vunpack.c.h.bf16 %v10832_v21  ;;  %v10954_v32 = vpop.eup %7633 }
 0x4e5   : > { %v5645_v8 = vadd.f32 %v12515_v9, %v5389_v17  ;;  %v12519_v46 = vunpack.c.l.bf16 %v10827_v43  ;;  %v12520_v31 = vunpack.c.h.bf16 %v10827_v43  ;;  %v12521_v63 = vunpack.c.l.bf16 %v10837_v14 }
 0x4e6   : > { %v5646_v48 = vadd.f32 %v12516_v5, %v5390_v18  ;;  %v5647_v50 = vadd.f32 %v12517_v39, %v5391_v62  ;;  %v5648_v59 = vadd.f32 %v12518_v13, %v5392_v47  ;;  %v12522_v17 = vunpack.c.h.bf16 %v10837_v14 }
 0x4e7   : > { %v5649_v3 = vadd.f32 %v12519_v46, %v5393_v19  ;;  %v5650_v11 = vadd.f32 %v12520_v31, %v5394_v52  ;;  %v5651_v6 = vadd.f32 %v12521_v63, %v5395_v54  ;;  %v12523_v18 = vunpack.c.l.bf16 %v10842_v53 }
 0x4e8   : > { %v5652_v2 = vadd.f32 %v12522_v17, %v5396_v0  ;;  %v12524_v62 = vunpack.c.h.bf16 %v10842_v53  ;;  %v12525_v19 = vunpack.c.l.bf16 %v10852_v28  ;;  %v12526_v52 = vunpack.c.h.bf16 %v10852_v28 }
 0x4e9   : > { %v5653_v21 = vadd.f32 %v12523_v18, %v5397_v22  ;;  %v12527_v54 = vunpack.c.l.bf16 %v10847_v24  ;;  %v12528_v0 = vunpack.c.h.bf16 %v10847_v24  ;;  %v12529_v16 = vunpack.c.l.bf16 %v10857_v15 }
 0x4ea   : > { %v5654_v47 = vadd.f32 %v12524_v62, %v5398_v27  ;;  %v5655_v43 = vadd.f32 %v12525_v19, %v5399_v33  ;;  %v5656_v37 = vadd.f32 %v12526_v52, %v5400_v30  ;;  %v12530_v53 = vunpack.c.h.bf16 %v10857_v15  ;;  %v12539_v62 = vld [vmem:[#allocation59_spill] sm:$0xff]  ;;  %v12542_v52 = vld [vmem:[#allocation62_spill] sm:$0xff] }
 0x4eb   : > { %v10968_v14 = vadd.f32 %v12527_v54, %v5401_v56  ;;  %v10972_v49 = vadd.f32 %v12528_v0, %v5402_v55  ;;  %v10976_v22 = vadd.f32 %v12529_v16, %v5403_v61  ;;  %v12531_v33 = vunpack.c.l.bf16 %v10862_v38  ;;  %v12546_v16 = vld [vmem:[#allocation67_spill] sm:$0xff] }
 0x4ec   : > { %v10980_v27 = vadd.f32 %v12530_v53, %v5404_v40  ;;  %v12532_v30 = vunpack.c.h.bf16 %v10862_v38  ;;  %v12533_v24 = vunpack.c.l.bf16 %v10872_v42  ;;  %v12534_v34 = vunpack.c.h.bf16 %v10872_v42 }
 0x4ed   : > { %v10984_v28 = vadd.f32 %v12531_v33, %v5405_v58  ;;  %v12535_v15 = vunpack.c.l.bf16 %v10867_v26  ;;  %v12536_v51 = vunpack.c.h.bf16 %v10867_v26  ;;  %v12537_v38 = vunpack.c.l.bf16 %v10877_v20 }
 0x4ee   : > { %v10988_v56 = vadd.f32 %v12532_v30, %v5406_v10  ;;  %v10992_v55 = vadd.f32 %v12533_v24, %v5407_v45  ;;  %v10996_v61 = vadd.f32 %v12534_v34, %v5408_v12  ;;  %v12538_v9 = vunpack.c.h.bf16 %v10877_v20  ;;  %v5252_v24 = vpop.xlane.xlu0 %5251 }
 0x4ef   : > { %v11000_v40 = vadd.f32 %v12535_v15, %v5409_v57  ;;  %v11004_v58 = vadd.f32 %v12536_v51, %v5410_v35  ;;  %v11008_v10 = vadd.f32 %v12537_v38, %v5411_v23  ;;  %v5765_v5 = vmax.f32 %v5637_v44, 0.0 }
 0x4f0   : > { %v11012_v45 = vadd.f32 %v12538_v9, %v5412_v29  ;;  %v5766_v42 = vmax.f32 %v5638_v4, 0.0  ;;  %v5767_v12 = vmax.f32 %v5639_v1, 0.0  ;;  %v5768_v39 = vmax.f32 %v5640_v60, 0.0 }
 0x4f1   : > { %v5769_v13 = vmax.f32 %v5641_v41, 0.0  ;;  %v5770_v46 = vmax.f32 %v5642_v25, 0.0  ;;  %v5771_v57 = vmax.f32 %v5643_v36, 0.0  ;;  %v5772_v31 = vmax.f32 %v5644_v7, 0.0  ;;  %5893 = vst [vmem:[%s11014_s22] sm:$0xff] %v5765_v5  ;;  %v11085_v5 = vld [vmem:[%s7927_s27 + $0x80] sm:$0xff] }
 0x4f2   : > { %v5773_v63 = vmax.f32 %v5645_v8, 0.0  ;;  %v5774_v26 = vmax.f32 %v5646_v48, 0.0  ;;  %v5775_v35 = vmax.f32 %v5647_v50, 0.0  ;;  %v5776_v17 = vmax.f32 %v5648_v59, 0.0  ;;  %5894 = vst [vmem:[%s11014_s22 + $0x8] sm:$0xff] %v5766_v42  ;;  %5895 = vst [vmem:[%s11014_s22 + $0x10] sm:$0xff] %v5767_v12 }
 0x4f3   : > { %5896 = vst [vmem:[%s11014_s22 + $0x18] sm:$0xff] %v5768_v39  ;;  %v5777_v1 = vmax.f32 %v5649_v3, 0.0  ;;  %v5778_v23 = vmax.f32 %v5650_v11, 0.0  ;;  %v5779_v44 = vmax.f32 %v5651_v6, 0.0  ;;  %v5780_v20 = vmax.f32 %v5652_v2, 0.0  ;;  %5897 = vst [vmem:[%s11014_s22 + $0x20] sm:$0xff] %v5769_v13  ;;  %v5211_v11 = vpop.xlane.xlu1 %5210 }
 0x4f4   : > { %5898 = vst [vmem:[%s11014_s22 + $0x28] sm:$0xff] %v5770_v46  ;;  %5899 = vst [vmem:[%s11014_s22 + $0x30] sm:$0xff] %v5771_v57  ;;  %v5781_v29 = vmax.f32 %v5653_v21, 0.0  ;;  %v5782_v4 = vmax.f32 %v5654_v47, 0.0  ;;  %v5783_v60 = vmax.f32 %v5655_v43, 0.0  ;;  %v5784_v41 = vmax.f32 %v5656_v37, 0.0 }
 0x4f5   : > { %5900 = vst [vmem:[%s11014_s22 + $0x38] sm:$0xff] %v5772_v31  ;;  %5901 = vst [vmem:[%s11014_s22 + $0x40] sm:$0xff] %v5773_v63  ;;  %v5785_v25 = vmax.f32 %v10968_v14, 0.0  ;;  %v5786_v36 = vmax.f32 %v10972_v49, 0.0  ;;  %v5787_v7 = vmax.f32 %v10976_v22, 0.0  ;;  %v5788_v8 = vmax.f32 %v10980_v27, 0.0 }
 0x4f6   : > { %5902 = vst [vmem:[%s11014_s22 + $0x48] sm:$0xff] %v5774_v26  ;;  %5903 = vst [vmem:[%s11014_s22 + $0x50] sm:$0xff] %v5775_v35  ;;  %v5789_v48 = vmax.f32 %v10984_v28, 0.0  ;;  %v5790_v50 = vmax.f32 %v10988_v56, 0.0  ;;  %v5791_v59 = vmax.f32 %v10992_v55, 0.0  ;;  %v5792_v3 = vmax.f32 %v10996_v61, 0.0 }
 0x4f7   : > { %5904 = vst [vmem:[%s11014_s22 + $0x58] sm:$0xff] %v5776_v17  ;;  %5905 = vst [vmem:[%s11014_s22 + $0x60] sm:$0xff] %v5777_v1  ;;  %v5793_v6 = vmax.f32 %v11000_v40, 0.0  ;;  %v5794_v2 = vmax.f32 %v11004_v58, 0.0  ;;  %v5795_v18 = vmax.f32 %v11008_v10, 0.0  ;;  %v5796_v21 = vmax.f32 %v11012_v45, 0.0 }
 0x4f8   : > { %5906 = vst [vmem:[%s11014_s22 + $0x68] sm:$0xff] %v5778_v23  ;;  %5907 = vst [vmem:[%s11014_s22 + $0x70] sm:$0xff] %v5779_v44  ;;  %v12540_v47 = vld [vmem:[#allocation128_spill] sm:$0xff]  ;;  %v12544_v14 = vld [vmem:[#allocation65_spill] sm:$0xff]  ;;  %v11076_v27 = vmul.f32 0.001953125, %v5211_v11  ;;  %v5260_v51 = vmul.f32 0.001953125, %v5252_v24 }
 0x4f9   : > { %5908 = vst [vmem:[%s11014_s22 + $0x78] sm:$0xff] %v5780_v20  ;;  %5909 = vst [vmem:[%s11014_s22 + $0x80] sm:$0xff] %v5781_v29  ;;  %v12541_v19 = vsub.f32 %v12539_v62, %v12540_v47  ;;  %v12543_v37 = vsub.f32 %v12542_v52, %v12540_v47  ;;  %v12545_v0 = vsub.f32 %v12544_v14, %v12540_v47  ;;  %v12549_v55 = vld [vmem:[#allocation127_spill] sm:$0xff]  ;;  %v11090_v39 = vld [vmem:[%s7927_s27 + $0x90] sm:$0xff] }
 0x4fa   : > { %5910 = vst [vmem:[%s11014_s22 + $0x88] sm:$0xff] %v5782_v4  ;;  %5911 = vst [vmem:[%s11014_s22 + $0x90] sm:$0xff] %v5783_v60  ;;  %v12547_v22 = vsub.f32 %v12546_v16, %v12540_v47  ;;  %v5264_v40 = vmul.f32 %v11076_v27, %v11076_v27  ;;  %v11095_v57 = vld [vmem:[%s7927_s27 + $0x88] sm:$0xff]  ;;  %v11100_v35 = vld [vmem:[%s7927_s27 + $0x98] sm:$0xff] }
 0x4fb   : > { %5912 = vst [vmem:[%s11014_s22 + $0x98] sm:$0xff] %v5784_v41  ;;  %5913 = vst [vmem:[%s11014_s22 + $0xa0] sm:$0xff] %v5785_v25  ;;  %v5302_v43 = vmul.f32 %v10954_v32, %v12541_v19  ;;  %v5303_v54 = vmul.f32 %v10954_v32, %v12543_v37  ;;  %v5304_v49 = vmul.f32 %v10954_v32, %v12545_v0  ;;  %v11105_v23 = vld [vmem:[%s7927_s27 + $0xa0] sm:$0xff]  ;;  %v11110_v29 = vld [vmem:[%s7927_s27 + $0xb0] sm:$0xff] }
 0x4fc   : > { %5914 = vst [vmem:[%s11014_s22 + $0xa8] sm:$0xff] %v5786_v36  ;;  %5915 = vst [vmem:[%s11014_s22 + $0xb0] sm:$0xff] %v5787_v7  ;;  %v5305_v53 = vmul.f32 %v10954_v32, %v12547_v22  ;;  %v5268_v45 = vsub.f32 %v5260_v51, %v5264_v40  ;;  %v11115_v41 = vld [vmem:[%s7927_s27 + $0xa8] sm:$0xff]  ;;  %v11120_v7 = vld [vmem:[%s7927_s27 + $0xb8] sm:$0xff] }
 0x4fd   : > { %5916 = vst [vmem:[%s11014_s22 + $0xb8] sm:$0xff] %v5788_v8  ;;  %5917 = vst [vmem:[%s11014_s22 + $0xc0] sm:$0xff] %v5789_v48  ;;  %v5320_v33 = vmul.f32 %v5302_v43, %v5302_v43  ;;  %v5321_v28 = vmul.f32 %v5303_v54, %v5303_v54  ;;  %v5322_v30 = vmul.f32 %v5304_v49, %v5304_v49  ;;  %v11130_v11 = vld [vmem:[%s7927_s27 + $0xd0] sm:$0xff]  ;;  %v11140_v19 = vld [vmem:[%s7927_s27 + $0xd8] sm:$0xff] }
 0x4fe   : > { %5918 = vst [vmem:[%s11014_s22 + $0xc8] sm:$0xff] %v5790_v50  ;;  %5919 = vst [vmem:[%s11014_s22 + $0xd0] sm:$0xff] %v5791_v59  ;;  %v5323_v56 = vmul.f32 %v5305_v53, %v5305_v53  ;;  %v5272_v26 = vmax.f32 %v5268_v45, 0.0  ;;  %v11125_v50 = vld [vmem:[%s7927_s27 + $0xc0] sm:$0xff]  ;;  %v11150_v0 = vld [vmem:[%s7927_s27 + $0xf0] sm:$0xff] }
 0x4ff   : > { %5920 = vst [vmem:[%s11014_s22 + $0xd8] sm:$0xff] %v5792_v3  ;;  %5921 = vst [vmem:[%s11014_s22 + $0xe0] sm:$0xff] %v5793_v6  ;;  %v5337_v34 = vmul.f32 %v12549_v55, %v5320_v33  ;;  %v5338_v61 = vmul.f32 %v12549_v55, %v5321_v28  ;;  %v5339_v15 = vmul.f32 %v12549_v55, %v5322_v30  ;;  %v11145_v37 = vld [vmem:[%s7927_s27 + $0xe0] sm:$0xff]  ;;  %v11155_v22 = vld [vmem:[%s7927_s27 + $0xe8] sm:$0xff] }
 0x500   : > { %5922 = vst [vmem:[%s11014_s22 + $0xe8] sm:$0xff] %v5794_v2  ;;  %5923 = vst [vmem:[%s11014_s22 + $0xf0] sm:$0xff] %v5795_v18  ;;  %v5340_v32 = vmul.f32 %v12549_v55, %v5323_v56  ;;  %v11135_v18 = vld [vmem:[%s7927_s27 + $0xc8] sm:$0xff]  ;;  %v5292_v62 = vadd.f32 1e-05, %v5272_v26  ;;  %v11160_v28 = vld [vmem:[%s7927_s27 + $0xf8] sm:$0xff] }
 0x501   : > { %5924 = vst [vmem:[%s11014_s22 + $0xf8] sm:$0xff] %v5796_v21  ;;  %12548 = vst [vmem:[#allocation47_spill] sm:$0xff] %v11076_v27  ;;  %v5357_v58 = vmul.f32 1.442695, %v5337_v34  ;;  %v5359_v38 = vmul.f32 1.442695, %v5338_v61 }
 0x502   : > { %v5361_v10 = vmul.f32 1.442695, %v5339_v15  ;;  %v5363_v9 = vmul.f32 1.442695, %v5340_v32  ;;  %v12555_v26 = vld [vmem:[#allocation31_spill] sm:$0xff]  ;;  %v12556_v56 = vld [vmem:[#allocation49_spill] sm:$0xff] }
 0x503   : > { %7635 = vpow2.f32 %v5357_v58  ;;  %v12557_v49 = vld [vmem:[#allocation10_spill] sm:$0xff]  ;;  %v12558_v53 = vld [vmem:[#allocation55_spill] sm:$0xff]  ;;  %v12560_v52 = vld [vmem:[#allocation8_spill] sm:$0xff] }
 0x504   : > { %7637 = vpow2.f32 %v5359_v38  ;;  %v12559_v32 = vld [vmem:[#allocation38_spill] sm:$0xff]  ;;  %v12561_v43 = vld [vmem:[#allocation19_spill] sm:$0xff]  ;;  %v12567_v48 = vld [vmem:[#allocation45_spill] sm:$0xff] }
 0x505   : > { %7639 = vpow2.f32 %v5361_v10  ;;  %v12563_v47 = vld [vmem:[#allocation34_spill] sm:$0xff]  ;;  %v12564_v21 = vld [vmem:[#allocation15_spill] sm:$0xff]  ;;  %v12573_v44 = vld [vmem:[#allocation16_spill] sm:$0xff] }
 0x506   : > { %7641 = vpow2.f32 %v5363_v9  ;;  %v12554_v9 = vld [vmem:[#allocation41_spill] sm:$0xff]  ;;  %v12565_v3 = vld [vmem:[#allocation11_spill] sm:$0xff]  ;;  %v12572_v20 = vld [vmem:[#allocation18_spill] sm:$0xff] }
 0x507   : > { %7643 = vrsqrt.f32 %v5292_v62  ;;  %v12562_v62 = vld [vmem:[#allocation51_spill] sm:$0xff]  ;;  %v12575_v17 = vld [vmem:[#allocation21_spill] sm:$0xff]  ;;  %v12577_v13 = vld [vmem:[#allocation30_spill] sm:$0xff] }
 0x508   : > { %v12566_v59 = vld [vmem:[#allocation7_spill] sm:$0xff]  ;;  %v12576_v46 = vld [vmem:[#allocation29_spill] sm:$0xff]  ;;  %v12581_v42 = vld [vmem:[#allocation24_spill] sm:$0xff] }
 0x509   : > { %v12574_v1 = vld [vmem:[#allocation27_spill] sm:$0xff]  ;;  %v12579_v31 = vld [vmem:[#allocation33_spill] sm:$0xff]  ;;  %v12583_v58 = vld [vmem:[#allocation32_spill] sm:$0xff] }
 0x50a   : > { %v12578_v63 = vld [vmem:[#allocation23_spill] sm:$0xff]  ;;  %v12580_v12 = vld [vmem:[#allocation25_spill] sm:$0xff]  ;;  %v12584_v40 = vld [vmem:[#allocation28_spill] sm:$0xff] }
 0x50b   : > { %v12582_v55 = vld [vmem:[#allocation35_spill] sm:$0xff]  ;;  %v12585_v15 = vld [vmem:[#allocation36_spill] sm:$0xff] }
 0x510   : > { %v7636_v61 = vpop.eup %7635 }
 0x511   : > { %v7638_v10 = vpop.eup %7637  ;;  %v5413_v45 = vmul.f32 %v7636_v61, %v12554_v9  ;;  %v5417_v30 = vmul.f32 %v7636_v61, %v12555_v26  ;;  %v5421_v16 = vmul.f32 %v7636_v61, %v12556_v56  ;;  %v5425_v34 = vmul.f32 %v7636_v61, %v12557_v49 }
 0x512   : > { %v7640_v33 = vpop.eup %7639  ;;  %v5414_v14 = vmul.f32 %v7638_v10, %v12558_v53  ;;  %v5418_v54 = vmul.f32 %v7638_v10, %v12559_v32  ;;  %v5422_v51 = vmul.f32 %v7638_v10, %v12560_v52  ;;  %v5426_v2 = vmul.f32 %v7638_v10, %v12561_v43  ;;  %v12568_v53 = vld [vmem:[#allocation12_spill] sm:$0xff]  ;;  %v12569_v32 = vld [vmem:[#allocation14_spill] sm:$0xff] }
 0x513   : > { %v7642_v38 = vpop.eup %7641  ;;  %v5415_v6 = vmul.f32 %v7640_v33, %v12562_v62  ;;  %v5419_v9 = vmul.f32 %v7640_v33, %v12563_v47  ;;  %v5423_v26 = vmul.f32 %v7640_v33, %v12564_v21  ;;  %v5427_v56 = vmul.f32 %v7640_v33, %v12565_v3  ;;  %v12570_v52 = vld [vmem:[#allocation22_spill] sm:$0xff]  ;;  %v12571_v43 = vld [vmem:[#allocation20_spill] sm:$0xff] }
 0x514   : > { %v5416_v49 = vmul.f32 %v7642_v38, %v12566_v59  ;;  %v5420_v8 = vmul.f32 %v7642_v38, %v12567_v48  ;;  %v5424_v60 = vmul.f32 %v7642_v38, %v12568_v53  ;;  %v5428_v4 = vmul.f32 %v7642_v38, %v12569_v32 }
 0x515   : > { %v5429_v36 = vmul.f32 %v7636_v61, %v12570_v52  ;;  %v5430_v25 = vmul.f32 %v7638_v10, %v12571_v43  ;;  %v5431_v62 = vmul.f32 %v7640_v33, %v12572_v20  ;;  %v5432_v47 = vmul.f32 %v7642_v38, %v12573_v44 }
 0x516   : > { %v5433_v21 = vmul.f32 %v7636_v61, %v12574_v1  ;;  %v5434_v3 = vmul.f32 %v7638_v10, %v12575_v17  ;;  %v5435_v59 = vmul.f32 %v7640_v33, %v12576_v46  ;;  %v5436_v48 = vmul.f32 %v7642_v38, %v12577_v13 }
 0x517   : > { %v5437_v53 = vmul.f32 %v7636_v61, %v12578_v63  ;;  %v5438_v32 = vmul.f32 %v7638_v10, %v12579_v31  ;;  %v5439_v52 = vmul.f32 %v7640_v33, %v12580_v12  ;;  %v5440_v43 = vmul.f32 %v7642_v38, %v12581_v42 }
 0x518   : > { %v5441_v20 = vmul.f32 %v7636_v61, %v12582_v55  ;;  %v5442_v44 = vmul.f32 %v7638_v10, %v12583_v58  ;;  %v5443_v1 = vmul.f32 %v7640_v33, %v12584_v40  ;;  %v5444_v17 = vmul.f32 %v7642_v38, %v12585_v15 }
 0x519   : > { %v12586_v46 = vunpack.c.l.bf16 %v11085_v5  ;;  %v12587_v13 = vunpack.c.h.bf16 %v11085_v5  ;;  %v12588_v31 = vunpack.c.l.bf16 %v11095_v57  ;;  %v12589_v12 = vunpack.c.h.bf16 %v11095_v57 }
 0x51a   : > { %v12590_v55 = vunpack.c.l.bf16 %v11090_v39  ;;  %v12591_v58 = vunpack.c.h.bf16 %v11090_v39  ;;  %v12592_v15 = vunpack.c.l.bf16 %v11100_v35  ;;  %v12593_v38 = vunpack.c.h.bf16 %v11100_v35 }
 0x51b   : > { %v5669_v27 = vadd.f32 %v12586_v46, %v5413_v45  ;;  %v5670_v63 = vadd.f32 %v12587_v13, %v5414_v14  ;;  %v5671_v24 = vadd.f32 %v12588_v31, %v5415_v6  ;;  %v5672_v42 = vadd.f32 %v12589_v12, %v5416_v49 }
 0x51c   : > { %v5673_v61 = vadd.f32 %v12590_v55, %v5417_v30  ;;  %v5674_v33 = vadd.f32 %v12591_v58, %v5418_v54  ;;  %v5675_v40 = vadd.f32 %v12592_v15, %v5419_v9  ;;  %v5676_v10 = vadd.f32 %v12593_v38, %v5420_v8 }
 0x51d   : > { %v12594_v5 = vunpack.c.l.bf16 %v11105_v23  ;;  %v12595_v6 = vunpack.c.h.bf16 %v11105_v23  ;;  %v12596_v57 = vunpack.c.l.bf16 %v11115_v41  ;;  %v12597_v30 = vunpack.c.h.bf16 %v11115_v41  ;;  %v11236_v23 = vpop.eup %7643 }
 0x51e   : > { %v12598_v39 = vunpack.c.l.bf16 %v11110_v29  ;;  %v12599_v9 = vunpack.c.h.bf16 %v11110_v29  ;;  %v12600_v35 = vunpack.c.l.bf16 %v11120_v7  ;;  %v12603_v41 = vunpack.c.h.bf16 %v11125_v50 }
 0x51f   : > { %v5677_v14 = vadd.f32 %v12594_v5, %v5421_v16  ;;  %v5678_v45 = vadd.f32 %v12595_v6, %v5422_v51  ;;  %v5679_v49 = vadd.f32 %v12596_v57, %v5423_v26  ;;  %v5680_v46 = vadd.f32 %v12597_v30, %v5424_v60 }
 0x520   : > { %v5681_v54 = vadd.f32 %v12598_v39, %v5425_v34  ;;  %v5682_v13 = vadd.f32 %v12599_v9, %v5426_v2  ;;  %v5683_v8 = vadd.f32 %v12600_v35, %v5427_v56  ;;  %v12601_v16 = vunpack.c.h.bf16 %v11120_v7 }
 0x521   : > { %v12602_v51 = vunpack.c.l.bf16 %v11125_v50  ;;  %v5686_v60 = vadd.f32 %v12603_v41, %v5430_v25  ;;  %v12604_v12 = vunpack.c.l.bf16 %v11135_v18  ;;  %v12605_v29 = vunpack.c.h.bf16 %v11135_v18  ;;  %v12618_v41 = vld [vmem:[#allocation95_spill] sm:$0xff] }
 0x522   : > { %v5684_v31 = vadd.f32 %v12601_v16, %v5428_v4  ;;  %v12606_v55 = vunpack.c.l.bf16 %v11130_v11  ;;  %v12607_v4 = vunpack.c.h.bf16 %v11130_v11  ;;  %v12608_v58 = vunpack.c.l.bf16 %v11140_v19 }
 0x523   : > { %v5685_v26 = vadd.f32 %v12602_v51, %v5429_v36  ;;  %v5687_v34 = vadd.f32 %v12604_v12, %v5431_v62  ;;  %v5688_v2 = vadd.f32 %v12605_v29, %v5432_v47  ;;  %v12609_v25 = vunpack.c.h.bf16 %v11140_v19  ;;  %v12621_v29 = vld [vmem:[#allocation98_spill] sm:$0xff] }
 0x524   : > { %v11248_v56 = vadd.f32 %v12606_v55, %v5433_v21  ;;  %v11252_v7 = vadd.f32 %v12607_v4, %v5434_v3  ;;  %v11256_v36 = vadd.f32 %v12608_v58, %v5435_v59  ;;  %v12610_v62 = vunpack.c.l.bf16 %v11145_v37  ;;  %v12625_v58 = vld [vmem:[#allocation103_spill] sm:$0xff] }
 0x525   : > { %v11260_v50 = vadd.f32 %v12609_v25, %v5436_v48  ;;  %v12611_v47 = vunpack.c.h.bf16 %v11145_v37  ;;  %v12612_v11 = vunpack.c.l.bf16 %v11155_v22  ;;  %v12613_v15 = vunpack.c.h.bf16 %v11155_v22 }
 0x526   : > { %v11264_v18 = vadd.f32 %v12610_v62, %v5437_v53  ;;  %v12614_v19 = vunpack.c.l.bf16 %v11150_v0  ;;  %v12615_v38 = vunpack.c.h.bf16 %v11150_v0  ;;  %v12616_v37 = vunpack.c.l.bf16 %v11160_v28 }
 0x527   : > { %v11268_v21 = vadd.f32 %v12611_v47, %v5438_v32  ;;  %v11272_v3 = vadd.f32 %v12612_v11, %v5439_v52  ;;  %v11276_v59 = vadd.f32 %v12613_v15, %v5440_v43  ;;  %v12617_v52 = vunpack.c.h.bf16 %v11160_v28 }
 0x528   : > { %v11280_v48 = vadd.f32 %v12614_v19, %v5441_v20  ;;  %v11284_v53 = vadd.f32 %v12615_v38, %v5442_v44  ;;  %v11288_v32 = vadd.f32 %v12616_v37, %v5443_v1  ;;  %v5797_v43 = vmax.f32 %v5669_v27, 0.0 }
 0x529   : > { %v11292_v22 = vadd.f32 %v12617_v52, %v5444_v17  ;;  %v5798_v5 = vmax.f32 %v5670_v63, 0.0  ;;  %v5799_v20 = vmax.f32 %v5671_v24, 0.0  ;;  %v5800_v6 = vmax.f32 %v5672_v42, 0.0 }
 0x52a   : > { %v5801_v57 = vmax.f32 %v5673_v61, 0.0  ;;  %v5802_v0 = vmax.f32 %v5674_v33, 0.0  ;;  %v5803_v44 = vmax.f32 %v5675_v40, 0.0  ;;  %v5804_v30 = vmax.f32 %v5676_v10, 0.0  ;;  %5925 = vst [vmem:[%s11014_s22 + $0x100] sm:$0xff] %v5797_v43  ;;  %v5216_v10 = vpop.xlane.xlu1 %5215  ;;  %v11363_v43 = vld [vmem:[%s7927_s27 + $0x100] sm:$0xff] }
 0x52b   : > { %v5805_v1 = vmax.f32 %v5677_v14, 0.0  ;;  %v5806_v39 = vmax.f32 %v5678_v45, 0.0  ;;  %v5807_v9 = vmax.f32 %v5679_v49, 0.0  ;;  %v5808_v28 = vmax.f32 %v5680_v46, 0.0  ;;  %5926 = vst [vmem:[%s11014_s22 + $0x108] sm:$0xff] %v5798_v5  ;;  %5927 = vst [vmem:[%s11014_s22 + $0x110] sm:$0xff] %v5799_v20 }
 0x52c   : > { %5928 = vst [vmem:[%s11014_s22 + $0x118] sm:$0xff] %v5800_v6  ;;  %v5809_v27 = vmax.f32 %v5681_v54, 0.0  ;;  %v5810_v24 = vmax.f32 %v5682_v13, 0.0  ;;  %v5811_v17 = vmax.f32 %v5683_v8, 0.0  ;;  %v5812_v63 = vmax.f32 %v5684_v31, 0.0  ;;  %5929 = vst [vmem:[%s11014_s22 + $0x120] sm:$0xff] %v5801_v57 }
 0x52d   : > { %5930 = vst [vmem:[%s11014_s22 + $0x128] sm:$0xff] %v5802_v0  ;;  %5931 = vst [vmem:[%s11014_s22 + $0x130] sm:$0xff] %v5803_v44  ;;  %v5813_v42 = vmax.f32 %v5685_v26, 0.0  ;;  %v5814_v61 = vmax.f32 %v5686_v60, 0.0  ;;  %v5815_v33 = vmax.f32 %v5687_v34, 0.0  ;;  %v5816_v40 = vmax.f32 %v5688_v2, 0.0 }
 0x52e   : > { %5932 = vst [vmem:[%s11014_s22 + $0x138] sm:$0xff] %v5804_v30  ;;  %5933 = vst [vmem:[%s11014_s22 + $0x140] sm:$0xff] %v5805_v1  ;;  %v5817_v14 = vmax.f32 %v11248_v56, 0.0  ;;  %v5818_v45 = vmax.f32 %v11252_v7, 0.0  ;;  %v5819_v49 = vmax.f32 %v11256_v36, 0.0  ;;  %v5820_v46 = vmax.f32 %v11260_v50, 0.0 }
 0x52f   : > { %5934 = vst [vmem:[%s11014_s22 + $0x148] sm:$0xff] %v5806_v39  ;;  %5935 = vst [vmem:[%s11014_s22 + $0x150] sm:$0xff] %v5807_v9  ;;  %v5821_v54 = vmax.f32 %v11264_v18, 0.0  ;;  %v5822_v13 = vmax.f32 %v11268_v21, 0.0  ;;  %v5823_v35 = vmax.f32 %v11272_v3, 0.0  ;;  %v5824_v8 = vmax.f32 %v11276_v59, 0.0  ;;  %v5257_v21 = vpop.xlane.xlu1 %5256 }
 0x530   : > { %5936 = vst [vmem:[%s11014_s22 + $0x158] sm:$0xff] %v5808_v28  ;;  %5937 = vst [vmem:[%s11014_s22 + $0x160] sm:$0xff] %v5809_v27  ;;  %v5825_v16 = vmax.f32 %v11280_v48, 0.0  ;;  %v5826_v31 = vmax.f32 %v11284_v53, 0.0  ;;  %v5827_v51 = vmax.f32 %v11288_v32, 0.0  ;;  %v5828_v26 = vmax.f32 %v11292_v22, 0.0 }
 0x531   : > { %5938 = vst [vmem:[%s11014_s22 + $0x168] sm:$0xff] %v5810_v24  ;;  %5939 = vst [vmem:[%s11014_s22 + $0x170] sm:$0xff] %v5811_v17  ;;  %v12619_v60 = vld [vmem:[#allocation47_spill] sm:$0xff]  ;;  %v12623_v56 = vld [vmem:[#allocation101_spill] sm:$0xff]  ;;  %v11354_v11 = vmul.f32 0.001953125, %v5216_v10  ;;  %v5261_v48 = vmul.f32 0.001953125, %v5257_v21 }
 0x532   : > { %5940 = vst [vmem:[%s11014_s22 + $0x178] sm:$0xff] %v5812_v63  ;;  %5941 = vst [vmem:[%s11014_s22 + $0x180] sm:$0xff] %v5813_v42  ;;  %v12620_v12 = vsub.f32 %v12618_v41, %v12619_v60  ;;  %v12622_v2 = vsub.f32 %v12621_v29, %v12619_v60  ;;  %v12624_v4 = vsub.f32 %v12623_v56, %v12619_v60  ;;  %v12628_v3 = vld [vmem:[#allocation127_spill] sm:$0xff]  ;;  %v11368_v6 = vld [vmem:[%s7927_s27 + $0x110] sm:$0xff] }
 0x533   : > { %5942 = vst [vmem:[%s11014_s22 + $0x188] sm:$0xff] %v5814_v61  ;;  %5943 = vst [vmem:[%s11014_s22 + $0x190] sm:$0xff] %v5815_v33  ;;  %v12626_v36 = vsub.f32 %v12625_v58, %v12619_v60  ;;  %v5265_v52 = vmul.f32 %v11354_v11, %v11354_v11  ;;  %v11373_v44 = vld [vmem:[%s7927_s27 + $0x108] sm:$0xff]  ;;  %v11378_v9 = vld [vmem:[%s7927_s27 + $0x118] sm:$0xff] }
 0x534   : > { %5944 = vst [vmem:[%s11014_s22 + $0x198] sm:$0xff] %v5816_v40  ;;  %5945 = vst [vmem:[%s11014_s22 + $0x1a0] sm:$0xff] %v5817_v14  ;;  %v5306_v34 = vmul.f32 %v11236_v23, %v12620_v12  ;;  %v5307_v55 = vmul.f32 %v11236_v23, %v12622_v2  ;;  %v5308_v7 = vmul.f32 %v11236_v23, %v12624_v4  ;;  %v11383_v24 = vld [vmem:[%s7927_s27 + $0x120] sm:$0xff]  ;;  %v11388_v42 = vld [vmem:[%s7927_s27 + $0x130] sm:$0xff] }
 0x535   : > { %5946 = vst [vmem:[%s11014_s22 + $0x1a8] sm:$0xff] %v5818_v45  ;;  %5947 = vst [vmem:[%s11014_s22 + $0x1b0] sm:$0xff] %v5819_v49  ;;  %v5309_v25 = vmul.f32 %v11236_v23, %v12626_v36  ;;  %v5269_v22 = vsub.f32 %v5261_v48, %v5265_v52  ;;  %v11393_v40 = vld [vmem:[%s7927_s27 + $0x128] sm:$0xff]  ;;  %v11398_v45 = vld [vmem:[%s7927_s27 + $0x138] sm:$0xff] }
 0x536   : > { %5948 = vst [vmem:[%s11014_s22 + $0x1b8] sm:$0xff] %v5820_v46  ;;  %5949 = vst [vmem:[%s11014_s22 + $0x1c0] sm:$0xff] %v5821_v54  ;;  %v5324_v50 = vmul.f32 %v5306_v34, %v5306_v34  ;;  %v5325_v62 = vmul.f32 %v5307_v55, %v5307_v55  ;;  %v5326_v18 = vmul.f32 %v5308_v7, %v5308_v7  ;;  %v11403_v54 = vld [vmem:[%s7927_s27 + $0x140] sm:$0xff]  ;;  %v11418_v12 = vld [vmem:[%s7927_s27 + $0x158] sm:$0xff] }
 0x537   : > { %5950 = vst [vmem:[%s11014_s22 + $0x1c8] sm:$0xff] %v5822_v13  ;;  %5951 = vst [vmem:[%s11014_s22 + $0x1d0] sm:$0xff] %v5823_v35  ;;  %v5327_v47 = vmul.f32 %v5309_v25, %v5309_v25  ;;  %v5273_v39 = vmax.f32 %v5269_v22, 0.0  ;;  %v11423_v2 = vld [vmem:[%s7927_s27 + $0x160] sm:$0xff]  ;;  %v11428_v4 = vld [vmem:[%s7927_s27 + $0x170] sm:$0xff] }
 0x538   : > { %5952 = vst [vmem:[%s11014_s22 + $0x1d8] sm:$0xff] %v5824_v8  ;;  %5953 = vst [vmem:[%s11014_s22 + $0x1e0] sm:$0xff] %v5825_v16  ;;  %v5341_v15 = vmul.f32 %v12628_v3, %v5324_v50  ;;  %v5342_v59 = vmul.f32 %v12628_v3, %v5325_v62  ;;  %v5343_v19 = vmul.f32 %v12628_v3, %v5326_v18  ;;  %v11408_v8 = vld [vmem:[%s7927_s27 + $0x150] sm:$0xff]  ;;  %v11433_v36 = vld [vmem:[%s7927_s27 + $0x168] sm:$0xff] }
 0x539   : > { %5954 = vst [vmem:[%s11014_s22 + $0x1e8] sm:$0xff] %v5826_v31  ;;  %5955 = vst [vmem:[%s11014_s22 + $0x1f0] sm:$0xff] %v5827_v51  ;;  %v5344_v23 = vmul.f32 %v12628_v3, %v5327_v47  ;;  %v11413_v51 = vld [vmem:[%s7927_s27 + $0x148] sm:$0xff]  ;;  %v5293_v41 = vadd.f32 1e-05, %v5273_v39  ;;  %v11438_v62 = vld [vmem:[%s7927_s27 + $0x178] sm:$0xff] }
 0x53a   : > { %5956 = vst [vmem:[%s11014_s22 + $0x1f8] sm:$0xff] %v5828_v26  ;;  %12627 = vst [vmem:[#allocation52_spill] sm:$0xff] %v11354_v11  ;;  %v5365_v38 = vmul.f32 1.442695, %v5341_v15  ;;  %v5367_v53 = vmul.f32 1.442695, %v5342_v59 }
 0x53b   : > { %v5369_v37 = vmul.f32 1.442695, %v5343_v19  ;;  %v5371_v32 = vmul.f32 1.442695, %v5344_v23  ;;  %v12633_v52 = vld [vmem:[#allocation40_spill] sm:$0xff]  ;;  %v12635_v47 = vld [vmem:[#allocation42_spill] sm:$0xff] }
 0x53c   : > { %7645 = vpow2.f32 %v5365_v38  ;;  %v12634_v39 = vld [vmem:[#allocation44_spill] sm:$0xff]  ;;  %v12636_v7 = vld [vmem:[#allocation66_spill] sm:$0xff]  ;;  %v12637_v25 = vld [vmem:[#allocation43_spill] sm:$0xff] }
 0x53d   : > { %7647 = vpow2.f32 %v5367_v53  ;;  %v12638_v23 = vld [vmem:[#allocation46_spill] sm:$0xff]  ;;  %v12639_v29 = vld [vmem:[#allocation63_spill] sm:$0xff]  ;;  %v12640_v34 = vld [vmem:[#allocation69_spill] sm:$0xff] }
 0x53e   : > { %7649 = vpow2.f32 %v5369_v37  ;;  %v12642_v60 = vld [vmem:[#allocation37_spill] sm:$0xff]  ;;  %v12644_v35 = vld [vmem:[#allocation68_spill] sm:$0xff]  ;;  %v12652_v17 = vld [vmem:[#allocation74_spill] sm:$0xff] }
 0x53f   : > { %7651 = vpow2.f32 %v5371_v32  ;;  %v12643_v26 = vld [vmem:[#allocation61_spill] sm:$0xff]  ;;  %v12645_v13 = vld [vmem:[#allocation60_spill] sm:$0xff]  ;;  %v12653_v27 = vld [vmem:[#allocation75_spill] sm:$0xff] }
 0x540   : > { %7653 = vrsqrt.f32 %v5293_v41  ;;  %v12641_v41 = vld [vmem:[#allocation39_spill] sm:$0xff]  ;;  %v12646_v46 = vld [vmem:[#allocation48_spill] sm:$0xff]  ;;  %v12654_v28 = vld [vmem:[#allocation77_spill] sm:$0xff] }
 0x541   : > { %v12651_v63 = vld [vmem:[#allocation72_spill] sm:$0xff]  ;;  %v12656_v57 = vld [vmem:[#allocation78_spill] sm:$0xff]  ;;  %v12657_v1 = vld [vmem:[#allocation79_spill] sm:$0xff] }
 0x542   : > { %v12655_v0 = vld [vmem:[#allocation76_spill] sm:$0xff]  ;;  %v12658_v30 = vld [vmem:[#allocation81_spill] sm:$0xff]  ;;  %v12660_v5 = vld [vmem:[#allocation82_spill] sm:$0xff] }
 0x543   : > { %v12659_v20 = vld [vmem:[#allocation80_spill] sm:$0xff]  ;;  %v12661_v3 = vld [vmem:[#allocation83_spill] sm:$0xff]  ;;  %v12662_v53 = vld [vmem:[#allocation85_spill] sm:$0xff] }
 0x544   : > { %v12663_v48 = vld [vmem:[#allocation84_spill] sm:$0xff]  ;;  %v12664_v19 = vld [vmem:[#allocation86_spill] sm:$0xff] }
 0x549   : > { %v7646_v59 = vpop.eup %7645 }
 0x54a   : > { %v7648_v32 = vpop.eup %7647  ;;  %v5445_v22 = vmul.f32 %v7646_v59, %v12633_v52  ;;  %v5449_v18 = vmul.f32 %v7646_v59, %v12634_v39  ;;  %v5453_v58 = vmul.f32 %v7646_v59, %v12635_v47  ;;  %v5457_v15 = vmul.f32 %v7646_v59, %v12636_v7 }
 0x54b   : > { %v7650_v50 = vpop.eup %7649  ;;  %v5446_v56 = vmul.f32 %v7648_v32, %v12637_v25  ;;  %v5450_v55 = vmul.f32 %v7648_v32, %v12638_v23  ;;  %v5454_v38 = vmul.f32 %v7648_v32, %v12639_v29  ;;  %v5458_v31 = vmul.f32 %v7648_v32, %v12640_v34  ;;  %v12647_v25 = vld [vmem:[#allocation64_spill] sm:$0xff]  ;;  %v12648_v23 = vld [vmem:[#allocation70_spill] sm:$0xff]  ;;  %v12649_v29 = vld [vmem:[#allocation71_spill] sm:$0xff] }
 0x54c   : > { %v7652_v37 = vpop.eup %7651  ;;  %v5447_v16 = vmul.f32 %v7650_v50, %v12641_v41  ;;  %v5451_v52 = vmul.f32 %v7650_v50, %v12642_v60  ;;  %v5455_v39 = vmul.f32 %v7650_v50, %v12643_v26  ;;  %v5459_v47 = vmul.f32 %v7650_v50, %v12644_v35  ;;  %v12650_v34 = vld [vmem:[#allocation73_spill] sm:$0xff] }
 0x54d   : > { %v5448_v7 = vmul.f32 %v7652_v37, %v12645_v13  ;;  %v5452_v49 = vmul.f32 %v7652_v37, %v12646_v46  ;;  %v5456_v33 = vmul.f32 %v7652_v37, %v12647_v25  ;;  %v5460_v61 = vmul.f32 %v7652_v37, %v12648_v23 }
 0x54e   : > { %v5461_v14 = vmul.f32 %v7646_v59, %v12649_v29  ;;  %v5462_v10 = vmul.f32 %v7648_v32, %v12650_v34  ;;  %v5463_v41 = vmul.f32 %v7650_v50, %v12651_v63  ;;  %v5464_v60 = vmul.f32 %v7652_v37, %v12652_v17 }
 0x54f   : > { %v5465_v26 = vmul.f32 %v7646_v59, %v12653_v27  ;;  %v5466_v35 = vmul.f32 %v7648_v32, %v12654_v28  ;;  %v5467_v13 = vmul.f32 %v7650_v50, %v12655_v0  ;;  %v5468_v46 = vmul.f32 %v7652_v37, %v12656_v57 }
 0x550   : > { %v5469_v25 = vmul.f32 %v7646_v59, %v12657_v1  ;;  %v5470_v23 = vmul.f32 %v7648_v32, %v12658_v30  ;;  %v5471_v29 = vmul.f32 %v7650_v50, %v12659_v20  ;;  %v5472_v34 = vmul.f32 %v7652_v37, %v12660_v5 }
 0x551   : > { %v5473_v63 = vmul.f32 %v7646_v59, %v12661_v3  ;;  %v5474_v17 = vmul.f32 %v7648_v32, %v12662_v53  ;;  %v5475_v27 = vmul.f32 %v7650_v50, %v12663_v48  ;;  %v5476_v28 = vmul.f32 %v7652_v37, %v12664_v19 }
 0x552   : > { %v12665_v0 = vunpack.c.l.bf16 %v11363_v43  ;;  %v12666_v57 = vunpack.c.h.bf16 %v11363_v43  ;;  %v12667_v30 = vunpack.c.l.bf16 %v11373_v44  ;;  %v12668_v20 = vunpack.c.h.bf16 %v11373_v44 }
 0x553   : > { %v12669_v3 = vunpack.c.l.bf16 %v11368_v6  ;;  %v12670_v53 = vunpack.c.h.bf16 %v11368_v6  ;;  %v12671_v19 = vunpack.c.l.bf16 %v11378_v9  ;;  %v12672_v37 = vunpack.c.h.bf16 %v11378_v9 }
 0x554   : > { %v5701_v11 = vadd.f32 %v12665_v0, %v5445_v22  ;;  %v5702_v1 = vadd.f32 %v12666_v57, %v5446_v56  ;;  %v5703_v21 = vadd.f32 %v12667_v30, %v5447_v16  ;;  %v5704_v5 = vadd.f32 %v12668_v20, %v5448_v7 }
 0x555   : > { %v5705_v59 = vadd.f32 %v12669_v3, %v5449_v18  ;;  %v5706_v50 = vadd.f32 %v12670_v53, %v5450_v55  ;;  %v5707_v48 = vadd.f32 %v12671_v19, %v5451_v52  ;;  %v5708_v32 = vadd.f32 %v12672_v37, %v5452_v49 }
 0x556   : > { %v12673_v43 = vunpack.c.l.bf16 %v11383_v24  ;;  %v12674_v16 = vunpack.c.h.bf16 %v11383_v24  ;;  %v12675_v44 = vunpack.c.l.bf16 %v11393_v40  ;;  %v12676_v18 = vunpack.c.h.bf16 %v11393_v40  ;;  %v11514_v24 = vpop.eup %7653 }
 0x557   : > { %v12677_v6 = vunpack.c.l.bf16 %v11388_v42  ;;  %v12678_v52 = vunpack.c.h.bf16 %v11388_v42  ;;  %v12679_v9 = vunpack.c.l.bf16 %v11398_v45  ;;  %v12682_v40 = vunpack.c.h.bf16 %v11403_v54 }
 0x558   : > { %v5709_v56 = vadd.f32 %v12673_v43, %v5453_v58  ;;  %v5710_v22 = vadd.f32 %v12674_v16, %v5454_v38  ;;  %v5711_v7 = vadd.f32 %v12675_v44, %v5455_v39  ;;  %v5712_v0 = vadd.f32 %v12676_v18, %v5456_v33 }
 0x559   : > { %v5713_v55 = vadd.f32 %v12677_v6, %v5457_v15  ;;  %v5714_v57 = vadd.f32 %v12678_v52, %v5458_v31  ;;  %v5715_v49 = vadd.f32 %v12679_v9, %v5459_v47  ;;  %v12680_v58 = vunpack.c.h.bf16 %v11398_v45 }
 0x55a   : > { %v12681_v38 = vunpack.c.l.bf16 %v11403_v54  ;;  %v5718_v33 = vadd.f32 %v12682_v40, %v5462_v10  ;;  %v12683_v20 = vunpack.c.l.bf16 %v11413_v51  ;;  %v12684_v42 = vunpack.c.h.bf16 %v11413_v51  ;;  %v12698_v40 = vld [vmem:[#allocation52_spill] sm:$0xff] }
 0x55b   : > { %v5716_v30 = vadd.f32 %v12680_v58, %v5460_v61  ;;  %v12685_v3 = vunpack.c.l.bf16 %v11408_v8  ;;  %v12686_v61 = vunpack.c.h.bf16 %v11408_v8  ;;  %v12687_v53 = vunpack.c.l.bf16 %v11418_v12 }
 0x55c   : > { %v5717_v39 = vadd.f32 %v12681_v38, %v5461_v14  ;;  %v5719_v15 = vadd.f32 %v12683_v20, %v5463_v41  ;;  %v5720_v31 = vadd.f32 %v12684_v42, %v5464_v60  ;;  %v12688_v10 = vunpack.c.h.bf16 %v11418_v12 }
 0x55d   : > { %v11526_v47 = vadd.f32 %v12685_v3, %v5465_v26  ;;  %v11530_v45 = vadd.f32 %v12686_v61, %v5466_v35  ;;  %v11534_v14 = vadd.f32 %v12687_v53, %v5467_v13  ;;  %v12689_v41 = vunpack.c.l.bf16 %v11423_v2  ;;  %v12702_v3 = vld [vmem:[#allocation125_spill] sm:$0xff] }
 0x55e   : > { %v11538_v54 = vadd.f32 %v12688_v10, %v5468_v46  ;;  %v12690_v60 = vunpack.c.h.bf16 %v11423_v2  ;;  %v12691_v8 = vunpack.c.l.bf16 %v11433_v36  ;;  %v12692_v19 = vunpack.c.h.bf16 %v11433_v36 }
 0x55f   : > { %v11542_v51 = vadd.f32 %v12689_v41, %v5469_v25  ;;  %v12693_v12 = vunpack.c.l.bf16 %v11428_v4  ;;  %v12694_v37 = vunpack.c.h.bf16 %v11428_v4  ;;  %v12695_v2 = vunpack.c.l.bf16 %v11438_v62 }
 0x560   : > { %v11546_v26 = vadd.f32 %v12690_v60, %v5470_v23  ;;  %v11550_v35 = vadd.f32 %v12691_v8, %v5471_v29  ;;  %v11554_v13 = vadd.f32 %v12692_v19, %v5472_v34  ;;  %v12696_v29 = vunpack.c.h.bf16 %v11438_v62  ;;  %v12706_v60 = vld [vmem:[#allocation127_spill] sm:$0xff] }
 0x561   : > { %v11558_v46 = vadd.f32 %v12693_v12, %v5473_v63  ;;  %v11562_v25 = vadd.f32 %v12694_v37, %v5474_v17  ;;  %v11566_v23 = vadd.f32 %v12695_v2, %v5475_v27  ;;  %v5829_v34 = vmax.f32 %v5701_v11, 0.0  ;;  %v11637_v37 = vld [vmem:[%s7927_s27 + $0x180] sm:$0xff]  ;;  %v12740_v2 = vld [vmem:[#allocation120_spill] sm:$0xff] }
 0x562   : > { %v11570_v36 = vadd.f32 %v12696_v29, %v5476_v28  ;;  %v5830_v43 = vmax.f32 %v5702_v1, 0.0  ;;  %v5831_v63 = vmax.f32 %v5703_v21, 0.0  ;;  %v5832_v16 = vmax.f32 %v5704_v5, 0.0  ;;  %v12739_v29 = vld [vmem:[#allocation121_spill] sm:$0xff] }
 0x563   : > { %v5833_v44 = vmax.f32 %v5705_v59, 0.0  ;;  %v5834_v4 = vmax.f32 %v5706_v50, 0.0  ;;  %v5835_v17 = vmax.f32 %v5707_v48, 0.0  ;;  %v5836_v18 = vmax.f32 %v5708_v32, 0.0  ;;  %5957 = vst [vmem:[%s11014_s22 + $0x200] sm:$0xff] %v5829_v34  ;;  %v11647_v34 = vld [vmem:[%s7927_s27 + $0x1a0] sm:$0xff] }
 0x564   : > { %v5837_v27 = vmax.f32 %v5709_v56, 0.0  ;;  %v5838_v6 = vmax.f32 %v5710_v22, 0.0  ;;  %v5839_v52 = vmax.f32 %v5711_v7, 0.0  ;;  %v5840_v62 = vmax.f32 %v5712_v0, 0.0  ;;  %5958 = vst [vmem:[%s11014_s22 + $0x208] sm:$0xff] %v5830_v43  ;;  %5959 = vst [vmem:[%s11014_s22 + $0x210] sm:$0xff] %v5831_v63 }
 0x565   : > { %5960 = vst [vmem:[%s11014_s22 + $0x218] sm:$0xff] %v5832_v16  ;;  %v5841_v11 = vmax.f32 %v5713_v55, 0.0  ;;  %v5842_v21 = vmax.f32 %v5714_v57, 0.0  ;;  %v5843_v28 = vmax.f32 %v5715_v49, 0.0  ;;  %v5844_v1 = vmax.f32 %v5716_v30, 0.0  ;;  %5961 = vst [vmem:[%s11014_s22 + $0x220] sm:$0xff] %v5833_v44 }
 0x566   : > { %5962 = vst [vmem:[%s11014_s22 + $0x228] sm:$0xff] %v5834_v4  ;;  %5963 = vst [vmem:[%s11014_s22 + $0x230] sm:$0xff] %v5835_v17  ;;  %v5845_v5 = vmax.f32 %v5717_v39, 0.0  ;;  %v5846_v59 = vmax.f32 %v5718_v33, 0.0  ;;  %v5847_v50 = vmax.f32 %v5719_v15, 0.0  ;;  %v5848_v48 = vmax.f32 %v5720_v31, 0.0 }
 0x567   : > { %5964 = vst [vmem:[%s11014_s22 + $0x238] sm:$0xff] %v5836_v18  ;;  %5965 = vst [vmem:[%s11014_s22 + $0x240] sm:$0xff] %v5837_v27  ;;  %v5849_v32 = vmax.f32 %v11526_v47, 0.0  ;;  %v5850_v56 = vmax.f32 %v11530_v45, 0.0  ;;  %v5851_v22 = vmax.f32 %v11534_v14, 0.0  ;;  %v5852_v7 = vmax.f32 %v11538_v54, 0.0 }
 0x568   : > { %5966 = vst [vmem:[%s11014_s22 + $0x248] sm:$0xff] %v5838_v6  ;;  %5967 = vst [vmem:[%s11014_s22 + $0x250] sm:$0xff] %v5839_v52  ;;  %v5853_v0 = vmax.f32 %v11542_v51, 0.0  ;;  %v5854_v55 = vmax.f32 %v11546_v26, 0.0  ;;  %v5855_v57 = vmax.f32 %v11550_v35, 0.0  ;;  %v5856_v9 = vmax.f32 %v11554_v13, 0.0 }
 0x569   : > { %5968 = vst [vmem:[%s11014_s22 + $0x258] sm:$0xff] %v5840_v62  ;;  %5969 = vst [vmem:[%s11014_s22 + $0x260] sm:$0xff] %v5841_v11  ;;  %v5857_v49 = vmax.f32 %v11558_v46, 0.0  ;;  %v5858_v58 = vmax.f32 %v11562_v25, 0.0  ;;  %v5859_v30 = vmax.f32 %v11566_v23, 0.0  ;;  %v5860_v38 = vmax.f32 %v11570_v36, 0.0 }
 0x56a   : > { %5970 = vst [vmem:[%s11014_s22 + $0x268] sm:$0xff] %v5842_v21  ;;  %5971 = vst [vmem:[%s11014_s22 + $0x270] sm:$0xff] %v5843_v28  ;;  %v12697_v39 = vld [vmem:[#allocation123_spill] sm:$0xff]  ;;  %v12700_v15 = vld [vmem:[#allocation124_spill] sm:$0xff]  ;;  %v12703_v47 = vsub.f32 %v12702_v3, %v12698_v40 }
 0x56b   : > { %5972 = vst [vmem:[%s11014_s22 + $0x278] sm:$0xff] %v5844_v1  ;;  %5973 = vst [vmem:[%s11014_s22 + $0x280] sm:$0xff] %v5845_v5  ;;  %v12699_v33 = vsub.f32 %v12697_v39, %v12698_v40  ;;  %v12701_v42 = vsub.f32 %v12700_v15, %v12698_v40  ;;  %v12704_v45 = vld [vmem:[#allocation126_spill] sm:$0xff]  ;;  %v11642_v23 = vld [vmem:[%s7927_s27 + $0x190] sm:$0xff] }
 0x56c   : > { %5974 = vst [vmem:[%s11014_s22 + $0x288] sm:$0xff] %v5846_v59  ;;  %5975 = vst [vmem:[%s11014_s22 + $0x290] sm:$0xff] %v5847_v50  ;;  %v5312_v61 = vmul.f32 %v11514_v24, %v12703_v47  ;;  %v12705_v53 = vsub.f32 %v12704_v45, %v12698_v40  ;;  %v11652_v16 = vld [vmem:[%s7927_s27 + $0x1b0] sm:$0xff]  ;;  %v11657_v17 = vld [vmem:[%s7927_s27 + $0x1c0] sm:$0xff] }
 0x56d   : > { %5976 = vst [vmem:[%s11014_s22 + $0x298] sm:$0xff] %v5848_v48  ;;  %5977 = vst [vmem:[%s11014_s22 + $0x2a0] sm:$0xff] %v5849_v32  ;;  %v5310_v20 = vmul.f32 %v11514_v24, %v12699_v33  ;;  %v5311_v31 = vmul.f32 %v11514_v24, %v12701_v42  ;;  %v11662_v6 = vld [vmem:[%s7927_s27 + $0x1d0] sm:$0xff]  ;;  %v11667_v11 = vld [vmem:[%s7927_s27 + $0x1e0] sm:$0xff] }
 0x56e   : > { %5978 = vst [vmem:[%s11014_s22 + $0x2a8] sm:$0xff] %v5850_v56  ;;  %5979 = vst [vmem:[%s11014_s22 + $0x2b0] sm:$0xff] %v5851_v22  ;;  %v5313_v14 = vmul.f32 %v11514_v24, %v12705_v53  ;;  %v5330_v41 = vmul.f32 %v5312_v61, %v5312_v61  ;;  %v11672_v1 = vld [vmem:[%s7927_s27 + $0x1f0] sm:$0xff]  ;;  %v11677_v50 = vld [vmem:[%s7927_s27 + $0x188] sm:$0xff] }
 0x56f   : > { %5980 = vst [vmem:[%s11014_s22 + $0x2b8] sm:$0xff] %v5852_v7  ;;  %5981 = vst [vmem:[%s11014_s22 + $0x2c0] sm:$0xff] %v5853_v0  ;;  %v5328_v10 = vmul.f32 %v5310_v20, %v5310_v20  ;;  %v5329_v54 = vmul.f32 %v5311_v31, %v5311_v31  ;;  %v5607_v48 = vunpack.c.l.bf16 %v11677_v50  ;;  %v5608_v32 = vunpack.c.h.bf16 %v11677_v50  ;;  %v11682_v56 = vld [vmem:[%s7927_s27 + $0x198] sm:$0xff]  ;;  %v11687_v0 = vld [vmem:[%s7927_s27 + $0x1a8] sm:$0xff] }
 0x570   : > { %5982 = vst [vmem:[%s11014_s22 + $0x2c8] sm:$0xff] %v5854_v55  ;;  %5983 = vst [vmem:[%s11014_s22 + $0x2d0] sm:$0xff] %v5855_v57  ;;  %v5331_v51 = vmul.f32 %v5313_v14, %v5313_v14  ;;  %v5347_v35 = vmul.f32 %v12706_v60, %v5330_v41  ;;  %v5611_v22 = vunpack.c.l.bf16 %v11682_v56  ;;  %v5612_v7 = vunpack.c.h.bf16 %v11682_v56  ;;  %v11702_v40 = vld [vmem:[%s7927_s27 + $0x1d8] sm:$0xff]  ;;  %v11707_v42 = vld [vmem:[%s7927_s27 + $0x1e8] sm:$0xff] }
 0x571   : > { %5984 = vst [vmem:[%s11014_s22 + $0x2d8] sm:$0xff] %v5856_v9  ;;  %5985 = vst [vmem:[%s11014_s22 + $0x2e0] sm:$0xff] %v5857_v49  ;;  %v5345_v26 = vmul.f32 %v12706_v60, %v5328_v10  ;;  %v5346_v8 = vmul.f32 %v12706_v60, %v5329_v54  ;;  %v11692_v9 = vld [vmem:[%s7927_s27 + $0x1b8] sm:$0xff]  ;;  %v12710_v14 = vld [vmem:[#allocation87_spill] sm:$0xff] }
 0x572   : > { %5986 = vst [vmem:[%s11014_s22 + $0x2e8] sm:$0xff] %v5858_v58  ;;  %5987 = vst [vmem:[%s11014_s22 + $0x2f0] sm:$0xff] %v5859_v30  ;;  %v5348_v19 = vmul.f32 %v12706_v60, %v5331_v51  ;;  %v5377_v12 = vmul.f32 1.442695, %v5347_v35  ;;  %v11697_v30 = vld [vmem:[%s7927_s27 + $0x1c8] sm:$0xff]  ;;  %v11712_v47 = vld [vmem:[%s7927_s27 + $0x1f8] sm:$0xff] }
 0x573   : > { %5988 = vst [vmem:[%s11014_s22 + $0x2f8] sm:$0xff] %v5860_v38  ;;  %v5373_v24 = vmul.f32 1.442695, %v5345_v26  ;;  %v5375_v13 = vmul.f32 1.442695, %v5346_v8  ;;  %12707 = vst [vmem:[#allocation50_spill] sm:$0xff] %v11672_v1 }
 0x574   : > { %v5379_v46 = vmul.f32 1.442695, %v5348_v19  ;;  %12708 = vst [vmem:[#allocation53_spill] sm:$0xff] %v11707_v42  ;;  %12709 = vst [vmem:[#allocation57_spill] sm:$0xff] %v11712_v47  ;;  %v12711_v54 = vld [vmem:[#allocation89_spill] sm:$0xff]  ;;  %v12712_v51 = vld [vmem:[#allocation94_spill] sm:$0xff] }
 0x575   : > { %7655 = vpow2.f32 %v5373_v24  ;;  %v12713_v26 = vld [vmem:[#allocation102_spill] sm:$0xff]  ;;  %v12714_v19 = vld [vmem:[#allocation92_spill] sm:$0xff]  ;;  %v12717_v56 = vld [vmem:[#allocation105_spill] sm:$0xff]  ;;  %s6528_s27 = sshll.u32 %s7869_s7, 14 }
 0x576   : > { %7657 = vpow2.f32 %v5375_v13  ;;  %v12715_v13 = vld [vmem:[#allocation91_spill] sm:$0xff]  ;;  %v12718_v45 = vld [vmem:[#allocation88_spill] sm:$0xff]  ;;  %v12719_v3 = vld [vmem:[#allocation90_spill] sm:$0xff]  ;;  %s11861_s25 = scalar_lea.hbm %s11931_s8, %s6528_s27 }
 0x577   : > { %7659 = vpow2.f32 %v5377_v12  ;;  %v12720_v31 = vld [vmem:[#allocation97_spill] sm:$0xff]  ;;  %v12721_v28 = vld [vmem:[#allocation104_spill] sm:$0xff]  ;;  %v12729_v18 = vld [vmem:[#allocation110_spill] sm:$0xff] }
 0x578   : > { %7661 = vpow2.f32 %v5379_v46  ;;  %v12716_v46 = vld [vmem:[#allocation99_spill] sm:$0xff]  ;;  %v12722_v21 = vld [vmem:[#allocation96_spill] sm:$0xff]  ;;  %v12723_v20 = vld [vmem:[#allocation93_spill] sm:$0xff] }
 0x579   : > { %v12728_v27 = vld [vmem:[#allocation108_spill] sm:$0xff]  ;;  %v12730_v58 = vld [vmem:[#allocation111_spill] sm:$0xff]  ;;  %v12731_v49 = vld [vmem:[#allocation113_spill] sm:$0xff] }
 0x57a   : > { %v12732_v4 = vld [vmem:[#allocation112_spill] sm:$0xff]  ;;  %v12733_v44 = vld [vmem:[#allocation114_spill] sm:$0xff]  ;;  %v12734_v57 = vld [vmem:[#allocation115_spill] sm:$0xff] }
 0x57b   : > { %v12735_v55 = vld [vmem:[#allocation117_spill] sm:$0xff]  ;;  %v12736_v63 = vld [vmem:[#allocation116_spill] sm:$0xff]  ;;  %v12737_v43 = vld [vmem:[#allocation118_spill] sm:$0xff] }
 0x57c   : > { %v12738_v36 = vld [vmem:[#allocation119_spill] sm:$0xff]  ;;  %v12741_v25 = vld [vmem:[#allocation122_spill] sm:$0xff] }
 0x582   : > { %v7656_v15 = vpop.eup %7655 }
 0x583   : > { %v7658_v53 = vpop.eup %7657  ;;  %v5477_v10 = vmul.f32 %v7656_v15, %v12710_v14  ;;  %v5481_v41 = vmul.f32 %v7656_v15, %v12711_v54  ;;  %v5485_v60 = vmul.f32 %v7656_v15, %v12712_v51  ;;  %v5489_v8 = vmul.f32 %v7656_v15, %v12713_v26 }
 0x584   : > { %v7660_v35 = vpop.eup %7659  ;;  %v5478_v24 = vmul.f32 %v7658_v53, %v12714_v19  ;;  %v5482_v12 = vmul.f32 %v7658_v53, %v12715_v13  ;;  %v5486_v50 = vmul.f32 %v7658_v53, %v12716_v46  ;;  %v5490_v61 = vmul.f32 %v7658_v53, %v12717_v56  ;;  %v12724_v19 = vld [vmem:[#allocation100_spill] sm:$0xff]  ;;  %v12725_v13 = vld [vmem:[#allocation106_spill] sm:$0xff]  ;;  %v12726_v46 = vld [vmem:[#allocation107_spill] sm:$0xff] }
 0x585   : > { %v7662_v59 = vpop.eup %7661  ;;  %v5479_v5 = vmul.f32 %v7660_v35, %v12718_v45  ;;  %v5483_v14 = vmul.f32 %v7660_v35, %v12719_v3  ;;  %v5487_v54 = vmul.f32 %v7660_v35, %v12720_v31  ;;  %v5491_v51 = vmul.f32 %v7660_v35, %v12721_v28  ;;  %v12727_v56 = vld [vmem:[#allocation109_spill] sm:$0xff] }
 0x586   : > { %v5480_v26 = vmul.f32 %v7662_v59, %v12722_v21  ;;  %v5484_v33 = vmul.f32 %v7662_v59, %v12723_v20  ;;  %v5488_v62 = vmul.f32 %v7662_v59, %v12724_v19  ;;  %v5492_v52 = vmul.f32 %v7662_v59, %v12725_v13 }
 0x587   : > { %v5493_v39 = vmul.f32 %v7656_v15, %v12726_v46  ;;  %v5494_v38 = vmul.f32 %v7658_v53, %v12727_v56  ;;  %v5495_v45 = vmul.f32 %v7660_v35, %v12728_v27  ;;  %v5496_v3 = vmul.f32 %v7662_v59, %v12729_v18 }
 0x588   : > { %v5497_v31 = vmul.f32 %v7656_v15, %v12730_v58  ;;  %v5498_v28 = vmul.f32 %v7658_v53, %v12731_v49  ;;  %v5499_v21 = vmul.f32 %v7660_v35, %v12732_v4  ;;  %v5500_v20 = vmul.f32 %v7662_v59, %v12733_v44 }
 0x589   : > { %v5501_v19 = vmul.f32 %v7656_v15, %v12734_v57  ;;  %v5502_v13 = vmul.f32 %v7658_v53, %v12735_v55  ;;  %v5503_v46 = vmul.f32 %v7660_v35, %v12736_v63  ;;  %v5504_v56 = vmul.f32 %v7662_v59, %v12737_v43 }
 0x58a   : > { %v5505_v27 = vmul.f32 %v7656_v15, %v12738_v36  ;;  %v5506_v18 = vmul.f32 %v7658_v53, %v12739_v29  ;;  %v5507_v58 = vmul.f32 %v7660_v35, %v12740_v2  ;;  %v5508_v49 = vmul.f32 %v7662_v59, %v12741_v25 }
 0x58b   : > { %v12742_v4 = vunpack.c.l.bf16 %v11637_v37  ;;  %v12743_v44 = vunpack.c.h.bf16 %v11637_v37  ;;  %v5735_v1 = vadd.f32 %v5607_v48, %v5479_v5  ;;  %v5736_v55 = vadd.f32 %v5608_v32, %v5480_v26 }
 0x58c   : > { %v12744_v63 = vunpack.c.l.bf16 %v11642_v23  ;;  %v12745_v43 = vunpack.c.h.bf16 %v11642_v23  ;;  %v5739_v15 = vadd.f32 %v5611_v22, %v5483_v14  ;;  %v5740_v29 = vadd.f32 %v5612_v7, %v5484_v33 }
 0x58d   : > { %v5733_v47 = vadd.f32 %v12742_v4, %v5477_v10  ;;  %v5734_v57 = vadd.f32 %v12743_v44, %v5478_v24  ;;  %v12746_v2 = vunpack.c.l.bf16 %v11647_v34  ;;  %v12747_v25 = vunpack.c.h.bf16 %v11647_v34  ;;  %v12767_v4 = vld [vmem:[#allocation50_spill] sm:$0xff] }
 0x58e   : > { %v5737_v42 = vadd.f32 %v12744_v63, %v5481_v41  ;;  %v5738_v36 = vadd.f32 %v12745_v43, %v5482_v12  ;;  %v12748_v10 = vunpack.c.l.bf16 %v11687_v0  ;;  %v12749_v5 = vunpack.c.h.bf16 %v11687_v0 }
 0x58f   : > { %v5741_v53 = vadd.f32 %v12746_v2, %v5485_v60  ;;  %v5742_v59 = vadd.f32 %v12747_v25, %v5486_v50  ;;  %v12750_v32 = vunpack.c.l.bf16 %v11652_v16  ;;  %v12751_v23 = vunpack.c.h.bf16 %v11652_v16 }
 0x590   : > { %v5743_v37 = vadd.f32 %v12748_v10, %v5487_v54  ;;  %v5744_v48 = vadd.f32 %v12749_v5, %v5488_v62  ;;  %v12752_v22 = vunpack.c.l.bf16 %v11692_v9  ;;  %v12753_v33 = vunpack.c.h.bf16 %v11692_v9 }
 0x591   : > { %v5745_v41 = vadd.f32 %v12750_v32, %v5489_v8  ;;  %v5746_v35 = vadd.f32 %v12751_v23, %v5490_v61  ;;  %v12754_v34 = vunpack.c.l.bf16 %v11657_v17  ;;  %v12755_v12 = vunpack.c.h.bf16 %v11657_v17 }
 0x592   : > { %v5747_v7 = vadd.f32 %v12752_v22, %v5491_v51  ;;  %v5748_v60 = vadd.f32 %v12753_v33, %v5492_v52  ;;  %v12756_v62 = vunpack.c.l.bf16 %v11697_v30  ;;  %v12757_v8 = vunpack.c.h.bf16 %v11697_v30 }
 0x593   : > { %v5749_v24 = vadd.f32 %v12754_v34, %v5493_v39  ;;  %v5750_v50 = vadd.f32 %v12755_v12, %v5494_v38  ;;  %v12758_v16 = vunpack.c.l.bf16 %v11662_v6  ;;  %v12759_v54 = vunpack.c.h.bf16 %v11662_v6 }
 0x594   : > { %v5751_v0 = vadd.f32 %v12756_v62, %v5495_v45  ;;  %v5752_v14 = vadd.f32 %v12757_v8, %v5496_v3  ;;  %v12760_v52 = vunpack.c.l.bf16 %v11702_v40  ;;  %v12761_v17 = vunpack.c.h.bf16 %v11702_v40  ;;  %v12764_v3 = vld [vmem:[#allocation53_spill] sm:$0xff] }
 0x595   : > { %v11782_v61 = vadd.f32 %v12758_v16, %v5497_v31  ;;  %v11786_v9 = vadd.f32 %v12759_v54, %v5498_v28  ;;  %v12762_v51 = vunpack.c.l.bf16 %v11667_v11  ;;  %v12763_v26 = vunpack.c.h.bf16 %v11667_v11  ;;  %v12770_v11 = vld [vmem:[#allocation57_spill] sm:$0xff] }
 0x596   : > { %v11790_v39 = vadd.f32 %v12760_v52, %v5499_v21  ;;  %v11794_v38 = vadd.f32 %v12761_v17, %v5500_v20  ;;  %v12765_v6 = vunpack.c.l.bf16 %v12764_v3  ;;  %v12766_v28 = vunpack.c.h.bf16 %v12764_v3 }
 0x597   : > { %v11798_v30 = vadd.f32 %v12762_v51, %v5501_v19  ;;  %v11802_v45 = vadd.f32 %v12763_v26, %v5502_v13  ;;  %v12768_v40 = vunpack.c.l.bf16 %v12767_v4  ;;  %v12769_v44 = vunpack.c.h.bf16 %v12767_v4 }
 0x598   : > { %v11806_v31 = vadd.f32 %v12765_v6, %v5503_v46  ;;  %v11810_v21 = vadd.f32 %v12766_v28, %v5504_v56  ;;  %v12771_v13 = vunpack.c.l.bf16 %v12770_v11  ;;  %v12772_v46 = vunpack.c.h.bf16 %v12770_v11 }
 0x599   : > { %v11814_v20 = vadd.f32 %v12768_v40, %v5505_v27  ;;  %v11818_v19 = vadd.f32 %v12769_v44, %v5506_v18  ;;  %v5861_v56 = vmax.f32 %v5733_v47, 0.0  ;;  %v5862_v2 = vmax.f32 %v5734_v57, 0.0 }
 0x59a   : > { %v11822_v63 = vadd.f32 %v12771_v13, %v5507_v58  ;;  %v11826_v43 = vadd.f32 %v12772_v46, %v5508_v49  ;;  %v5863_v27 = vmax.f32 %v5735_v1, 0.0  ;;  %v5864_v25 = vmax.f32 %v5736_v55, 0.0 }
 0x59b   : > { %v5865_v10 = vmax.f32 %v5737_v42, 0.0  ;;  %v5866_v5 = vmax.f32 %v5738_v36, 0.0  ;;  %v5867_v18 = vmax.f32 %v5739_v15, 0.0  ;;  %v5868_v32 = vmax.f32 %v5740_v29, 0.0  ;;  %5989 = vst [vmem:[%s11014_s22 + $0x300] sm:$0xff] %v5861_v56  ;;  %5990 = vst [vmem:[%s11014_s22 + $0x308] sm:$0xff] %v5862_v2 }
 0x59c   : > { %v5869_v58 = vmax.f32 %v5741_v53, 0.0  ;;  %v5870_v23 = vmax.f32 %v5742_v59, 0.0  ;;  %v5871_v22 = vmax.f32 %v5743_v37, 0.0  ;;  %v5872_v49 = vmax.f32 %v5744_v48, 0.0  ;;  %5991 = vst [vmem:[%s11014_s22 + $0x310] sm:$0xff] %v5863_v27  ;;  %5992 = vst [vmem:[%s11014_s22 + $0x318] sm:$0xff] %v5864_v25 }
 0x59d   : > { %v5873_v1 = vmax.f32 %v5745_v41, 0.0  ;;  %v5874_v42 = vmax.f32 %v5746_v35, 0.0  ;;  %v5875_v47 = vmax.f32 %v5747_v7, 0.0  ;;  %v5876_v57 = vmax.f32 %v5748_v60, 0.0  ;;  %5993 = vst [vmem:[%s11014_s22 + $0x320] sm:$0xff] %v5865_v10  ;;  %5994 = vst [vmem:[%s11014_s22 + $0x328] sm:$0xff] %v5866_v5 }
 0x59e   : > { %5995 = vst [vmem:[%s11014_s22 + $0x330] sm:$0xff] %v5867_v18  ;;  %5996 = vst [vmem:[%s11014_s22 + $0x338] sm:$0xff] %v5868_v32  ;;  %v5877_v55 = vmax.f32 %v5749_v24, 0.0  ;;  %v5878_v36 = vmax.f32 %v5750_v50, 0.0  ;;  %v5879_v15 = vmax.f32 %v5751_v0, 0.0  ;;  %v5880_v29 = vmax.f32 %v5752_v14, 0.0 }
 0x59f   : > { %5997 = vst [vmem:[%s11014_s22 + $0x340] sm:$0xff] %v5869_v58  ;;  %5998 = vst [vmem:[%s11014_s22 + $0x348] sm:$0xff] %v5870_v23  ;;  %v5881_v53 = vmax.f32 %v11782_v61, 0.0  ;;  %v5882_v59 = vmax.f32 %v11786_v9, 0.0  ;;  %v5883_v37 = vmax.f32 %v11790_v39, 0.0  ;;  %v5884_v48 = vmax.f32 %v11794_v38, 0.0 }
 0x5a0   : > { %5999 = vst [vmem:[%s11014_s22 + $0x350] sm:$0xff] %v5871_v22  ;;  %6000 = vst [vmem:[%s11014_s22 + $0x358] sm:$0xff] %v5872_v49  ;;  %v5885_v41 = vmax.f32 %v11798_v30, 0.0  ;;  %v5886_v35 = vmax.f32 %v11802_v45, 0.0  ;;  %v5887_v7 = vmax.f32 %v11806_v31, 0.0  ;;  %v5888_v33 = vmax.f32 %v11810_v21, 0.0 }
 0x5a1   : > { %6001 = vst [vmem:[%s11014_s22 + $0x360] sm:$0xff] %v5873_v1  ;;  %6002 = vst [vmem:[%s11014_s22 + $0x368] sm:$0xff] %v5874_v42  ;;  %v5889_v60 = vmax.f32 %v11814_v20, 0.0  ;;  %v5890_v34 = vmax.f32 %v11818_v19, 0.0  ;;  %v5891_v24 = vmax.f32 %v11822_v63, 0.0  ;;  %v5892_v12 = vmax.f32 %v11826_v43, 0.0 }
 0x5a2   : > { %6003 = vst [vmem:[%s11014_s22 + $0x370] sm:$0xff] %v5875_v47  ;;  %6004 = vst [vmem:[%s11014_s22 + $0x378] sm:$0xff] %v5876_v57 }
 0x5a3   : > { %6005 = vst [vmem:[%s11014_s22 + $0x380] sm:$0xff] %v5877_v55  ;;  %6006 = vst [vmem:[%s11014_s22 + $0x388] sm:$0xff] %v5878_v36 }
 0x5a4   : > { %6007 = vst [vmem:[%s11014_s22 + $0x390] sm:$0xff] %v5879_v15  ;;  %6008 = vst [vmem:[%s11014_s22 + $0x398] sm:$0xff] %v5880_v29 }
 0x5a5   : > { %6009 = vst [vmem:[%s11014_s22 + $0x3a0] sm:$0xff] %v5881_v53  ;;  %6010 = vst [vmem:[%s11014_s22 + $0x3a8] sm:$0xff] %v5882_v59 }
 0x5a6   : > { %6011 = vst [vmem:[%s11014_s22 + $0x3b0] sm:$0xff] %v5883_v37  ;;  %6012 = vst [vmem:[%s11014_s22 + $0x3b8] sm:$0xff] %v5884_v48 }
 0x5a7   : > { %6013 = vst [vmem:[%s11014_s22 + $0x3c0] sm:$0xff] %v5885_v41  ;;  %6014 = vst [vmem:[%s11014_s22 + $0x3c8] sm:$0xff] %v5886_v35 }
 0x5a8   : > { %6015 = vst [vmem:[%s11014_s22 + $0x3d0] sm:$0xff] %v5887_v7  ;;  %6016 = vst [vmem:[%s11014_s22 + $0x3d8] sm:$0xff] %v5888_v33 }
 0x5a9   : > { %6017 = vst [vmem:[%s11014_s22 + $0x3e0] sm:$0xff] %v5889_v60  ;;  %6018 = vst [vmem:[%s11014_s22 + $0x3e8] sm:$0xff] %v5890_v34 }
 0x5aa   : > { %6019 = vst [vmem:[%s11014_s22 + $0x3f0] sm:$0xff] %v5891_v24  ;;  %6020 = vst [vmem:[%s11014_s22 + $0x3f8] sm:$0xff] %v5892_v12 }
 0x5ab   : > { %7747 = shalt.err (!%p7744_p3)
}
 0x5ac   : > { %s7748_s14 = scalar_lea.hbm %s11861_s25, 16384  ;;  %s7752_s21 = scalar_lea.hbm %s11931_s8, 32768 }
 0x5ad   : > { %p7749_p4 = scmp.ne.s32.totalorder %s11861_s25, %s7748_s14  ;;  %p7753_p9 = scmp.lt.s32.totalorder %s11861_s25, %s11931_s8 }
 0x5ae   : > { %p7754_p10 = scmp.lt.s32.totalorder %s7752_s21, %s7748_s14 }
 0x5af   : > { %p7750_p7 = pnand %p7749_p4, %p7886_p5 }
 0x5b0   : > { %p7755_p11 = por %p7754_p10, %p7753_p9 }
 0x5b1   : > { %p7751_p8 = pneg %p7750_p7 }
 0x5b3   : > { %p7756_p12 = pnand %p7755_p11, %p7751_p8 }
 0x5b5   : > { %7759 = shalt.err (!%p7756_p12)
}
 0x5b6   : > { %s7798_s7 = smov 512   ;;  %s7799_s24 = smov 32  }
 0x5b7   : > { %7289 = dma.vmem_to_hbm [thread:$0]  (%p7886_p5), %s11863_s23, 16384, %s11861_s25, %s11883_s26, %s7798_s7, %s7798_s7, %s7799_s24  }
 0x5b8 PF: > { %p7295_p13 = scmp.ge.s32.totalorder %s7794_s10, 2  ;;  %s6051_s28 = sand.u32 1, %s7782_s29  }
 0x5b9   : > { %s6052_s11 = scalar_lea.sflag [#allocation5], %s6051_s28 }
 0x5ba   : > { %p7292_p0 = pnand %p7295_p13, %p7890_p6 }
 0x5bc   : > { %p7293_p1 = pneg %p7292_p0 }
 0x5be   : > { %7777 = dma.done.wait (%p7293_p1), %s6052_s11, 16384  }
 0x5bf   : > { %7779 = vsyncadd (%p7293_p1), %s6052_s11, 4294950912  ;;  %p19_p2 = scmp.ge.s32.totalorder %s7873_s12, 4   ;;  %s12773_s29 = smov %s7786_s30 }
 0x5c0   : > { %s12774_s30 = smov %s7790_s9  ;;  %s12775_s9 = smov %s7884_s15 }
 0x5c1   : > { %s12776_s10 = smov %s7873_s12  ;;  %21 = sbr.rel (!%p19_p2) target bundleno = 5 (0x5), region = 88 }
 0x5c6   :  { %6057 = vsyncpa [#allocation5], 1 }
 0x5c7   :  { %6059 = vsyncpa [#allocation5 + $0x1], 1 }

</bundles_post_ra>
